<compile_context>
chip_gen: v5e
topology: v5e:2x2
jax: 0.10.0
libtpu: 0.0.40
codegen_flags: <defaults>
</compile_context>

<pallas_src>
import functools

import jax
import jax.numpy as jnp
from jax.experimental import pallas as pl
from jax.experimental.pallas import tpu as pltpu


# ----------------------------- Pallas kernels ------------------------------

def _mm_bias_act_kernel(a_ref, b_ref, bias_ref, o_ref, acc_ref, *, relu):
    # Tiled (tm,tk)x(tk,tn) matmul with f32 accumulator; bias (+ReLU) epilogue.
    @pl.when(pl.program_id(2) == 0)
    def _():
        acc_ref[...] = jnp.zeros_like(acc_ref)

    acc_ref[...] += jnp.dot(a_ref[...], b_ref[...],
                            preferred_element_type=jnp.float32)

    @pl.when(pl.program_id(2) == pl.num_programs(2) - 1)
    def _():
        res = acc_ref[...] + bias_ref[...]
        if relu:
            res = jnp.maximum(res, 0.0)
        o_ref[...] = res.astype(o_ref.dtype)


def _maxpool_kernel(a_ref, b_ref, c_ref, d_ref, o_ref):
    # 2x2 stride-2 max pool expressed as elementwise max of 4 strided views.
    o_ref[...] = jnp.maximum(jnp.maximum(a_ref[...], b_ref[...]),
                             jnp.maximum(c_ref[...], d_ref[...]))


# --------------------------- Pallas call wrappers ---------------------------

def _round_up(x, m):
    return (x + m - 1) // m * m


def _pick_tile(dim_padded, candidates):
    for c in candidates:
        if dim_padded % c == 0:
            return c
    return dim_padded


def matmul_bias_act(a, b, bias, relu):
    """(M,K) @ (K,N) + bias, optional ReLU.  Tiled, pipelined Pallas matmul."""
    M, K = a.shape
    K2, N = b.shape
    assert K == K2

    Mp = _round_up(M, 8)
    Kp = _round_up(K, 128)
    Np = _round_up(N, 128)
    tm = _pick_tile(Mp, (256, 128, 64, 32, 16, 8))
    tk = _pick_tile(Kp, (512, 384, 256, 128))
    tn = _pick_tile(Np, (256, 128))

    # Zero-pad to tile-aligned shapes; cast matmul operands to bf16 (halves
    # DMA bytes, doubles MXU throughput); accumulation stays f32.
    a_p = jnp.pad(a, ((0, Mp - M), (0, Kp - K))).astype(jnp.bfloat16)
    b_p = jnp.pad(b, ((0, Kp - K), (0, Np - N))).astype(jnp.bfloat16)
    bias_p = jnp.pad(bias.reshape(1, N).astype(jnp.float32),
                     ((0, 0), (0, Np - N)))

    grid = (Mp // tm, Np // tn, Kp // tk)

    out = pl.pallas_call(
        functools.partial(_mm_bias_act_kernel, relu=relu),
        out_shape=jax.ShapeDtypeStruct((Mp, Np), jnp.float32),
        grid_spec=pltpu.PrefetchScalarGridSpec(
            num_scalar_prefetch=0,
            grid=grid,
            in_specs=[
                pl.BlockSpec((tm, tk), lambda i, j, k: (i, k)),
                pl.BlockSpec((tk, tn), lambda i, j, k: (k, j)),
                pl.BlockSpec((1, tn), lambda i, j, k: (0, j)),
            ],
            out_specs=pl.BlockSpec((tm, tn), lambda i, j, k: (i, j)),
            scratch_shapes=[pltpu.VMEM((tm, tn), jnp.float32)],
        ),
        compiler_params=pltpu.CompilerParams(
            dimension_semantics=("parallel", "parallel", "arbitrary"),
            vmem_limit_bytes=32 * 1024 * 1024,
        ),
    )(a_p, b_p, bias_p)
    return out[:M, :N]


def maxpool2x2(x):
    """MaxPool2d(kernel=2, stride=2) on NHWC input, lane-dense layout."""
    N, H, W, C = x.shape
    OH, OW = H // 2, W // 2
    a = x[:, 0::2, 0::2, :].reshape(N * OH, OW * C)
    b = x[:, 0::2, 1::2, :].reshape(N * OH, OW * C)
    c = x[:, 1::2, 0::2, :].reshape(N * OH, OW * C)
    d = x[:, 1::2, 1::2, :].reshape(N * OH, OW * C)
    y = pl.pallas_call(
        _maxpool_kernel,
        out_shape=jax.ShapeDtypeStruct((N * OH, OW * C), jnp.float32),
    )(a, b, c, d)
    return y.reshape(N, OH, OW, C)


# ------------------------------ JAX glue layer ------------------------------

def _im2col_3x3(x):
    # x: NHWC -> (N*H*W, 9*C) patches, 'same' padding, stride 1.
    # Reduction ordering (kh, kw, cin) matches PyTorch weight layout after
    # transpose (2,3,1,0).
    N, H, W, C = x.shape
    x_p = jnp.pad(x, ((0, 0), (1, 1), (1, 1), (0, 0)))
    cols = [x_p[:, ki:ki + H, kj:kj + W, :]
            for ki in range(3) for kj in range(3)]
    patches = jnp.stack(cols, axis=3)        # (N, H, W, 9, C)
    return patches.reshape(N * H * W, 9 * C)


def conv3x3_bias_relu(x, w, b, relu=True):
    # x: NHWC, w: (Cout, Cin, 3, 3) PyTorch layout, b: (Cout,)
    N, H, W, C = x.shape
    Cout = w.shape[0]
    patches = _im2col_3x3(x)                                    # (N*H*W, 9*C)
    wm = jnp.transpose(w, (2, 3, 1, 0)).reshape(9 * C, Cout)    # (9*C, Cout)
    y = matmul_bias_act(patches, wm, b, relu=relu)
    return y.reshape(N, H, W, Cout)


def cifar100_net_forward(params, x_nchw):
    N = x_nchw.shape[0]
    if x_nchw.shape[1] != 3:
        x_nchw = x_nchw.reshape(N, 3, 32, 32)
    x = jnp.transpose(x_nchw, (0, 2, 3, 1)).astype(jnp.float32)  # -> NHWC

    x = conv3x3_bias_relu(x, params['conv1_w'], params['conv1_b'])
    x = conv3x3_bias_relu(x, params['conv2_w'], params['conv2_b'])
    x = maxpool2x2(x)          # drop1 (Dropout 0.25) == identity at inference
    x = conv3x3_bias_relu(x, params['conv3_w'], params['conv3_b'])
    x = conv3x3_bias_relu(x, params['conv4_w'], params['conv4_b'])
    x = maxpool2x2(x)
    x = conv3x3_bias_relu(x, params['conv5_w'], params['conv5_b'])
    x = conv3x3_bias_relu(x, params['conv6_w'], params['conv6_b'])
    x = maxpool2x2(x)

    # PyTorch flattens the NCHW tensor; transpose back so the feature ordering
    # feeding fc1 matches the reference module.
    h = jnp.transpose(x, (0, 3, 1, 2)).reshape(N, -1)            # (N, 2048)
    h = matmul_bias_act(h, params['fc1_w'], params['fc1_b'], relu=True)
    # drop2 (Dropout 0.5) == identity at inference
    return h                                                     # (N, 1024)


def supcon_mlp_forward(params, x_nchw, return_feat=False):
    encoded = cifar100_net_forward(params, x_nchw)
    h = matmul_bias_act(encoded, params['head1_w'], params['head1_b'],
                        relu=True)
    feat = matmul_bias_act(h, params['head2_w'], params['head2_b'],
                           relu=False)
    if return_feat:
        return feat, encoded
    return feat


# --------------------------- deterministic params ---------------------------

class _KeyGen:
    def __init__(self, key):
        self._key = key

    def __call__(self):
        self._key, sub = jax.random.split(self._key)
        return sub


def init_params(key):
    nk = _KeyGen(key)

    def conv(cout, cin):
        w = 0.1 * jax.random.normal(nk(), (cout, cin, 3, 3), jnp.float32)
        b = 0.05 * jax.random.normal(nk(), (cout,), jnp.float32)
        return w, b

    def linear(fin, fout):
        w = 0.02 * jax.random.normal(nk(), (fin, fout), jnp.float32)
        b = 0.02 * jax.random.normal(nk(), (fout,), jnp.float32)
        return w, b

    p = {}
    p['conv1_w'], p['conv1_b'] = conv(32, 3)
    p['conv2_w'], p['conv2_b'] = conv(32, 32)
    p['conv3_w'], p['conv3_b'] = conv(64, 32)
    p['conv4_w'], p['conv4_b'] = conv(64, 64)
    p['conv5_w'], p['conv5_b'] = conv(128, 64)
    p['conv6_w'], p['conv6_b'] = conv(128, 128)
    p['fc1_w'], p['fc1_b'] = linear(4 * 4 * 128, 1024)   # 32x32 -> 4x4x128
    p['head1_w'], p['head1_b'] = linear(1024, 1024)
    p['head2_w'], p['head2_b'] = linear(1024, 1024)
    return p


# ---------------------------------- main ------------------------------------

if __name__ == "__main__":
    key = jax.random.PRNGKey(0)
    k_param, k_x = jax.random.split(key)

    params = init_params(k_param)
    x = jax.random.normal(k_x, (2, 3, 32, 32), jnp.float32)   # NCHW like PyTorch

    fwd = jax.jit(lambda p, xx: supcon_mlp_forward(p, xx, return_feat=True))
    feat, encoded = fwd(params, x)
    feat, encoded = jax.block_until_ready((feat, encoded))

    assert feat.shape == (2, 1024)
    assert encoded.shape == (2, 1024)
    assert bool(jnp.all(jnp.isfinite(feat)))
    assert bool(jnp.all(jnp.isfinite(encoded)))
    print("KERNEL_OK")
</pallas_src>

<mosaic_0001>
module attributes {stable_mosaic.version = 11 : i64} {
  func.func @_mm_bias_act_kernel(%arg0: i32, %arg1: i32, %arg2: i32, %arg3: memref<256x128xbf16, #tpu.memory_space<vmem>>, %arg4: memref<128x128xbf16, #tpu.memory_space<vmem>>, %arg5: memref<1x128xf32, #tpu.memory_space<vmem>>, %arg6: memref<256x128xf32, #tpu.memory_space<vmem>>, %arg7: memref<256x128xf32, #tpu.memory_space<vmem>>) attributes {dimension_semantics = [#tpu.dimension_semantics<parallel>, #tpu.dimension_semantics<parallel>, #tpu.dimension_semantics<arbitrary>], iteration_bounds = array<i64: 8, 1, 1>, scalar_prefetch = 0 : i64, scratch_operands = 1 : i64, tpu.core_type = #tpu.core_type<tc>, window_params = [{transform_indices = @transform_0, window_bounds = array<i64: 256, 128>}, {transform_indices = @transform_1, window_bounds = array<i64: 128, 128>}, {transform_indices = @transform_2, window_bounds = array<i64: 1, 128>}, {transform_indices = @transform_3, window_bounds = array<i64: 256, 128>}]} {
    %c0_i32 = arith.constant 0 : i32
    %0 = arith.cmpi eq, %arg2, %c0_i32 : i32
    %1 = arith.extui %0 : i1 to i32
    %c0_i32_0 = arith.constant 0 : i32
    %2 = arith.cmpi ne, %1, %c0_i32_0 : i32
    scf.if %2 {
      %cst_10 = arith.constant 0.000000e+00 : f32
      %12 = vector.broadcast %cst_10 : f32 to vector<256x128xf32>
      %c0_11 = arith.constant 0 : index
      %c0_12 = arith.constant 0 : index
      %13 = vector.load %arg7[%c0_11, %c0_12] : memref<256x128xf32, #tpu.memory_space<vmem>>, vector<256x128xf32>
      tpu.vector_store %arg7[%c0_11, %c0_12], %12 {strides = array<i32>} : memref<256x128xf32, #tpu.memory_space<vmem>>, vector<256x128xf32>,
    } else {
    }
    %c0 = arith.constant 0 : index
    %c0_1 = arith.constant 0 : index
    %3 = vector.load %arg7[%c0, %c0_1] : memref<256x128xf32, #tpu.memory_space<vmem>>, vector<256x128xf32>
    %c0_2 = arith.constant 0 : index
    %c0_3 = arith.constant 0 : index
    %4 = vector.load %arg3[%c0_2, %c0_3] : memref<256x128xbf16, #tpu.memory_space<vmem>>, vector<256x128xbf16>
    %c0_4 = arith.constant 0 : index
    %c0_5 = arith.constant 0 : index
    %5 = vector.load %arg4[%c0_4, %c0_5] : memref<128x128xbf16, #tpu.memory_space<vmem>>, vector<128x128xbf16>
    %cst = arith.constant dense<0.000000e+00> : vector<256x128xf32>
    %6 = tpu.matmul %4, %5, %cst {dimension_numbers = #tpu.dot_dimension_numbers<[1], [0], [0], [1], [0, 0, 1, 1], [], []>} : vector<256x128xbf16>, vector<128x128xbf16>, vector<256x128xf32> -> vector<256x128xf32>
    %7 = arith.addf %3, %6 : vector<256x128xf32>
    %c0_6 = arith.constant 0 : index
    %c0_7 = arith.constant 0 : index
    %8 = vector.load %arg7[%c0_6, %c0_7] : memref<256x128xf32, #tpu.memory_space<vmem>>, vector<256x128xf32>
    tpu.vector_store %arg7[%c0_6, %c0_7], %7 {strides = array<i32>} : memref<256x128xf32, #tpu.memory_space<vmem>>, vector<256x128xf32>,
    %c0_i32_8 = arith.constant 0 : i32
    %9 = arith.cmpi eq, %arg2, %c0_i32_8 : i32
    %10 = arith.extui %9 : i1 to i32
    %c0_i32_9 = arith.constant 0 : i32
    %11 = arith.cmpi ne, %10, %c0_i32_9 : i32
    scf.if %11 {
      %c0_10 = arith.constant 0 : index
      %c0_11 = arith.constant 0 : index
      %12 = vector.load %arg7[%c0_10, %c0_11] : memref<256x128xf32, #tpu.memory_space<vmem>>, vector<256x128xf32>
      %c0_12 = arith.constant 0 : index
      %c0_13 = arith.constant 0 : index
      %13 = vector.load %arg5[%c0_12, %c0_13] : memref<1x128xf32, #tpu.memory_space<vmem>>, vector<1x128xf32>
      %14 = vector.broadcast %13 : vector<1x128xf32> to vector<256x128xf32>
      %15 = arith.addf %12, %14 : vector<256x128xf32>
      %cst_14 = arith.constant 0.000000e+00 : f32
      %16 = vector.broadcast %cst_14 : f32 to vector<256x128xf32>
      %17 = arith.maximumf %15, %16 : vector<256x128xf32>
      %c0_15 = arith.constant 0 : index
      %c0_16 = arith.constant 0 : index
      %18 = vector.load %arg6[%c0_15, %c0_16] : memref<256x128xf32, #tpu.memory_space<vmem>>, vector<256x128xf32>
      tpu.vector_store %arg6[%c0_15, %c0_16], %17 {strides = array<i32>} : memref<256x128xf32, #tpu.memory_space<vmem>>, vector<256x128xf32>,
    } else {
    }
    return
  }
  func.func @transform_0(%arg0: i32, %arg1: i32, %arg2: i32) -> (i32, i32) {
    %c0_i32 = arith.constant 0 : i32
    return %arg0, %arg2 : i32, i32
  }
  func.func @transform_1(%arg0: i32, %arg1: i32, %arg2: i32) -> (i32, i32) {
    %c0_i32 = arith.constant 0 : i32
    return %arg2, %arg1 : i32, i32
  }
  func.func @transform_2(%arg0: i32, %arg1: i32, %arg2: i32) -> (i32, i32) {
    %c0_i32 = arith.constant 0 : i32
    %c0_i32_0 = arith.constant 0 : i32
    return %c0_i32, %arg1 : i32, i32
  }
  func.func @transform_3(%arg0: i32, %arg1: i32, %arg2: i32) -> (i32, i32) {
    %c0_i32 = arith.constant 0 : i32
    return %arg0, %arg1 : i32, i32
  }
}

module attributes {stable_mosaic.version = 11 : i64} {
  func.func @_mm_bias_act_kernel(%arg0: i32, %arg1: i32, %arg2: i32, %arg3: memref<256x384xbf16, #tpu.memory_space<vmem>>, %arg4: memref<384x128xbf16, #tpu.memory_space<vmem>>, %arg5: memref<1x128xf32, #tpu.memory_space<vmem>>, %arg6: memref<256x128xf32, #tpu.memory_space<vmem>>, %arg7: memref<256x128xf32, #tpu.memory_space<vmem>>) attributes {dimension_semantics = [#tpu.dimension_semantics<parallel>, #tpu.dimension_semantics<parallel>, #tpu.dimension_semantics<arbitrary>], iteration_bounds = array<i64: 8, 1, 1>, scalar_prefetch = 0 : i64, scratch_operands = 1 : i64, tpu.core_type = #tpu.core_type<tc>, window_params = [{transform_indices = @transform_0, window_bounds = array<i64: 256, 384>}, {transform_indices = @transform_1, window_bounds = array<i64: 384, 128>}, {transform_indices = @transform_2, window_bounds = array<i64: 1, 128>}, {transform_indices = @transform_3, window_bounds = array<i64: 256, 128>}]} {
    %c0_i32 = arith.constant 0 : i32
    %0 = arith.cmpi eq, %arg2, %c0_i32 : i32
    %1 = arith.extui %0 : i1 to i32
    %c0_i32_0 = arith.constant 0 : i32
    %2 = arith.cmpi ne, %1, %c0_i32_0 : i32
    scf.if %2 {
      %cst_10 = arith.constant 0.000000e+00 : f32
      %12 = vector.broadcast %cst_10 : f32 to vector<256x128xf32>
      %c0_11 = arith.constant 0 : index
      %c0_12 = arith.constant 0 : index
      %13 = vector.load %arg7[%c0_11, %c0_12] : memref<256x128xf32, #tpu.memory_space<vmem>>, vector<256x128xf32>
      tpu.vector_store %arg7[%c0_11, %c0_12], %12 {strides = array<i32>} : memref<256x128xf32, #tpu.memory_space<vmem>>, vector<256x128xf32>,
    } else {
    }
    %c0 = arith.constant 0 : index
    %c0_1 = arith.constant 0 : index
    %3 = vector.load %arg7[%c0, %c0_1] : memref<256x128xf32, #tpu.memory_space<vmem>>, vector<256x128xf32>
    %c0_2 = arith.constant 0 : index
    %c0_3 = arith.constant 0 : index
    %4 = vector.load %arg3[%c0_2, %c0_3] : memref<256x384xbf16, #tpu.memory_space<vmem>>, vector<256x384xbf16>
    %c0_4 = arith.constant 0 : index
    %c0_5 = arith.constant 0 : index
    %5 = vector.load %arg4[%c0_4, %c0_5] : memref<384x128xbf16, #tpu.memory_space<vmem>>, vector<384x128xbf16>
    %cst = arith.constant dense<0.000000e+00> : vector<256x128xf32>
    %6 = tpu.matmul %4, %5, %cst {dimension_numbers = #tpu.dot_dimension_numbers<[1], [0], [0], [1], [0, 0, 1, 1], [], []>} : vector<256x384xbf16>, vector<384x128xbf16>, vector<256x128xf32> -> vector<256x128xf32>
    %7 = arith.addf %3, %6 : vector<256x128xf32>
    %c0_6 = arith.constant 0 : index
    %c0_7 = arith.constant 0 : index
    %8 = vector.load %arg7[%c0_6, %c0_7] : memref<256x128xf32, #tpu.memory_space<vmem>>, vector<256x128xf32>
    tpu.vector_store %arg7[%c0_6, %c0_7], %7 {strides = array<i32>} : memref<256x128xf32, #tpu.memory_space<vmem>>, vector<256x128xf32>,
    %c0_i32_8 = arith.constant 0 : i32
    %9 = arith.cmpi eq, %arg2, %c0_i32_8 : i32
    %10 = arith.extui %9 : i1 to i32
    %c0_i32_9 = arith.constant 0 : i32
    %11 = arith.cmpi ne, %10, %c0_i32_9 : i32
    scf.if %11 {
      %c0_10 = arith.constant 0 : index
      %c0_11 = arith.constant 0 : index
      %12 = vector.load %arg7[%c0_10, %c0_11] : memref<256x128xf32, #tpu.memory_space<vmem>>, vector<256x128xf32>
      %c0_12 = arith.constant 0 : index
      %c0_13 = arith.constant 0 : index
      %13 = vector.load %arg5[%c0_12, %c0_13] : memref<1x128xf32, #tpu.memory_space<vmem>>, vector<1x128xf32>
      %14 = vector.broadcast %13 : vector<1x128xf32> to vector<256x128xf32>
      %15 = arith.addf %12, %14 : vector<256x128xf32>
      %cst_14 = arith.constant 0.000000e+00 : f32
      %16 = vector.broadcast %cst_14 : f32 to vector<256x128xf32>
      %17 = arith.maximumf %15, %16 : vector<256x128xf32>
      %c0_15 = arith.constant 0 : index
      %c0_16 = arith.constant 0 : index
      %18 = vector.load %arg6[%c0_15, %c0_16] : memref<256x128xf32, #tpu.memory_space<vmem>>, vector<256x128xf32>
      tpu.vector_store %arg6[%c0_15, %c0_16], %17 {strides = array<i32>} : memref<256x128xf32, #tpu.memory_space<vmem>>, vector<256x128xf32>,
    } else {
    }
    return
  }
  func.func @transform_0(%arg0: i32, %arg1: i32, %arg2: i32) -> (i32, i32) {
    %c0_i32 = arith.constant 0 : i32
    return %arg0, %arg2 : i32, i32
  }
  func.func @transform_1(%arg0: i32, %arg1: i32, %arg2: i32) -> (i32, i32) {
    %c0_i32 = arith.constant 0 : i32
    return %arg2, %arg1 : i32, i32
  }
  func.func @transform_2(%arg0: i32, %arg1: i32, %arg2: i32) -> (i32, i32) {
    %c0_i32 = arith.constant 0 : i32
    %c0_i32_0 = arith.constant 0 : i32
    return %c0_i32, %arg1 : i32, i32
  }
  func.func @transform_3(%arg0: i32, %arg1: i32, %arg2: i32) -> (i32, i32) {
    %c0_i32 = arith.constant 0 : i32
    return %arg0, %arg1 : i32, i32
  }
}

module attributes {stable_mosaic.version = 11 : i64} {
  func.func @_maxpool_kernel(%arg0: memref<32x512xf32, #tpu.memory_space<vmem>>, %arg1: memref<32x512xf32, #tpu.memory_space<vmem>>, %arg2: memref<32x512xf32, #tpu.memory_space<vmem>>, %arg3: memref<32x512xf32, #tpu.memory_space<vmem>>, %arg4: memref<32x512xf32, #tpu.memory_space<vmem>>) attributes {dimension_semantics = [], scalar_prefetch = 0 : i64, scratch_operands = 0 : i64, tpu.core_type = #tpu.core_type<tc>} {
    %c0 = arith.constant 0 : index
    %c0_0 = arith.constant 0 : index
    %0 = vector.load %arg0[%c0, %c0_0] : memref<32x512xf32, #tpu.memory_space<vmem>>, vector<32x512xf32>
    %c0_1 = arith.constant 0 : index
    %c0_2 = arith.constant 0 : index
    %1 = vector.load %arg1[%c0_1, %c0_2] : memref<32x512xf32, #tpu.memory_space<vmem>>, vector<32x512xf32>
    %2 = arith.maximumf %0, %1 : vector<32x512xf32>
    %c0_3 = arith.constant 0 : index
    %c0_4 = arith.constant 0 : index
    %3 = vector.load %arg2[%c0_3, %c0_4] : memref<32x512xf32, #tpu.memory_space<vmem>>, vector<32x512xf32>
    %c0_5 = arith.constant 0 : index
    %c0_6 = arith.constant 0 : index
    %4 = vector.load %arg3[%c0_5, %c0_6] : memref<32x512xf32, #tpu.memory_space<vmem>>, vector<32x512xf32>
    %5 = arith.maximumf %3, %4 : vector<32x512xf32>
    %6 = arith.maximumf %2, %5 : vector<32x512xf32>
    %c0_7 = arith.constant 0 : index
    %c0_8 = arith.constant 0 : index
    %7 = vector.load %arg4[%c0_7, %c0_8] : memref<32x512xf32, #tpu.memory_space<vmem>>, vector<32x512xf32>
    tpu.vector_store %arg4[%c0_7, %c0_8], %6 {strides = array<i32>} : memref<32x512xf32, #tpu.memory_space<vmem>>, vector<32x512xf32>,
    return
  }
}

module attributes {stable_mosaic.version = 11 : i64} {
  func.func @_mm_bias_act_kernel(%arg0: i32, %arg1: i32, %arg2: i32, %arg3: memref<256x384xbf16, #tpu.memory_space<vmem>>, %arg4: memref<384x128xbf16, #tpu.memory_space<vmem>>, %arg5: memref<1x128xf32, #tpu.memory_space<vmem>>, %arg6: memref<256x128xf32, #tpu.memory_space<vmem>>, %arg7: memref<256x128xf32, #tpu.memory_space<vmem>>) attributes {dimension_semantics = [#tpu.dimension_semantics<parallel>, #tpu.dimension_semantics<parallel>, #tpu.dimension_semantics<arbitrary>], iteration_bounds = array<i64: 2, 1, 1>, scalar_prefetch = 0 : i64, scratch_operands = 1 : i64, tpu.core_type = #tpu.core_type<tc>, window_params = [{transform_indices = @transform_0, window_bounds = array<i64: 256, 384>}, {transform_indices = @transform_1, window_bounds = array<i64: 384, 128>}, {transform_indices = @transform_2, window_bounds = array<i64: 1, 128>}, {transform_indices = @transform_3, window_bounds = array<i64: 256, 128>}]} {
    %c0_i32 = arith.constant 0 : i32
    %0 = arith.cmpi eq, %arg2, %c0_i32 : i32
    %1 = arith.extui %0 : i1 to i32
    %c0_i32_0 = arith.constant 0 : i32
    %2 = arith.cmpi ne, %1, %c0_i32_0 : i32
    scf.if %2 {
      %cst_10 = arith.constant 0.000000e+00 : f32
      %12 = vector.broadcast %cst_10 : f32 to vector<256x128xf32>
      %c0_11 = arith.constant 0 : index
      %c0_12 = arith.constant 0 : index
      %13 = vector.load %arg7[%c0_11, %c0_12] : memref<256x128xf32, #tpu.memory_space<vmem>>, vector<256x128xf32>
      tpu.vector_store %arg7[%c0_11, %c0_12], %12 {strides = array<i32>} : memref<256x128xf32, #tpu.memory_space<vmem>>, vector<256x128xf32>,
    } else {
    }
    %c0 = arith.constant 0 : index
    %c0_1 = arith.constant 0 : index
    %3 = vector.load %arg7[%c0, %c0_1] : memref<256x128xf32, #tpu.memory_space<vmem>>, vector<256x128xf32>
    %c0_2 = arith.constant 0 : index
    %c0_3 = arith.constant 0 : index
    %4 = vector.load %arg3[%c0_2, %c0_3] : memref<256x384xbf16, #tpu.memory_space<vmem>>, vector<256x384xbf16>
    %c0_4 = arith.constant 0 : index
    %c0_5 = arith.constant 0 : index
    %5 = vector.load %arg4[%c0_4, %c0_5] : memref<384x128xbf16, #tpu.memory_space<vmem>>, vector<384x128xbf16>
    %cst = arith.constant dense<0.000000e+00> : vector<256x128xf32>
    %6 = tpu.matmul %4, %5, %cst {dimension_numbers = #tpu.dot_dimension_numbers<[1], [0], [0], [1], [0, 0, 1, 1], [], []>} : vector<256x384xbf16>, vector<384x128xbf16>, vector<256x128xf32> -> vector<256x128xf32>
    %7 = arith.addf %3, %6 : vector<256x128xf32>
    %c0_6 = arith.constant 0 : index
    %c0_7 = arith.constant 0 : index
    %8 = vector.load %arg7[%c0_6, %c0_7] : memref<256x128xf32, #tpu.memory_space<vmem>>, vector<256x128xf32>
    tpu.vector_store %arg7[%c0_6, %c0_7], %7 {strides = array<i32>} : memref<256x128xf32, #tpu.memory_space<vmem>>, vector<256x128xf32>,
    %c0_i32_8 = arith.constant 0 : i32
    %9 = arith.cmpi eq, %arg2, %c0_i32_8 : i32
    %10 = arith.extui %9 : i1 to i32
    %c0_i32_9 = arith.constant 0 : i32
    %11 = arith.cmpi ne, %10, %c0_i32_9 : i32
    scf.if %11 {
      %c0_10 = arith.constant 0 : index
      %c0_11 = arith.constant 0 : index
      %12 = vector.load %arg7[%c0_10, %c0_11] : memref<256x128xf32, #tpu.memory_space<vmem>>, vector<256x128xf32>
      %c0_12 = arith.constant 0 : index
      %c0_13 = arith.constant 0 : index
      %13 = vector.load %arg5[%c0_12, %c0_13] : memref<1x128xf32, #tpu.memory_space<vmem>>, vector<1x128xf32>
      %14 = vector.broadcast %13 : vector<1x128xf32> to vector<256x128xf32>
      %15 = arith.addf %12, %14 : vector<256x128xf32>
      %cst_14 = arith.constant 0.000000e+00 : f32
      %16 = vector.broadcast %cst_14 : f32 to vector<256x128xf32>
      %17 = arith.maximumf %15, %16 : vector<256x128xf32>
      %c0_15 = arith.constant 0 : index
      %c0_16 = arith.constant 0 : index
      %18 = vector.load %arg6[%c0_15, %c0_16] : memref<256x128xf32, #tpu.memory_space<vmem>>, vector<256x128xf32>
      tpu.vector_store %arg6[%c0_15, %c0_16], %17 {strides = array<i32>} : memref<256x128xf32, #tpu.memory_space<vmem>>, vector<256x128xf32>,
    } else {
    }
    return
  }
  func.func @transform_0(%arg0: i32, %arg1: i32, %arg2: i32) -> (i32, i32) {
    %c0_i32 = arith.constant 0 : i32
    return %arg0, %arg2 : i32, i32
  }
  func.func @transform_1(%arg0: i32, %arg1: i32, %arg2: i32) -> (i32, i32) {
    %c0_i32 = arith.constant 0 : i32
    return %arg2, %arg1 : i32, i32
  }
  func.func @transform_2(%arg0: i32, %arg1: i32, %arg2: i32) -> (i32, i32) {
    %c0_i32 = arith.constant 0 : i32
    %c0_i32_0 = arith.constant 0 : i32
    return %c0_i32, %arg1 : i32, i32
  }
  func.func @transform_3(%arg0: i32, %arg1: i32, %arg2: i32) -> (i32, i32) {
    %c0_i32 = arith.constant 0 : i32
    return %arg0, %arg1 : i32, i32
  }
}

module attributes {stable_mosaic.version = 11 : i64} {
  func.func @_mm_bias_act_kernel(%arg0: i32, %arg1: i32, %arg2: i32, %arg3: memref<256x128xbf16, #tpu.memory_space<vmem>>, %arg4: memref<128x128xbf16, #tpu.memory_space<vmem>>, %arg5: memref<1x128xf32, #tpu.memory_space<vmem>>, %arg6: memref<256x128xf32, #tpu.memory_space<vmem>>, %arg7: memref<256x128xf32, #tpu.memory_space<vmem>>) attributes {dimension_semantics = [#tpu.dimension_semantics<parallel>, #tpu.dimension_semantics<parallel>, #tpu.dimension_semantics<arbitrary>], iteration_bounds = array<i64: 2, 1, 5>, scalar_prefetch = 0 : i64, scratch_operands = 1 : i64, tpu.core_type = #tpu.core_type<tc>, window_params = [{transform_indices = @transform_0, window_bounds = array<i64: 256, 128>}, {transform_indices = @transform_1, window_bounds = array<i64: 128, 128>}, {transform_indices = @transform_2, window_bounds = array<i64: 1, 128>}, {transform_indices = @transform_3, window_bounds = array<i64: 256, 128>}]} {
    %c0_i32 = arith.constant 0 : i32
    %0 = arith.cmpi eq, %arg2, %c0_i32 : i32
    %1 = arith.extui %0 : i1 to i32
    %c0_i32_0 = arith.constant 0 : i32
    %2 = arith.cmpi ne, %1, %c0_i32_0 : i32
    scf.if %2 {
      %cst_9 = arith.constant 0.000000e+00 : f32
      %12 = vector.broadcast %cst_9 : f32 to vector<256x128xf32>
      %c0_10 = arith.constant 0 : index
      %c0_11 = arith.constant 0 : index
      %13 = vector.load %arg7[%c0_10, %c0_11] : memref<256x128xf32, #tpu.memory_space<vmem>>, vector<256x128xf32>
      tpu.vector_store %arg7[%c0_10, %c0_11], %12 {strides = array<i32>} : memref<256x128xf32, #tpu.memory_space<vmem>>, vector<256x128xf32>,
    } else {
    }
    %c0 = arith.constant 0 : index
    %c0_1 = arith.constant 0 : index
    %3 = vector.load %arg7[%c0, %c0_1] : memref<256x128xf32, #tpu.memory_space<vmem>>, vector<256x128xf32>
    %c0_2 = arith.constant 0 : index
    %c0_3 = arith.constant 0 : index
    %4 = vector.load %arg3[%c0_2, %c0_3] : memref<256x128xbf16, #tpu.memory_space<vmem>>, vector<256x128xbf16>
    %c0_4 = arith.constant 0 : index
    %c0_5 = arith.constant 0 : index
    %5 = vector.load %arg4[%c0_4, %c0_5] : memref<128x128xbf16, #tpu.memory_space<vmem>>, vector<128x128xbf16>
    %cst = arith.constant dense<0.000000e+00> : vector<256x128xf32>
    %6 = tpu.matmul %4, %5, %cst {dimension_numbers = #tpu.dot_dimension_numbers<[1], [0], [0], [1], [0, 0, 1, 1], [], []>} : vector<256x128xbf16>, vector<128x128xbf16>, vector<256x128xf32> -> vector<256x128xf32>
    %7 = arith.addf %3, %6 : vector<256x128xf32>
    %c0_6 = arith.constant 0 : index
    %c0_7 = arith.constant 0 : index
    %8 = vector.load %arg7[%c0_6, %c0_7] : memref<256x128xf32, #tpu.memory_space<vmem>>, vector<256x128xf32>
    tpu.vector_store %arg7[%c0_6, %c0_7], %7 {strides = array<i32>} : memref<256x128xf32, #tpu.memory_space<vmem>>, vector<256x128xf32>,
    %c4_i32 = arith.constant 4 : i32
    %9 = arith.cmpi eq, %arg2, %c4_i32 : i32
    %10 = arith.extui %9 : i1 to i32
    %c0_i32_8 = arith.constant 0 : i32
    %11 = arith.cmpi ne, %10, %c0_i32_8 : i32
    scf.if %11 {
      %c0_9 = arith.constant 0 : index
      %c0_10 = arith.constant 0 : index
      %12 = vector.load %arg7[%c0_9, %c0_10] : memref<256x128xf32, #tpu.memory_space<vmem>>, vector<256x128xf32>
      %c0_11 = arith.constant 0 : index
      %c0_12 = arith.constant 0 : index
      %13 = vector.load %arg5[%c0_11, %c0_12] : memref<1x128xf32, #tpu.memory_space<vmem>>, vector<1x128xf32>
      %14 = vector.broadcast %13 : vector<1x128xf32> to vector<256x128xf32>
      %15 = arith.addf %12, %14 : vector<256x128xf32>
      %cst_13 = arith.constant 0.000000e+00 : f32
      %16 = vector.broadcast %cst_13 : f32 to vector<256x128xf32>
      %17 = arith.maximumf %15, %16 : vector<256x128xf32>
      %c0_14 = arith.constant 0 : index
      %c0_15 = arith.constant 0 : index
      %18 = vector.load %arg6[%c0_14, %c0_15] : memref<256x128xf32, #tpu.memory_space<vmem>>, vector<256x128xf32>
      tpu.vector_store %arg6[%c0_14, %c0_15], %17 {strides = array<i32>} : memref<256x128xf32, #tpu.memory_space<vmem>>, vector<256x128xf32>,
    } else {
    }
    return
  }
  func.func @transform_0(%arg0: i32, %arg1: i32, %arg2: i32) -> (i32, i32) {
    %c0_i32 = arith.constant 0 : i32
    return %arg0, %arg2 : i32, i32
  }
  func.func @transform_1(%arg0: i32, %arg1: i32, %arg2: i32) -> (i32, i32) {
    %c0_i32 = arith.constant 0 : i32
    return %arg2, %arg1 : i32, i32
  }
  func.func @transform_2(%arg0: i32, %arg1: i32, %arg2: i32) -> (i32, i32) {
    %c0_i32 = arith.constant 0 : i32
    %c0_i32_0 = arith.constant 0 : i32
    return %c0_i32, %arg1 : i32, i32
  }
  func.func @transform_3(%arg0: i32, %arg1: i32, %arg2: i32) -> (i32, i32) {
    %c0_i32 = arith.constant 0 : i32
    return %arg0, %arg1 : i32, i32
  }
}

module attributes {stable_mosaic.version = 11 : i64} {
  func.func @_maxpool_kernel(%arg0: memref<16x512xf32, #tpu.memory_space<vmem>>, %arg1: memref<16x512xf32, #tpu.memory_space<vmem>>, %arg2: memref<16x512xf32, #tpu.memory_space<vmem>>, %arg3: memref<16x512xf32, #tpu.memory_space<vmem>>, %arg4: memref<16x512xf32, #tpu.memory_space<vmem>>) attributes {dimension_semantics = [], scalar_prefetch = 0 : i64, scratch_operands = 0 : i64, tpu.core_type = #tpu.core_type<tc>} {
    %c0 = arith.constant 0 : index
    %c0_0 = arith.constant 0 : index
    %0 = vector.load %arg0[%c0, %c0_0] : memref<16x512xf32, #tpu.memory_space<vmem>>, vector<16x512xf32>
    %c0_1 = arith.constant 0 : index
    %c0_2 = arith.constant 0 : index
    %1 = vector.load %arg1[%c0_1, %c0_2] : memref<16x512xf32, #tpu.memory_space<vmem>>, vector<16x512xf32>
    %2 = arith.maximumf %0, %1 : vector<16x512xf32>
    %c0_3 = arith.constant 0 : index
    %c0_4 = arith.constant 0 : index
    %3 = vector.load %arg2[%c0_3, %c0_4] : memref<16x512xf32, #tpu.memory_space<vmem>>, vector<16x512xf32>
    %c0_5 = arith.constant 0 : index
    %c0_6 = arith.constant 0 : index
    %4 = vector.load %arg3[%c0_5, %c0_6] : memref<16x512xf32, #tpu.memory_space<vmem>>, vector<16x512xf32>
    %5 = arith.maximumf %3, %4 : vector<16x512xf32>
    %6 = arith.maximumf %2, %5 : vector<16x512xf32>
    %c0_7 = arith.constant 0 : index
    %c0_8 = arith.constant 0 : index
    %7 = vector.load %arg4[%c0_7, %c0_8] : memref<16x512xf32, #tpu.memory_space<vmem>>, vector<16x512xf32>
    tpu.vector_store %arg4[%c0_7, %c0_8], %6 {strides = array<i32>} : memref<16x512xf32, #tpu.memory_space<vmem>>, vector<16x512xf32>,
    return
  }
}

module attributes {stable_mosaic.version = 11 : i64} {
  func.func @_mm_bias_act_kernel(%arg0: i32, %arg1: i32, %arg2: i32, %arg3: memref<128x128xbf16, #tpu.memory_space<vmem>>, %arg4: memref<128x128xbf16, #tpu.memory_space<vmem>>, %arg5: memref<1x128xf32, #tpu.memory_space<vmem>>, %arg6: memref<128x128xf32, #tpu.memory_space<vmem>>, %arg7: memref<128x128xf32, #tpu.memory_space<vmem>>) attributes {dimension_semantics = [#tpu.dimension_semantics<parallel>, #tpu.dimension_semantics<parallel>, #tpu.dimension_semantics<arbitrary>], iteration_bounds = array<i64: 1, 1, 5>, scalar_prefetch = 0 : i64, scratch_operands = 1 : i64, tpu.core_type = #tpu.core_type<tc>, window_params = [{transform_indices = @transform_0, window_bounds = array<i64: 128, 128>}, {transform_indices = @transform_1, window_bounds = array<i64: 128, 128>}, {transform_indices = @transform_2, window_bounds = array<i64: 1, 128>}, {transform_indices = @transform_3, window_bounds = array<i64: 128, 128>}]} {
    %c0_i32 = arith.constant 0 : i32
    %0 = arith.cmpi eq, %arg2, %c0_i32 : i32
    %1 = arith.extui %0 : i1 to i32
    %c0_i32_0 = arith.constant 0 : i32
    %2 = arith.cmpi ne, %1, %c0_i32_0 : i32
    scf.if %2 {
      %cst_9 = arith.constant 0.000000e+00 : f32
      %12 = vector.broadcast %cst_9 : f32 to vector<128x128xf32>
      %c0_10 = arith.constant 0 : index
      %c0_11 = arith.constant 0 : index
      %13 = vector.load %arg7[%c0_10, %c0_11] : memref<128x128xf32, #tpu.memory_space<vmem>>, vector<128x128xf32>
      tpu.vector_store %arg7[%c0_10, %c0_11], %12 {strides = array<i32>} : memref<128x128xf32, #tpu.memory_space<vmem>>, vector<128x128xf32>,
    } else {
    }
    %c0 = arith.constant 0 : index
    %c0_1 = arith.constant 0 : index
    %3 = vector.load %arg7[%c0, %c0_1] : memref<128x128xf32, #tpu.memory_space<vmem>>, vector<128x128xf32>
    %c0_2 = arith.constant 0 : index
    %c0_3 = arith.constant 0 : index
    %4 = vector.load %arg3[%c0_2, %c0_3] : memref<128x128xbf16, #tpu.memory_space<vmem>>, vector<128x128xbf16>
    %c0_4 = arith.constant 0 : index
    %c0_5 = arith.constant 0 : index
    %5 = vector.load %arg4[%c0_4, %c0_5] : memref<128x128xbf16, #tpu.memory_space<vmem>>, vector<128x128xbf16>
    %cst = arith.constant dense<0.000000e+00> : vector<128x128xf32>
    %6 = tpu.matmul %4, %5, %cst {dimension_numbers = #tpu.dot_dimension_numbers<[1], [0], [0], [1], [0, 0, 1, 1], [], []>} : vector<128x128xbf16>, vector<128x128xbf16>, vector<128x128xf32> -> vector<128x128xf32>
    %7 = arith.addf %3, %6 : vector<128x128xf32>
    %c0_6 = arith.constant 0 : index
    %c0_7 = arith.constant 0 : index
    %8 = vector.load %arg7[%c0_6, %c0_7] : memref<128x128xf32, #tpu.memory_space<vmem>>, vector<128x128xf32>
    tpu.vector_store %arg7[%c0_6, %c0_7], %7 {strides = array<i32>} : memref<128x128xf32, #tpu.memory_space<vmem>>, vector<128x128xf32>,
    %c4_i32 = arith.constant 4 : i32
    %9 = arith.cmpi eq, %arg2, %c4_i32 : i32
    %10 = arith.extui %9 : i1 to i32
    %c0_i32_8 = arith.constant 0 : i32
    %11 = arith.cmpi ne, %10, %c0_i32_8 : i32
    scf.if %11 {
      %c0_9 = arith.constant 0 : index
      %c0_10 = arith.constant 0 : index
      %12 = vector.load %arg7[%c0_9, %c0_10] : memref<128x128xf32, #tpu.memory_space<vmem>>, vector<128x128xf32>
      %c0_11 = arith.constant 0 : index
      %c0_12 = arith.constant 0 : index
      %13 = vector.load %arg5[%c0_11, %c0_12] : memref<1x128xf32, #tpu.memory_space<vmem>>, vector<1x128xf32>
      %14 = vector.broadcast %13 : vector<1x128xf32> to vector<128x128xf32>
      %15 = arith.addf %12, %14 : vector<128x128xf32>
      %cst_13 = arith.constant 0.000000e+00 : f32
      %16 = vector.broadcast %cst_13 : f32 to vector<128x128xf32>
      %17 = arith.maximumf %15, %16 : vector<128x128xf32>
      %c0_14 = arith.constant 0 : index
      %c0_15 = arith.constant 0 : index
      %18 = vector.load %arg6[%c0_14, %c0_15] : memref<128x128xf32, #tpu.memory_space<vmem>>, vector<128x128xf32>
      tpu.vector_store %arg6[%c0_14, %c0_15], %17 {strides = array<i32>} : memref<128x128xf32, #tpu.memory_space<vmem>>, vector<128x128xf32>,
    } else {
    }
    return
  }
  func.func @transform_0(%arg0: i32, %arg1: i32, %arg2: i32) -> (i32, i32) {
    %c0_i32 = arith.constant 0 : i32
    return %arg0, %arg2 : i32, i32
  }
  func.func @transform_1(%arg0: i32, %arg1: i32, %arg2: i32) -> (i32, i32) {
    %c0_i32 = arith.constant 0 : i32
    return %arg2, %arg1 : i32, i32
  }
  func.func @transform_2(%arg0: i32, %arg1: i32, %arg2: i32) -> (i32, i32) {
    %c0_i32 = arith.constant 0 : i32
    %c0_i32_0 = arith.constant 0 : i32
    return %c0_i32, %arg1 : i32, i32
  }
  func.func @transform_3(%arg0: i32, %arg1: i32, %arg2: i32) -> (i32, i32) {
    %c0_i32 = arith.constant 0 : i32
    return %arg0, %arg1 : i32, i32
  }
}

module attributes {stable_mosaic.version = 11 : i64} {
  func.func @_mm_bias_act_kernel(%arg0: i32, %arg1: i32, %arg2: i32, %arg3: memref<128x384xbf16, #tpu.memory_space<vmem>>, %arg4: memref<384x128xbf16, #tpu.memory_space<vmem>>, %arg5: memref<1x128xf32, #tpu.memory_space<vmem>>, %arg6: memref<128x128xf32, #tpu.memory_space<vmem>>, %arg7: memref<128x128xf32, #tpu.memory_space<vmem>>) attributes {dimension_semantics = [#tpu.dimension_semantics<parallel>, #tpu.dimension_semantics<parallel>, #tpu.dimension_semantics<arbitrary>], iteration_bounds = array<i64: 1, 1, 3>, scalar_prefetch = 0 : i64, scratch_operands = 1 : i64, tpu.core_type = #tpu.core_type<tc>, window_params = [{transform_indices = @transform_0, window_bounds = array<i64: 128, 384>}, {transform_indices = @transform_1, window_bounds = array<i64: 384, 128>}, {transform_indices = @transform_2, window_bounds = array<i64: 1, 128>}, {transform_indices = @transform_3, window_bounds = array<i64: 128, 128>}]} {
    %c0_i32 = arith.constant 0 : i32
    %0 = arith.cmpi eq, %arg2, %c0_i32 : i32
    %1 = arith.extui %0 : i1 to i32
    %c0_i32_0 = arith.constant 0 : i32
    %2 = arith.cmpi ne, %1, %c0_i32_0 : i32
    scf.if %2 {
      %cst_9 = arith.constant 0.000000e+00 : f32
      %12 = vector.broadcast %cst_9 : f32 to vector<128x128xf32>
      %c0_10 = arith.constant 0 : index
      %c0_11 = arith.constant 0 : index
      %13 = vector.load %arg7[%c0_10, %c0_11] : memref<128x128xf32, #tpu.memory_space<vmem>>, vector<128x128xf32>
      tpu.vector_store %arg7[%c0_10, %c0_11], %12 {strides = array<i32>} : memref<128x128xf32, #tpu.memory_space<vmem>>, vector<128x128xf32>,
    } else {
    }
    %c0 = arith.constant 0 : index
    %c0_1 = arith.constant 0 : index
    %3 = vector.load %arg7[%c0, %c0_1] : memref<128x128xf32, #tpu.memory_space<vmem>>, vector<128x128xf32>
    %c0_2 = arith.constant 0 : index
    %c0_3 = arith.constant 0 : index
    %4 = vector.load %arg3[%c0_2, %c0_3] : memref<128x384xbf16, #tpu.memory_space<vmem>>, vector<128x384xbf16>
    %c0_4 = arith.constant 0 : index
    %c0_5 = arith.constant 0 : index
    %5 = vector.load %arg4[%c0_4, %c0_5] : memref<384x128xbf16, #tpu.memory_space<vmem>>, vector<384x128xbf16>
    %cst = arith.constant dense<0.000000e+00> : vector<128x128xf32>
    %6 = tpu.matmul %4, %5, %cst {dimension_numbers = #tpu.dot_dimension_numbers<[1], [0], [0], [1], [0, 0, 1, 1], [], []>} : vector<128x384xbf16>, vector<384x128xbf16>, vector<128x128xf32> -> vector<128x128xf32>
    %7 = arith.addf %3, %6 : vector<128x128xf32>
    %c0_6 = arith.constant 0 : index
    %c0_7 = arith.constant 0 : index
    %8 = vector.load %arg7[%c0_6, %c0_7] : memref<128x128xf32, #tpu.memory_space<vmem>>, vector<128x128xf32>
    tpu.vector_store %arg7[%c0_6, %c0_7], %7 {strides = array<i32>} : memref<128x128xf32, #tpu.memory_space<vmem>>, vector<128x128xf32>,
    %c2_i32 = arith.constant 2 : i32
    %9 = arith.cmpi eq, %arg2, %c2_i32 : i32
    %10 = arith.extui %9 : i1 to i32
    %c0_i32_8 = arith.constant 0 : i32
    %11 = arith.cmpi ne, %10, %c0_i32_8 : i32
    scf.if %11 {
      %c0_9 = arith.constant 0 : index
      %c0_10 = arith.constant 0 : index
      %12 = vector.load %arg7[%c0_9, %c0_10] : memref<128x128xf32, #tpu.memory_space<vmem>>, vector<128x128xf32>
      %c0_11 = arith.constant 0 : index
      %c0_12 = arith.constant 0 : index
      %13 = vector.load %arg5[%c0_11, %c0_12] : memref<1x128xf32, #tpu.memory_space<vmem>>, vector<1x128xf32>
      %14 = vector.broadcast %13 : vector<1x128xf32> to vector<128x128xf32>
      %15 = arith.addf %12, %14 : vector<128x128xf32>
      %cst_13 = arith.constant 0.000000e+00 : f32
      %16 = vector.broadcast %cst_13 : f32 to vector<128x128xf32>
      %17 = arith.maximumf %15, %16 : vector<128x128xf32>
      %c0_14 = arith.constant 0 : index
      %c0_15 = arith.constant 0 : index
      %18 = vector.load %arg6[%c0_14, %c0_15] : memref<128x128xf32, #tpu.memory_space<vmem>>, vector<128x128xf32>
      tpu.vector_store %arg6[%c0_14, %c0_15], %17 {strides = array<i32>} : memref<128x128xf32, #tpu.memory_space<vmem>>, vector<128x128xf32>,
    } else {
    }
    return
  }
  func.func @transform_0(%arg0: i32, %arg1: i32, %arg2: i32) -> (i32, i32) {
    %c0_i32 = arith.constant 0 : i32
    return %arg0, %arg2 : i32, i32
  }
  func.func @transform_1(%arg0: i32, %arg1: i32, %arg2: i32) -> (i32, i32) {
    %c0_i32 = arith.constant 0 : i32
    return %arg2, %arg1 : i32, i32
  }
  func.func @transform_2(%arg0: i32, %arg1: i32, %arg2: i32) -> (i32, i32) {
    %c0_i32 = arith.constant 0 : i32
    %c0_i32_0 = arith.constant 0 : i32
    return %c0_i32, %arg1 : i32, i32
  }
  func.func @transform_3(%arg0: i32, %arg1: i32, %arg2: i32) -> (i32, i32) {
    %c0_i32 = arith.constant 0 : i32
    return %arg0, %arg1 : i32, i32
  }
}

module attributes {stable_mosaic.version = 11 : i64} {
  func.func @_maxpool_kernel(%arg0: memref<8x512xf32, #tpu.memory_space<vmem>>, %arg1: memref<8x512xf32, #tpu.memory_space<vmem>>, %arg2: memref<8x512xf32, #tpu.memory_space<vmem>>, %arg3: memref<8x512xf32, #tpu.memory_space<vmem>>, %arg4: memref<8x512xf32, #tpu.memory_space<vmem>>) attributes {dimension_semantics = [], scalar_prefetch = 0 : i64, scratch_operands = 0 : i64, tpu.core_type = #tpu.core_type<tc>} {
    %c0 = arith.constant 0 : index
    %c0_0 = arith.constant 0 : index
    %0 = vector.load %arg0[%c0, %c0_0] : memref<8x512xf32, #tpu.memory_space<vmem>>, vector<8x512xf32>
    %c0_1 = arith.constant 0 : index
    %c0_2 = arith.constant 0 : index
    %1 = vector.load %arg1[%c0_1, %c0_2] : memref<8x512xf32, #tpu.memory_space<vmem>>, vector<8x512xf32>
    %2 = arith.maximumf %0, %1 : vector<8x512xf32>
    %c0_3 = arith.constant 0 : index
    %c0_4 = arith.constant 0 : index
    %3 = vector.load %arg2[%c0_3, %c0_4] : memref<8x512xf32, #tpu.memory_space<vmem>>, vector<8x512xf32>
    %c0_5 = arith.constant 0 : index
    %c0_6 = arith.constant 0 : index
    %4 = vector.load %arg3[%c0_5, %c0_6] : memref<8x512xf32, #tpu.memory_space<vmem>>, vector<8x512xf32>
    %5 = arith.maximumf %3, %4 : vector<8x512xf32>
    %6 = arith.maximumf %2, %5 : vector<8x512xf32>
    %c0_7 = arith.constant 0 : index
    %c0_8 = arith.constant 0 : index
    %7 = vector.load %arg4[%c0_7, %c0_8] : memref<8x512xf32, #tpu.memory_space<vmem>>, vector<8x512xf32>
    tpu.vector_store %arg4[%c0_7, %c0_8], %6 {strides = array<i32>} : memref<8x512xf32, #tpu.memory_space<vmem>>, vector<8x512xf32>,
    return
  }
}

module attributes {stable_mosaic.version = 11 : i64} {
  func.func @_mm_bias_act_kernel(%arg0: i32, %arg1: i32, %arg2: i32, %arg3: memref<8x512xbf16, #tpu.memory_space<vmem>>, %arg4: memref<512x256xbf16, #tpu.memory_space<vmem>>, %arg5: memref<1x256xf32, #tpu.memory_space<vmem>>, %arg6: memref<8x256xf32, #tpu.memory_space<vmem>>, %arg7: memref<8x256xf32, #tpu.memory_space<vmem>>) attributes {dimension_semantics = [#tpu.dimension_semantics<parallel>, #tpu.dimension_semantics<parallel>, #tpu.dimension_semantics<arbitrary>], iteration_bounds = array<i64: 1, 4, 4>, scalar_prefetch = 0 : i64, scratch_operands = 1 : i64, tpu.core_type = #tpu.core_type<tc>, window_params = [{transform_indices = @transform_0, window_bounds = array<i64: 8, 512>}, {transform_indices = @transform_1, window_bounds = array<i64: 512, 256>}, {transform_indices = @transform_2, window_bounds = array<i64: 1, 256>}, {transform_indices = @transform_3, window_bounds = array<i64: 8, 256>}]} {
    %c0_i32 = arith.constant 0 : i32
    %0 = arith.cmpi eq, %arg2, %c0_i32 : i32
    %1 = arith.extui %0 : i1 to i32
    %c0_i32_0 = arith.constant 0 : i32
    %2 = arith.cmpi ne, %1, %c0_i32_0 : i32
    scf.if %2 {
      %cst_9 = arith.constant 0.000000e+00 : f32
      %12 = vector.broadcast %cst_9 : f32 to vector<8x256xf32>
      %c0_10 = arith.constant 0 : index
      %c0_11 = arith.constant 0 : index
      %13 = vector.load %arg7[%c0_10, %c0_11] : memref<8x256xf32, #tpu.memory_space<vmem>>, vector<8x256xf32>
      tpu.vector_store %arg7[%c0_10, %c0_11], %12 {strides = array<i32>} : memref<8x256xf32, #tpu.memory_space<vmem>>, vector<8x256xf32>,
    } else {
    }
    %c0 = arith.constant 0 : index
    %c0_1 = arith.constant 0 : index
    %3 = vector.load %arg7[%c0, %c0_1] : memref<8x256xf32, #tpu.memory_space<vmem>>, vector<8x256xf32>
    %c0_2 = arith.constant 0 : index
    %c0_3 = arith.constant 0 : index
    %4 = vector.load %arg3[%c0_2, %c0_3] : memref<8x512xbf16, #tpu.memory_space<vmem>>, vector<8x512xbf16>
    %c0_4 = arith.constant 0 : index
    %c0_5 = arith.constant 0 : index
    %5 = vector.load %arg4[%c0_4, %c0_5] : memref<512x256xbf16, #tpu.memory_space<vmem>>, vector<512x256xbf16>
    %cst = arith.constant dense<0.000000e+00> : vector<8x256xf32>
    %6 = tpu.matmul %4, %5, %cst {dimension_numbers = #tpu.dot_dimension_numbers<[1], [0], [0], [1], [0, 0, 1, 1], [], []>} : vector<8x512xbf16>, vector<512x256xbf16>, vector<8x256xf32> -> vector<8x256xf32>
    %7 = arith.addf %3, %6 : vector<8x256xf32>
    %c0_6 = arith.constant 0 : index
    %c0_7 = arith.constant 0 : index
    %8 = vector.load %arg7[%c0_6, %c0_7] : memref<8x256xf32, #tpu.memory_space<vmem>>, vector<8x256xf32>
    tpu.vector_store %arg7[%c0_6, %c0_7], %7 {strides = array<i32>} : memref<8x256xf32, #tpu.memory_space<vmem>>, vector<8x256xf32>,
    %c3_i32 = arith.constant 3 : i32
    %9 = arith.cmpi eq, %arg2, %c3_i32 : i32
    %10 = arith.extui %9 : i1 to i32
    %c0_i32_8 = arith.constant 0 : i32
    %11 = arith.cmpi ne, %10, %c0_i32_8 : i32
    scf.if %11 {
      %c0_9 = arith.constant 0 : index
      %c0_10 = arith.constant 0 : index
      %12 = vector.load %arg7[%c0_9, %c0_10] : memref<8x256xf32, #tpu.memory_space<vmem>>, vector<8x256xf32>
      %c0_11 = arith.constant 0 : index
      %c0_12 = arith.constant 0 : index
      %13 = vector.load %arg5[%c0_11, %c0_12] : memref<1x256xf32, #tpu.memory_space<vmem>>, vector<1x256xf32>
      %14 = vector.broadcast %13 : vector<1x256xf32> to vector<8x256xf32>
      %15 = arith.addf %12, %14 : vector<8x256xf32>
      %cst_13 = arith.constant 0.000000e+00 : f32
      %16 = vector.broadcast %cst_13 : f32 to vector<8x256xf32>
      %17 = arith.maximumf %15, %16 : vector<8x256xf32>
      %c0_14 = arith.constant 0 : index
      %c0_15 = arith.constant 0 : index
      %18 = vector.load %arg6[%c0_14, %c0_15] : memref<8x256xf32, #tpu.memory_space<vmem>>, vector<8x256xf32>
      tpu.vector_store %arg6[%c0_14, %c0_15], %17 {strides = array<i32>} : memref<8x256xf32, #tpu.memory_space<vmem>>, vector<8x256xf32>,
    } else {
    }
    return
  }
  func.func @transform_0(%arg0: i32, %arg1: i32, %arg2: i32) -> (i32, i32) {
    %c0_i32 = arith.constant 0 : i32
    return %arg0, %arg2 : i32, i32
  }
  func.func @transform_1(%arg0: i32, %arg1: i32, %arg2: i32) -> (i32, i32) {
    %c0_i32 = arith.constant 0 : i32
    return %arg2, %arg1 : i32, i32
  }
  func.func @transform_2(%arg0: i32, %arg1: i32, %arg2: i32) -> (i32, i32) {
    %c0_i32 = arith.constant 0 : i32
    %c0_i32_0 = arith.constant 0 : i32
    return %c0_i32, %arg1 : i32, i32
  }
  func.func @transform_3(%arg0: i32, %arg1: i32, %arg2: i32) -> (i32, i32) {
    %c0_i32 = arith.constant 0 : i32
    return %arg0, %arg1 : i32, i32
  }
}

module attributes {stable_mosaic.version = 11 : i64} {
  func.func @_mm_bias_act_kernel(%arg0: i32, %arg1: i32, %arg2: i32, %arg3: memref<8x512xbf16, #tpu.memory_space<vmem>>, %arg4: memref<512x256xbf16, #tpu.memory_space<vmem>>, %arg5: memref<1x256xf32, #tpu.memory_space<vmem>>, %arg6: memref<8x256xf32, #tpu.memory_space<vmem>>, %arg7: memref<8x256xf32, #tpu.memory_space<vmem>>) attributes {dimension_semantics = [#tpu.dimension_semantics<parallel>, #tpu.dimension_semantics<parallel>, #tpu.dimension_semantics<arbitrary>], iteration_bounds = array<i64: 1, 4, 2>, scalar_prefetch = 0 : i64, scratch_operands = 1 : i64, tpu.core_type = #tpu.core_type<tc>, window_params = [{transform_indices = @transform_0, window_bounds = array<i64: 8, 512>}, {transform_indices = @transform_1, window_bounds = array<i64: 512, 256>}, {transform_indices = @transform_2, window_bounds = array<i64: 1, 256>}, {transform_indices = @transform_3, window_bounds = array<i64: 8, 256>}]} {
    %c0_i32 = arith.constant 0 : i32
    %0 = arith.cmpi eq, %arg2, %c0_i32 : i32
    %1 = arith.extui %0 : i1 to i32
    %c0_i32_0 = arith.constant 0 : i32
    %2 = arith.cmpi ne, %1, %c0_i32_0 : i32
    scf.if %2 {
      %cst_9 = arith.constant 0.000000e+00 : f32
      %12 = vector.broadcast %cst_9 : f32 to vector<8x256xf32>
      %c0_10 = arith.constant 0 : index
      %c0_11 = arith.constant 0 : index
      %13 = vector.load %arg7[%c0_10, %c0_11] : memref<8x256xf32, #tpu.memory_space<vmem>>, vector<8x256xf32>
      tpu.vector_store %arg7[%c0_10, %c0_11], %12 {strides = array<i32>} : memref<8x256xf32, #tpu.memory_space<vmem>>, vector<8x256xf32>,
    } else {
    }
    %c0 = arith.constant 0 : index
    %c0_1 = arith.constant 0 : index
    %3 = vector.load %arg7[%c0, %c0_1] : memref<8x256xf32, #tpu.memory_space<vmem>>, vector<8x256xf32>
    %c0_2 = arith.constant 0 : index
    %c0_3 = arith.constant 0 : index
    %4 = vector.load %arg3[%c0_2, %c0_3] : memref<8x512xbf16, #tpu.memory_space<vmem>>, vector<8x512xbf16>
    %c0_4 = arith.constant 0 : index
    %c0_5 = arith.constant 0 : index
    %5 = vector.load %arg4[%c0_4, %c0_5] : memref<512x256xbf16, #tpu.memory_space<vmem>>, vector<512x256xbf16>
    %cst = arith.constant dense<0.000000e+00> : vector<8x256xf32>
    %6 = tpu.matmul %4, %5, %cst {dimension_numbers = #tpu.dot_dimension_numbers<[1], [0], [0], [1], [0, 0, 1, 1], [], []>} : vector<8x512xbf16>, vector<512x256xbf16>, vector<8x256xf32> -> vector<8x256xf32>
    %7 = arith.addf %3, %6 : vector<8x256xf32>
    %c0_6 = arith.constant 0 : index
    %c0_7 = arith.constant 0 : index
    %8 = vector.load %arg7[%c0_6, %c0_7] : memref<8x256xf32, #tpu.memory_space<vmem>>, vector<8x256xf32>
    tpu.vector_store %arg7[%c0_6, %c0_7], %7 {strides = array<i32>} : memref<8x256xf32, #tpu.memory_space<vmem>>, vector<8x256xf32>,
    %c1_i32 = arith.constant 1 : i32
    %9 = arith.cmpi eq, %arg2, %c1_i32 : i32
    %10 = arith.extui %9 : i1 to i32
    %c0_i32_8 = arith.constant 0 : i32
    %11 = arith.cmpi ne, %10, %c0_i32_8 : i32
    scf.if %11 {
      %c0_9 = arith.constant 0 : index
      %c0_10 = arith.constant 0 : index
      %12 = vector.load %arg7[%c0_9, %c0_10] : memref<8x256xf32, #tpu.memory_space<vmem>>, vector<8x256xf32>
      %c0_11 = arith.constant 0 : index
      %c0_12 = arith.constant 0 : index
      %13 = vector.load %arg5[%c0_11, %c0_12] : memref<1x256xf32, #tpu.memory_space<vmem>>, vector<1x256xf32>
      %14 = vector.broadcast %13 : vector<1x256xf32> to vector<8x256xf32>
      %15 = arith.addf %12, %14 : vector<8x256xf32>
      %cst_13 = arith.constant 0.000000e+00 : f32
      %16 = vector.broadcast %cst_13 : f32 to vector<8x256xf32>
      %17 = arith.maximumf %15, %16 : vector<8x256xf32>
      %c0_14 = arith.constant 0 : index
      %c0_15 = arith.constant 0 : index
      %18 = vector.load %arg6[%c0_14, %c0_15] : memref<8x256xf32, #tpu.memory_space<vmem>>, vector<8x256xf32>
      tpu.vector_store %arg6[%c0_14, %c0_15], %17 {strides = array<i32>} : memref<8x256xf32, #tpu.memory_space<vmem>>, vector<8x256xf32>,
    } else {
    }
    return
  }
  func.func @transform_0(%arg0: i32, %arg1: i32, %arg2: i32) -> (i32, i32) {
    %c0_i32 = arith.constant 0 : i32
    return %arg0, %arg2 : i32, i32
  }
  func.func @transform_1(%arg0: i32, %arg1: i32, %arg2: i32) -> (i32, i32) {
    %c0_i32 = arith.constant 0 : i32
    return %arg2, %arg1 : i32, i32
  }
  func.func @transform_2(%arg0: i32, %arg1: i32, %arg2: i32) -> (i32, i32) {
    %c0_i32 = arith.constant 0 : i32
    %c0_i32_0 = arith.constant 0 : i32
    return %c0_i32, %arg1 : i32, i32
  }
  func.func @transform_3(%arg0: i32, %arg1: i32, %arg2: i32) -> (i32, i32) {
    %c0_i32 = arith.constant 0 : i32
    return %arg0, %arg1 : i32, i32
  }
}

module attributes {stable_mosaic.version = 11 : i64} {
  func.func @_mm_bias_act_kernel(%arg0: i32, %arg1: i32, %arg2: i32, %arg3: memref<8x512xbf16, #tpu.memory_space<vmem>>, %arg4: memref<512x256xbf16, #tpu.memory_space<vmem>>, %arg5: memref<1x256xf32, #tpu.memory_space<vmem>>, %arg6: memref<8x256xf32, #tpu.memory_space<vmem>>, %arg7: memref<8x256xf32, #tpu.memory_space<vmem>>) attributes {dimension_semantics = [#tpu.dimension_semantics<parallel>, #tpu.dimension_semantics<parallel>, #tpu.dimension_semantics<arbitrary>], iteration_bounds = array<i64: 1, 4, 2>, scalar_prefetch = 0 : i64, scratch_operands = 1 : i64, tpu.core_type = #tpu.core_type<tc>, window_params = [{transform_indices = @transform_0, window_bounds = array<i64: 8, 512>}, {transform_indices = @transform_1, window_bounds = array<i64: 512, 256>}, {transform_indices = @transform_2, window_bounds = array<i64: 1, 256>}, {transform_indices = @transform_3, window_bounds = array<i64: 8, 256>}]} {
    %c0_i32 = arith.constant 0 : i32
    %0 = arith.cmpi eq, %arg2, %c0_i32 : i32
    %1 = arith.extui %0 : i1 to i32
    %c0_i32_0 = arith.constant 0 : i32
    %2 = arith.cmpi ne, %1, %c0_i32_0 : i32
    scf.if %2 {
      %cst_9 = arith.constant 0.000000e+00 : f32
      %12 = vector.broadcast %cst_9 : f32 to vector<8x256xf32>
      %c0_10 = arith.constant 0 : index
      %c0_11 = arith.constant 0 : index
      %13 = vector.load %arg7[%c0_10, %c0_11] : memref<8x256xf32, #tpu.memory_space<vmem>>, vector<8x256xf32>
      tpu.vector_store %arg7[%c0_10, %c0_11], %12 {strides = array<i32>} : memref<8x256xf32, #tpu.memory_space<vmem>>, vector<8x256xf32>,
    } else {
    }
    %c0 = arith.constant 0 : index
    %c0_1 = arith.constant 0 : index
    %3 = vector.load %arg7[%c0, %c0_1] : memref<8x256xf32, #tpu.memory_space<vmem>>, vector<8x256xf32>
    %c0_2 = arith.constant 0 : index
    %c0_3 = arith.constant 0 : index
    %4 = vector.load %arg3[%c0_2, %c0_3] : memref<8x512xbf16, #tpu.memory_space<vmem>>, vector<8x512xbf16>
    %c0_4 = arith.constant 0 : index
    %c0_5 = arith.constant 0 : index
    %5 = vector.load %arg4[%c0_4, %c0_5] : memref<512x256xbf16, #tpu.memory_space<vmem>>, vector<512x256xbf16>
    %cst = arith.constant dense<0.000000e+00> : vector<8x256xf32>
    %6 = tpu.matmul %4, %5, %cst {dimension_numbers = #tpu.dot_dimension_numbers<[1], [0], [0], [1], [0, 0, 1, 1], [], []>} : vector<8x512xbf16>, vector<512x256xbf16>, vector<8x256xf32> -> vector<8x256xf32>
    %7 = arith.addf %3, %6 : vector<8x256xf32>
    %c0_6 = arith.constant 0 : index
    %c0_7 = arith.constant 0 : index
    %8 = vector.load %arg7[%c0_6, %c0_7] : memref<8x256xf32, #tpu.memory_space<vmem>>, vector<8x256xf32>
    tpu.vector_store %arg7[%c0_6, %c0_7], %7 {strides = array<i32>} : memref<8x256xf32, #tpu.memory_space<vmem>>, vector<8x256xf32>,
    %c1_i32 = arith.constant 1 : i32
    %9 = arith.cmpi eq, %arg2, %c1_i32 : i32
    %10 = arith.extui %9 : i1 to i32
    %c0_i32_8 = arith.constant 0 : i32
    %11 = arith.cmpi ne, %10, %c0_i32_8 : i32
    scf.if %11 {
      %c0_9 = arith.constant 0 : index
      %c0_10 = arith.constant 0 : index
      %12 = vector.load %arg7[%c0_9, %c0_10] : memref<8x256xf32, #tpu.memory_space<vmem>>, vector<8x256xf32>
      %c0_11 = arith.constant 0 : index
      %c0_12 = arith.constant 0 : index
      %13 = vector.load %arg5[%c0_11, %c0_12] : memref<1x256xf32, #tpu.memory_space<vmem>>, vector<1x256xf32>
      %14 = vector.broadcast %13 : vector<1x256xf32> to vector<8x256xf32>
      %15 = arith.addf %12, %14 : vector<8x256xf32>
      %c0_13 = arith.constant 0 : index
      %c0_14 = arith.constant 0 : index
      %16 = vector.load %arg6[%c0_13, %c0_14] : memref<8x256xf32, #tpu.memory_space<vmem>>, vector<8x256xf32>
      tpu.vector_store %arg6[%c0_13, %c0_14], %15 {strides = array<i32>} : memref<8x256xf32, #tpu.memory_space<vmem>>, vector<8x256xf32>,
    } else {
    }
    return
  }
  func.func @transform_0(%arg0: i32, %arg1: i32, %arg2: i32) -> (i32, i32) {
    %c0_i32 = arith.constant 0 : i32
    return %arg0, %arg2 : i32, i32
  }
  func.func @transform_1(%arg0: i32, %arg1: i32, %arg2: i32) -> (i32, i32) {
    %c0_i32 = arith.constant 0 : i32
    return %arg2, %arg1 : i32, i32
  }
  func.func @transform_2(%arg0: i32, %arg1: i32, %arg2: i32) -> (i32, i32) {
    %c0_i32 = arith.constant 0 : i32
    %c0_i32_0 = arith.constant 0 : i32
    return %c0_i32, %arg1 : i32, i32
  }
  func.func @transform_3(%arg0: i32, %arg1: i32, %arg2: i32) -> (i32, i32) {
    %c0_i32 = arith.constant 0 : i32
    return %arg0, %arg1 : i32, i32
  }
}

</mosaic_0001>

<bundles_post_ra>
// kernel: _lambda_.12
= control target key start
LH: loop header
LB: loop body
LE: loop exit
PB: predicated region body
PF: predicated region fallthrough
CT: control target
= control target key end

     0   :  { %s1144_s12 = smov 0   ;;  %s1146_s13 = smov 0   ;;  %s1297_s0 = inlined_call_operand.vmem [shape: bf16[2048,128], index: 0, kind: input, shape index: {}]   ;;  %s1298_s1 = inlined_call_operand.vmem [shape: bf16[128,128], index: 1, kind: input, shape index: {}]   ;;  %s1299_s2 = inlined_call_operand.vmem [shape: f32[1,128], index: 2, kind: input, shape index: {}]   ;;  %s1300_s3 = inlined_call_operand.vmem [shape: f32[2048,128], index: 3, kind: output, shape index: {}]  }
   0x1   :  { %s1148_s14 = smov 0  }
   0x2 LB: > { %s32_s15 = sadd.s32 1, %s1118_s13  ;;  %p924_p0 = scmp.ge.s32.totalorder %s1122_s14, 1  ;;  %s1122_s14 = sphi %s1148_s14, %s13_s14   ;;  %s1118_s13 = sphi %s1146_s13, %s1302_s13   ;;  %s1114_s12 = sphi %s1144_s12, %s1301_s12  }
   0x3   : > { %p34_p1 = scmp.ge.s32.totalorder %s32_s15, 8  ;;  %p188_p2 = scmp.lt.s32.totalorder %s1122_s14, 9 }
   0x5   : > { %s1304_s15 = smov (%p34_p1, %s32_s15), 0  ;;  %p189_p3 = pnand %p924_p0, %p188_p2 }
   0x6   : > { %s925_s24 = sshll.u32 (!%p189_p3), %s1114_s12, 5 }
   0x7   : > { %192 = sbr.rel (%p189_p3) target bundleno = 239 (0xef), region = 32  ;;  %p230_p4 = scmp.lt.s32.totalorder (!%p189_p3), %s925_s24, 255 }
   0xc   : > { %v1050_v0 = vld [vmem:[%s1298_s1 + $0x38] sm:$0xff]  ;;  %v1049_v1 = vld [vmem:[%s1298_s1 + $0x30] sm:$0xff]  ;;  %v1048_v2 = vld [vmem:[%s1298_s1 + $0x28] sm:$0xff]  ;;  %s1306_s24 = smov (!%p230_p4, %s925_s24), 255 }
   0xd   : > { %519 = vmatpush.bf16.msra.mxu0 %v1050_v0  ;;  %1051 = vmatpush.bf16.msra.mxu1 %v1050_v0  ;;  %v1047_v3 = vld [vmem:[%s1298_s1 + $0x20] sm:$0xff]  ;;  %v1046_v4 = vld [vmem:[%s1298_s1 + $0x18] sm:$0xff]  ;;  %v1045_v5 = vld [vmem:[%s1298_s1 + $0x10] sm:$0xff]  ;;  %s926_s4 = sshll.u32 %s1306_s24, 2  ;;  %s928_s12 = sshll.u32 %s1306_s24, 3 }
   0xe   : > { %1052 = vmatpush.bf16.msra.mxu2 %v1050_v0  ;;  %1053 = vmatpush.bf16.msra.mxu3 %v1050_v0  ;;  %v1044_v6 = vld [vmem:[%s1298_s1 + $0x8] sm:$0xff]  ;;  %v1043_v7 = vld [vmem:[%s1298_s1] sm:$0xff]  ;;  %s1195_s9 = scalar_lea.vmem %s1297_s0, %s926_s4  ;;  %s1224_s18 = scalar_lea.vmem %s1300_s3, %s928_s12 }
   0xf   : > { %v1027_v8 = vld [vmem:[%s1195_s9] sm:$0xff]  ;;  %v1028_v12 = vld [vmem:[%s1195_s9 + $0x8] sm:$0xff]  ;;  %v1029_v16 = vld [vmem:[%s1195_s9 + $0x10] sm:$0xff] }
  0x10   : > { %v1031_v9 = vld [vmem:[%s1195_s9 + $0x20] sm:$0xff]  ;;  %v1032_v13 = vld [vmem:[%s1195_s9 + $0x28] sm:$0xff]  ;;  %v1033_v17 = vld [vmem:[%s1195_s9 + $0x30] sm:$0xff] }
  0x11   : > { %520 = vmatpush.bf16.msra.mxu0 %v1049_v1  ;;  %1054 = vmatpush.bf16.msra.mxu1 %v1049_v1  ;;  %v1035_v10 = vld [vmem:[%s1195_s9 + $0x40] sm:$0xff]  ;;  %v1036_v14 = vld [vmem:[%s1195_s9 + $0x48] sm:$0xff]  ;;  %v1037_v18 = vld [vmem:[%s1195_s9 + $0x50] sm:$0xff] }
  0x12   : > { %1055 = vmatpush.bf16.msra.mxu2 %v1049_v1  ;;  %1056 = vmatpush.bf16.msra.mxu3 %v1049_v1  ;;  %v1039_v11 = vld [vmem:[%s1195_s9 + $0x60] sm:$0xff]  ;;  %v1040_v15 = vld [vmem:[%s1195_s9 + $0x68] sm:$0xff]  ;;  %v1041_v19 = vld [vmem:[%s1195_s9 + $0x70] sm:$0xff] }
  0x13   : > { %v1030_v20 = vld [vmem:[%s1195_s9 + $0x18] sm:$0xff]  ;;  %v1216_v24 = vld [vmem:[%s1299_s2] ss:$0 sm:$0xff] }
  0x14   : > { %v1034_v21 = vld [vmem:[%s1195_s9 + $0x38] sm:$0xff] }
  0x15   : > { %521 = vmatpush.bf16.msra.mxu0 %v1048_v2  ;;  %1057 = vmatpush.bf16.msra.mxu1 %v1048_v2  ;;  %v1038_v22 = vld [vmem:[%s1195_s9 + $0x58] sm:$0xff] }
  0x16   : > { %1058 = vmatpush.bf16.msra.mxu2 %v1048_v2  ;;  %1059 = vmatpush.bf16.msra.mxu3 %v1048_v2  ;;  %v1042_v23 = vld [vmem:[%s1195_s9 + $0x78] sm:$0xff] }
  0x19   : > { %522 = vmatpush.bf16.msra.mxu0 %v1047_v3  ;;  %1060 = vmatpush.bf16.msra.mxu1 %v1047_v3 }
  0x1a   : > { %1061 = vmatpush.bf16.msra.mxu2 %v1047_v3  ;;  %1062 = vmatpush.bf16.msra.mxu3 %v1047_v3 }
  0x1d   : > { %523 = vmatpush.bf16.msra.mxu0 %v1046_v4  ;;  %1063 = vmatpush.bf16.msra.mxu1 %v1046_v4 }
  0x1e   : > { %1064 = vmatpush.bf16.msra.mxu2 %v1046_v4  ;;  %1065 = vmatpush.bf16.msra.mxu3 %v1046_v4 }
  0x21   : > { %524 = vmatpush.bf16.msra.mxu0 %v1045_v5  ;;  %1066 = vmatpush.bf16.msra.mxu1 %v1045_v5 }
  0x22   : > { %1067 = vmatpush.bf16.msra.mxu2 %v1045_v5  ;;  %1068 = vmatpush.bf16.msra.mxu3 %v1045_v5 }
  0x25   : > { %525 = vmatpush.bf16.msra.mxu0 %v1044_v6  ;;  %1069 = vmatpush.bf16.msra.mxu1 %v1044_v6 }
  0x26   : > { %1070 = vmatpush.bf16.msra.mxu2 %v1044_v6  ;;  %1071 = vmatpush.bf16.msra.mxu3 %v1044_v6 }
  0x29   : > { %526 = vmatpush.bf16.msra.mxu0 %v1043_v7  ;;  %1072 = vmatpush.bf16.msra.mxu1 %v1043_v7 }
  0x2a   : > { %1073 = vmatpush.bf16.msra.mxu2 %v1043_v7  ;;  %1074 = vmatpush.bf16.msra.mxu3 %v1043_v7 }
  0x2c   : > { %527 = vmatmul.bf16.vlgmr.msra.gmra.mxu0 %v1027_v8  ;;  %547 = vmatmul.bf16.vlgmr.msra.gmra.mxu1 %v1031_v9 }
  0x2d   : > { %567 = vmatmul.bf16.vlgmr.msra.gmra.mxu2 %v1035_v10  ;;  %587 = vmatmul.bf16.vlgmr.msra.gmra.mxu3 %v1039_v11 }
  0x3c   : > { %532 = vmatmul.bf16.gmra.mxu0 %v1028_v12  ;;  %552 = vmatmul.bf16.gmra.mxu1 %v1032_v13 }
  0x3d   : > { %572 = vmatmul.bf16.gmra.mxu2 %v1036_v14  ;;  %592 = vmatmul.bf16.gmra.mxu3 %v1040_v15 }
  0x4c   : > { %537 = vmatmul.bf16.gmra.mxu0 %v1029_v16  ;;  %557 = vmatmul.bf16.gmra.mxu1 %v1033_v17 }
  0x4d   : > { %577 = vmatmul.bf16.gmra.mxu2 %v1037_v18  ;;  %597 = vmatmul.bf16.gmra.mxu3 %v1041_v19 }
  0x5c   : > { %542 = vmatmul.bf16.gmra.mxu0 %v1030_v20  ;;  %562 = vmatmul.bf16.gmra.mxu1 %v1034_v21 }
  0x5d   : > { %582 = vmatmul.bf16.gmra.mxu2 %v1038_v22  ;;  %602 = vmatmul.bf16.gmra.mxu3 %v1042_v23 }
  0xa9   : > { %v528_v25 = vpop.f32.mrf.mxu0  ;;  %v548_v26 = vpop.f32.mrf.mxu1 }
  0xaa   : > { %v711_v27 = vadd.f32 %v1216_v24, %v528_v25  ;;  %v719_v28 = vadd.f32 %v1216_v24, %v548_v26 }
  0xac   : > { %v743_v29 = vmax.f32 %v711_v27, 0.0  ;;  %v751_v30 = vmax.f32 %v719_v28, 0.0 }
  0xae   : > { %775 = vst [vmem:[%s1224_s18] sm:$0xff] %v743_v29 }
  0xaf   : > { %783 = vst [vmem:[%s1224_s18 + $0x40] sm:$0xff] %v751_v30 }
  0xb0   : > { %v568_v31 = vpop.f32.mrf.mxu2  ;;  %v588_v32 = vpop.f32.mrf.mxu3 }
  0xb1   : > { %v727_v33 = vadd.f32 %v1216_v24, %v568_v31  ;;  %v735_v34 = vadd.f32 %v1216_v24, %v588_v32  ;;  %v530_v35 = vpop.f32.mrf.mxu0  ;;  %v550_v36 = vpop.f32.mrf.mxu1 }
  0xb2   : > { %v712_v37 = vadd.f32 %v1216_v24, %v530_v35  ;;  %v720_v38 = vadd.f32 %v1216_v24, %v550_v36 }
  0xb3   : > { %v759_v39 = vmax.f32 %v727_v33, 0.0  ;;  %v767_v40 = vmax.f32 %v735_v34, 0.0 }
  0xb4   : > { %v744_v41 = vmax.f32 %v712_v37, 0.0  ;;  %v752_v42 = vmax.f32 %v720_v38, 0.0 }
  0xb5   : > { %791 = vst [vmem:[%s1224_s18 + $0x80] sm:$0xff] %v759_v39 }
  0xb6   : > { %799 = vst [vmem:[%s1224_s18 + $0xc0] sm:$0xff] %v767_v40 }
  0xb7   : > { %776 = vst [vmem:[%s1224_s18 + $0x8] sm:$0xff] %v744_v41 }
  0xb8   : > { %784 = vst [vmem:[%s1224_s18 + $0x48] sm:$0xff] %v752_v42  ;;  %v570_v43 = vpop.f32.mrf.mxu2  ;;  %v590_v44 = vpop.f32.mrf.mxu3 }
  0xb9   : > { %v728_v45 = vadd.f32 %v1216_v24, %v570_v43  ;;  %v736_v46 = vadd.f32 %v1216_v24, %v590_v44  ;;  %v533_v47 = vpop.f32.mrf.mxu0  ;;  %v553_v48 = vpop.f32.mrf.mxu1 }
  0xba   : > { %v713_v49 = vadd.f32 %v1216_v24, %v533_v47  ;;  %v721_v50 = vadd.f32 %v1216_v24, %v553_v48 }
  0xbb   : > { %v760_v51 = vmax.f32 %v728_v45, 0.0  ;;  %v768_v52 = vmax.f32 %v736_v46, 0.0 }
  0xbc   : > { %v745_v53 = vmax.f32 %v713_v49, 0.0  ;;  %v753_v54 = vmax.f32 %v721_v50, 0.0 }
  0xbd   : > { %792 = vst [vmem:[%s1224_s18 + $0x88] sm:$0xff] %v760_v51 }
  0xbe   : > { %800 = vst [vmem:[%s1224_s18 + $0xc8] sm:$0xff] %v768_v52 }
  0xbf   : > { %777 = vst [vmem:[%s1224_s18 + $0x10] sm:$0xff] %v745_v53 }
  0xc0   : > { %785 = vst [vmem:[%s1224_s18 + $0x50] sm:$0xff] %v753_v54  ;;  %v573_v55 = vpop.f32.mrf.mxu2  ;;  %v593_v56 = vpop.f32.mrf.mxu3 }
  0xc1   : > { %v729_v57 = vadd.f32 %v1216_v24, %v573_v55  ;;  %v737_v58 = vadd.f32 %v1216_v24, %v593_v56  ;;  %v535_v59 = vpop.f32.mrf.mxu0  ;;  %v555_v60 = vpop.f32.mrf.mxu1 }
  0xc2   : > { %v714_v61 = vadd.f32 %v1216_v24, %v535_v59  ;;  %v722_v62 = vadd.f32 %v1216_v24, %v555_v60 }
  0xc3   : > { %v761_v63 = vmax.f32 %v729_v57, 0.0  ;;  %v769_v0 = vmax.f32 %v737_v58, 0.0 }
  0xc4   : > { %v746_v1 = vmax.f32 %v714_v61, 0.0  ;;  %v754_v2 = vmax.f32 %v722_v62, 0.0 }
  0xc5   : > { %793 = vst [vmem:[%s1224_s18 + $0x90] sm:$0xff] %v761_v63 }
  0xc6   : > { %801 = vst [vmem:[%s1224_s18 + $0xd0] sm:$0xff] %v769_v0 }
  0xc7   : > { %778 = vst [vmem:[%s1224_s18 + $0x18] sm:$0xff] %v746_v1 }
  0xc8   : > { %786 = vst [vmem:[%s1224_s18 + $0x58] sm:$0xff] %v754_v2  ;;  %v575_v3 = vpop.f32.mrf.mxu2  ;;  %v595_v4 = vpop.f32.mrf.mxu3 }
  0xc9   : > { %v730_v5 = vadd.f32 %v1216_v24, %v575_v3  ;;  %v738_v6 = vadd.f32 %v1216_v24, %v595_v4  ;;  %v538_v7 = vpop.f32.mrf.mxu0  ;;  %v558_v8 = vpop.f32.mrf.mxu1 }
  0xca   : > { %v715_v9 = vadd.f32 %v1216_v24, %v538_v7  ;;  %v723_v10 = vadd.f32 %v1216_v24, %v558_v8 }
  0xcb   : > { %v762_v11 = vmax.f32 %v730_v5, 0.0  ;;  %v770_v12 = vmax.f32 %v738_v6, 0.0 }
  0xcc   : > { %v747_v13 = vmax.f32 %v715_v9, 0.0  ;;  %v755_v14 = vmax.f32 %v723_v10, 0.0 }
  0xcd   : > { %794 = vst [vmem:[%s1224_s18 + $0x98] sm:$0xff] %v762_v11 }
  0xce   : > { %802 = vst [vmem:[%s1224_s18 + $0xd8] sm:$0xff] %v770_v12 }
  0xcf   : > { %779 = vst [vmem:[%s1224_s18 + $0x20] sm:$0xff] %v747_v13 }
  0xd0   : > { %787 = vst [vmem:[%s1224_s18 + $0x60] sm:$0xff] %v755_v14  ;;  %v578_v15 = vpop.f32.mrf.mxu2  ;;  %v598_v16 = vpop.f32.mrf.mxu3 }
  0xd1   : > { %v731_v17 = vadd.f32 %v1216_v24, %v578_v15  ;;  %v739_v18 = vadd.f32 %v1216_v24, %v598_v16  ;;  %v540_v19 = vpop.f32.mrf.mxu0  ;;  %v560_v20 = vpop.f32.mrf.mxu1 }
  0xd2   : > { %v716_v21 = vadd.f32 %v1216_v24, %v540_v19  ;;  %v724_v22 = vadd.f32 %v1216_v24, %v560_v20 }
  0xd3   : > { %v763_v23 = vmax.f32 %v731_v17, 0.0  ;;  %v771_v25 = vmax.f32 %v739_v18, 0.0 }
  0xd4   : > { %v748_v26 = vmax.f32 %v716_v21, 0.0  ;;  %v756_v27 = vmax.f32 %v724_v22, 0.0 }
  0xd5   : > { %795 = vst [vmem:[%s1224_s18 + $0xa0] sm:$0xff] %v763_v23 }
  0xd6   : > { %803 = vst [vmem:[%s1224_s18 + $0xe0] sm:$0xff] %v771_v25 }
  0xd7   : > { %780 = vst [vmem:[%s1224_s18 + $0x28] sm:$0xff] %v748_v26 }
  0xd8   : > { %788 = vst [vmem:[%s1224_s18 + $0x68] sm:$0xff] %v756_v27  ;;  %v580_v28 = vpop.f32.mrf.mxu2  ;;  %v600_v29 = vpop.f32.mrf.mxu3 }
  0xd9   : > { %v732_v30 = vadd.f32 %v1216_v24, %v580_v28  ;;  %v740_v31 = vadd.f32 %v1216_v24, %v600_v29  ;;  %v543_v32 = vpop.f32.mrf.mxu0  ;;  %v563_v33 = vpop.f32.mrf.mxu1 }
  0xda   : > { %v717_v34 = vadd.f32 %v1216_v24, %v543_v32  ;;  %v725_v35 = vadd.f32 %v1216_v24, %v563_v33 }
  0xdb   : > { %v764_v36 = vmax.f32 %v732_v30, 0.0  ;;  %v772_v37 = vmax.f32 %v740_v31, 0.0 }
  0xdc   : > { %v749_v38 = vmax.f32 %v717_v34, 0.0  ;;  %v757_v39 = vmax.f32 %v725_v35, 0.0 }
  0xdd   : > { %796 = vst [vmem:[%s1224_s18 + $0xa8] sm:$0xff] %v764_v36 }
  0xde   : > { %804 = vst [vmem:[%s1224_s18 + $0xe8] sm:$0xff] %v772_v37 }
  0xdf   : > { %781 = vst [vmem:[%s1224_s18 + $0x30] sm:$0xff] %v749_v38 }
  0xe0   : > { %789 = vst [vmem:[%s1224_s18 + $0x70] sm:$0xff] %v757_v39  ;;  %v583_v40 = vpop.f32.mrf.mxu2  ;;  %v603_v41 = vpop.f32.mrf.mxu3 }
  0xe1   : > { %v733_v42 = vadd.f32 %v1216_v24, %v583_v40  ;;  %v741_v43 = vadd.f32 %v1216_v24, %v603_v41  ;;  %v545_v44 = vpop.f32.mrf.mxu0  ;;  %v565_v45 = vpop.f32.mrf.mxu1 }
  0xe2   : > { %v718_v46 = vadd.f32 %v1216_v24, %v545_v44  ;;  %v726_v47 = vadd.f32 %v1216_v24, %v565_v45 }
  0xe3   : > { %v765_v48 = vmax.f32 %v733_v42, 0.0  ;;  %v773_v49 = vmax.f32 %v741_v43, 0.0 }
  0xe4   : > { %v750_v50 = vmax.f32 %v718_v46, 0.0  ;;  %v758_v51 = vmax.f32 %v726_v47, 0.0 }
  0xe5   : > { %797 = vst [vmem:[%s1224_s18 + $0xb0] sm:$0xff] %v765_v48 }
  0xe6   : > { %805 = vst [vmem:[%s1224_s18 + $0xf0] sm:$0xff] %v773_v49 }
  0xe7   : > { %782 = vst [vmem:[%s1224_s18 + $0x38] sm:$0xff] %v750_v50 }
  0xe8   : > { %790 = vst [vmem:[%s1224_s18 + $0x78] sm:$0xff] %v758_v51  ;;  %v585_v52 = vpop.f32.mrf.mxu2  ;;  %v605_v53 = vpop.f32.mrf.mxu3 }
  0xe9   : > { %v734_v54 = vadd.f32 %v1216_v24, %v585_v52  ;;  %v742_v55 = vadd.f32 %v1216_v24, %v605_v53 }
  0xeb   : > { %v766_v56 = vmax.f32 %v734_v54, 0.0  ;;  %v774_v57 = vmax.f32 %v742_v55, 0.0 }
  0xed   : > { %798 = vst [vmem:[%s1224_s18 + $0xb8] sm:$0xff] %v766_v56 }
  0xee   : > { %806 = vst [vmem:[%s1224_s18 + $0xf8] sm:$0xff] %v774_v57 }
  0xef PF: > { %s13_s14 = sadd.s32 1, %s1122_s14   ;;  %s1301_s12 = smov %s1118_s13 }
  0xf0   : > { %p10_p5 = scmp.ge.s32.totalorder %s13_s14, 10   ;;  %s1302_s13 = smov %s1304_s15 }
  0xf2   :  { %12 = sbr.rel (!%p10_p5) target bundleno = 2 (0x2), region = 76 }

// kernel: _lambda_.13
= control target key start
LH: loop header
LB: loop body
LE: loop exit
PB: predicated region body
PF: predicated region fallthrough
CT: control target
= control target key end

     0   :  { %s1894_s12 = smov 0   ;;  %s1896_s13 = smov 0   ;;  %s2271_s0 = inlined_call_operand.vmem [shape: bf16[2048,384], index: 0, kind: input, shape index: {}]   ;;  %s2272_s1 = inlined_call_operand.vmem [shape: bf16[384,128], index: 1, kind: input, shape index: {}]   ;;  %s2273_s2 = inlined_call_operand.vmem [shape: f32[1,128], index: 2, kind: input, shape index: {}]   ;;  %s2274_s3 = inlined_call_operand.vmem [shape: f32[2048,128], index: 3, kind: output, shape index: {}]  }
   0x1   :  { %s1898_s14 = smov 0  }
   0x2 LB: > { %s32_s15 = sadd.s32 1, %s1868_s13  ;;  %p1433_p0 = scmp.ge.s32.totalorder %s1872_s14, 1  ;;  %s1872_s14 = sphi %s1898_s14, %s13_s14   ;;  %s1868_s13 = sphi %s1896_s13, %s2276_s13   ;;  %s1864_s12 = sphi %s1894_s12, %s2275_s12  }
   0x3   : > { %p34_p1 = scmp.ge.s32.totalorder %s32_s15, 8  ;;  %p191_p2 = scmp.lt.s32.totalorder %s1872_s14, 9 }
   0x5   : > { %s2278_s15 = smov (%p34_p1, %s32_s15), 0  ;;  %p192_p3 = pnand %p1433_p0, %p191_p2 }
   0x6   : > { %s1434_s7 = sshll.u32 (!%p192_p3), %s1864_s12, 5 }
   0x7   : > { %195 = sbr.rel (%p192_p3) target bundleno = 369 (0x171), region = 32  ;;  %p236_p4 = scmp.lt.s32.totalorder (!%p192_p3), %s1434_s7, 255 }
   0xc   : > { %v1783_v0 = vld [vmem:[%s2272_s1 + $0x38] sm:$0xff]  ;;  %v1782_v3 = vld [vmem:[%s2272_s1 + $0x30] sm:$0xff]  ;;  %v1781_v6 = vld [vmem:[%s2272_s1 + $0x28] sm:$0xff]  ;;  %s2280_s7 = smov (!%p236_p4, %s1434_s7), 255 }
   0xd   : > { %v1920_v1 = vld [vmem:[%s2272_s1 + $0x78] sm:$0xff]  ;;  %847 = vmatpush.bf16.msra.mxu0 %v1783_v0  ;;  %1800 = vmatpush.bf16.msra.mxu3 %v1783_v0  ;;  %v1935_v4 = vld [vmem:[%s2272_s1 + $0x70] sm:$0xff]  ;;  %v1950_v7 = vld [vmem:[%s2272_s1 + $0x68] sm:$0xff]  ;;  %s1824_s25 = smul.u32 12, %s2280_s7  ;;  %s1437_s24 = sshll.u32 %s2280_s7, 3 }
   0xe   : > { %v1925_v2 = vld [vmem:[%s2272_s1 + $0xb8] sm:$0xff]  ;;  %936 = vmatpush.bf16.msra.mxu1 %v1920_v1  ;;  %v1940_v5 = vld [vmem:[%s2272_s1 + $0xb0] sm:$0xff]  ;;  %v1955_v8 = vld [vmem:[%s2272_s1 + $0xa8] sm:$0xff]  ;;  %s2127_s27 = scalar_lea.vmem %s2274_s3, %s1437_s24 }
   0xf   : > { %1025 = vmatpush.bf16.msra.mxu2 %v1925_v2  ;;  %v1780_v9 = vld [vmem:[%s2272_s1 + $0x20] sm:$0xff]  ;;  %v1779_v12 = vld [vmem:[%s2272_s1 + $0x18] sm:$0xff]  ;;  %v1778_v15 = vld [vmem:[%s2272_s1 + $0x10] sm:$0xff]  ;;  %s2007_s8 = scalar_lea.vmem %s2271_s0, %s1824_s25 }
  0x10   : > { %v1966_v10 = vld [vmem:[%s2272_s1 + $0x60] sm:$0xff]  ;;  %v1787_v13 = vld [vmem:[%s2272_s1 + $0x58] sm:$0xff]  ;;  %v1786_v16 = vld [vmem:[%s2272_s1 + $0x50] sm:$0xff] }
  0x11   : > { %848 = vmatpush.bf16.msra.mxu0 %v1782_v3  ;;  %1801 = vmatpush.bf16.msra.mxu3 %v1782_v3  ;;  %v1971_v11 = vld [vmem:[%s2272_s1 + $0xa0] sm:$0xff]  ;;  %v1986_v14 = vld [vmem:[%s2272_s1 + $0x98] sm:$0xff]  ;;  %v1999_v17 = vld [vmem:[%s2272_s1 + $0x90] sm:$0xff] }
  0x12   : > { %937 = vmatpush.bf16.msra.mxu1 %v1935_v4  ;;  %v1777_v18 = vld [vmem:[%s2272_s1 + $0x8] sm:$0xff]  ;;  %v1776_v21 = vld [vmem:[%s2272_s1] sm:$0xff]  ;;  %v1442_v29 = vld [vmem:[%s2007_s8 + $0xc] sm:$0xf0] }
  0x13   : > { %1026 = vmatpush.bf16.msra.mxu2 %v1940_v5  ;;  %v1785_v19 = vld [vmem:[%s2272_s1 + $0x48] sm:$0xff]  ;;  %v1784_v22 = vld [vmem:[%s2272_s1 + $0x40] sm:$0xff]  ;;  %v1730_v31 = vld [vmem:[%s2007_s8 + $0x10] sm:$0xf0] }
  0x14   : > { %v2016_v20 = vld [vmem:[%s2272_s1 + $0x88] sm:$0xff]  ;;  %v2027_v23 = vld [vmem:[%s2272_s1 + $0x80] sm:$0xff]  ;;  %v1452_v36 = vld [vmem:[%s2007_s8 + $0x18] sm:$0xf] }
  0x15   : > { %849 = vmatpush.bf16.msra.mxu0 %v1781_v6  ;;  %1802 = vmatpush.bf16.msra.mxu3 %v1781_v6  ;;  %v1440_v24 = vld [vmem:[%s2007_s8] sm:$0xf]  ;;  %v1729_v25 = vld [vmem:[%s2007_s8 + $0x8] sm:$0xf0]  ;;  %v1728_v28 = vld [vmem:[%s2007_s8 + $0x4] sm:$0xf] }
  0x16   : > { %938 = vmatpush.bf16.msra.mxu1 %v1950_v7  ;;  %v1584_v26 = vld [vmem:[%s2007_s8 + $0x120] sm:$0xf]  ;;  %v1765_v27 = vld [vmem:[%s2007_s8 + $0x128] sm:$0xf0]  ;;  %v1448_v30 = vld [vmem:[%s2007_s8 + $0x8] sm:$0xf]  ;;  %v1441_v32 = vor.u32 %v1729_v25, %v1440_v24  ;;  %v1445_v34 = vor.u32 %v1728_v28, %v1442_v29 }
  0x17   : > { %1027 = vmatpush.bf16.msra.mxu2 %v1955_v8  ;;  %v1585_v33 = vor.u32 %v1765_v27, %v1584_v26  ;;  %v1449_v35 = vor.u32 %v1730_v31, %v1448_v30  ;;  %v1732_v37 = vld [vmem:[%s2007_s8 + $0x20] sm:$0xf0]  ;;  %v1596_v38 = vld [vmem:[%s2007_s8 + $0x138] sm:$0xf]  ;;  %v1731_v40 = vld [vmem:[%s2007_s8 + $0x1c] sm:$0xf] }
  0x18   : > { %v1768_v39 = vld [vmem:[%s2007_s8 + $0x140] sm:$0xf0]  ;;  %v1454_v41 = vld [vmem:[%s2007_s8 + $0x24] sm:$0xf0]  ;;  %v1460_v42 = vld [vmem:[%s2007_s8 + $0x20] sm:$0xf]  ;;  %v1453_v44 = vor.u32 %v1732_v37, %v1452_v36 }
  0x19   : > { %850 = vmatpush.bf16.msra.mxu0 %v1780_v9  ;;  %1803 = vmatpush.bf16.msra.mxu3 %v1780_v9  ;;  %v1733_v43 = vld [vmem:[%s2007_s8 + $0x28] sm:$0xf0]  ;;  %v1597_v45 = vor.u32 %v1768_v39, %v1596_v38  ;;  %v1457_v46 = vor.u32 %v1731_v40, %v1454_v41  ;;  %v1464_v48 = vld [vmem:[%s2007_s8 + $0x30] sm:$0xf]  ;;  %v1735_v49 = vld [vmem:[%s2007_s8 + $0x38] sm:$0xf0] }
  0x1a   : > { %939 = vmatpush.bf16.msra.mxu1 %v1966_v10  ;;  %v1461_v47 = vor.u32 %v1733_v43, %v1460_v42  ;;  %v1608_v50 = vld [vmem:[%s2007_s8 + $0x150] sm:$0xf]  ;;  %v1771_v51 = vld [vmem:[%s2007_s8 + $0x158] sm:$0xf0]  ;;  %v1734_v52 = vld [vmem:[%s2007_s8 + $0x34] sm:$0xf]  ;;  %v1465_v56 = vor.u32 %v1735_v49, %v1464_v48 }
  0x1b   : > { %1028 = vmatpush.bf16.msra.mxu2 %v1971_v11  ;;  %v1466_v53 = vld [vmem:[%s2007_s8 + $0x3c] sm:$0xf0]  ;;  %v1472_v54 = vld [vmem:[%s2007_s8 + $0x38] sm:$0xf]  ;;  %v1736_v55 = vld [vmem:[%s2007_s8 + $0x40] sm:$0xf0]  ;;  %v1609_v57 = vor.u32 %v1771_v51, %v1608_v50 }
  0x1c   : > { %v1469_v58 = vor.u32 %v1734_v52, %v1466_v53  ;;  %v1473_v59 = vor.u32 %v1736_v55, %v1472_v54  ;;  %v1476_v60 = vld [vmem:[%s2007_s8 + $0x48] sm:$0xf]  ;;  %v1738_v61 = vld [vmem:[%s2007_s8 + $0x50] sm:$0xf0]  ;;  %v1737_v0 = vld [vmem:[%s2007_s8 + $0x4c] sm:$0xf] }
  0x1d   : > { %851 = vmatpush.bf16.msra.mxu0 %v1779_v12  ;;  %1804 = vmatpush.bf16.msra.mxu3 %v1779_v12  ;;  %v1620_v62 = vld [vmem:[%s2007_s8 + $0x168] sm:$0xf]  ;;  %v1774_v63 = vld [vmem:[%s2007_s8 + $0x170] sm:$0xf0]  ;;  %v1739_v3 = vld [vmem:[%s2007_s8 + $0x58] sm:$0xf0] }
  0x1e   : > { %940 = vmatpush.bf16.msra.mxu1 %v1787_v13  ;;  %v1741_v9 = vld [vmem:[%s2007_s8 + $0x68] sm:$0xf0]  ;;  %v1586_v12 = vld [vmem:[%s2007_s8 + $0x12c] sm:$0xf0]  ;;  %v1767_v24 = vld [vmem:[%s2007_s8 + $0x13c] sm:$0xf] }
  0x1f   : > { %1029 = vmatpush.bf16.msra.mxu2 %v1986_v14  ;;  %v1598_v25 = vld [vmem:[%s2007_s8 + $0x144] sm:$0xf0]  ;;  %v1508_v26 = vld [vmem:[%s2007_s8 + $0x80] sm:$0xf]  ;;  %v1745_v27 = vld [vmem:[%s2007_s8 + $0x88] sm:$0xf0] }
  0x20   : > { %v1601_v29 = vor.u32 %v1767_v24, %v1598_v25  ;;  %v1509_v31 = vor.u32 %v1745_v27, %v1508_v26  ;;  %v1610_v36 = vld [vmem:[%s2007_s8 + $0x15c] sm:$0xf0]  ;;  %v1520_v38 = vld [vmem:[%s2007_s8 + $0x98] sm:$0xf]  ;;  %v1748_v39 = vld [vmem:[%s2007_s8 + $0xa0] sm:$0xf0] }
  0x21   : > { %852 = vmatpush.bf16.msra.mxu0 %v1778_v15  ;;  %1805 = vmatpush.bf16.msra.mxu3 %v1778_v15  ;;  %v1742_v15 = vld [vmem:[%s2007_s8 + $0x70] sm:$0xf0]  ;;  %v1514_v37 = vld [vmem:[%s2007_s8 + $0x9c] sm:$0xf0]  ;;  %v1521_v43 = vor.u32 %v1748_v39, %v1520_v38  ;;  %v1622_v48 = vld [vmem:[%s2007_s8 + $0x174] sm:$0xf0] }
  0x22   : > { %941 = vmatpush.bf16.msra.mxu1 %v1786_v16  ;;  %v1526_v49 = vld [vmem:[%s2007_s8 + $0xb4] sm:$0xf0]  ;;  %v1532_v50 = vld [vmem:[%s2007_s8 + $0xb0] sm:$0xf]  ;;  %v1751_v51 = vld [vmem:[%s2007_s8 + $0xb8] sm:$0xf0] }
  0x23   : > { %1030 = vmatpush.bf16.msra.mxu2 %v1999_v17  ;;  %v1533_v55 = vor.u32 %v1751_v51, %v1532_v50  ;;  %v1760_v50 = vld [vmem:[%s2007_s8 + $0x100] sm:$0xf0] }
  0x25   : > { %853 = vmatpush.bf16.msra.mxu0 %v1777_v18  ;;  %1806 = vmatpush.bf16.msra.mxu3 %v1777_v18 }
  0x26   : > { %942 = vmatpush.bf16.msra.mxu1 %v1785_v19 }
  0x27   : > { %1031 = vmatpush.bf16.msra.mxu2 %v2016_v20 }
  0x29   : > { %854 = vmatpush.bf16.msra.mxu0 %v1776_v21  ;;  %1807 = vmatpush.bf16.msra.mxu3 %v1776_v21  ;;  %v1744_v21 = vld [vmem:[%s2007_s8 + $0x80] sm:$0xf0] }
  0x2a   : > { %943 = vmatpush.bf16.msra.mxu1 %v1784_v22 }
  0x2b   : > { %1032 = vmatpush.bf16.msra.mxu2 %v2027_v23 }
  0x2c   : > { %855 = vmatmul.bf16.vlgmr.msra.gmra.mxu0 %v1441_v32  ;;  %915 = vmatmul.bf16.vlgmr.msra.gmra.mxu3 %v1585_v33  ;;  %v1512_v32 = vld [vmem:[%s2007_s8 + $0x90] sm:$0xf]  ;;  %v1747_v33 = vld [vmem:[%s2007_s8 + $0x98] sm:$0xf0] }
  0x2d   : > { %1808 = vmatpush.bf16.msrb.mxu3 %v1920_v1  ;;  %944 = vmatmul.bf16.vlgmr.msra.gmra.mxu1 %v1445_v34  ;;  %v1478_v1 = vld [vmem:[%s2007_s8 + $0x54] sm:$0xf0]  ;;  %v1746_v34 = vld [vmem:[%s2007_s8 + $0x94] sm:$0xf]  ;;  %v1513_v40 = vor.u32 %v1747_v33, %v1512_v32 }
  0x2e   : > { %1033 = vmatmul.bf16.vlgmr.msra.gmra.mxu2 %v1449_v35  ;;  %v1481_v6 = vor.u32 %v1737_v0, %v1478_v1  ;;  %v1770_v35 = vld [vmem:[%s2007_s8 + $0x154] sm:$0xf]  ;;  %v1517_v42 = vor.u32 %v1746_v34, %v1514_v37 }
  0x2f   : > { %v1613_v41 = vor.u32 %v1770_v35, %v1610_v36 }
  0x31   : > { %1809 = vmatpush.bf16.msrb.mxu3 %v1935_v4  ;;  %v1477_v4 = vor.u32 %v1738_v61, %v1476_v60  ;;  %v1766_v60 = vld [vmem:[%s2007_s8 + $0x130] sm:$0xf0]  ;;  %v1538_v61 = vld [vmem:[%s2007_s8 + $0xcc] sm:$0xf0] }
  0x35   : > { %1810 = vmatpush.bf16.msrb.mxu3 %v1950_v7 }
  0x39   : > { %1811 = vmatpush.bf16.msrb.mxu3 %v1966_v10  ;;  %v1740_v10 = vld [vmem:[%s2007_s8 + $0x64] sm:$0xf] }
  0x3c   : > { %860 = vmatmul.bf16.gmra.mxu0 %v1453_v44  ;;  %920 = vmatmul.bf16.gmra.mxu3 %v1597_v45  ;;  %v1524_v44 = vld [vmem:[%s2007_s8 + $0xa8] sm:$0xf]  ;;  %v1750_v45 = vld [vmem:[%s2007_s8 + $0xb0] sm:$0xf0] }
  0x3d   : > { %1812 = vmatpush.bf16.msrb.mxu3 %v1787_v13  ;;  %949 = vmatmul.bf16.gmra.mxu1 %v1457_v46  ;;  %v1490_v13 = vld [vmem:[%s2007_s8 + $0x6c] sm:$0xf0]  ;;  %v1749_v46 = vld [vmem:[%s2007_s8 + $0xac] sm:$0xf]  ;;  %v1525_v52 = vor.u32 %v1750_v45, %v1524_v44  ;;  %v1758_v44 = vld [vmem:[%s2007_s8 + $0xf4] sm:$0xf] }
  0x3e   : > { %1038 = vmatmul.bf16.gmra.mxu2 %v1461_v47  ;;  %v1493_v18 = vor.u32 %v1740_v10, %v1490_v13  ;;  %v1773_v47 = vld [vmem:[%s2007_s8 + $0x16c] sm:$0xf]  ;;  %v1529_v54 = vor.u32 %v1749_v46, %v1526_v49  ;;  %v1616_v46 = vld [vmem:[%s2007_s8 + $0x158] sm:$0xf] }
  0x3f   : > { %v1625_v53 = vor.u32 %v1773_v47, %v1622_v48  ;;  %v1772_v47 = vld [vmem:[%s2007_s8 + $0x160] sm:$0xf0]  ;;  %v1562_v48 = vld [vmem:[%s2007_s8 + $0xfc] sm:$0xf0]  ;;  %v1568_v49 = vld [vmem:[%s2007_s8 + $0xf8] sm:$0xf] }
  0x41   : > { %1813 = vmatpush.bf16.msrb.mxu3 %v1786_v16 }
  0x45   : > { %1814 = vmatpush.bf16.msrb.mxu3 %v1785_v19 }
  0x49   : > { %1815 = vmatpush.bf16.msrb.mxu3 %v1784_v22  ;;  %v1743_v22 = vld [vmem:[%s2007_s8 + $0x7c] sm:$0xf] }
  0x4c   : > { %865 = vmatmul.bf16.gmra.mxu0 %v1465_v56  ;;  %925 = vmatmul.bf16.gmra.mxu3 %v1609_v57  ;;  %v1536_v56 = vld [vmem:[%s2007_s8 + $0xc0] sm:$0xf]  ;;  %v1753_v57 = vld [vmem:[%s2007_s8 + $0xc8] sm:$0xf0] }
  0x4d   : > { %1816 = vmatpush.bf16.msra.mxu3 %v1925_v2  ;;  %954 = vmatmul.bf16.gmra.mxu1 %v1469_v58  ;;  %v1484_v2 = vld [vmem:[%s2007_s8 + $0x50] sm:$0xf]  ;;  %v1752_v58 = vld [vmem:[%s2007_s8 + $0xc4] sm:$0xf]  ;;  %v1537_v0 = vor.u32 %v1753_v57, %v1536_v56 }
  0x4e   : > { %1043 = vmatmul.bf16.gmra.mxu2 %v1473_v59  ;;  %v1485_v7 = vor.u32 %v1739_v3, %v1484_v2  ;;  %v1592_v59 = vld [vmem:[%s2007_s8 + $0x128] sm:$0xf]  ;;  %v1541_v3 = vor.u32 %v1752_v58, %v1538_v61  ;;  %v1565_v58 = vor.u32 %v1758_v44, %v1562_v48 }
  0x4f   : > { %v1593_v1 = vor.u32 %v1766_v60, %v1592_v59  ;;  %v1569_v59 = vor.u32 %v1760_v50, %v1568_v49 }
  0x51   : > { %1817 = vmatpush.bf16.msra.mxu3 %v1940_v5  ;;  %v1621_v5 = vor.u32 %v1774_v63, %v1620_v62  ;;  %v1544_v62 = vld [vmem:[%s2007_s8 + $0xc8] sm:$0xf]  ;;  %v1754_v63 = vld [vmem:[%s2007_s8 + $0xd0] sm:$0xf0] }
  0x55   : > { %1818 = vmatpush.bf16.msra.mxu3 %v1955_v8  ;;  %v1488_v8 = vld [vmem:[%s2007_s8 + $0x60] sm:$0xf] }
  0x56   : > { %v1489_v16 = vor.u32 %v1741_v9, %v1488_v8  ;;  %v2120_v8 = vld [vmem:[%s2273_s2] ss:$0 sm:$0xff] }
  0x59   : > { %1819 = vmatpush.bf16.msra.mxu3 %v1971_v11  ;;  %v1764_v11 = vld [vmem:[%s2007_s8 + $0x124] sm:$0xf] }
  0x5c   : > { %870 = vmatmul.bf16.gmra.mxu0 %v1477_v4  ;;  %930 = vmatmul.bf16.gmra.mxu3 %v1621_v5  ;;  %v1545_v4 = vor.u32 %v1754_v63, %v1544_v62 }
  0x5d   : > { %1820 = vmatpush.bf16.msra.mxu3 %v1986_v14  ;;  %959 = vmatmul.bf16.gmra.mxu1 %v1481_v6  ;;  %v1496_v14 = vld [vmem:[%s2007_s8 + $0x68] sm:$0xf] }
  0x5e   : > { %1048 = vmatmul.bf16.gmra.mxu2 %v1485_v7  ;;  %v1497_v19 = vor.u32 %v1742_v15, %v1496_v14  ;;  %v1548_v14 = vld [vmem:[%s2007_s8 + $0xd8] sm:$0xf]  ;;  %v1756_v15 = vld [vmem:[%s2007_s8 + $0xe0] sm:$0xf0] }
  0x5f   : > { %v1549_v26 = vor.u32 %v1756_v15, %v1548_v14  ;;  %v1574_v14 = vld [vmem:[%s2007_s8 + $0x114] sm:$0xf0]  ;;  %v1580_v15 = vld [vmem:[%s2007_s8 + $0x110] sm:$0xf] }
  0x61   : > { %1821 = vmatpush.bf16.msra.mxu3 %v1999_v17  ;;  %v1589_v17 = vor.u32 %v1764_v11, %v1586_v12 }
  0x65   : > { %1822 = vmatpush.bf16.msra.mxu3 %v2016_v20  ;;  %v1500_v20 = vld [vmem:[%s2007_s8 + $0x78] sm:$0xf] }
  0x66   : > { %v1501_v28 = vor.u32 %v1744_v21, %v1500_v20  ;;  %v1550_v20 = vld [vmem:[%s2007_s8 + $0xe4] sm:$0xf0]  ;;  %v1556_v21 = vld [vmem:[%s2007_s8 + $0xe0] sm:$0xf] }
  0x69   : > { %1823 = vmatpush.bf16.msra.mxu3 %v2027_v23  ;;  %v1502_v23 = vld [vmem:[%s2007_s8 + $0x84] sm:$0xf0] }
  0x6a   : > { %v1505_v30 = vor.u32 %v1743_v22, %v1502_v23  ;;  %v1757_v22 = vld [vmem:[%s2007_s8 + $0xe8] sm:$0xf0] }
  0x6c   : > { %875 = vmatmul.bf16.gmra.mxu0 %v1489_v16  ;;  %1004 = vmatmul.bf16.vlgmr.msrb.gmra.mxu3 %v1589_v17  ;;  %v1755_v16 = vld [vmem:[%s2007_s8 + $0xdc] sm:$0xf] }
  0x6d   : > { %964 = vmatmul.bf16.gmra.mxu1 %v1493_v18  ;;  %v1604_v18 = vld [vmem:[%s2007_s8 + $0x140] sm:$0xf] }
  0x6e   : > { %1053 = vmatmul.bf16.gmra.mxu2 %v1497_v19  ;;  %v1769_v19 = vld [vmem:[%s2007_s8 + $0x148] sm:$0xf0] }
  0x6f   : > { %v1605_v27 = vor.u32 %v1769_v19, %v1604_v18 }
  0x7c   : > { %880 = vmatmul.bf16.gmra.mxu0 %v1501_v28  ;;  %1009 = vmatmul.bf16.gmra.mxu3 %v1601_v29 }
  0x7d   : > { %969 = vmatmul.bf16.gmra.mxu1 %v1505_v30  ;;  %v1553_v30 = vor.u32 %v1755_v16, %v1550_v20  ;;  %v1763_v16 = vld [vmem:[%s2007_s8 + $0x118] sm:$0xf0] }
  0x7e   : > { %1058 = vmatmul.bf16.gmra.mxu2 %v1509_v31  ;;  %v1557_v31 = vor.u32 %v1757_v22, %v1556_v21 }
  0x8c   : > { %885 = vmatmul.bf16.gmra.mxu0 %v1513_v40  ;;  %1014 = vmatmul.bf16.gmra.mxu3 %v1613_v41 }
  0x8d   : > { %974 = vmatmul.bf16.gmra.mxu1 %v1517_v42  ;;  %v1560_v42 = vld [vmem:[%s2007_s8 + $0xf0] sm:$0xf] }
  0x8e   : > { %1063 = vmatmul.bf16.gmra.mxu2 %v1521_v43  ;;  %v1759_v43 = vld [vmem:[%s2007_s8 + $0xf8] sm:$0xf0] }
  0x9c   : > { %890 = vmatmul.bf16.gmra.mxu0 %v1525_v52  ;;  %1019 = vmatmul.bf16.gmra.mxu3 %v1625_v53 }
  0x9d   : > { %979 = vmatmul.bf16.gmra.mxu1 %v1529_v54  ;;  %v1561_v54 = vor.u32 %v1759_v43, %v1560_v42 }
  0x9e   : > { %1068 = vmatmul.bf16.gmra.mxu2 %v1533_v55  ;;  %v1617_v55 = vor.u32 %v1772_v47, %v1616_v46 }
  0xa9   : > { %v856_v2 = vpop.f32.mrf.mxu0 }
  0xaa   : > { %v945_v5 = vpop.f32.mrf.mxu1 }
  0xab   : > { %v946_v6 = vadd.f32 %v945_v5, %v856_v2 }
  0xac   : > { %895 = vmatmul.bf16.gmra.mxu0 %v1537_v0  ;;  %1093 = vmatmul.bf16.vlgmr.msra.gmra.mxu3 %v1593_v1 }
  0xad   : > { %984 = vmatmul.bf16.gmra.mxu1 %v1541_v3 }
  0xae   : > { %1073 = vmatmul.bf16.gmra.mxu2 %v1545_v4 }
  0xaf   : > { %v2115_v7 = vpop.f32.mrf.mxu3 }
  0xb1   : > { %v1034_v9 = vpop.f32.mrf.mxu2  ;;  %v858_v11 = vpop.f32.mrf.mxu0 }
  0xb2   : > { %v1035_v10 = vadd.f32 %v1034_v9, %v946_v6  ;;  %v947_v12 = vpop.f32.mrf.mxu1  ;;  %v1572_v6 = vld [vmem:[%s2007_s8 + $0x108] sm:$0xf]  ;;  %v1762_v9 = vld [vmem:[%s2007_s8 + $0x110] sm:$0xf0] }
  0xb3   : > { %v948_v24 = vadd.f32 %v947_v12, %v858_v11  ;;  %v1628_v12 = vld [vmem:[%s2007_s8 + $0x170] sm:$0xf]  ;;  %v1573_v20 = vor.u32 %v1762_v9, %v1572_v6 }
  0xb4   : > { %v1217_v13 = vadd.f32 %v2120_v8, %v1035_v10  ;;  %v1761_v10 = vld [vmem:[%s2007_s8 + $0x10c] sm:$0xf] }
  0xb6   : > { %v1249_v17 = vmax.f32 %v1217_v13, 0.0  ;;  %v1775_v13 = vld [vmem:[%s2007_s8 + $0x178] sm:$0xf0] }
  0xb7   : > { %v2138_v25 = vpop.f32.mrf.mxu3  ;;  %v1629_v21 = vor.u32 %v1775_v13, %v1628_v12 }
  0xb8   : > { %1281 = vst [vmem:[%s2127_s27] sm:$0xff] %v1249_v17 }
  0xb9   : > { %v1036_v23 = vpop.f32.mrf.mxu2  ;;  %v861_v29 = vpop.f32.mrf.mxu0 }
  0xba   : > { %v1037_v28 = vadd.f32 %v1036_v23, %v948_v24  ;;  %v950_v32 = vpop.f32.mrf.mxu1  ;;  %v1577_v23 = vor.u32 %v1761_v10, %v1574_v14 }
  0xbb   : > { %v951_v35 = vadd.f32 %v950_v32, %v861_v29 }
  0xbc   : > { %v1218_v33 = vadd.f32 %v2120_v8, %v1037_v28  ;;  %900 = vmatmul.bf16.gmra.mxu0 %v1549_v26  ;;  %1098 = vmatmul.bf16.gmra.mxu3 %v1605_v27  ;;  %v1581_v26 = vor.u32 %v1763_v16, %v1580_v15 }
  0xbd   : > { %989 = vmatmul.bf16.gmra.mxu1 %v1553_v30 }
  0xbe   : > { %v1250_v34 = vmax.f32 %v1218_v33, 0.0  ;;  %1078 = vmatmul.bf16.gmra.mxu2 %v1557_v31 }
  0xbf   : > { %v2142_v36 = vpop.f32.mrf.mxu3 }
  0xc0   : > { %1282 = vst [vmem:[%s2127_s27 + $0x8] sm:$0xff] %v1250_v34 }
  0xc1   : > { %v1039_v37 = vpop.f32.mrf.mxu2  ;;  %v863_v39 = vpop.f32.mrf.mxu0 }
  0xc2   : > { %v1040_v38 = vadd.f32 %v1039_v37, %v951_v35  ;;  %v952_v40 = vpop.f32.mrf.mxu1 }
  0xc3   : > { %v953_v51 = vadd.f32 %v952_v40, %v863_v39 }
  0xc4   : > { %v1219_v41 = vadd.f32 %v2120_v8, %v1040_v38 }
  0xc6   : > { %v1251_v45 = vmax.f32 %v1219_v41, 0.0 }
  0xc7   : > { %v2154_v52 = vpop.f32.mrf.mxu3 }
  0xc8   : > { %1283 = vst [vmem:[%s2127_s27 + $0x10] sm:$0xff] %v1251_v45 }
  0xc9   : > { %v1041_v53 = vpop.f32.mrf.mxu2  ;;  %v866_v57 = vpop.f32.mrf.mxu0 }
  0xca   : > { %v1042_v56 = vadd.f32 %v1041_v53, %v953_v51  ;;  %v955_v60 = vpop.f32.mrf.mxu1 }
  0xcb   : > { %v956_v63 = vadd.f32 %v955_v60, %v866_v57 }
  0xcc   : > { %v1220_v61 = vadd.f32 %v2120_v8, %v1042_v56  ;;  %905 = vmatmul.bf16.gmra.mxu0 %v1561_v54  ;;  %1103 = vmatmul.bf16.gmra.mxu3 %v1617_v55 }
  0xcd   : > { %994 = vmatmul.bf16.gmra.mxu1 %v1565_v58 }
  0xce   : > { %v1252_v62 = vmax.f32 %v1220_v61, 0.0  ;;  %1083 = vmatmul.bf16.gmra.mxu2 %v1569_v59 }
  0xcf   : > { %v2158_v0 = vpop.f32.mrf.mxu3 }
  0xd0   : > { %1284 = vst [vmem:[%s2127_s27 + $0x18] sm:$0xff] %v1252_v62 }
  0xd1   : > { %v1044_v1 = vpop.f32.mrf.mxu2  ;;  %v868_v3 = vpop.f32.mrf.mxu0 }
  0xd2   : > { %v1045_v2 = vadd.f32 %v1044_v1, %v956_v63  ;;  %v957_v4 = vpop.f32.mrf.mxu1 }
  0xd3   : > { %v958_v17 = vadd.f32 %v957_v4, %v868_v3 }
  0xd4   : > { %v1221_v5 = vadd.f32 %v2120_v8, %v1045_v2 }
  0xd6   : > { %v1253_v11 = vmax.f32 %v1221_v5, 0.0 }
  0xd7   : > { %v2170_v18 = vpop.f32.mrf.mxu3 }
  0xd8   : > { %1285 = vst [vmem:[%s2127_s27 + $0x20] sm:$0xff] %v1253_v11 }
  0xd9   : > { %v1046_v19 = vpop.f32.mrf.mxu2  ;;  %v871_v24 = vpop.f32.mrf.mxu0 }
  0xda   : > { %v1047_v22 = vadd.f32 %v1046_v19, %v958_v17  ;;  %v960_v27 = vpop.f32.mrf.mxu1 }
  0xdb   : > { %v961_v30 = vadd.f32 %v960_v27, %v871_v24 }
  0xdc   : > { %v1222_v28 = vadd.f32 %v2120_v8, %v1047_v22  ;;  %910 = vmatmul.bf16.gmra.mxu0 %v1573_v20  ;;  %1108 = vmatmul.bf16.gmra.mxu3 %v1629_v21 }
  0xdd   : > { %999 = vmatmul.bf16.gmra.mxu1 %v1577_v23 }
  0xde   : > { %v1254_v29 = vmax.f32 %v1222_v28, 0.0  ;;  %1088 = vmatmul.bf16.gmra.mxu2 %v1581_v26 }
  0xdf   : > { %v2174_v31 = vpop.f32.mrf.mxu3 }
  0xe0   : > { %1286 = vst [vmem:[%s2127_s27 + $0x28] sm:$0xff] %v1254_v29 }
  0xe1   : > { %v1049_v32 = vpop.f32.mrf.mxu2  ;;  %v873_v34 = vpop.f32.mrf.mxu0 }
  0xe2   : > { %v1050_v33 = vadd.f32 %v1049_v32, %v961_v30  ;;  %v962_v35 = vpop.f32.mrf.mxu1 }
  0xe3   : > { %v963_v39 = vadd.f32 %v962_v35, %v873_v34 }
  0xe4   : > { %v1223_v37 = vadd.f32 %v2120_v8, %v1050_v33 }
  0xe6   : > { %v1255_v38 = vmax.f32 %v1223_v37, 0.0 }
  0xe7   : > { %v2178_v40 = vpop.f32.mrf.mxu3 }
  0xe8   : > { %1287 = vst [vmem:[%s2127_s27 + $0x30] sm:$0xff] %v1255_v38 }
  0xe9   : > { %v1051_v41 = vpop.f32.mrf.mxu2  ;;  %v876_v43 = vpop.f32.mrf.mxu0 }
  0xea   : > { %v1052_v42 = vadd.f32 %v1051_v41, %v963_v39  ;;  %v965_v44 = vpop.f32.mrf.mxu1 }
  0xeb   : > { %v966_v47 = vadd.f32 %v965_v44, %v876_v43 }
  0xec   : > { %v1224_v45 = vadd.f32 %v2120_v8, %v1052_v42 }
  0xee   : > { %v1256_v46 = vmax.f32 %v1224_v45, 0.0 }
  0xef   : > { %v2182_v48 = vpop.f32.mrf.mxu3 }
  0xf0   : > { %1288 = vst [vmem:[%s2127_s27 + $0x38] sm:$0xff] %v1256_v46 }
  0xf1   : > { %v1054_v49 = vpop.f32.mrf.mxu2  ;;  %v878_v51 = vpop.f32.mrf.mxu0 }
  0xf2   : > { %v1055_v50 = vadd.f32 %v1054_v49, %v966_v47  ;;  %v967_v53 = vpop.f32.mrf.mxu1 }
  0xf3   : > { %v968_v56 = vadd.f32 %v967_v53, %v878_v51 }
  0xf4   : > { %v1225_v54 = vadd.f32 %v2120_v8, %v1055_v50 }
  0xf6   : > { %v1257_v55 = vmax.f32 %v1225_v54, 0.0 }
  0xf7   : > { %v2186_v57 = vpop.f32.mrf.mxu3 }
  0xf8   : > { %1289 = vst [vmem:[%s2127_s27 + $0x40] sm:$0xff] %v1257_v55 }
  0xf9   : > { %v1056_v58 = vpop.f32.mrf.mxu2  ;;  %v881_v60 = vpop.f32.mrf.mxu0 }
  0xfa   : > { %v1057_v59 = vadd.f32 %v1056_v58, %v968_v56  ;;  %v970_v61 = vpop.f32.mrf.mxu1 }
  0xfb   : > { %v971_v1 = vadd.f32 %v970_v61, %v881_v60  ;;  %v1006_v60 = vadd.f32 %v2182_v48, %v2115_v7 }
  0xfc   : > { %v1226_v62 = vadd.f32 %v2120_v8, %v1057_v59 }
  0xfe   : > { %v1258_v63 = vmax.f32 %v1226_v62, 0.0 }
  0xff   : > { %v2190_v2 = vpop.f32.mrf.mxu3 }
 0x100   : > { %1290 = vst [vmem:[%s2127_s27 + $0x48] sm:$0xff] %v1258_v63 }
 0x101   : > { %v1059_v3 = vpop.f32.mrf.mxu2  ;;  %v883_v5 = vpop.f32.mrf.mxu0 }
 0x102   : > { %v1060_v4 = vadd.f32 %v1059_v3, %v971_v1  ;;  %v972_v6 = vpop.f32.mrf.mxu1 }
 0x103   : > { %v973_v11 = vadd.f32 %v972_v6, %v883_v5 }
 0x104   : > { %v1227_v9 = vadd.f32 %v2120_v8, %v1060_v4 }
 0x106   : > { %v1259_v10 = vmax.f32 %v1227_v9, 0.0 }
 0x107   : > { %v2194_v12 = vpop.f32.mrf.mxu3 }
 0x108   : > { %1291 = vst [vmem:[%s2127_s27 + $0x50] sm:$0xff] %v1259_v10 }
 0x109   : > { %v1061_v13 = vpop.f32.mrf.mxu2  ;;  %v886_v15 = vpop.f32.mrf.mxu0 }
 0x10a   : > { %v1062_v14 = vadd.f32 %v1061_v13, %v973_v11  ;;  %v975_v16 = vpop.f32.mrf.mxu1  ;;  %v1008_v11 = vadd.f32 %v2186_v57, %v2138_v25  ;;  %v1011_v25 = vadd.f32 %v2190_v2, %v2142_v36 }
 0x10b   : > { %v976_v20 = vadd.f32 %v975_v16, %v886_v15 }
 0x10c   : > { %v1228_v17 = vadd.f32 %v2120_v8, %v1062_v14 }
 0x10e   : > { %v1260_v19 = vmax.f32 %v1228_v17, 0.0 }
 0x10f   : > { %v2198_v21 = vpop.f32.mrf.mxu3 }
 0x110   : > { %1292 = vst [vmem:[%s2127_s27 + $0x58] sm:$0xff] %v1260_v19 }
 0x111   : > { %v1064_v22 = vpop.f32.mrf.mxu2  ;;  %v888_v23 = vpop.f32.mrf.mxu0 }
 0x112   : > { %v1065_v24 = vadd.f32 %v1064_v22, %v976_v20  ;;  %v977_v26 = vpop.f32.mrf.mxu1 }
 0x113   : > { %v978_v29 = vadd.f32 %v977_v26, %v888_v23 }
 0x114   : > { %v1229_v27 = vadd.f32 %v2120_v8, %v1065_v24 }
 0x116   : > { %v1261_v28 = vmax.f32 %v1229_v27, 0.0 }
 0x117   : > { %v2202_v30 = vpop.f32.mrf.mxu3 }
 0x118   : > { %1293 = vst [vmem:[%s2127_s27 + $0x60] sm:$0xff] %v1261_v28 }
 0x119   : > { %v1066_v32 = vpop.f32.mrf.mxu2  ;;  %v891_v34 = vpop.f32.mrf.mxu0 }
 0x11a   : > { %v1067_v33 = vadd.f32 %v1066_v32, %v978_v29  ;;  %v980_v35 = vpop.f32.mrf.mxu1 }
 0x11b   : > { %v981_v39 = vadd.f32 %v980_v35, %v891_v34 }
 0x11c   : > { %v1230_v37 = vadd.f32 %v2120_v8, %v1067_v33 }
 0x11e   : > { %v1262_v38 = vmax.f32 %v1230_v37, 0.0 }
 0x11f   : > { %v2206_v41 = vpop.f32.mrf.mxu3 }
 0x120   : > { %1294 = vst [vmem:[%s2127_s27 + $0x68] sm:$0xff] %v1262_v38  ;;  %v1013_v38 = vadd.f32 %v2194_v12, %v2154_v52  ;;  %v1016_v52 = vadd.f32 %v2198_v21, %v2158_v0 }
 0x121   : > { %v1069_v42 = vpop.f32.mrf.mxu2  ;;  %v893_v44 = vpop.f32.mrf.mxu0 }
 0x122   : > { %v1070_v43 = vadd.f32 %v1069_v42, %v981_v39  ;;  %v982_v45 = vpop.f32.mrf.mxu1 }
 0x123   : > { %v983_v49 = vadd.f32 %v982_v45, %v893_v44 }
 0x124   : > { %v1231_v46 = vadd.f32 %v2120_v8, %v1070_v43 }
 0x126   : > { %v1263_v47 = vmax.f32 %v1231_v46, 0.0 }
 0x127   : > { %v2210_v50 = vpop.f32.mrf.mxu3 }
 0x128   : > { %1295 = vst [vmem:[%s2127_s27 + $0x70] sm:$0xff] %v1263_v47 }
 0x129   : > { %v1071_v51 = vpop.f32.mrf.mxu2  ;;  %v896_v54 = vpop.f32.mrf.mxu0 }
 0x12a   : > { %v1072_v53 = vadd.f32 %v1071_v51, %v983_v49  ;;  %v985_v55 = vpop.f32.mrf.mxu1 }
 0x12b   : > { %v986_v59 = vadd.f32 %v985_v55, %v896_v54 }
 0x12c   : > { %v1232_v56 = vadd.f32 %v2120_v8, %v1072_v53 }
 0x12e   : > { %v1264_v58 = vmax.f32 %v1232_v56, 0.0 }
 0x12f   : > { %v1094_v61 = vpop.f32.mrf.mxu3 }
 0x130   : > { %1296 = vst [vmem:[%s2127_s27 + $0x78] sm:$0xff] %v1264_v58  ;;  %v1095_v63 = vadd.f32 %v1094_v61, %v1006_v60 }
 0x131   : > { %v1074_v62 = vpop.f32.mrf.mxu2  ;;  %v898_v3 = vpop.f32.mrf.mxu0 }
 0x132   : > { %v1075_v1 = vadd.f32 %v1074_v62, %v986_v59  ;;  %v1241_v4 = vadd.f32 %v2120_v8, %v1095_v63  ;;  %v987_v5 = vpop.f32.mrf.mxu1 }
 0x133   : > { %v988_v7 = vadd.f32 %v987_v5, %v898_v3 }
 0x134   : > { %v1233_v6 = vadd.f32 %v2120_v8, %v1075_v1  ;;  %v1273_v9 = vmax.f32 %v1241_v4, 0.0  ;;  %v1018_v1 = vadd.f32 %v2202_v30, %v2170_v18  ;;  %v1021_v18 = vadd.f32 %v2206_v41, %v2174_v31 }
 0x136   : > { %v1265_v10 = vmax.f32 %v1233_v6, 0.0  ;;  %1305 = vst [vmem:[%s2127_s27 + $0xc0] sm:$0xff] %v1273_v9 }
 0x137   : > { %v1096_v48 = vpop.f32.mrf.mxu3 }
 0x138   : > { %1297 = vst [vmem:[%s2127_s27 + $0x80] sm:$0xff] %v1265_v10  ;;  %v1097_v14 = vadd.f32 %v1096_v48, %v1008_v11 }
 0x139   : > { %v1076_v13 = vpop.f32.mrf.mxu2  ;;  %v901_v16 = vpop.f32.mrf.mxu0 }
 0x13a   : > { %v1077_v15 = vadd.f32 %v1076_v13, %v988_v7  ;;  %v1242_v17 = vadd.f32 %v2120_v8, %v1097_v14  ;;  %v990_v19 = vpop.f32.mrf.mxu1 }
 0x13b   : > { %v991_v23 = vadd.f32 %v990_v19, %v901_v16 }
 0x13c   : > { %v1234_v20 = vadd.f32 %v2120_v8, %v1077_v15  ;;  %v1274_v22 = vmax.f32 %v1242_v17, 0.0 }
 0x13e   : > { %v1266_v24 = vmax.f32 %v1234_v20, 0.0  ;;  %1306 = vst [vmem:[%s2127_s27 + $0xc8] sm:$0xff] %v1274_v22 }
 0x13f   : > { %v1099_v57 = vpop.f32.mrf.mxu3 }
 0x140   : > { %1298 = vst [vmem:[%s2127_s27 + $0x88] sm:$0xff] %v1266_v24  ;;  %v1100_v27 = vadd.f32 %v1099_v57, %v1011_v25  ;;  %v1023_v25 = vadd.f32 %v2210_v50, %v2178_v40 }
 0x141   : > { %v1079_v26 = vpop.f32.mrf.mxu2  ;;  %v903_v29 = vpop.f32.mrf.mxu0 }
 0x142   : > { %v1080_v28 = vadd.f32 %v1079_v26, %v991_v23  ;;  %v1243_v32 = vadd.f32 %v2120_v8, %v1100_v27  ;;  %v992_v33 = vpop.f32.mrf.mxu1 }
 0x143   : > { %v993_v36 = vadd.f32 %v992_v33, %v903_v29 }
 0x144   : > { %v1235_v34 = vadd.f32 %v2120_v8, %v1080_v28  ;;  %v1275_v35 = vmax.f32 %v1243_v32, 0.0 }
 0x146   : > { %v1267_v37 = vmax.f32 %v1235_v34, 0.0  ;;  %1307 = vst [vmem:[%s2127_s27 + $0xd0] sm:$0xff] %v1275_v35 }
 0x147   : > { %v1101_v2 = vpop.f32.mrf.mxu3 }
 0x148   : > { %1299 = vst [vmem:[%s2127_s27 + $0x90] sm:$0xff] %v1267_v37  ;;  %v1102_v42 = vadd.f32 %v1101_v2, %v1013_v38 }
 0x149   : > { %v1081_v39 = vpop.f32.mrf.mxu2  ;;  %v906_v44 = vpop.f32.mrf.mxu0 }
 0x14a   : > { %v1082_v43 = vadd.f32 %v1081_v39, %v993_v36  ;;  %v1244_v45 = vadd.f32 %v2120_v8, %v1102_v42  ;;  %v995_v46 = vpop.f32.mrf.mxu1 }
 0x14b   : > { %v996_v53 = vadd.f32 %v995_v46, %v906_v44 }
 0x14c   : > { %v1236_v47 = vadd.f32 %v2120_v8, %v1082_v43  ;;  %v1276_v49 = vmax.f32 %v1244_v45, 0.0 }
 0x14e   : > { %v1268_v51 = vmax.f32 %v1236_v47, 0.0  ;;  %1308 = vst [vmem:[%s2127_s27 + $0xd8] sm:$0xff] %v1276_v49 }
 0x14f   : > { %v1104_v12 = vpop.f32.mrf.mxu3 }
 0x150   : > { %1300 = vst [vmem:[%s2127_s27 + $0x98] sm:$0xff] %v1268_v51  ;;  %v1105_v55 = vadd.f32 %v1104_v12, %v1016_v52 }
 0x151   : > { %v1084_v54 = vpop.f32.mrf.mxu2  ;;  %v908_v58 = vpop.f32.mrf.mxu0 }
 0x152   : > { %v1085_v56 = vadd.f32 %v1084_v54, %v996_v53  ;;  %v1245_v59 = vadd.f32 %v2120_v8, %v1105_v55  ;;  %v997_v60 = vpop.f32.mrf.mxu1 }
 0x153   : > { %v998_v0 = vadd.f32 %v997_v60, %v908_v58 }
 0x154   : > { %v1237_v61 = vadd.f32 %v2120_v8, %v1085_v56  ;;  %v1277_v62 = vmax.f32 %v1245_v59, 0.0 }
 0x156   : > { %v1269_v63 = vmax.f32 %v1237_v61, 0.0  ;;  %1309 = vst [vmem:[%s2127_s27 + $0xe0] sm:$0xff] %v1277_v62 }
 0x157   : > { %v1106_v21 = vpop.f32.mrf.mxu3 }
 0x158   : > { %1301 = vst [vmem:[%s2127_s27 + $0xa0] sm:$0xff] %v1269_v63  ;;  %v1107_v4 = vadd.f32 %v1106_v21, %v1018_v1 }
 0x159   : > { %v1086_v3 = vpop.f32.mrf.mxu2  ;;  %v911_v9 = vpop.f32.mrf.mxu0 }
 0x15a   : > { %v1087_v5 = vadd.f32 %v1086_v3, %v998_v0  ;;  %v1246_v6 = vadd.f32 %v2120_v8, %v1107_v4  ;;  %v1000_v10 = vpop.f32.mrf.mxu1 }
 0x15b   : > { %v1001_v13 = vadd.f32 %v1000_v10, %v911_v9 }
 0x15c   : > { %v1238_v11 = vadd.f32 %v2120_v8, %v1087_v5  ;;  %v1278_v7 = vmax.f32 %v1246_v6, 0.0 }
 0x15e   : > { %v1270_v48 = vmax.f32 %v1238_v11, 0.0  ;;  %1310 = vst [vmem:[%s2127_s27 + $0xe8] sm:$0xff] %v1278_v7 }
 0x15f   : > { %v1109_v30 = vpop.f32.mrf.mxu3 }
 0x160   : > { %1302 = vst [vmem:[%s2127_s27 + $0xa8] sm:$0xff] %v1270_v48  ;;  %v1110_v15 = vadd.f32 %v1109_v30, %v1021_v18 }
 0x161   : > { %v1089_v14 = vpop.f32.mrf.mxu2  ;;  %v913_v22 = vpop.f32.mrf.mxu0 }
 0x162   : > { %v1090_v16 = vadd.f32 %v1089_v14, %v1001_v13  ;;  %v1247_v17 = vadd.f32 %v2120_v8, %v1110_v15  ;;  %v1002_v24 = vpop.f32.mrf.mxu1 }
 0x163   : > { %v1003_v31 = vadd.f32 %v1002_v24, %v913_v22 }
 0x164   : > { %v1239_v19 = vadd.f32 %v2120_v8, %v1090_v16  ;;  %v1279_v20 = vmax.f32 %v1247_v17, 0.0 }
 0x166   : > { %v1271_v23 = vmax.f32 %v1239_v19, 0.0  ;;  %1311 = vst [vmem:[%s2127_s27 + $0xf0] sm:$0xff] %v1279_v20 }
 0x167   : > { %v1111_v41 = vpop.f32.mrf.mxu3 }
 0x168   : > { %1303 = vst [vmem:[%s2127_s27 + $0xb0] sm:$0xff] %v1271_v23  ;;  %v1112_v26 = vadd.f32 %v1111_v41, %v1023_v25 }
 0x169   : > { %v1091_v57 = vpop.f32.mrf.mxu2 }
 0x16a   : > { %v1092_v27 = vadd.f32 %v1091_v57, %v1003_v31  ;;  %v1248_v28 = vadd.f32 %v2120_v8, %v1112_v26 }
 0x16c   : > { %v1240_v29 = vadd.f32 %v2120_v8, %v1092_v27  ;;  %v1280_v32 = vmax.f32 %v1248_v28, 0.0 }
 0x16e   : > { %v1272_v33 = vmax.f32 %v1240_v29, 0.0  ;;  %1312 = vst [vmem:[%s2127_s27 + $0xf8] sm:$0xff] %v1280_v32 }
 0x170   : > { %1304 = vst [vmem:[%s2127_s27 + $0xb8] sm:$0xff] %v1272_v33 }
 0x171 PF: > { %s13_s14 = sadd.s32 1, %s1872_s14   ;;  %s2275_s12 = smov %s1868_s13 }
 0x172   : > { %p10_p5 = scmp.ge.s32.totalorder %s13_s14, 10   ;;  %s2276_s13 = smov %s2278_s15 }
 0x174   :  { %12 = sbr.rel (!%p10_p5) target bundleno = 2 (0x2), region = 76 }

// kernel: _lambda_.14
= control target key start
LH: loop header
LB: loop body
LE: loop exit
PB: predicated region body
PF: predicated region fallthrough
CT: control target
= control target key end

     0   :  { %s414_s0 = inlined_call_operand.vmem [shape: f32[32,512], index: 0, kind: input, shape index: {}]   ;;  %s415_s1 = inlined_call_operand.vmem [shape: f32[32,512], index: 1, kind: input, shape index: {}]   ;;  %s416_s2 = inlined_call_operand.vmem [shape: f32[32,512], index: 2, kind: input, shape index: {}]   ;;  %s417_s3 = inlined_call_operand.vmem [shape: f32[32,512], index: 3, kind: input, shape index: {}]   ;;  %s418_s4 = inlined_call_operand.vmem [shape: f32[32,512], index: 4, kind: output, shape index: {}]  }
   0x1   :  { %v17_v0 = vld [vmem:[%s414_s0] sm:$0xff]  ;;  %v18_v5 = vld [vmem:[%s414_s0 + $0x8] sm:$0xff]  ;;  %v19_v11 = vld [vmem:[%s414_s0 + $0x10] sm:$0xff] }
   0x2   :  { %v33_v1 = vld [vmem:[%s415_s1] sm:$0xff]  ;;  %v34_v6 = vld [vmem:[%s415_s1 + $0x8] sm:$0xff]  ;;  %v35_v13 = vld [vmem:[%s415_s1 + $0x10] sm:$0xff] }
   0x3   :  { %v65_v2 = vld [vmem:[%s416_s2] sm:$0xff]  ;;  %v49_v3 = vmax.f32 %v17_v0, %v33_v1  ;;  %v50_v8 = vmax.f32 %v18_v5, %v34_v6  ;;  %v66_v9 = vld [vmem:[%s416_s2 + $0x8] sm:$0xff]  ;;  %v67_v14 = vld [vmem:[%s416_s2 + $0x10] sm:$0xff]  ;;  %v51_v17 = vmax.f32 %v19_v11, %v35_v13 }
   0x4   :  { %v81_v4 = vld [vmem:[%s417_s3] sm:$0xff]  ;;  %v82_v10 = vld [vmem:[%s417_s3 + $0x8] sm:$0xff]  ;;  %v83_v15 = vld [vmem:[%s417_s3 + $0x10] sm:$0xff] }
   0x5   :  { %v97_v7 = vmax.f32 %v65_v2, %v81_v4  ;;  %v98_v12 = vmax.f32 %v66_v9, %v82_v10  ;;  %v99_v18 = vmax.f32 %v67_v14, %v83_v15  ;;  %v20_v19 = vld [vmem:[%s414_s0 + $0x18] sm:$0xff]  ;;  %v21_v25 = vld [vmem:[%s414_s0 + $0x20] sm:$0xff]  ;;  %v22_v32 = vld [vmem:[%s414_s0 + $0x28] sm:$0xff] }
   0x6   :  { %v36_v20 = vld [vmem:[%s415_s1 + $0x18] sm:$0xff]  ;;  %v37_v26 = vld [vmem:[%s415_s1 + $0x20] sm:$0xff]  ;;  %v38_v34 = vld [vmem:[%s415_s1 + $0x28] sm:$0xff] }
   0x7   :  { %v113_v16 = vmax.f32 %v49_v3, %v97_v7  ;;  %v68_v21 = vld [vmem:[%s416_s2 + $0x18] sm:$0xff]  ;;  %v114_v22 = vmax.f32 %v50_v8, %v98_v12  ;;  %v52_v23 = vmax.f32 %v20_v19, %v36_v20  ;;  %v115_v27 = vmax.f32 %v51_v17, %v99_v18  ;;  %v69_v30 = vld [vmem:[%s416_s2 + $0x20] sm:$0xff]  ;;  %v70_v35 = vld [vmem:[%s416_s2 + $0x28] sm:$0xff] }
   0x8   :  { %v84_v24 = vld [vmem:[%s417_s3 + $0x18] sm:$0xff]  ;;  %v53_v29 = vmax.f32 %v21_v25, %v37_v26  ;;  %v85_v31 = vld [vmem:[%s417_s3 + $0x20] sm:$0xff]  ;;  %v86_v36 = vld [vmem:[%s417_s3 + $0x28] sm:$0xff]  ;;  %v54_v38 = vmax.f32 %v22_v32, %v38_v34 }
   0x9   :  { %129 = vst [vmem:[%s418_s4] sm:$0xff] %v113_v16  ;;  %v100_v28 = vmax.f32 %v68_v21, %v84_v24  ;;  %v101_v33 = vmax.f32 %v69_v30, %v85_v31  ;;  %v102_v39 = vmax.f32 %v70_v35, %v86_v36  ;;  %v23_v40 = vld [vmem:[%s414_s0 + $0x30] sm:$0xff]  ;;  %v24_v46 = vld [vmem:[%s414_s0 + $0x38] sm:$0xff]  ;;  %v25_v53 = vld [vmem:[%s414_s0 + $0x40] sm:$0xff] }
   0xa   :  { %130 = vst [vmem:[%s418_s4 + $0x8] sm:$0xff] %v114_v22  ;;  %v39_v41 = vld [vmem:[%s415_s1 + $0x30] sm:$0xff]  ;;  %v40_v47 = vld [vmem:[%s415_s1 + $0x38] sm:$0xff]  ;;  %v41_v55 = vld [vmem:[%s415_s1 + $0x40] sm:$0xff] }
   0xb   :  { %131 = vst [vmem:[%s418_s4 + $0x10] sm:$0xff] %v115_v27  ;;  %v116_v37 = vmax.f32 %v52_v23, %v100_v28  ;;  %v71_v42 = vld [vmem:[%s416_s2 + $0x30] sm:$0xff]  ;;  %v117_v43 = vmax.f32 %v53_v29, %v101_v33  ;;  %v55_v44 = vmax.f32 %v23_v40, %v39_v41  ;;  %v118_v48 = vmax.f32 %v54_v38, %v102_v39  ;;  %v72_v51 = vld [vmem:[%s416_s2 + $0x38] sm:$0xff]  ;;  %v73_v56 = vld [vmem:[%s416_s2 + $0x40] sm:$0xff] }
   0xc   :  { %v87_v45 = vld [vmem:[%s417_s3 + $0x30] sm:$0xff]  ;;  %v56_v50 = vmax.f32 %v24_v46, %v40_v47  ;;  %v88_v52 = vld [vmem:[%s417_s3 + $0x38] sm:$0xff]  ;;  %v89_v57 = vld [vmem:[%s417_s3 + $0x40] sm:$0xff]  ;;  %v57_v59 = vmax.f32 %v25_v53, %v41_v55 }
   0xd   :  { %132 = vst [vmem:[%s418_s4 + $0x18] sm:$0xff] %v116_v37  ;;  %v103_v49 = vmax.f32 %v71_v42, %v87_v45  ;;  %v104_v54 = vmax.f32 %v72_v51, %v88_v52  ;;  %v105_v60 = vmax.f32 %v73_v56, %v89_v57  ;;  %v26_v61 = vld [vmem:[%s414_s0 + $0x48] sm:$0xff]  ;;  %v27_v3 = vld [vmem:[%s414_s0 + $0x50] sm:$0xff]  ;;  %v28_v10 = vld [vmem:[%s414_s0 + $0x58] sm:$0xff] }
   0xe   :  { %133 = vst [vmem:[%s418_s4 + $0x20] sm:$0xff] %v117_v43  ;;  %v42_v62 = vld [vmem:[%s415_s1 + $0x48] sm:$0xff]  ;;  %v43_v4 = vld [vmem:[%s415_s1 + $0x50] sm:$0xff]  ;;  %v44_v12 = vld [vmem:[%s415_s1 + $0x58] sm:$0xff] }
   0xf   :  { %134 = vst [vmem:[%s418_s4 + $0x28] sm:$0xff] %v118_v48  ;;  %v119_v58 = vmax.f32 %v55_v44, %v103_v49  ;;  %v74_v63 = vld [vmem:[%s416_s2 + $0x48] sm:$0xff]  ;;  %v120_v0 = vmax.f32 %v56_v50, %v104_v54  ;;  %v58_v1 = vmax.f32 %v26_v61, %v42_v62  ;;  %v121_v5 = vmax.f32 %v57_v59, %v105_v60  ;;  %v75_v8 = vld [vmem:[%s416_s2 + $0x50] sm:$0xff]  ;;  %v76_v13 = vld [vmem:[%s416_s2 + $0x58] sm:$0xff] }
  0x10   :  { %v90_v2 = vld [vmem:[%s417_s3 + $0x48] sm:$0xff]  ;;  %v59_v7 = vmax.f32 %v27_v3, %v43_v4  ;;  %v91_v9 = vld [vmem:[%s417_s3 + $0x50] sm:$0xff]  ;;  %v92_v14 = vld [vmem:[%s417_s3 + $0x58] sm:$0xff]  ;;  %v60_v16 = vmax.f32 %v28_v10, %v44_v12 }
  0x11   :  { %135 = vst [vmem:[%s418_s4 + $0x30] sm:$0xff] %v119_v58  ;;  %v106_v6 = vmax.f32 %v74_v63, %v90_v2  ;;  %v107_v11 = vmax.f32 %v75_v8, %v91_v9  ;;  %v108_v17 = vmax.f32 %v76_v13, %v92_v14  ;;  %v29_v18 = vld [vmem:[%s414_s0 + $0x60] sm:$0xff]  ;;  %v30_v24 = vld [vmem:[%s414_s0 + $0x68] sm:$0xff]  ;;  %v31_v31 = vld [vmem:[%s414_s0 + $0x70] sm:$0xff] }
  0x12   :  { %136 = vst [vmem:[%s418_s4 + $0x38] sm:$0xff] %v120_v0  ;;  %v45_v19 = vld [vmem:[%s415_s1 + $0x60] sm:$0xff]  ;;  %v46_v25 = vld [vmem:[%s415_s1 + $0x68] sm:$0xff]  ;;  %v47_v33 = vld [vmem:[%s415_s1 + $0x70] sm:$0xff] }
  0x13   :  { %137 = vst [vmem:[%s418_s4 + $0x40] sm:$0xff] %v121_v5  ;;  %v122_v15 = vmax.f32 %v58_v1, %v106_v6  ;;  %v77_v20 = vld [vmem:[%s416_s2 + $0x60] sm:$0xff]  ;;  %v123_v21 = vmax.f32 %v59_v7, %v107_v11  ;;  %v61_v22 = vmax.f32 %v29_v18, %v45_v19  ;;  %v124_v26 = vmax.f32 %v60_v16, %v108_v17  ;;  %v78_v29 = vld [vmem:[%s416_s2 + $0x68] sm:$0xff]  ;;  %v79_v34 = vld [vmem:[%s416_s2 + $0x70] sm:$0xff] }
  0x14   :  { %v93_v23 = vld [vmem:[%s417_s3 + $0x60] sm:$0xff]  ;;  %v62_v28 = vmax.f32 %v30_v24, %v46_v25  ;;  %v94_v30 = vld [vmem:[%s417_s3 + $0x68] sm:$0xff]  ;;  %v95_v35 = vld [vmem:[%s417_s3 + $0x70] sm:$0xff]  ;;  %v63_v37 = vmax.f32 %v31_v31, %v47_v33 }
  0x15   :  { %138 = vst [vmem:[%s418_s4 + $0x48] sm:$0xff] %v122_v15  ;;  %v109_v27 = vmax.f32 %v77_v20, %v93_v23  ;;  %v110_v32 = vmax.f32 %v78_v29, %v94_v30  ;;  %v111_v38 = vmax.f32 %v79_v34, %v95_v35  ;;  %v32_v39 = vld [vmem:[%s414_s0 + $0x78] sm:$0xff] }
  0x16   :  { %139 = vst [vmem:[%s418_s4 + $0x50] sm:$0xff] %v123_v21  ;;  %v48_v40 = vld [vmem:[%s415_s1 + $0x78] sm:$0xff] }
  0x17   :  { %140 = vst [vmem:[%s418_s4 + $0x58] sm:$0xff] %v124_v26  ;;  %v125_v36 = vmax.f32 %v61_v22, %v109_v27  ;;  %v80_v41 = vld [vmem:[%s416_s2 + $0x78] sm:$0xff]  ;;  %v126_v42 = vmax.f32 %v62_v28, %v110_v32  ;;  %v64_v43 = vmax.f32 %v32_v39, %v48_v40  ;;  %v127_v45 = vmax.f32 %v63_v37, %v111_v38 }
  0x18   :  { %v96_v44 = vld [vmem:[%s417_s3 + $0x78] sm:$0xff] }
  0x19   :  { %141 = vst [vmem:[%s418_s4 + $0x60] sm:$0xff] %v125_v36  ;;  %v112_v46 = vmax.f32 %v80_v41, %v96_v44 }
  0x1a   :  { %142 = vst [vmem:[%s418_s4 + $0x68] sm:$0xff] %v126_v42 }
  0x1b   :  { %143 = vst [vmem:[%s418_s4 + $0x70] sm:$0xff] %v127_v45  ;;  %v128_v47 = vmax.f32 %v64_v43, %v112_v46 }
  0x1d   :  { %144 = vst [vmem:[%s418_s4 + $0x78] sm:$0xff] %v128_v47 }

// kernel: _lambda_.15
= control target key start
LH: loop header
LB: loop body
LE: loop exit
PB: predicated region body
PF: predicated region fallthrough
CT: control target
= control target key end

     0   :  { %s1894_s12 = smov 0   ;;  %s1896_s13 = smov 0   ;;  %s2271_s0 = inlined_call_operand.vmem [shape: bf16[512,384], index: 0, kind: input, shape index: {}]   ;;  %s2272_s1 = inlined_call_operand.vmem [shape: bf16[384,128], index: 1, kind: input, shape index: {}]   ;;  %s2273_s2 = inlined_call_operand.vmem [shape: f32[1,128], index: 2, kind: input, shape index: {}]   ;;  %s2274_s3 = inlined_call_operand.vmem [shape: f32[512,128], index: 3, kind: output, shape index: {}]  }
   0x1   :  { %s1898_s14 = smov 0  }
   0x2 LB: > { %s32_s15 = sadd.s32 1, %s1868_s13  ;;  %p1433_p0 = scmp.ge.s32.totalorder %s1872_s14, 1  ;;  %s1872_s14 = sphi %s1898_s14, %s13_s14   ;;  %s1868_s13 = sphi %s1896_s13, %s2276_s13   ;;  %s1864_s12 = sphi %s1894_s12, %s2275_s12  }
   0x3   : > { %p34_p1 = scmp.ge.s32.totalorder %s32_s15, 2  ;;  %p191_p2 = scmp.lt.s32.totalorder %s1872_s14, 3 }
   0x5   : > { %s2278_s15 = smov (%p34_p1, %s32_s15), 0  ;;  %p192_p3 = pnand %p1433_p0, %p191_p2 }
   0x6   : > { %s1434_s7 = sshll.u32 (!%p192_p3), %s1864_s12, 5 }
   0x7   : > { %195 = sbr.rel (%p192_p3) target bundleno = 369 (0x171), region = 32  ;;  %p236_p4 = scmp.lt.s32.totalorder (!%p192_p3), %s1434_s7, 63 }
   0xc   : > { %v1783_v0 = vld [vmem:[%s2272_s1 + $0x38] sm:$0xff]  ;;  %v1782_v3 = vld [vmem:[%s2272_s1 + $0x30] sm:$0xff]  ;;  %v1781_v6 = vld [vmem:[%s2272_s1 + $0x28] sm:$0xff]  ;;  %s2280_s7 = smov (!%p236_p4, %s1434_s7), 63 }
   0xd   : > { %v1920_v1 = vld [vmem:[%s2272_s1 + $0x78] sm:$0xff]  ;;  %847 = vmatpush.bf16.msra.mxu0 %v1783_v0  ;;  %1800 = vmatpush.bf16.msra.mxu3 %v1783_v0  ;;  %v1935_v4 = vld [vmem:[%s2272_s1 + $0x70] sm:$0xff]  ;;  %v1950_v7 = vld [vmem:[%s2272_s1 + $0x68] sm:$0xff]  ;;  %s1824_s25 = smul.u32 12, %s2280_s7  ;;  %s1437_s24 = sshll.u32 %s2280_s7, 3 }
   0xe   : > { %v1925_v2 = vld [vmem:[%s2272_s1 + $0xb8] sm:$0xff]  ;;  %936 = vmatpush.bf16.msra.mxu1 %v1920_v1  ;;  %v1940_v5 = vld [vmem:[%s2272_s1 + $0xb0] sm:$0xff]  ;;  %v1955_v8 = vld [vmem:[%s2272_s1 + $0xa8] sm:$0xff]  ;;  %s2127_s27 = scalar_lea.vmem %s2274_s3, %s1437_s24 }
   0xf   : > { %1025 = vmatpush.bf16.msra.mxu2 %v1925_v2  ;;  %v1780_v9 = vld [vmem:[%s2272_s1 + $0x20] sm:$0xff]  ;;  %v1779_v12 = vld [vmem:[%s2272_s1 + $0x18] sm:$0xff]  ;;  %v1778_v15 = vld [vmem:[%s2272_s1 + $0x10] sm:$0xff]  ;;  %s2007_s8 = scalar_lea.vmem %s2271_s0, %s1824_s25 }
  0x10   : > { %v1966_v10 = vld [vmem:[%s2272_s1 + $0x60] sm:$0xff]  ;;  %v1787_v13 = vld [vmem:[%s2272_s1 + $0x58] sm:$0xff]  ;;  %v1786_v16 = vld [vmem:[%s2272_s1 + $0x50] sm:$0xff] }
  0x11   : > { %848 = vmatpush.bf16.msra.mxu0 %v1782_v3  ;;  %1801 = vmatpush.bf16.msra.mxu3 %v1782_v3  ;;  %v1971_v11 = vld [vmem:[%s2272_s1 + $0xa0] sm:$0xff]  ;;  %v1986_v14 = vld [vmem:[%s2272_s1 + $0x98] sm:$0xff]  ;;  %v1999_v17 = vld [vmem:[%s2272_s1 + $0x90] sm:$0xff] }
  0x12   : > { %937 = vmatpush.bf16.msra.mxu1 %v1935_v4  ;;  %v1777_v18 = vld [vmem:[%s2272_s1 + $0x8] sm:$0xff]  ;;  %v1776_v21 = vld [vmem:[%s2272_s1] sm:$0xff]  ;;  %v1442_v29 = vld [vmem:[%s2007_s8 + $0xc] sm:$0xf0] }
  0x13   : > { %1026 = vmatpush.bf16.msra.mxu2 %v1940_v5  ;;  %v1785_v19 = vld [vmem:[%s2272_s1 + $0x48] sm:$0xff]  ;;  %v1784_v22 = vld [vmem:[%s2272_s1 + $0x40] sm:$0xff]  ;;  %v1730_v31 = vld [vmem:[%s2007_s8 + $0x10] sm:$0xf0] }
  0x14   : > { %v2016_v20 = vld [vmem:[%s2272_s1 + $0x88] sm:$0xff]  ;;  %v2027_v23 = vld [vmem:[%s2272_s1 + $0x80] sm:$0xff]  ;;  %v1452_v36 = vld [vmem:[%s2007_s8 + $0x18] sm:$0xf] }
  0x15   : > { %849 = vmatpush.bf16.msra.mxu0 %v1781_v6  ;;  %1802 = vmatpush.bf16.msra.mxu3 %v1781_v6  ;;  %v1440_v24 = vld [vmem:[%s2007_s8] sm:$0xf]  ;;  %v1729_v25 = vld [vmem:[%s2007_s8 + $0x8] sm:$0xf0]  ;;  %v1728_v28 = vld [vmem:[%s2007_s8 + $0x4] sm:$0xf] }
  0x16   : > { %938 = vmatpush.bf16.msra.mxu1 %v1950_v7  ;;  %v1584_v26 = vld [vmem:[%s2007_s8 + $0x120] sm:$0xf]  ;;  %v1765_v27 = vld [vmem:[%s2007_s8 + $0x128] sm:$0xf0]  ;;  %v1448_v30 = vld [vmem:[%s2007_s8 + $0x8] sm:$0xf]  ;;  %v1441_v32 = vor.u32 %v1729_v25, %v1440_v24  ;;  %v1445_v34 = vor.u32 %v1728_v28, %v1442_v29 }
  0x17   : > { %1027 = vmatpush.bf16.msra.mxu2 %v1955_v8  ;;  %v1585_v33 = vor.u32 %v1765_v27, %v1584_v26  ;;  %v1449_v35 = vor.u32 %v1730_v31, %v1448_v30  ;;  %v1732_v37 = vld [vmem:[%s2007_s8 + $0x20] sm:$0xf0]  ;;  %v1596_v38 = vld [vmem:[%s2007_s8 + $0x138] sm:$0xf]  ;;  %v1731_v40 = vld [vmem:[%s2007_s8 + $0x1c] sm:$0xf] }
  0x18   : > { %v1768_v39 = vld [vmem:[%s2007_s8 + $0x140] sm:$0xf0]  ;;  %v1454_v41 = vld [vmem:[%s2007_s8 + $0x24] sm:$0xf0]  ;;  %v1460_v42 = vld [vmem:[%s2007_s8 + $0x20] sm:$0xf]  ;;  %v1453_v44 = vor.u32 %v1732_v37, %v1452_v36 }
  0x19   : > { %850 = vmatpush.bf16.msra.mxu0 %v1780_v9  ;;  %1803 = vmatpush.bf16.msra.mxu3 %v1780_v9  ;;  %v1733_v43 = vld [vmem:[%s2007_s8 + $0x28] sm:$0xf0]  ;;  %v1597_v45 = vor.u32 %v1768_v39, %v1596_v38  ;;  %v1457_v46 = vor.u32 %v1731_v40, %v1454_v41  ;;  %v1464_v48 = vld [vmem:[%s2007_s8 + $0x30] sm:$0xf]  ;;  %v1735_v49 = vld [vmem:[%s2007_s8 + $0x38] sm:$0xf0] }
  0x1a   : > { %939 = vmatpush.bf16.msra.mxu1 %v1966_v10  ;;  %v1461_v47 = vor.u32 %v1733_v43, %v1460_v42  ;;  %v1608_v50 = vld [vmem:[%s2007_s8 + $0x150] sm:$0xf]  ;;  %v1771_v51 = vld [vmem:[%s2007_s8 + $0x158] sm:$0xf0]  ;;  %v1734_v52 = vld [vmem:[%s2007_s8 + $0x34] sm:$0xf]  ;;  %v1465_v56 = vor.u32 %v1735_v49, %v1464_v48 }
  0x1b   : > { %1028 = vmatpush.bf16.msra.mxu2 %v1971_v11  ;;  %v1466_v53 = vld [vmem:[%s2007_s8 + $0x3c] sm:$0xf0]  ;;  %v1472_v54 = vld [vmem:[%s2007_s8 + $0x38] sm:$0xf]  ;;  %v1736_v55 = vld [vmem:[%s2007_s8 + $0x40] sm:$0xf0]  ;;  %v1609_v57 = vor.u32 %v1771_v51, %v1608_v50 }
  0x1c   : > { %v1469_v58 = vor.u32 %v1734_v52, %v1466_v53  ;;  %v1473_v59 = vor.u32 %v1736_v55, %v1472_v54  ;;  %v1476_v60 = vld [vmem:[%s2007_s8 + $0x48] sm:$0xf]  ;;  %v1738_v61 = vld [vmem:[%s2007_s8 + $0x50] sm:$0xf0]  ;;  %v1737_v0 = vld [vmem:[%s2007_s8 + $0x4c] sm:$0xf] }
  0x1d   : > { %851 = vmatpush.bf16.msra.mxu0 %v1779_v12  ;;  %1804 = vmatpush.bf16.msra.mxu3 %v1779_v12  ;;  %v1620_v62 = vld [vmem:[%s2007_s8 + $0x168] sm:$0xf]  ;;  %v1774_v63 = vld [vmem:[%s2007_s8 + $0x170] sm:$0xf0]  ;;  %v1739_v3 = vld [vmem:[%s2007_s8 + $0x58] sm:$0xf0] }
  0x1e   : > { %940 = vmatpush.bf16.msra.mxu1 %v1787_v13  ;;  %v1741_v9 = vld [vmem:[%s2007_s8 + $0x68] sm:$0xf0]  ;;  %v1586_v12 = vld [vmem:[%s2007_s8 + $0x12c] sm:$0xf0]  ;;  %v1767_v24 = vld [vmem:[%s2007_s8 + $0x13c] sm:$0xf] }
  0x1f   : > { %1029 = vmatpush.bf16.msra.mxu2 %v1986_v14  ;;  %v1598_v25 = vld [vmem:[%s2007_s8 + $0x144] sm:$0xf0]  ;;  %v1508_v26 = vld [vmem:[%s2007_s8 + $0x80] sm:$0xf]  ;;  %v1745_v27 = vld [vmem:[%s2007_s8 + $0x88] sm:$0xf0] }
  0x20   : > { %v1601_v29 = vor.u32 %v1767_v24, %v1598_v25  ;;  %v1509_v31 = vor.u32 %v1745_v27, %v1508_v26  ;;  %v1610_v36 = vld [vmem:[%s2007_s8 + $0x15c] sm:$0xf0]  ;;  %v1520_v38 = vld [vmem:[%s2007_s8 + $0x98] sm:$0xf]  ;;  %v1748_v39 = vld [vmem:[%s2007_s8 + $0xa0] sm:$0xf0] }
  0x21   : > { %852 = vmatpush.bf16.msra.mxu0 %v1778_v15  ;;  %1805 = vmatpush.bf16.msra.mxu3 %v1778_v15  ;;  %v1742_v15 = vld [vmem:[%s2007_s8 + $0x70] sm:$0xf0]  ;;  %v1514_v37 = vld [vmem:[%s2007_s8 + $0x9c] sm:$0xf0]  ;;  %v1521_v43 = vor.u32 %v1748_v39, %v1520_v38  ;;  %v1622_v48 = vld [vmem:[%s2007_s8 + $0x174] sm:$0xf0] }
  0x22   : > { %941 = vmatpush.bf16.msra.mxu1 %v1786_v16  ;;  %v1526_v49 = vld [vmem:[%s2007_s8 + $0xb4] sm:$0xf0]  ;;  %v1532_v50 = vld [vmem:[%s2007_s8 + $0xb0] sm:$0xf]  ;;  %v1751_v51 = vld [vmem:[%s2007_s8 + $0xb8] sm:$0xf0] }
  0x23   : > { %1030 = vmatpush.bf16.msra.mxu2 %v1999_v17  ;;  %v1533_v55 = vor.u32 %v1751_v51, %v1532_v50  ;;  %v1760_v50 = vld [vmem:[%s2007_s8 + $0x100] sm:$0xf0] }
  0x25   : > { %853 = vmatpush.bf16.msra.mxu0 %v1777_v18  ;;  %1806 = vmatpush.bf16.msra.mxu3 %v1777_v18 }
  0x26   : > { %942 = vmatpush.bf16.msra.mxu1 %v1785_v19 }
  0x27   : > { %1031 = vmatpush.bf16.msra.mxu2 %v2016_v20 }
  0x29   : > { %854 = vmatpush.bf16.msra.mxu0 %v1776_v21  ;;  %1807 = vmatpush.bf16.msra.mxu3 %v1776_v21  ;;  %v1744_v21 = vld [vmem:[%s2007_s8 + $0x80] sm:$0xf0] }
  0x2a   : > { %943 = vmatpush.bf16.msra.mxu1 %v1784_v22 }
  0x2b   : > { %1032 = vmatpush.bf16.msra.mxu2 %v2027_v23 }
  0x2c   : > { %855 = vmatmul.bf16.vlgmr.msra.gmra.mxu0 %v1441_v32  ;;  %915 = vmatmul.bf16.vlgmr.msra.gmra.mxu3 %v1585_v33  ;;  %v1512_v32 = vld [vmem:[%s2007_s8 + $0x90] sm:$0xf]  ;;  %v1747_v33 = vld [vmem:[%s2007_s8 + $0x98] sm:$0xf0] }
  0x2d   : > { %1808 = vmatpush.bf16.msrb.mxu3 %v1920_v1  ;;  %944 = vmatmul.bf16.vlgmr.msra.gmra.mxu1 %v1445_v34  ;;  %v1478_v1 = vld [vmem:[%s2007_s8 + $0x54] sm:$0xf0]  ;;  %v1746_v34 = vld [vmem:[%s2007_s8 + $0x94] sm:$0xf]  ;;  %v1513_v40 = vor.u32 %v1747_v33, %v1512_v32 }
  0x2e   : > { %1033 = vmatmul.bf16.vlgmr.msra.gmra.mxu2 %v1449_v35  ;;  %v1481_v6 = vor.u32 %v1737_v0, %v1478_v1  ;;  %v1770_v35 = vld [vmem:[%s2007_s8 + $0x154] sm:$0xf]  ;;  %v1517_v42 = vor.u32 %v1746_v34, %v1514_v37 }
  0x2f   : > { %v1613_v41 = vor.u32 %v1770_v35, %v1610_v36 }
  0x31   : > { %1809 = vmatpush.bf16.msrb.mxu3 %v1935_v4  ;;  %v1477_v4 = vor.u32 %v1738_v61, %v1476_v60  ;;  %v1766_v60 = vld [vmem:[%s2007_s8 + $0x130] sm:$0xf0]  ;;  %v1538_v61 = vld [vmem:[%s2007_s8 + $0xcc] sm:$0xf0] }
  0x35   : > { %1810 = vmatpush.bf16.msrb.mxu3 %v1950_v7 }
  0x39   : > { %1811 = vmatpush.bf16.msrb.mxu3 %v1966_v10  ;;  %v1740_v10 = vld [vmem:[%s2007_s8 + $0x64] sm:$0xf] }
  0x3c   : > { %860 = vmatmul.bf16.gmra.mxu0 %v1453_v44  ;;  %920 = vmatmul.bf16.gmra.mxu3 %v1597_v45  ;;  %v1524_v44 = vld [vmem:[%s2007_s8 + $0xa8] sm:$0xf]  ;;  %v1750_v45 = vld [vmem:[%s2007_s8 + $0xb0] sm:$0xf0] }
  0x3d   : > { %1812 = vmatpush.bf16.msrb.mxu3 %v1787_v13  ;;  %949 = vmatmul.bf16.gmra.mxu1 %v1457_v46  ;;  %v1490_v13 = vld [vmem:[%s2007_s8 + $0x6c] sm:$0xf0]  ;;  %v1749_v46 = vld [vmem:[%s2007_s8 + $0xac] sm:$0xf]  ;;  %v1525_v52 = vor.u32 %v1750_v45, %v1524_v44  ;;  %v1758_v44 = vld [vmem:[%s2007_s8 + $0xf4] sm:$0xf] }
  0x3e   : > { %1038 = vmatmul.bf16.gmra.mxu2 %v1461_v47  ;;  %v1493_v18 = vor.u32 %v1740_v10, %v1490_v13  ;;  %v1773_v47 = vld [vmem:[%s2007_s8 + $0x16c] sm:$0xf]  ;;  %v1529_v54 = vor.u32 %v1749_v46, %v1526_v49  ;;  %v1616_v46 = vld [vmem:[%s2007_s8 + $0x158] sm:$0xf] }
  0x3f   : > { %v1625_v53 = vor.u32 %v1773_v47, %v1622_v48  ;;  %v1772_v47 = vld [vmem:[%s2007_s8 + $0x160] sm:$0xf0]  ;;  %v1562_v48 = vld [vmem:[%s2007_s8 + $0xfc] sm:$0xf0]  ;;  %v1568_v49 = vld [vmem:[%s2007_s8 + $0xf8] sm:$0xf] }
  0x41   : > { %1813 = vmatpush.bf16.msrb.mxu3 %v1786_v16 }
  0x45   : > { %1814 = vmatpush.bf16.msrb.mxu3 %v1785_v19 }
  0x49   : > { %1815 = vmatpush.bf16.msrb.mxu3 %v1784_v22  ;;  %v1743_v22 = vld [vmem:[%s2007_s8 + $0x7c] sm:$0xf] }
  0x4c   : > { %865 = vmatmul.bf16.gmra.mxu0 %v1465_v56  ;;  %925 = vmatmul.bf16.gmra.mxu3 %v1609_v57  ;;  %v1536_v56 = vld [vmem:[%s2007_s8 + $0xc0] sm:$0xf]  ;;  %v1753_v57 = vld [vmem:[%s2007_s8 + $0xc8] sm:$0xf0] }
  0x4d   : > { %1816 = vmatpush.bf16.msra.mxu3 %v1925_v2  ;;  %954 = vmatmul.bf16.gmra.mxu1 %v1469_v58  ;;  %v1484_v2 = vld [vmem:[%s2007_s8 + $0x50] sm:$0xf]  ;;  %v1752_v58 = vld [vmem:[%s2007_s8 + $0xc4] sm:$0xf]  ;;  %v1537_v0 = vor.u32 %v1753_v57, %v1536_v56 }
  0x4e   : > { %1043 = vmatmul.bf16.gmra.mxu2 %v1473_v59  ;;  %v1485_v7 = vor.u32 %v1739_v3, %v1484_v2  ;;  %v1592_v59 = vld [vmem:[%s2007_s8 + $0x128] sm:$0xf]  ;;  %v1541_v3 = vor.u32 %v1752_v58, %v1538_v61  ;;  %v1565_v58 = vor.u32 %v1758_v44, %v1562_v48 }
  0x4f   : > { %v1593_v1 = vor.u32 %v1766_v60, %v1592_v59  ;;  %v1569_v59 = vor.u32 %v1760_v50, %v1568_v49 }
  0x51   : > { %1817 = vmatpush.bf16.msra.mxu3 %v1940_v5  ;;  %v1621_v5 = vor.u32 %v1774_v63, %v1620_v62  ;;  %v1544_v62 = vld [vmem:[%s2007_s8 + $0xc8] sm:$0xf]  ;;  %v1754_v63 = vld [vmem:[%s2007_s8 + $0xd0] sm:$0xf0] }
  0x55   : > { %1818 = vmatpush.bf16.msra.mxu3 %v1955_v8  ;;  %v1488_v8 = vld [vmem:[%s2007_s8 + $0x60] sm:$0xf] }
  0x56   : > { %v1489_v16 = vor.u32 %v1741_v9, %v1488_v8  ;;  %v2120_v8 = vld [vmem:[%s2273_s2] ss:$0 sm:$0xff] }
  0x59   : > { %1819 = vmatpush.bf16.msra.mxu3 %v1971_v11  ;;  %v1764_v11 = vld [vmem:[%s2007_s8 + $0x124] sm:$0xf] }
  0x5c   : > { %870 = vmatmul.bf16.gmra.mxu0 %v1477_v4  ;;  %930 = vmatmul.bf16.gmra.mxu3 %v1621_v5  ;;  %v1545_v4 = vor.u32 %v1754_v63, %v1544_v62 }
  0x5d   : > { %1820 = vmatpush.bf16.msra.mxu3 %v1986_v14  ;;  %959 = vmatmul.bf16.gmra.mxu1 %v1481_v6  ;;  %v1496_v14 = vld [vmem:[%s2007_s8 + $0x68] sm:$0xf] }
  0x5e   : > { %1048 = vmatmul.bf16.gmra.mxu2 %v1485_v7  ;;  %v1497_v19 = vor.u32 %v1742_v15, %v1496_v14  ;;  %v1548_v14 = vld [vmem:[%s2007_s8 + $0xd8] sm:$0xf]  ;;  %v1756_v15 = vld [vmem:[%s2007_s8 + $0xe0] sm:$0xf0] }
  0x5f   : > { %v1549_v26 = vor.u32 %v1756_v15, %v1548_v14  ;;  %v1574_v14 = vld [vmem:[%s2007_s8 + $0x114] sm:$0xf0]  ;;  %v1580_v15 = vld [vmem:[%s2007_s8 + $0x110] sm:$0xf] }
  0x61   : > { %1821 = vmatpush.bf16.msra.mxu3 %v1999_v17  ;;  %v1589_v17 = vor.u32 %v1764_v11, %v1586_v12 }
  0x65   : > { %1822 = vmatpush.bf16.msra.mxu3 %v2016_v20  ;;  %v1500_v20 = vld [vmem:[%s2007_s8 + $0x78] sm:$0xf] }
  0x66   : > { %v1501_v28 = vor.u32 %v1744_v21, %v1500_v20  ;;  %v1550_v20 = vld [vmem:[%s2007_s8 + $0xe4] sm:$0xf0]  ;;  %v1556_v21 = vld [vmem:[%s2007_s8 + $0xe0] sm:$0xf] }
  0x69   : > { %1823 = vmatpush.bf16.msra.mxu3 %v2027_v23  ;;  %v1502_v23 = vld [vmem:[%s2007_s8 + $0x84] sm:$0xf0] }
  0x6a   : > { %v1505_v30 = vor.u32 %v1743_v22, %v1502_v23  ;;  %v1757_v22 = vld [vmem:[%s2007_s8 + $0xe8] sm:$0xf0] }
  0x6c   : > { %875 = vmatmul.bf16.gmra.mxu0 %v1489_v16  ;;  %1004 = vmatmul.bf16.vlgmr.msrb.gmra.mxu3 %v1589_v17  ;;  %v1755_v16 = vld [vmem:[%s2007_s8 + $0xdc] sm:$0xf] }
  0x6d   : > { %964 = vmatmul.bf16.gmra.mxu1 %v1493_v18  ;;  %v1604_v18 = vld [vmem:[%s2007_s8 + $0x140] sm:$0xf] }
  0x6e   : > { %1053 = vmatmul.bf16.gmra.mxu2 %v1497_v19  ;;  %v1769_v19 = vld [vmem:[%s2007_s8 + $0x148] sm:$0xf0] }
  0x6f   : > { %v1605_v27 = vor.u32 %v1769_v19, %v1604_v18 }
  0x7c   : > { %880 = vmatmul.bf16.gmra.mxu0 %v1501_v28  ;;  %1009 = vmatmul.bf16.gmra.mxu3 %v1601_v29 }
  0x7d   : > { %969 = vmatmul.bf16.gmra.mxu1 %v1505_v30  ;;  %v1553_v30 = vor.u32 %v1755_v16, %v1550_v20  ;;  %v1763_v16 = vld [vmem:[%s2007_s8 + $0x118] sm:$0xf0] }
  0x7e   : > { %1058 = vmatmul.bf16.gmra.mxu2 %v1509_v31  ;;  %v1557_v31 = vor.u32 %v1757_v22, %v1556_v21 }
  0x8c   : > { %885 = vmatmul.bf16.gmra.mxu0 %v1513_v40  ;;  %1014 = vmatmul.bf16.gmra.mxu3 %v1613_v41 }
  0x8d   : > { %974 = vmatmul.bf16.gmra.mxu1 %v1517_v42  ;;  %v1560_v42 = vld [vmem:[%s2007_s8 + $0xf0] sm:$0xf] }
  0x8e   : > { %1063 = vmatmul.bf16.gmra.mxu2 %v1521_v43  ;;  %v1759_v43 = vld [vmem:[%s2007_s8 + $0xf8] sm:$0xf0] }
  0x9c   : > { %890 = vmatmul.bf16.gmra.mxu0 %v1525_v52  ;;  %1019 = vmatmul.bf16.gmra.mxu3 %v1625_v53 }
  0x9d   : > { %979 = vmatmul.bf16.gmra.mxu1 %v1529_v54  ;;  %v1561_v54 = vor.u32 %v1759_v43, %v1560_v42 }
  0x9e   : > { %1068 = vmatmul.bf16.gmra.mxu2 %v1533_v55  ;;  %v1617_v55 = vor.u32 %v1772_v47, %v1616_v46 }
  0xa9   : > { %v856_v2 = vpop.f32.mrf.mxu0 }
  0xaa   : > { %v945_v5 = vpop.f32.mrf.mxu1 }
  0xab   : > { %v946_v6 = vadd.f32 %v945_v5, %v856_v2 }
  0xac   : > { %895 = vmatmul.bf16.gmra.mxu0 %v1537_v0  ;;  %1093 = vmatmul.bf16.vlgmr.msra.gmra.mxu3 %v1593_v1 }
  0xad   : > { %984 = vmatmul.bf16.gmra.mxu1 %v1541_v3 }
  0xae   : > { %1073 = vmatmul.bf16.gmra.mxu2 %v1545_v4 }
  0xaf   : > { %v2115_v7 = vpop.f32.mrf.mxu3 }
  0xb1   : > { %v1034_v9 = vpop.f32.mrf.mxu2  ;;  %v858_v11 = vpop.f32.mrf.mxu0 }
  0xb2   : > { %v1035_v10 = vadd.f32 %v1034_v9, %v946_v6  ;;  %v947_v12 = vpop.f32.mrf.mxu1  ;;  %v1572_v6 = vld [vmem:[%s2007_s8 + $0x108] sm:$0xf]  ;;  %v1762_v9 = vld [vmem:[%s2007_s8 + $0x110] sm:$0xf0] }
  0xb3   : > { %v948_v24 = vadd.f32 %v947_v12, %v858_v11  ;;  %v1628_v12 = vld [vmem:[%s2007_s8 + $0x170] sm:$0xf]  ;;  %v1573_v20 = vor.u32 %v1762_v9, %v1572_v6 }
  0xb4   : > { %v1217_v13 = vadd.f32 %v2120_v8, %v1035_v10  ;;  %v1761_v10 = vld [vmem:[%s2007_s8 + $0x10c] sm:$0xf] }
  0xb6   : > { %v1249_v17 = vmax.f32 %v1217_v13, 0.0  ;;  %v1775_v13 = vld [vmem:[%s2007_s8 + $0x178] sm:$0xf0] }
  0xb7   : > { %v2138_v25 = vpop.f32.mrf.mxu3  ;;  %v1629_v21 = vor.u32 %v1775_v13, %v1628_v12 }
  0xb8   : > { %1281 = vst [vmem:[%s2127_s27] sm:$0xff] %v1249_v17 }
  0xb9   : > { %v1036_v23 = vpop.f32.mrf.mxu2  ;;  %v861_v29 = vpop.f32.mrf.mxu0 }
  0xba   : > { %v1037_v28 = vadd.f32 %v1036_v23, %v948_v24  ;;  %v950_v32 = vpop.f32.mrf.mxu1  ;;  %v1577_v23 = vor.u32 %v1761_v10, %v1574_v14 }
  0xbb   : > { %v951_v35 = vadd.f32 %v950_v32, %v861_v29 }
  0xbc   : > { %v1218_v33 = vadd.f32 %v2120_v8, %v1037_v28  ;;  %900 = vmatmul.bf16.gmra.mxu0 %v1549_v26  ;;  %1098 = vmatmul.bf16.gmra.mxu3 %v1605_v27  ;;  %v1581_v26 = vor.u32 %v1763_v16, %v1580_v15 }
  0xbd   : > { %989 = vmatmul.bf16.gmra.mxu1 %v1553_v30 }
  0xbe   : > { %v1250_v34 = vmax.f32 %v1218_v33, 0.0  ;;  %1078 = vmatmul.bf16.gmra.mxu2 %v1557_v31 }
  0xbf   : > { %v2142_v36 = vpop.f32.mrf.mxu3 }
  0xc0   : > { %1282 = vst [vmem:[%s2127_s27 + $0x8] sm:$0xff] %v1250_v34 }
  0xc1   : > { %v1039_v37 = vpop.f32.mrf.mxu2  ;;  %v863_v39 = vpop.f32.mrf.mxu0 }
  0xc2   : > { %v1040_v38 = vadd.f32 %v1039_v37, %v951_v35  ;;  %v952_v40 = vpop.f32.mrf.mxu1 }
  0xc3   : > { %v953_v51 = vadd.f32 %v952_v40, %v863_v39 }
  0xc4   : > { %v1219_v41 = vadd.f32 %v2120_v8, %v1040_v38 }
  0xc6   : > { %v1251_v45 = vmax.f32 %v1219_v41, 0.0 }
  0xc7   : > { %v2154_v52 = vpop.f32.mrf.mxu3 }
  0xc8   : > { %1283 = vst [vmem:[%s2127_s27 + $0x10] sm:$0xff] %v1251_v45 }
  0xc9   : > { %v1041_v53 = vpop.f32.mrf.mxu2  ;;  %v866_v57 = vpop.f32.mrf.mxu0 }
  0xca   : > { %v1042_v56 = vadd.f32 %v1041_v53, %v953_v51  ;;  %v955_v60 = vpop.f32.mrf.mxu1 }
  0xcb   : > { %v956_v63 = vadd.f32 %v955_v60, %v866_v57 }
  0xcc   : > { %v1220_v61 = vadd.f32 %v2120_v8, %v1042_v56  ;;  %905 = vmatmul.bf16.gmra.mxu0 %v1561_v54  ;;  %1103 = vmatmul.bf16.gmra.mxu3 %v1617_v55 }
  0xcd   : > { %994 = vmatmul.bf16.gmra.mxu1 %v1565_v58 }
  0xce   : > { %v1252_v62 = vmax.f32 %v1220_v61, 0.0  ;;  %1083 = vmatmul.bf16.gmra.mxu2 %v1569_v59 }
  0xcf   : > { %v2158_v0 = vpop.f32.mrf.mxu3 }
  0xd0   : > { %1284 = vst [vmem:[%s2127_s27 + $0x18] sm:$0xff] %v1252_v62 }
  0xd1   : > { %v1044_v1 = vpop.f32.mrf.mxu2  ;;  %v868_v3 = vpop.f32.mrf.mxu0 }
  0xd2   : > { %v1045_v2 = vadd.f32 %v1044_v1, %v956_v63  ;;  %v957_v4 = vpop.f32.mrf.mxu1 }
  0xd3   : > { %v958_v17 = vadd.f32 %v957_v4, %v868_v3 }
  0xd4   : > { %v1221_v5 = vadd.f32 %v2120_v8, %v1045_v2 }
  0xd6   : > { %v1253_v11 = vmax.f32 %v1221_v5, 0.0 }
  0xd7   : > { %v2170_v18 = vpop.f32.mrf.mxu3 }
  0xd8   : > { %1285 = vst [vmem:[%s2127_s27 + $0x20] sm:$0xff] %v1253_v11 }
  0xd9   : > { %v1046_v19 = vpop.f32.mrf.mxu2  ;;  %v871_v24 = vpop.f32.mrf.mxu0 }
  0xda   : > { %v1047_v22 = vadd.f32 %v1046_v19, %v958_v17  ;;  %v960_v27 = vpop.f32.mrf.mxu1 }
  0xdb   : > { %v961_v30 = vadd.f32 %v960_v27, %v871_v24 }
  0xdc   : > { %v1222_v28 = vadd.f32 %v2120_v8, %v1047_v22  ;;  %910 = vmatmul.bf16.gmra.mxu0 %v1573_v20  ;;  %1108 = vmatmul.bf16.gmra.mxu3 %v1629_v21 }
  0xdd   : > { %999 = vmatmul.bf16.gmra.mxu1 %v1577_v23 }
  0xde   : > { %v1254_v29 = vmax.f32 %v1222_v28, 0.0  ;;  %1088 = vmatmul.bf16.gmra.mxu2 %v1581_v26 }
  0xdf   : > { %v2174_v31 = vpop.f32.mrf.mxu3 }
  0xe0   : > { %1286 = vst [vmem:[%s2127_s27 + $0x28] sm:$0xff] %v1254_v29 }
  0xe1   : > { %v1049_v32 = vpop.f32.mrf.mxu2  ;;  %v873_v34 = vpop.f32.mrf.mxu0 }
  0xe2   : > { %v1050_v33 = vadd.f32 %v1049_v32, %v961_v30  ;;  %v962_v35 = vpop.f32.mrf.mxu1 }
  0xe3   : > { %v963_v39 = vadd.f32 %v962_v35, %v873_v34 }
  0xe4   : > { %v1223_v37 = vadd.f32 %v2120_v8, %v1050_v33 }
  0xe6   : > { %v1255_v38 = vmax.f32 %v1223_v37, 0.0 }
  0xe7   : > { %v2178_v40 = vpop.f32.mrf.mxu3 }
  0xe8   : > { %1287 = vst [vmem:[%s2127_s27 + $0x30] sm:$0xff] %v1255_v38 }
  0xe9   : > { %v1051_v41 = vpop.f32.mrf.mxu2  ;;  %v876_v43 = vpop.f32.mrf.mxu0 }
  0xea   : > { %v1052_v42 = vadd.f32 %v1051_v41, %v963_v39  ;;  %v965_v44 = vpop.f32.mrf.mxu1 }
  0xeb   : > { %v966_v47 = vadd.f32 %v965_v44, %v876_v43 }
  0xec   : > { %v1224_v45 = vadd.f32 %v2120_v8, %v1052_v42 }
  0xee   : > { %v1256_v46 = vmax.f32 %v1224_v45, 0.0 }
  0xef   : > { %v2182_v48 = vpop.f32.mrf.mxu3 }
  0xf0   : > { %1288 = vst [vmem:[%s2127_s27 + $0x38] sm:$0xff] %v1256_v46 }
  0xf1   : > { %v1054_v49 = vpop.f32.mrf.mxu2  ;;  %v878_v51 = vpop.f32.mrf.mxu0 }
  0xf2   : > { %v1055_v50 = vadd.f32 %v1054_v49, %v966_v47  ;;  %v967_v53 = vpop.f32.mrf.mxu1 }
  0xf3   : > { %v968_v56 = vadd.f32 %v967_v53, %v878_v51 }
  0xf4   : > { %v1225_v54 = vadd.f32 %v2120_v8, %v1055_v50 }
  0xf6   : > { %v1257_v55 = vmax.f32 %v1225_v54, 0.0 }
  0xf7   : > { %v2186_v57 = vpop.f32.mrf.mxu3 }
  0xf8   : > { %1289 = vst [vmem:[%s2127_s27 + $0x40] sm:$0xff] %v1257_v55 }
  0xf9   : > { %v1056_v58 = vpop.f32.mrf.mxu2  ;;  %v881_v60 = vpop.f32.mrf.mxu0 }
  0xfa   : > { %v1057_v59 = vadd.f32 %v1056_v58, %v968_v56  ;;  %v970_v61 = vpop.f32.mrf.mxu1 }
  0xfb   : > { %v971_v1 = vadd.f32 %v970_v61, %v881_v60  ;;  %v1006_v60 = vadd.f32 %v2182_v48, %v2115_v7 }
  0xfc   : > { %v1226_v62 = vadd.f32 %v2120_v8, %v1057_v59 }
  0xfe   : > { %v1258_v63 = vmax.f32 %v1226_v62, 0.0 }
  0xff   : > { %v2190_v2 = vpop.f32.mrf.mxu3 }
 0x100   : > { %1290 = vst [vmem:[%s2127_s27 + $0x48] sm:$0xff] %v1258_v63 }
 0x101   : > { %v1059_v3 = vpop.f32.mrf.mxu2  ;;  %v883_v5 = vpop.f32.mrf.mxu0 }
 0x102   : > { %v1060_v4 = vadd.f32 %v1059_v3, %v971_v1  ;;  %v972_v6 = vpop.f32.mrf.mxu1 }
 0x103   : > { %v973_v11 = vadd.f32 %v972_v6, %v883_v5 }
 0x104   : > { %v1227_v9 = vadd.f32 %v2120_v8, %v1060_v4 }
 0x106   : > { %v1259_v10 = vmax.f32 %v1227_v9, 0.0 }
 0x107   : > { %v2194_v12 = vpop.f32.mrf.mxu3 }
 0x108   : > { %1291 = vst [vmem:[%s2127_s27 + $0x50] sm:$0xff] %v1259_v10 }
 0x109   : > { %v1061_v13 = vpop.f32.mrf.mxu2  ;;  %v886_v15 = vpop.f32.mrf.mxu0 }
 0x10a   : > { %v1062_v14 = vadd.f32 %v1061_v13, %v973_v11  ;;  %v975_v16 = vpop.f32.mrf.mxu1  ;;  %v1008_v11 = vadd.f32 %v2186_v57, %v2138_v25  ;;  %v1011_v25 = vadd.f32 %v2190_v2, %v2142_v36 }
 0x10b   : > { %v976_v20 = vadd.f32 %v975_v16, %v886_v15 }
 0x10c   : > { %v1228_v17 = vadd.f32 %v2120_v8, %v1062_v14 }
 0x10e   : > { %v1260_v19 = vmax.f32 %v1228_v17, 0.0 }
 0x10f   : > { %v2198_v21 = vpop.f32.mrf.mxu3 }
 0x110   : > { %1292 = vst [vmem:[%s2127_s27 + $0x58] sm:$0xff] %v1260_v19 }
 0x111   : > { %v1064_v22 = vpop.f32.mrf.mxu2  ;;  %v888_v23 = vpop.f32.mrf.mxu0 }
 0x112   : > { %v1065_v24 = vadd.f32 %v1064_v22, %v976_v20  ;;  %v977_v26 = vpop.f32.mrf.mxu1 }
 0x113   : > { %v978_v29 = vadd.f32 %v977_v26, %v888_v23 }
 0x114   : > { %v1229_v27 = vadd.f32 %v2120_v8, %v1065_v24 }
 0x116   : > { %v1261_v28 = vmax.f32 %v1229_v27, 0.0 }
 0x117   : > { %v2202_v30 = vpop.f32.mrf.mxu3 }
 0x118   : > { %1293 = vst [vmem:[%s2127_s27 + $0x60] sm:$0xff] %v1261_v28 }
 0x119   : > { %v1066_v32 = vpop.f32.mrf.mxu2  ;;  %v891_v34 = vpop.f32.mrf.mxu0 }
 0x11a   : > { %v1067_v33 = vadd.f32 %v1066_v32, %v978_v29  ;;  %v980_v35 = vpop.f32.mrf.mxu1 }
 0x11b   : > { %v981_v39 = vadd.f32 %v980_v35, %v891_v34 }
 0x11c   : > { %v1230_v37 = vadd.f32 %v2120_v8, %v1067_v33 }
 0x11e   : > { %v1262_v38 = vmax.f32 %v1230_v37, 0.0 }
 0x11f   : > { %v2206_v41 = vpop.f32.mrf.mxu3 }
 0x120   : > { %1294 = vst [vmem:[%s2127_s27 + $0x68] sm:$0xff] %v1262_v38  ;;  %v1013_v38 = vadd.f32 %v2194_v12, %v2154_v52  ;;  %v1016_v52 = vadd.f32 %v2198_v21, %v2158_v0 }
 0x121   : > { %v1069_v42 = vpop.f32.mrf.mxu2  ;;  %v893_v44 = vpop.f32.mrf.mxu0 }
 0x122   : > { %v1070_v43 = vadd.f32 %v1069_v42, %v981_v39  ;;  %v982_v45 = vpop.f32.mrf.mxu1 }
 0x123   : > { %v983_v49 = vadd.f32 %v982_v45, %v893_v44 }
 0x124   : > { %v1231_v46 = vadd.f32 %v2120_v8, %v1070_v43 }
 0x126   : > { %v1263_v47 = vmax.f32 %v1231_v46, 0.0 }
 0x127   : > { %v2210_v50 = vpop.f32.mrf.mxu3 }
 0x128   : > { %1295 = vst [vmem:[%s2127_s27 + $0x70] sm:$0xff] %v1263_v47 }
 0x129   : > { %v1071_v51 = vpop.f32.mrf.mxu2  ;;  %v896_v54 = vpop.f32.mrf.mxu0 }
 0x12a   : > { %v1072_v53 = vadd.f32 %v1071_v51, %v983_v49  ;;  %v985_v55 = vpop.f32.mrf.mxu1 }
 0x12b   : > { %v986_v59 = vadd.f32 %v985_v55, %v896_v54 }
 0x12c   : > { %v1232_v56 = vadd.f32 %v2120_v8, %v1072_v53 }
 0x12e   : > { %v1264_v58 = vmax.f32 %v1232_v56, 0.0 }
 0x12f   : > { %v1094_v61 = vpop.f32.mrf.mxu3 }
 0x130   : > { %1296 = vst [vmem:[%s2127_s27 + $0x78] sm:$0xff] %v1264_v58  ;;  %v1095_v63 = vadd.f32 %v1094_v61, %v1006_v60 }
 0x131   : > { %v1074_v62 = vpop.f32.mrf.mxu2  ;;  %v898_v3 = vpop.f32.mrf.mxu0 }
 0x132   : > { %v1075_v1 = vadd.f32 %v1074_v62, %v986_v59  ;;  %v1241_v4 = vadd.f32 %v2120_v8, %v1095_v63  ;;  %v987_v5 = vpop.f32.mrf.mxu1 }
 0x133   : > { %v988_v7 = vadd.f32 %v987_v5, %v898_v3 }
 0x134   : > { %v1233_v6 = vadd.f32 %v2120_v8, %v1075_v1  ;;  %v1273_v9 = vmax.f32 %v1241_v4, 0.0  ;;  %v1018_v1 = vadd.f32 %v2202_v30, %v2170_v18  ;;  %v1021_v18 = vadd.f32 %v2206_v41, %v2174_v31 }
 0x136   : > { %v1265_v10 = vmax.f32 %v1233_v6, 0.0  ;;  %1305 = vst [vmem:[%s2127_s27 + $0xc0] sm:$0xff] %v1273_v9 }
 0x137   : > { %v1096_v48 = vpop.f32.mrf.mxu3 }
 0x138   : > { %1297 = vst [vmem:[%s2127_s27 + $0x80] sm:$0xff] %v1265_v10  ;;  %v1097_v14 = vadd.f32 %v1096_v48, %v1008_v11 }
 0x139   : > { %v1076_v13 = vpop.f32.mrf.mxu2  ;;  %v901_v16 = vpop.f32.mrf.mxu0 }
 0x13a   : > { %v1077_v15 = vadd.f32 %v1076_v13, %v988_v7  ;;  %v1242_v17 = vadd.f32 %v2120_v8, %v1097_v14  ;;  %v990_v19 = vpop.f32.mrf.mxu1 }
 0x13b   : > { %v991_v23 = vadd.f32 %v990_v19, %v901_v16 }
 0x13c   : > { %v1234_v20 = vadd.f32 %v2120_v8, %v1077_v15  ;;  %v1274_v22 = vmax.f32 %v1242_v17, 0.0 }
 0x13e   : > { %v1266_v24 = vmax.f32 %v1234_v20, 0.0  ;;  %1306 = vst [vmem:[%s2127_s27 + $0xc8] sm:$0xff] %v1274_v22 }
 0x13f   : > { %v1099_v57 = vpop.f32.mrf.mxu3 }
 0x140   : > { %1298 = vst [vmem:[%s2127_s27 + $0x88] sm:$0xff] %v1266_v24  ;;  %v1100_v27 = vadd.f32 %v1099_v57, %v1011_v25  ;;  %v1023_v25 = vadd.f32 %v2210_v50, %v2178_v40 }
 0x141   : > { %v1079_v26 = vpop.f32.mrf.mxu2  ;;  %v903_v29 = vpop.f32.mrf.mxu0 }
 0x142   : > { %v1080_v28 = vadd.f32 %v1079_v26, %v991_v23  ;;  %v1243_v32 = vadd.f32 %v2120_v8, %v1100_v27  ;;  %v992_v33 = vpop.f32.mrf.mxu1 }
 0x143   : > { %v993_v36 = vadd.f32 %v992_v33, %v903_v29 }
 0x144   : > { %v1235_v34 = vadd.f32 %v2120_v8, %v1080_v28  ;;  %v1275_v35 = vmax.f32 %v1243_v32, 0.0 }
 0x146   : > { %v1267_v37 = vmax.f32 %v1235_v34, 0.0  ;;  %1307 = vst [vmem:[%s2127_s27 + $0xd0] sm:$0xff] %v1275_v35 }
 0x147   : > { %v1101_v2 = vpop.f32.mrf.mxu3 }
 0x148   : > { %1299 = vst [vmem:[%s2127_s27 + $0x90] sm:$0xff] %v1267_v37  ;;  %v1102_v42 = vadd.f32 %v1101_v2, %v1013_v38 }
 0x149   : > { %v1081_v39 = vpop.f32.mrf.mxu2  ;;  %v906_v44 = vpop.f32.mrf.mxu0 }
 0x14a   : > { %v1082_v43 = vadd.f32 %v1081_v39, %v993_v36  ;;  %v1244_v45 = vadd.f32 %v2120_v8, %v1102_v42  ;;  %v995_v46 = vpop.f32.mrf.mxu1 }
 0x14b   : > { %v996_v53 = vadd.f32 %v995_v46, %v906_v44 }
 0x14c   : > { %v1236_v47 = vadd.f32 %v2120_v8, %v1082_v43  ;;  %v1276_v49 = vmax.f32 %v1244_v45, 0.0 }
 0x14e   : > { %v1268_v51 = vmax.f32 %v1236_v47, 0.0  ;;  %1308 = vst [vmem:[%s2127_s27 + $0xd8] sm:$0xff] %v1276_v49 }
 0x14f   : > { %v1104_v12 = vpop.f32.mrf.mxu3 }
 0x150   : > { %1300 = vst [vmem:[%s2127_s27 + $0x98] sm:$0xff] %v1268_v51  ;;  %v1105_v55 = vadd.f32 %v1104_v12, %v1016_v52 }
 0x151   : > { %v1084_v54 = vpop.f32.mrf.mxu2  ;;  %v908_v58 = vpop.f32.mrf.mxu0 }
 0x152   : > { %v1085_v56 = vadd.f32 %v1084_v54, %v996_v53  ;;  %v1245_v59 = vadd.f32 %v2120_v8, %v1105_v55  ;;  %v997_v60 = vpop.f32.mrf.mxu1 }
 0x153   : > { %v998_v0 = vadd.f32 %v997_v60, %v908_v58 }
 0x154   : > { %v1237_v61 = vadd.f32 %v2120_v8, %v1085_v56  ;;  %v1277_v62 = vmax.f32 %v1245_v59, 0.0 }
 0x156   : > { %v1269_v63 = vmax.f32 %v1237_v61, 0.0  ;;  %1309 = vst [vmem:[%s2127_s27 + $0xe0] sm:$0xff] %v1277_v62 }
 0x157   : > { %v1106_v21 = vpop.f32.mrf.mxu3 }
 0x158   : > { %1301 = vst [vmem:[%s2127_s27 + $0xa0] sm:$0xff] %v1269_v63  ;;  %v1107_v4 = vadd.f32 %v1106_v21, %v1018_v1 }
 0x159   : > { %v1086_v3 = vpop.f32.mrf.mxu2  ;;  %v911_v9 = vpop.f32.mrf.mxu0 }
 0x15a   : > { %v1087_v5 = vadd.f32 %v1086_v3, %v998_v0  ;;  %v1246_v6 = vadd.f32 %v2120_v8, %v1107_v4  ;;  %v1000_v10 = vpop.f32.mrf.mxu1 }
 0x15b   : > { %v1001_v13 = vadd.f32 %v1000_v10, %v911_v9 }
 0x15c   : > { %v1238_v11 = vadd.f32 %v2120_v8, %v1087_v5  ;;  %v1278_v7 = vmax.f32 %v1246_v6, 0.0 }
 0x15e   : > { %v1270_v48 = vmax.f32 %v1238_v11, 0.0  ;;  %1310 = vst [vmem:[%s2127_s27 + $0xe8] sm:$0xff] %v1278_v7 }
 0x15f   : > { %v1109_v30 = vpop.f32.mrf.mxu3 }
 0x160   : > { %1302 = vst [vmem:[%s2127_s27 + $0xa8] sm:$0xff] %v1270_v48  ;;  %v1110_v15 = vadd.f32 %v1109_v30, %v1021_v18 }
 0x161   : > { %v1089_v14 = vpop.f32.mrf.mxu2  ;;  %v913_v22 = vpop.f32.mrf.mxu0 }
 0x162   : > { %v1090_v16 = vadd.f32 %v1089_v14, %v1001_v13  ;;  %v1247_v17 = vadd.f32 %v2120_v8, %v1110_v15  ;;  %v1002_v24 = vpop.f32.mrf.mxu1 }
 0x163   : > { %v1003_v31 = vadd.f32 %v1002_v24, %v913_v22 }
 0x164   : > { %v1239_v19 = vadd.f32 %v2120_v8, %v1090_v16  ;;  %v1279_v20 = vmax.f32 %v1247_v17, 0.0 }
 0x166   : > { %v1271_v23 = vmax.f32 %v1239_v19, 0.0  ;;  %1311 = vst [vmem:[%s2127_s27 + $0xf0] sm:$0xff] %v1279_v20 }
 0x167   : > { %v1111_v41 = vpop.f32.mrf.mxu3 }
 0x168   : > { %1303 = vst [vmem:[%s2127_s27 + $0xb0] sm:$0xff] %v1271_v23  ;;  %v1112_v26 = vadd.f32 %v1111_v41, %v1023_v25 }
 0x169   : > { %v1091_v57 = vpop.f32.mrf.mxu2 }
 0x16a   : > { %v1092_v27 = vadd.f32 %v1091_v57, %v1003_v31  ;;  %v1248_v28 = vadd.f32 %v2120_v8, %v1112_v26 }
 0x16c   : > { %v1240_v29 = vadd.f32 %v2120_v8, %v1092_v27  ;;  %v1280_v32 = vmax.f32 %v1248_v28, 0.0 }
 0x16e   : > { %v1272_v33 = vmax.f32 %v1240_v29, 0.0  ;;  %1312 = vst [vmem:[%s2127_s27 + $0xf8] sm:$0xff] %v1280_v32 }
 0x170   : > { %1304 = vst [vmem:[%s2127_s27 + $0xb8] sm:$0xff] %v1272_v33 }
 0x171 PF: > { %s13_s14 = sadd.s32 1, %s1872_s14   ;;  %s2275_s12 = smov %s1868_s13 }
 0x172   : > { %p10_p5 = scmp.ge.s32.totalorder %s13_s14, 4   ;;  %s2276_s13 = smov %s2278_s15 }
 0x174   :  { %12 = sbr.rel (!%p10_p5) target bundleno = 2 (0x2), region = 76 }

// kernel: _lambda_.16
= control target key start
LH: loop header
LB: loop body
LE: loop exit
PB: predicated region body
PF: predicated region fallthrough
CT: control target
= control target key end

     0   :  { %s1383_s12 = smov 0   ;;  %s1385_s13 = smov 0   ;;  %s1644_s0 = inlined_call_operand.vmem [shape: bf16[512,640], index: 0, kind: input, shape index: {}]   ;;  %s1645_s1 = inlined_call_operand.vmem [shape: bf16[640,128], index: 1, kind: input, shape index: {}]   ;;  %s1646_s2 = inlined_call_operand.vmem [shape: f32[1,128], index: 2, kind: input, shape index: {}]   ;;  %s1647_s3 = inlined_call_operand.vmem [shape: f32[512,128], index: 3, kind: output, shape index: {}]  }
   0x1   :  { %s1387_s14 = smov 0   ;;  %s1389_s15 = smov 0  }
   0x2   :  { %s1391_s16 = smov 0   ;;  %s1393_s17 = smov 0  }
   0x3   :  { %s1395_s18 = smov 0  }
   0x4 LB: > { %s25_s19 = sadd.s32 1, %s1352_s16  ;;  %s32_s20 = sadd.s32 1, %s1356_s17  ;;  %s1360_s18 = sphi %s1395_s18, %s13_s18   ;;  %s1356_s17 = sphi %s1393_s17, %s1653_s17   ;;  %s1352_s16 = sphi %s1391_s16, %s1652_s16   ;;  %s1348_s15 = sphi %s1389_s15, %s1651_s15   ;;  %s1344_s14 = sphi %s1387_s14, %s1650_s14   ;;  %s1340_s13 = sphi %s1385_s13, %s1649_s13   ;;  %s1336_s12 = sphi %s1383_s12, %s1648_s12  }
   0x5   : > { %p26_p0 = scmp.ge.s32.totalorder %s25_s19, 5  ;;  %p48_p1 = scmp.ne.s32.totalorder %s1340_s13, %s1336_s12 }
   0x6   : > { %p49_p2 = scmp.eq.s32.totalorder %s1360_s18, 0  ;;  %s41_s24 = sadd.s32 1, %s1340_s13 }
   0x7   : > { %s1655_s19 = smov (%p26_p0, %s25_s19), 0  ;;  %s1657_s20 = smov (!%p26_p0, %s32_s20), %s1356_s17 }
   0x8   : > { %p50_p3 = por %p49_p2, %p48_p1  ;;  %p34_p4 = scmp.ge.s32.totalorder %s1657_s20, 2 }
   0x9   : > { %s37_s21 = ssub.s32 %s1352_s16, %s1655_s19  ;;  %p1088_p6 = scmp.ge.s32.totalorder %s1360_s18, 10 }
   0xa   : > { %s1659_s20 = smov (%p34_p4, %s1657_s20), 0 }
   0xb   : > { %s36_s22 = ssub.s32 %s1356_s17, %s1659_s20  ;;  %162 = sbr.rel (%p1088_p6) target bundleno = 55 (0x37), region = 20 }
   0xc   : > { %s38_s23 = sor.u32 %s37_s21, %s36_s22 }
   0xd   : > { %p39_p5 = scmp.eq.s32.totalorder %s38_s23, 0 }
   0xf   : > { %s1434_s25 = scalar_select %p39_p5, %s1340_s13, %s41_s24  }
  0x10   : > { %165 = sbr.rel (!%p50_p3) target bundleno = 55 (0x37), region = 24  ;;  %s167_s26 = sand.u32 (%p50_p3), 1, %s1340_s13  }
  0x11   : > { %s1247_s27 = smul.u32 (%p50_p3), 160, %s1356_s17  ;;  %s1089_s28 = sshll.u32 (%p50_p3), %s167_s26, 7 }
  0x12   : > { %s1448_s7 = scalar_lea.vmem (%p50_p3), [#allocation3], %s1089_s28 }
  0x13   : > { %s172_s29 = sadd.s32 (%p50_p3), %s1352_s16, %s1247_s27 }
  0x14   : > { %s1092_s30 = sshll.u32 (%p50_p3), %s172_s29, 2 }
  0x15   : > { %s1443_s6 = scalar_lea.vmem %s1644_s0, %s1092_s30 }
  0x16   : > { %v191_v0 = vld [vmem:[%s1443_s6] sm:$0xf]  ;;  %v193_v1 = vld [vmem:[%s1443_s6 + $0x14] sm:$0xf]  ;;  %v195_v2 = vld [vmem:[%s1443_s6 + $0x28] sm:$0xf] }
  0x17   : > { %192 = vst [vmem:[%s1448_s7] sm:$0xf] %v191_v0  ;;  %v197_v3 = vld [vmem:[%s1443_s6 + $0x3c] sm:$0xf]  ;;  %v199_v4 = vld [vmem:[%s1443_s6 + $0x50] sm:$0xf] }
  0x18   : > { %194 = vst [vmem:[%s1448_s7 + $0x4] sm:$0xf] %v193_v1  ;;  %v201_v5 = vld [vmem:[%s1443_s6 + $0x64] sm:$0xf]  ;;  %v203_v6 = vld [vmem:[%s1443_s6 + $0x78] sm:$0xf] }
  0x19   : > { %196 = vst [vmem:[%s1448_s7 + $0x8] sm:$0xf] %v195_v2  ;;  %v205_v7 = vld [vmem:[%s1443_s6 + $0x8c] sm:$0xf]  ;;  %v207_v8 = vld [vmem:[%s1443_s6 + $0xa0] sm:$0xf] }
  0x1a   : > { %198 = vst [vmem:[%s1448_s7 + $0xc] sm:$0xf] %v197_v3  ;;  %v209_v9 = vld [vmem:[%s1443_s6 + $0xb4] sm:$0xf]  ;;  %v211_v10 = vld [vmem:[%s1443_s6 + $0xc8] sm:$0xf] }
  0x1b   : > { %200 = vst [vmem:[%s1448_s7 + $0x10] sm:$0xf] %v199_v4  ;;  %v213_v11 = vld [vmem:[%s1443_s6 + $0xdc] sm:$0xf]  ;;  %v215_v12 = vld [vmem:[%s1443_s6 + $0xf0] sm:$0xf] }
  0x1c   : > { %202 = vst [vmem:[%s1448_s7 + $0x14] sm:$0xf] %v201_v5  ;;  %v217_v13 = vld [vmem:[%s1443_s6 + $0x104] sm:$0xf]  ;;  %v219_v14 = vld [vmem:[%s1443_s6 + $0x118] sm:$0xf] }
  0x1d   : > { %204 = vst [vmem:[%s1448_s7 + $0x18] sm:$0xf] %v203_v6  ;;  %v221_v15 = vld [vmem:[%s1443_s6 + $0x12c] sm:$0xf]  ;;  %v223_v16 = vld [vmem:[%s1443_s6 + $0x140] sm:$0xf] }
  0x1e   : > { %206 = vst [vmem:[%s1448_s7 + $0x1c] sm:$0xf] %v205_v7  ;;  %v225_v17 = vld [vmem:[%s1443_s6 + $0x154] sm:$0xf]  ;;  %v227_v18 = vld [vmem:[%s1443_s6 + $0x168] sm:$0xf] }
  0x1f   : > { %208 = vst [vmem:[%s1448_s7 + $0x20] sm:$0xf] %v207_v8  ;;  %v229_v19 = vld [vmem:[%s1443_s6 + $0x17c] sm:$0xf]  ;;  %v231_v20 = vld [vmem:[%s1443_s6 + $0x190] sm:$0xf] }
  0x20   : > { %210 = vst [vmem:[%s1448_s7 + $0x24] sm:$0xf] %v209_v9  ;;  %v233_v21 = vld [vmem:[%s1443_s6 + $0x1a4] sm:$0xf]  ;;  %v235_v22 = vld [vmem:[%s1443_s6 + $0x1b8] sm:$0xf] }
  0x21   : > { %212 = vst [vmem:[%s1448_s7 + $0x28] sm:$0xf] %v211_v10  ;;  %v237_v23 = vld [vmem:[%s1443_s6 + $0x1cc] sm:$0xf]  ;;  %v239_v24 = vld [vmem:[%s1443_s6 + $0x1e0] sm:$0xf] }
  0x22   : > { %214 = vst [vmem:[%s1448_s7 + $0x2c] sm:$0xf] %v213_v11  ;;  %v241_v25 = vld [vmem:[%s1443_s6 + $0x1f4] sm:$0xf]  ;;  %v243_v26 = vld [vmem:[%s1443_s6 + $0x208] sm:$0xf] }
  0x23   : > { %216 = vst [vmem:[%s1448_s7 + $0x30] sm:$0xf] %v215_v12  ;;  %v245_v27 = vld [vmem:[%s1443_s6 + $0x21c] sm:$0xf]  ;;  %v247_v28 = vld [vmem:[%s1443_s6 + $0x230] sm:$0xf] }
  0x24   : > { %218 = vst [vmem:[%s1448_s7 + $0x34] sm:$0xf] %v217_v13  ;;  %v249_v29 = vld [vmem:[%s1443_s6 + $0x244] sm:$0xf]  ;;  %v251_v30 = vld [vmem:[%s1443_s6 + $0x258] sm:$0xf] }
  0x25   : > { %220 = vst [vmem:[%s1448_s7 + $0x38] sm:$0xf] %v219_v14  ;;  %v253_v31 = vld [vmem:[%s1443_s6 + $0x26c] sm:$0xf] }
  0x26   : > { %222 = vst [vmem:[%s1448_s7 + $0x3c] sm:$0xf] %v221_v15 }
  0x27   : > { %224 = vst [vmem:[%s1448_s7 + $0x40] sm:$0xf] %v223_v16 }
  0x28   : > { %226 = vst [vmem:[%s1448_s7 + $0x44] sm:$0xf] %v225_v17 }
  0x29   : > { %228 = vst [vmem:[%s1448_s7 + $0x48] sm:$0xf] %v227_v18 }
  0x2a   : > { %230 = vst [vmem:[%s1448_s7 + $0x4c] sm:$0xf] %v229_v19 }
  0x2b   : > { %232 = vst [vmem:[%s1448_s7 + $0x50] sm:$0xf] %v231_v20 }
  0x2c   : > { %234 = vst [vmem:[%s1448_s7 + $0x54] sm:$0xf] %v233_v21 }
  0x2d   : > { %236 = vst [vmem:[%s1448_s7 + $0x58] sm:$0xf] %v235_v22 }
  0x2e   : > { %238 = vst [vmem:[%s1448_s7 + $0x5c] sm:$0xf] %v237_v23 }
  0x2f   : > { %240 = vst [vmem:[%s1448_s7 + $0x60] sm:$0xf] %v239_v24 }
  0x30   : > { %242 = vst [vmem:[%s1448_s7 + $0x64] sm:$0xf] %v241_v25 }
  0x31   : > { %244 = vst [vmem:[%s1448_s7 + $0x68] sm:$0xf] %v243_v26 }
  0x32   : > { %246 = vst [vmem:[%s1448_s7 + $0x6c] sm:$0xf] %v245_v27 }
  0x33   : > { %248 = vst [vmem:[%s1448_s7 + $0x70] sm:$0xf] %v247_v28 }
  0x34   : > { %250 = vst [vmem:[%s1448_s7 + $0x74] sm:$0xf] %v249_v29 }
  0x35   : > { %252 = vst [vmem:[%s1448_s7 + $0x78] sm:$0xf] %v251_v30 }
  0x36   : > { %254 = vst [vmem:[%s1448_s7 + $0x7c] sm:$0xf] %v253_v31 }
  0x37 PF: > { %p1093_p7 = scmp.ge.s32.totalorder %s1360_s18, 1  ;;  %p353_p8 = scmp.lt.s32.totalorder %s1360_s18, 11 }
  0x39   : > { %p354_p9 = pnand %p1093_p7, %p353_p8 }
  0x3a   : > { %s360_s8 = sand.u32 (!%p354_p9), 1, %s1336_s12   ;;  %s1095_s9 = sshll.u32 (!%p354_p9), %s1344_s14, 4 }
  0x3b   : > { %357 = sbr.rel (%p354_p9) target bundleno = 367 (0x16f), region = 69  ;;  %s1094_s10 = sshll.u32 (!%p354_p9), %s360_s8, 7 }
  0x3c   : > { %p399_p10 = scmp.lt.s32.totalorder (!%p354_p9), %s1095_s9, 79  ;;  %s1097_s11 = sshll.u32 (!%p354_p9), %s1348_s15, 5 }
  0x3d   : > { %p411_p11 = scmp.lt.s32.totalorder (!%p354_p9), %s1097_s11, 63  ;;  %s1526_s12 = scalar_lea.vmem (!%p354_p9), [#allocation3], %s1094_s10 }
  0x3e   : > { %p1099_p12 = scmp.ne.s32.totalorder (!%p354_p9), %s1344_s14, 0 }
  0x40   : > { %s1661_s9 = smov (!%p399_p10, %s1095_s9), 79  ;;  %s1663_s11 = smov (!%p411_p11, %s1097_s11), 63 }
  0x41   : > { %s1096_s21 = sshll.u32 %s1661_s9, 2  ;;  %s1098_s26 = sshll.u32 %s1663_s11, 3 }
  0x42   : > { %s1519_s24 = scalar_lea.vmem %s1645_s1, %s1096_s21  ;;  %s1524_s29 = scalar_lea.vmem %s1647_s3, %s1098_s26 }
  0x43   : > { %422 = sbr.rel (%p1099_p12) target bundleno = 105 (0x69), region = 77 }
  0x48   : > { %v1362_v32 = vmov 0.0  }
  0x49   : > { %423 = vst [vmem:[#allocation2 + $0xb0] sm:$0xff] %v1362_v32 }
  0x4a   : > { %424 = vst [vmem:[#allocation2] sm:$0xff] %v1362_v32 }
  0x4b   : > { %425 = vst [vmem:[#allocation2 + $0xd8] sm:$0xff] %v1362_v32 }
  0x4c   : > { %426 = vst [vmem:[#allocation2 + $0x18] sm:$0xff] %v1362_v32 }
  0x4d   : > { %427 = vst [vmem:[#allocation2 + $0x50] sm:$0xff] %v1362_v32 }
  0x4e   : > { %428 = vst [vmem:[#allocation2 + $0x68] sm:$0xff] %v1362_v32 }
  0x4f   : > { %429 = vst [vmem:[#allocation2 + $0x30] sm:$0xff] %v1362_v32 }
  0x50   : > { %430 = vst [vmem:[#allocation2 + $0x48] sm:$0xff] %v1362_v32 }
  0x51   : > { %431 = vst [vmem:[#allocation2 + $0x80] sm:$0xff] %v1362_v32 }
  0x52   : > { %432 = vst [vmem:[#allocation2 + $0x88] sm:$0xff] %v1362_v32 }
  0x53   : > { %433 = vst [vmem:[#allocation2 + $0xe8] sm:$0xff] %v1362_v32 }
  0x54   : > { %434 = vst [vmem:[#allocation2 + $0xb8] sm:$0xff] %v1362_v32 }
  0x55   : > { %435 = vst [vmem:[#allocation2 + $0x60] sm:$0xff] %v1362_v32 }
  0x56   : > { %436 = vst [vmem:[#allocation2 + $0xf0] sm:$0xff] %v1362_v32 }
  0x57   : > { %437 = vst [vmem:[#allocation2 + $0x8] sm:$0xff] %v1362_v32 }
  0x58   : > { %438 = vst [vmem:[#allocation2 + $0x78] sm:$0xff] %v1362_v32 }
  0x59   : > { %439 = vst [vmem:[#allocation2 + $0x38] sm:$0xff] %v1362_v32 }
  0x5a   : > { %440 = vst [vmem:[#allocation2 + $0x58] sm:$0xff] %v1362_v32 }
  0x5b   : > { %441 = vst [vmem:[#allocation2 + $0x40] sm:$0xff] %v1362_v32 }
  0x5c   : > { %442 = vst [vmem:[#allocation2 + $0xc8] sm:$0xff] %v1362_v32 }
  0x5d   : > { %443 = vst [vmem:[#allocation2 + $0xe0] sm:$0xff] %v1362_v32 }
  0x5e   : > { %444 = vst [vmem:[#allocation2 + $0x90] sm:$0xff] %v1362_v32 }
  0x5f   : > { %445 = vst [vmem:[#allocation2 + $0x70] sm:$0xff] %v1362_v32 }
  0x60   : > { %446 = vst [vmem:[#allocation2 + $0xc0] sm:$0xff] %v1362_v32 }
  0x61   : > { %447 = vst [vmem:[#allocation2 + $0xa8] sm:$0xff] %v1362_v32 }
  0x62   : > { %448 = vst [vmem:[#allocation2 + $0xd0] sm:$0xff] %v1362_v32 }
  0x63   : > { %449 = vst [vmem:[#allocation2 + $0x10] sm:$0xff] %v1362_v32 }
  0x64   : > { %450 = vst [vmem:[#allocation2 + $0x28] sm:$0xff] %v1362_v32 }
  0x65   : > { %451 = vst [vmem:[#allocation2 + $0xa0] sm:$0xff] %v1362_v32 }
  0x66   : > { %452 = vst [vmem:[#allocation2 + $0xf8] sm:$0xff] %v1362_v32 }
  0x67   : > { %453 = vst [vmem:[#allocation2 + $0x20] sm:$0xff] %v1362_v32 }
  0x68   : > { %454 = vst [vmem:[#allocation2 + $0x98] sm:$0xff] %v1362_v32 }
  0x69 PF: > { %v1222_v33 = vld [vmem:[%s1519_s24 + $0x38] sm:$0xff]  ;;  %v1221_v34 = vld [vmem:[%s1519_s24 + $0x30] sm:$0xff]  ;;  %v1220_v35 = vld [vmem:[%s1519_s24 + $0x28] sm:$0xff]  ;;  %p1196_p13 = scmp.ne.s32.totalorder %s1344_s14, 4 }
  0x6a   : > { %679 = vmatpush.bf16.msra.mxu0 %v1222_v33  ;;  %1223 = vmatpush.bf16.msra.mxu1 %v1222_v33  ;;  %v1219_v36 = vld [vmem:[%s1519_s24 + $0x20] sm:$0xff]  ;;  %v1218_v37 = vld [vmem:[%s1519_s24 + $0x18] sm:$0xff]  ;;  %v1217_v38 = vld [vmem:[%s1519_s24 + $0x10] sm:$0xff] }
  0x6b   : > { %1224 = vmatpush.bf16.msra.mxu2 %v1222_v33  ;;  %1225 = vmatpush.bf16.msra.mxu3 %v1222_v33  ;;  %v1216_v39 = vld [vmem:[%s1519_s24 + $0x8] sm:$0xff]  ;;  %v1215_v40 = vld [vmem:[%s1519_s24] sm:$0xff]  ;;  %v1201_v49 = vld [vmem:[%s1526_s12 + $0x10] sm:$0xff] }
  0x6c   : > { %v1199_v41 = vld [vmem:[%s1526_s12] sm:$0xff]  ;;  %v1200_v45 = vld [vmem:[%s1526_s12 + $0x8] sm:$0xff]  ;;  %v1205_v50 = vld [vmem:[%s1526_s12 + $0x30] sm:$0xff] }
  0x6d   : > { %v1203_v42 = vld [vmem:[%s1526_s12 + $0x20] sm:$0xff]  ;;  %v1204_v46 = vld [vmem:[%s1526_s12 + $0x28] sm:$0xff]  ;;  %v1209_v51 = vld [vmem:[%s1526_s12 + $0x50] sm:$0xff] }
  0x6e   : > { %680 = vmatpush.bf16.msra.mxu0 %v1221_v34  ;;  %1226 = vmatpush.bf16.msra.mxu1 %v1221_v34  ;;  %v1207_v43 = vld [vmem:[%s1526_s12 + $0x40] sm:$0xff]  ;;  %v1208_v47 = vld [vmem:[%s1526_s12 + $0x48] sm:$0xff]  ;;  %v1213_v52 = vld [vmem:[%s1526_s12 + $0x70] sm:$0xff] }
  0x6f   : > { %1227 = vmatpush.bf16.msra.mxu2 %v1221_v34  ;;  %1228 = vmatpush.bf16.msra.mxu3 %v1221_v34  ;;  %v1211_v44 = vld [vmem:[%s1526_s12 + $0x60] sm:$0xff]  ;;  %v1212_v48 = vld [vmem:[%s1526_s12 + $0x68] sm:$0xff]  ;;  %v1202_v53 = vld [vmem:[%s1526_s12 + $0x18] sm:$0xff] }
  0x70   : > { %v1206_v54 = vld [vmem:[%s1526_s12 + $0x38] sm:$0xff]  ;;  %v455_v57 = vld [vmem:[#allocation2 + $0xb0] sm:$0xff]  ;;  %v463_v58 = vld [vmem:[#allocation2 + $0x80] sm:$0xff] }
  0x71   : > { %v1210_v55 = vld [vmem:[%s1526_s12 + $0x58] sm:$0xff]  ;;  %v479_v0 = vld [vmem:[#allocation2 + $0xa8] sm:$0xff]  ;;  %v456_v1 = vld [vmem:[#allocation2] sm:$0xff] }
  0x72   : > { %681 = vmatpush.bf16.msra.mxu0 %v1220_v35  ;;  %1229 = vmatpush.bf16.msra.mxu1 %v1220_v35  ;;  %v1214_v56 = vld [vmem:[%s1526_s12 + $0x78] sm:$0xff]  ;;  %v464_v2 = vld [vmem:[#allocation2 + $0x88] sm:$0xff]  ;;  %v480_v12 = vld [vmem:[#allocation2 + $0xd0] sm:$0xff] }
  0x73   : > { %1230 = vmatpush.bf16.msra.mxu2 %v1220_v35  ;;  %1231 = vmatpush.bf16.msra.mxu3 %v1220_v35  ;;  %v471_v63 = vld [vmem:[#allocation2 + $0x38] sm:$0xff]  ;;  %v465_v14 = vld [vmem:[#allocation2 + $0xe8] sm:$0xff]  ;;  %v473_v23 = vld [vmem:[#allocation2 + $0x40] sm:$0xff] }
  0x74   : > { %v472_v11 = vld [vmem:[#allocation2 + $0x58] sm:$0xff]  ;;  %v481_v24 = vld [vmem:[#allocation2 + $0x10] sm:$0xff]  ;;  %v474_v35 = vld [vmem:[#allocation2 + $0xc8] sm:$0xff] }
  0x75   : > { %v457_v13 = vld [vmem:[#allocation2 + $0xd8] sm:$0xff] }
  0x76   : > { %682 = vmatpush.bf16.msra.mxu0 %v1219_v36  ;;  %1232 = vmatpush.bf16.msra.mxu1 %v1219_v36  ;;  %v458_v25 = vld [vmem:[#allocation2 + $0x18] sm:$0xff] }
  0x77   : > { %1233 = vmatpush.bf16.msra.mxu2 %v1219_v36  ;;  %1234 = vmatpush.bf16.msra.mxu3 %v1219_v36  ;;  %v466_v26 = vld [vmem:[#allocation2 + $0xb8] sm:$0xff]  ;;  %v482_v36 = vld [vmem:[#allocation2 + $0x28] sm:$0xff] }
  0x7a   : > { %683 = vmatpush.bf16.msra.mxu0 %v1218_v37  ;;  %1235 = vmatpush.bf16.msra.mxu1 %v1218_v37 }
  0x7b   : > { %1236 = vmatpush.bf16.msra.mxu2 %v1218_v37  ;;  %1237 = vmatpush.bf16.msra.mxu3 %v1218_v37  ;;  %v459_v37 = vld [vmem:[#allocation2 + $0x50] sm:$0xff] }
  0x7e   : > { %684 = vmatpush.bf16.msra.mxu0 %v1217_v38  ;;  %1238 = vmatpush.bf16.msra.mxu1 %v1217_v38 }
  0x7f   : > { %1239 = vmatpush.bf16.msra.mxu2 %v1217_v38  ;;  %1240 = vmatpush.bf16.msra.mxu3 %v1217_v38  ;;  %v467_v38 = vld [vmem:[#allocation2 + $0x60] sm:$0xff] }
  0x82   : > { %685 = vmatpush.bf16.msra.mxu0 %v1216_v39  ;;  %1241 = vmatpush.bf16.msra.mxu1 %v1216_v39 }
  0x83   : > { %1242 = vmatpush.bf16.msra.mxu2 %v1216_v39  ;;  %1243 = vmatpush.bf16.msra.mxu3 %v1216_v39 }
  0x86   : > { %686 = vmatpush.bf16.msra.mxu0 %v1215_v40  ;;  %1244 = vmatpush.bf16.msra.mxu1 %v1215_v40 }
  0x87   : > { %1245 = vmatpush.bf16.msra.mxu2 %v1215_v40  ;;  %1246 = vmatpush.bf16.msra.mxu3 %v1215_v40 }
  0x89   : > { %687 = vmatmul.bf16.vlgmr.msra.gmra.mxu0 %v1199_v41  ;;  %707 = vmatmul.bf16.vlgmr.msra.gmra.mxu1 %v1203_v42 }
  0x8a   : > { %727 = vmatmul.bf16.vlgmr.msra.gmra.mxu2 %v1207_v43  ;;  %747 = vmatmul.bf16.vlgmr.msra.gmra.mxu3 %v1211_v44 }
  0x99   : > { %692 = vmatmul.bf16.gmra.mxu0 %v1200_v45  ;;  %712 = vmatmul.bf16.gmra.mxu1 %v1204_v46 }
  0x9a   : > { %732 = vmatmul.bf16.gmra.mxu2 %v1208_v47  ;;  %752 = vmatmul.bf16.gmra.mxu3 %v1212_v48  ;;  %v475_v47 = vld [vmem:[#allocation2 + $0xe0] sm:$0xff] }
  0x9b   : > { %v483_v48 = vld [vmem:[#allocation2 + $0xa0] sm:$0xff] }
  0xa9   : > { %697 = vmatmul.bf16.gmra.mxu0 %v1201_v49  ;;  %717 = vmatmul.bf16.gmra.mxu1 %v1205_v50  ;;  %v460_v49 = vld [vmem:[#allocation2 + $0x68] sm:$0xff]  ;;  %v468_v50 = vld [vmem:[#allocation2 + $0xf0] sm:$0xff] }
  0xaa   : > { %737 = vmatmul.bf16.gmra.mxu2 %v1209_v51  ;;  %757 = vmatmul.bf16.gmra.mxu3 %v1213_v52 }
  0xb9   : > { %702 = vmatmul.bf16.gmra.mxu0 %v1202_v53  ;;  %722 = vmatmul.bf16.gmra.mxu1 %v1206_v54 }
  0xba   : > { %742 = vmatmul.bf16.gmra.mxu2 %v1210_v55  ;;  %762 = vmatmul.bf16.gmra.mxu3 %v1214_v56 }
 0x106   : > { %v688_v59 = vpop.f32.mrf.mxu0  ;;  %v708_v60 = vpop.f32.mrf.mxu1 }
 0x107   : > { %v768_v61 = vadd.f32 %v688_v59, %v455_v57  ;;  %v776_v62 = vadd.f32 %v708_v60, %v463_v58  ;;  %v476_v59 = vld [vmem:[#allocation2 + $0x90] sm:$0xff]  ;;  %v484_v60 = vld [vmem:[#allocation2 + $0xf8] sm:$0xff] }
 0x109   : > { %800 = vst [vmem:[#allocation2 + $0xb0] sm:$0xff] %v768_v61  ;;  %v461_v61 = vld [vmem:[#allocation2 + $0x30] sm:$0xff] }
 0x10a   : > { %808 = vst [vmem:[#allocation2 + $0x80] sm:$0xff] %v776_v62  ;;  %v469_v62 = vld [vmem:[#allocation2 + $0x8] sm:$0xff] }
 0x10d   : > { %v728_v3 = vpop.f32.mrf.mxu2  ;;  %v748_v4 = vpop.f32.mrf.mxu3 }
 0x10e   : > { %v784_v5 = vadd.f32 %v728_v3, %v471_v63  ;;  %v792_v6 = vadd.f32 %v748_v4, %v479_v0  ;;  %v690_v7 = vpop.f32.mrf.mxu0  ;;  %v710_v8 = vpop.f32.mrf.mxu1 }
 0x10f   : > { %v769_v9 = vadd.f32 %v690_v7, %v456_v1  ;;  %v777_v10 = vadd.f32 %v710_v8, %v464_v2  ;;  %v477_v7 = vld [vmem:[#allocation2 + $0x70] sm:$0xff]  ;;  %v485_v8 = vld [vmem:[#allocation2 + $0x20] sm:$0xff] }
 0x110   : > { %816 = vst [vmem:[#allocation2 + $0x38] sm:$0xff] %v784_v5 }
 0x111   : > { %824 = vst [vmem:[#allocation2 + $0xa8] sm:$0xff] %v792_v6 }
 0x112   : > { %801 = vst [vmem:[#allocation2] sm:$0xff] %v769_v9  ;;  %v462_v9 = vld [vmem:[#allocation2 + $0x48] sm:$0xff] }
 0x113   : > { %809 = vst [vmem:[#allocation2 + $0x88] sm:$0xff] %v777_v10  ;;  %v470_v10 = vld [vmem:[#allocation2 + $0x78] sm:$0xff] }
 0x115   : > { %v730_v15 = vpop.f32.mrf.mxu2  ;;  %v750_v16 = vpop.f32.mrf.mxu3 }
 0x116   : > { %v785_v17 = vadd.f32 %v730_v15, %v472_v11  ;;  %v793_v18 = vadd.f32 %v750_v16, %v480_v12  ;;  %v693_v19 = vpop.f32.mrf.mxu0  ;;  %v713_v20 = vpop.f32.mrf.mxu1 }
 0x117   : > { %v770_v21 = vadd.f32 %v693_v19, %v457_v13  ;;  %v778_v22 = vadd.f32 %v713_v20, %v465_v14  ;;  %v478_v19 = vld [vmem:[#allocation2 + $0xc0] sm:$0xff]  ;;  %v486_v20 = vld [vmem:[#allocation2 + $0x98] sm:$0xff] }
 0x118   : > { %817 = vst [vmem:[#allocation2 + $0x58] sm:$0xff] %v785_v17 }
 0x119   : > { %825 = vst [vmem:[#allocation2 + $0xd0] sm:$0xff] %v793_v18 }
 0x11a   : > { %802 = vst [vmem:[#allocation2 + $0xd8] sm:$0xff] %v770_v21 }
 0x11b   : > { %810 = vst [vmem:[#allocation2 + $0xe8] sm:$0xff] %v778_v22 }
 0x11d   : > { %v733_v27 = vpop.f32.mrf.mxu2  ;;  %v753_v28 = vpop.f32.mrf.mxu3 }
 0x11e   : > { %v786_v29 = vadd.f32 %v733_v27, %v473_v23  ;;  %v794_v30 = vadd.f32 %v753_v28, %v481_v24  ;;  %v695_v31 = vpop.f32.mrf.mxu0  ;;  %v715_v32 = vpop.f32.mrf.mxu1 }
 0x11f   : > { %v771_v33 = vadd.f32 %v695_v31, %v458_v25  ;;  %v779_v34 = vadd.f32 %v715_v32, %v466_v26 }
 0x120   : > { %818 = vst [vmem:[#allocation2 + $0x40] sm:$0xff] %v786_v29 }
 0x121   : > { %826 = vst [vmem:[#allocation2 + $0x10] sm:$0xff] %v794_v30 }
 0x122   : > { %803 = vst [vmem:[#allocation2 + $0x18] sm:$0xff] %v771_v33 }
 0x123   : > { %811 = vst [vmem:[#allocation2 + $0xb8] sm:$0xff] %v779_v34 }
 0x125   : > { %v735_v39 = vpop.f32.mrf.mxu2  ;;  %v755_v40 = vpop.f32.mrf.mxu3 }
 0x126   : > { %v787_v41 = vadd.f32 %v735_v39, %v474_v35  ;;  %v795_v42 = vadd.f32 %v755_v40, %v482_v36  ;;  %v698_v43 = vpop.f32.mrf.mxu0  ;;  %v718_v44 = vpop.f32.mrf.mxu1 }
 0x127   : > { %v772_v45 = vadd.f32 %v698_v43, %v459_v37  ;;  %v780_v46 = vadd.f32 %v718_v44, %v467_v38 }
 0x128   : > { %819 = vst [vmem:[#allocation2 + $0xc8] sm:$0xff] %v787_v41 }
 0x129   : > { %827 = vst [vmem:[#allocation2 + $0x28] sm:$0xff] %v795_v42 }
 0x12a   : > { %804 = vst [vmem:[#allocation2 + $0x50] sm:$0xff] %v772_v45 }
 0x12b   : > { %812 = vst [vmem:[#allocation2 + $0x60] sm:$0xff] %v780_v46 }
 0x12d   : > { %v738_v51 = vpop.f32.mrf.mxu2  ;;  %v758_v52 = vpop.f32.mrf.mxu3 }
 0x12e   : > { %v788_v53 = vadd.f32 %v738_v51, %v475_v47  ;;  %v796_v54 = vadd.f32 %v758_v52, %v483_v48  ;;  %v700_v55 = vpop.f32.mrf.mxu0  ;;  %v720_v56 = vpop.f32.mrf.mxu1 }
 0x12f   : > { %v773_v57 = vadd.f32 %v700_v55, %v460_v49  ;;  %v781_v58 = vadd.f32 %v720_v56, %v468_v50 }
 0x130   : > { %820 = vst [vmem:[#allocation2 + $0xe0] sm:$0xff] %v788_v53 }
 0x131   : > { %828 = vst [vmem:[#allocation2 + $0xa0] sm:$0xff] %v796_v54 }
 0x132   : > { %805 = vst [vmem:[#allocation2 + $0x68] sm:$0xff] %v773_v57 }
 0x133   : > { %813 = vst [vmem:[#allocation2 + $0xf0] sm:$0xff] %v781_v58 }
 0x135   : > { %v740_v63 = vpop.f32.mrf.mxu2  ;;  %v760_v0 = vpop.f32.mrf.mxu3 }
 0x136   : > { %v789_v1 = vadd.f32 %v740_v63, %v476_v59  ;;  %v797_v2 = vadd.f32 %v760_v0, %v484_v60  ;;  %v703_v3 = vpop.f32.mrf.mxu0  ;;  %v723_v4 = vpop.f32.mrf.mxu1 }
 0x137   : > { %v774_v5 = vadd.f32 %v703_v3, %v461_v61  ;;  %v782_v6 = vadd.f32 %v723_v4, %v469_v62 }
 0x138   : > { %821 = vst [vmem:[#allocation2 + $0x90] sm:$0xff] %v789_v1 }
 0x139   : > { %829 = vst [vmem:[#allocation2 + $0xf8] sm:$0xff] %v797_v2 }
 0x13a   : > { %806 = vst [vmem:[#allocation2 + $0x30] sm:$0xff] %v774_v5 }
 0x13b   : > { %814 = vst [vmem:[#allocation2 + $0x8] sm:$0xff] %v782_v6 }
 0x13d   : > { %v743_v11 = vpop.f32.mrf.mxu2  ;;  %v763_v12 = vpop.f32.mrf.mxu3 }
 0x13e   : > { %v790_v13 = vadd.f32 %v743_v11, %v477_v7  ;;  %v798_v14 = vadd.f32 %v763_v12, %v485_v8  ;;  %v705_v15 = vpop.f32.mrf.mxu0  ;;  %v725_v16 = vpop.f32.mrf.mxu1 }
 0x13f   : > { %v775_v17 = vadd.f32 %v705_v15, %v462_v9  ;;  %v783_v18 = vadd.f32 %v725_v16, %v470_v10 }
 0x140   : > { %822 = vst [vmem:[#allocation2 + $0x70] sm:$0xff] %v790_v13 }
 0x141   : > { %830 = vst [vmem:[#allocation2 + $0x20] sm:$0xff] %v798_v14 }
 0x142   : > { %807 = vst [vmem:[#allocation2 + $0x48] sm:$0xff] %v775_v17 }
 0x143   : > { %815 = vst [vmem:[#allocation2 + $0x78] sm:$0xff] %v783_v18 }
 0x145   : > { %v745_v21 = vpop.f32.mrf.mxu2  ;;  %v765_v22 = vpop.f32.mrf.mxu3  ;;  %835 = sbr.rel (%p1196_p13) target bundleno = 367 (0x16f), region = 81 }
 0x146   : > { %v791_v23 = vadd.f32 %v745_v21, %v478_v19  ;;  %v799_v24 = vadd.f32 %v765_v22, %v486_v20 }
 0x148   : > { %823 = vst [vmem:[#allocation2 + $0xc0] sm:$0xff] %v791_v23 }
 0x149   : > { %831 = vst [vmem:[#allocation2 + $0x98] sm:$0xff] %v799_v24 }
 0x14a   : > { %v836_v25 = vld [vmem:[#allocation2 + $0xb0] sm:$0xff]  ;;  %v1557_v26 = vld [vmem:[%s1646_s2] ss:$0 sm:$0xff]  ;;  %v838_v28 = vld [vmem:[#allocation2 + $0xd8] sm:$0xff] }
 0x14b   : > { %v837_v27 = vld [vmem:[#allocation2] sm:$0xff]  ;;  %v839_v29 = vld [vmem:[#allocation2 + $0x18] sm:$0xff]  ;;  %v872_v30 = vadd.f32 %v1557_v26, %v836_v25  ;;  %v874_v32 = vadd.f32 %v1557_v26, %v838_v28  ;;  %v840_v34 = vld [vmem:[#allocation2 + $0x50] sm:$0xff] }
 0x14c   : > { %v873_v31 = vadd.f32 %v1557_v26, %v837_v27  ;;  %v875_v33 = vadd.f32 %v1557_v26, %v839_v29  ;;  %v841_v35 = vld [vmem:[#allocation2 + $0x68] sm:$0xff]  ;;  %v842_v36 = vld [vmem:[#allocation2 + $0x30] sm:$0xff]  ;;  %v876_v37 = vadd.f32 %v1557_v26, %v840_v34  ;;  %v844_v40 = vld [vmem:[#allocation2 + $0x80] sm:$0xff] }
 0x14d   : > { %v877_v38 = vadd.f32 %v1557_v26, %v841_v35  ;;  %v843_v39 = vld [vmem:[#allocation2 + $0x48] sm:$0xff]  ;;  %v904_v41 = vmax.f32 %v872_v30, 0.0  ;;  %v906_v43 = vmax.f32 %v874_v32, 0.0  ;;  %v878_v44 = vadd.f32 %v1557_v26, %v842_v36  ;;  %v847_v51 = vld [vmem:[#allocation2 + $0xb8] sm:$0xff]  ;;  %v848_v54 = vld [vmem:[#allocation2 + $0x60] sm:$0xff] }
 0x14e   : > { %v905_v42 = vmax.f32 %v873_v31, 0.0  ;;  %v845_v45 = vld [vmem:[#allocation2 + $0x88] sm:$0xff]  ;;  %v907_v46 = vmax.f32 %v875_v33, 0.0  ;;  %v879_v47 = vadd.f32 %v1557_v26, %v843_v39  ;;  %v908_v49 = vmax.f32 %v876_v37, 0.0  ;;  %v849_v57 = vld [vmem:[#allocation2 + $0xf0] sm:$0xff]  ;;  %v851_v63 = vld [vmem:[#allocation2 + $0x78] sm:$0xff] }
 0x14f   : > { %v846_v48 = vld [vmem:[#allocation2 + $0xe8] sm:$0xff]  ;;  %936 = vst [vmem:[%s1524_s29] sm:$0xff] %v904_v41  ;;  %v880_v50 = vadd.f32 %v1557_v26, %v844_v40  ;;  %v909_v52 = vmax.f32 %v877_v38, 0.0  ;;  %v881_v53 = vadd.f32 %v1557_v26, %v845_v45  ;;  %v910_v55 = vmax.f32 %v878_v44, 0.0  ;;  %v852_v2 = vld [vmem:[#allocation2 + $0x38] sm:$0xff]  ;;  %v854_v8 = vld [vmem:[#allocation2 + $0x40] sm:$0xff] }
 0x150   : > { %937 = vst [vmem:[%s1524_s29 + $0x8] sm:$0xff] %v905_v42  ;;  %v882_v56 = vadd.f32 %v1557_v26, %v846_v48  ;;  %v911_v58 = vmax.f32 %v879_v47, 0.0  ;;  %v883_v59 = vadd.f32 %v1557_v26, %v847_v51  ;;  %v850_v60 = vld [vmem:[#allocation2 + $0x8] sm:$0xff]  ;;  %v884_v62 = vadd.f32 %v1557_v26, %v848_v54  ;;  %v853_v5 = vld [vmem:[#allocation2 + $0x58] sm:$0xff]  ;;  %v856_v14 = vld [vmem:[#allocation2 + $0xe0] sm:$0xff] }
 0x151   : > { %938 = vst [vmem:[%s1524_s29 + $0x10] sm:$0xff] %v906_v43  ;;  %v912_v61 = vmax.f32 %v880_v50, 0.0  ;;  %v913_v0 = vmax.f32 %v881_v53, 0.0  ;;  %v885_v1 = vadd.f32 %v1557_v26, %v849_v57  ;;  %v886_v4 = vadd.f32 %v1557_v26, %v850_v60  ;;  %v855_v11 = vld [vmem:[#allocation2 + $0xc8] sm:$0xff]  ;;  %v857_v17 = vld [vmem:[#allocation2 + $0x90] sm:$0xff]  ;;  %v859_v23 = vld [vmem:[#allocation2 + $0xc0] sm:$0xff] }
 0x152   : > { %939 = vst [vmem:[%s1524_s29 + $0x18] sm:$0xff] %v907_v46  ;;  %v914_v3 = vmax.f32 %v882_v56, 0.0  ;;  %v915_v6 = vmax.f32 %v883_v59, 0.0  ;;  %v887_v7 = vadd.f32 %v1557_v26, %v851_v63  ;;  %v916_v9 = vmax.f32 %v884_v62, 0.0  ;;  %v858_v20 = vld [vmem:[#allocation2 + $0x70] sm:$0xff]  ;;  %v860_v27 = vld [vmem:[#allocation2 + $0xa8] sm:$0xff] }
 0x153   : > { %940 = vst [vmem:[%s1524_s29 + $0x20] sm:$0xff] %v908_v49  ;;  %v888_v10 = vadd.f32 %v1557_v26, %v852_v2  ;;  %v917_v12 = vmax.f32 %v885_v1, 0.0  ;;  %v889_v13 = vadd.f32 %v1557_v26, %v853_v5  ;;  %v918_v15 = vmax.f32 %v886_v4, 0.0  ;;  %v861_v30 = vld [vmem:[#allocation2 + $0xd0] sm:$0xff]  ;;  %v863_v36 = vld [vmem:[#allocation2 + $0x28] sm:$0xff]  ;;  %v864_v39 = vld [vmem:[#allocation2 + $0xa0] sm:$0xff] }
 0x154   : > { %941 = vst [vmem:[%s1524_s29 + $0x28] sm:$0xff] %v909_v52  ;;  %v890_v16 = vadd.f32 %v1557_v26, %v854_v8  ;;  %v919_v18 = vmax.f32 %v887_v7, 0.0  ;;  %v891_v19 = vadd.f32 %v1557_v26, %v855_v11  ;;  %v892_v22 = vadd.f32 %v1557_v26, %v856_v14  ;;  %v862_v33 = vld [vmem:[#allocation2 + $0x10] sm:$0xff]  ;;  %v865_v42 = vld [vmem:[#allocation2 + $0xf8] sm:$0xff]  ;;  %v866_v45 = vld [vmem:[#allocation2 + $0x20] sm:$0xff] }
 0x155   : > { %942 = vst [vmem:[%s1524_s29 + $0x30] sm:$0xff] %v910_v55  ;;  %v920_v21 = vmax.f32 %v888_v10, 0.0  ;;  %v921_v24 = vmax.f32 %v889_v13, 0.0  ;;  %v893_v25 = vadd.f32 %v1557_v26, %v857_v17  ;;  %v894_v29 = vadd.f32 %v1557_v26, %v858_v20  ;;  %v867_v48 = vld [vmem:[#allocation2 + $0x98] sm:$0xff] }
 0x156   : > { %943 = vst [vmem:[%s1524_s29 + $0x38] sm:$0xff] %v911_v58  ;;  %v922_v28 = vmax.f32 %v890_v16, 0.0  ;;  %v923_v31 = vmax.f32 %v891_v19, 0.0  ;;  %v895_v32 = vadd.f32 %v1557_v26, %v859_v23  ;;  %v924_v34 = vmax.f32 %v892_v22, 0.0 }
 0x157   : > { %944 = vst [vmem:[%s1524_s29 + $0x40] sm:$0xff] %v912_v61  ;;  %v896_v35 = vadd.f32 %v1557_v26, %v860_v27  ;;  %v925_v37 = vmax.f32 %v893_v25, 0.0  ;;  %v897_v38 = vadd.f32 %v1557_v26, %v861_v30  ;;  %v926_v40 = vmax.f32 %v894_v29, 0.0 }
 0x158   : > { %945 = vst [vmem:[%s1524_s29 + $0x48] sm:$0xff] %v913_v0  ;;  %v898_v41 = vadd.f32 %v1557_v26, %v862_v33  ;;  %v927_v43 = vmax.f32 %v895_v32, 0.0  ;;  %v899_v44 = vadd.f32 %v1557_v26, %v863_v36  ;;  %v900_v47 = vadd.f32 %v1557_v26, %v864_v39 }
 0x159   : > { %946 = vst [vmem:[%s1524_s29 + $0x50] sm:$0xff] %v914_v3  ;;  %v928_v46 = vmax.f32 %v896_v35, 0.0  ;;  %v929_v49 = vmax.f32 %v897_v38, 0.0  ;;  %v901_v50 = vadd.f32 %v1557_v26, %v865_v42  ;;  %v902_v52 = vadd.f32 %v1557_v26, %v866_v45 }
 0x15a   : > { %947 = vst [vmem:[%s1524_s29 + $0x58] sm:$0xff] %v915_v6  ;;  %v930_v51 = vmax.f32 %v898_v41, 0.0  ;;  %v931_v53 = vmax.f32 %v899_v44, 0.0  ;;  %v903_v54 = vadd.f32 %v1557_v26, %v867_v48  ;;  %v932_v55 = vmax.f32 %v900_v47, 0.0 }
 0x15b   : > { %948 = vst [vmem:[%s1524_s29 + $0x60] sm:$0xff] %v916_v9  ;;  %v933_v56 = vmax.f32 %v901_v50, 0.0  ;;  %v934_v57 = vmax.f32 %v902_v52, 0.0 }
 0x15c   : > { %949 = vst [vmem:[%s1524_s29 + $0x68] sm:$0xff] %v917_v12  ;;  %v935_v58 = vmax.f32 %v903_v54, 0.0 }
 0x15d   : > { %950 = vst [vmem:[%s1524_s29 + $0x70] sm:$0xff] %v918_v15 }
 0x15e   : > { %951 = vst [vmem:[%s1524_s29 + $0x78] sm:$0xff] %v919_v18 }
 0x15f   : > { %952 = vst [vmem:[%s1524_s29 + $0x80] sm:$0xff] %v920_v21 }
 0x160   : > { %953 = vst [vmem:[%s1524_s29 + $0x88] sm:$0xff] %v921_v24 }
 0x161   : > { %954 = vst [vmem:[%s1524_s29 + $0x90] sm:$0xff] %v922_v28 }
 0x162   : > { %955 = vst [vmem:[%s1524_s29 + $0x98] sm:$0xff] %v923_v31 }
 0x163   : > { %956 = vst [vmem:[%s1524_s29 + $0xa0] sm:$0xff] %v924_v34 }
 0x164   : > { %957 = vst [vmem:[%s1524_s29 + $0xa8] sm:$0xff] %v925_v37 }
 0x165   : > { %958 = vst [vmem:[%s1524_s29 + $0xb0] sm:$0xff] %v926_v40 }
 0x166   : > { %959 = vst [vmem:[%s1524_s29 + $0xb8] sm:$0xff] %v927_v43 }
 0x167   : > { %960 = vst [vmem:[%s1524_s29 + $0xc0] sm:$0xff] %v928_v46 }
 0x168   : > { %961 = vst [vmem:[%s1524_s29 + $0xc8] sm:$0xff] %v929_v49 }
 0x169   : > { %962 = vst [vmem:[%s1524_s29 + $0xd0] sm:$0xff] %v930_v51 }
 0x16a   : > { %963 = vst [vmem:[%s1524_s29 + $0xd8] sm:$0xff] %v931_v53 }
 0x16b   : > { %964 = vst [vmem:[%s1524_s29 + $0xe0] sm:$0xff] %v932_v55 }
 0x16c   : > { %965 = vst [vmem:[%s1524_s29 + $0xe8] sm:$0xff] %v933_v56 }
 0x16d   : > { %966 = vst [vmem:[%s1524_s29 + $0xf0] sm:$0xff] %v934_v57 }
 0x16e   : > { %967 = vst [vmem:[%s1524_s29 + $0xf8] sm:$0xff] %v935_v58 }
 0x16f PF: > { %s13_s18 = sadd.s32 1, %s1360_s18   ;;  %s1648_s12 = smov %s1340_s13 }
 0x170   : > { %p10_p0 = scmp.ge.s32.totalorder %s13_s18, 12   ;;  %s1649_s13 = smov %s1434_s25 }
 0x171   : > { %s1650_s14 = smov %s1352_s16  ;;  %s1651_s15 = smov %s1356_s17 }
 0x172   : > { %s1652_s16 = smov %s1655_s19  ;;  %s1653_s17 = smov %s1659_s20 }
 0x173   :  { %12 = sbr.rel (!%p10_p0) target bundleno = 4 (0x4), region = 122 }

// kernel: _lambda_.17
= control target key start
LH: loop header
LB: loop body
LE: loop exit
PB: predicated region body
PF: predicated region fallthrough
CT: control target
= control target key end

     0   :  { %s230_s0 = inlined_call_operand.vmem [shape: f32[16,512], index: 0, kind: input, shape index: {}]   ;;  %s231_s1 = inlined_call_operand.vmem [shape: f32[16,512], index: 1, kind: input, shape index: {}]   ;;  %s232_s2 = inlined_call_operand.vmem [shape: f32[16,512], index: 2, kind: input, shape index: {}]   ;;  %s233_s3 = inlined_call_operand.vmem [shape: f32[16,512], index: 3, kind: input, shape index: {}]   ;;  %s234_s4 = inlined_call_operand.vmem [shape: f32[16,512], index: 4, kind: output, shape index: {}]  }
   0x1   :  { %v17_v0 = vld [vmem:[%s230_s0] sm:$0xff]  ;;  %v18_v5 = vld [vmem:[%s230_s0 + $0x8] sm:$0xff]  ;;  %v19_v11 = vld [vmem:[%s230_s0 + $0x10] sm:$0xff] }
   0x2   :  { %v25_v1 = vld [vmem:[%s231_s1] sm:$0xff]  ;;  %v26_v6 = vld [vmem:[%s231_s1 + $0x8] sm:$0xff]  ;;  %v27_v13 = vld [vmem:[%s231_s1 + $0x10] sm:$0xff] }
   0x3   :  { %v41_v2 = vld [vmem:[%s232_s2] sm:$0xff]  ;;  %v33_v3 = vmax.f32 %v17_v0, %v25_v1  ;;  %v34_v8 = vmax.f32 %v18_v5, %v26_v6  ;;  %v42_v9 = vld [vmem:[%s232_s2 + $0x8] sm:$0xff]  ;;  %v43_v14 = vld [vmem:[%s232_s2 + $0x10] sm:$0xff]  ;;  %v35_v17 = vmax.f32 %v19_v11, %v27_v13 }
   0x4   :  { %v49_v4 = vld [vmem:[%s233_s3] sm:$0xff]  ;;  %v50_v10 = vld [vmem:[%s233_s3 + $0x8] sm:$0xff]  ;;  %v51_v15 = vld [vmem:[%s233_s3 + $0x10] sm:$0xff] }
   0x5   :  { %v57_v7 = vmax.f32 %v41_v2, %v49_v4  ;;  %v58_v12 = vmax.f32 %v42_v9, %v50_v10  ;;  %v59_v18 = vmax.f32 %v43_v14, %v51_v15  ;;  %v20_v19 = vld [vmem:[%s230_s0 + $0x18] sm:$0xff]  ;;  %v21_v25 = vld [vmem:[%s230_s0 + $0x20] sm:$0xff]  ;;  %v22_v32 = vld [vmem:[%s230_s0 + $0x28] sm:$0xff] }
   0x6   :  { %v28_v20 = vld [vmem:[%s231_s1 + $0x18] sm:$0xff]  ;;  %v29_v26 = vld [vmem:[%s231_s1 + $0x20] sm:$0xff]  ;;  %v30_v34 = vld [vmem:[%s231_s1 + $0x28] sm:$0xff] }
   0x7   :  { %v65_v16 = vmax.f32 %v33_v3, %v57_v7  ;;  %v44_v21 = vld [vmem:[%s232_s2 + $0x18] sm:$0xff]  ;;  %v66_v22 = vmax.f32 %v34_v8, %v58_v12  ;;  %v36_v23 = vmax.f32 %v20_v19, %v28_v20  ;;  %v67_v27 = vmax.f32 %v35_v17, %v59_v18  ;;  %v45_v30 = vld [vmem:[%s232_s2 + $0x20] sm:$0xff]  ;;  %v46_v35 = vld [vmem:[%s232_s2 + $0x28] sm:$0xff] }
   0x8   :  { %v52_v24 = vld [vmem:[%s233_s3 + $0x18] sm:$0xff]  ;;  %v37_v29 = vmax.f32 %v21_v25, %v29_v26  ;;  %v53_v31 = vld [vmem:[%s233_s3 + $0x20] sm:$0xff]  ;;  %v54_v36 = vld [vmem:[%s233_s3 + $0x28] sm:$0xff]  ;;  %v38_v38 = vmax.f32 %v22_v32, %v30_v34 }
   0x9   :  { %73 = vst [vmem:[%s234_s4] sm:$0xff] %v65_v16  ;;  %v60_v28 = vmax.f32 %v44_v21, %v52_v24  ;;  %v61_v33 = vmax.f32 %v45_v30, %v53_v31  ;;  %v62_v39 = vmax.f32 %v46_v35, %v54_v36  ;;  %v23_v40 = vld [vmem:[%s230_s0 + $0x30] sm:$0xff]  ;;  %v24_v46 = vld [vmem:[%s230_s0 + $0x38] sm:$0xff] }
   0xa   :  { %74 = vst [vmem:[%s234_s4 + $0x8] sm:$0xff] %v66_v22  ;;  %v31_v41 = vld [vmem:[%s231_s1 + $0x30] sm:$0xff]  ;;  %v32_v47 = vld [vmem:[%s231_s1 + $0x38] sm:$0xff] }
   0xb   :  { %75 = vst [vmem:[%s234_s4 + $0x10] sm:$0xff] %v67_v27  ;;  %v68_v37 = vmax.f32 %v36_v23, %v60_v28  ;;  %v47_v42 = vld [vmem:[%s232_s2 + $0x30] sm:$0xff]  ;;  %v69_v43 = vmax.f32 %v37_v29, %v61_v33  ;;  %v39_v44 = vmax.f32 %v23_v40, %v31_v41  ;;  %v70_v48 = vmax.f32 %v38_v38, %v62_v39  ;;  %v48_v51 = vld [vmem:[%s232_s2 + $0x38] sm:$0xff] }
   0xc   :  { %v55_v45 = vld [vmem:[%s233_s3 + $0x30] sm:$0xff]  ;;  %v40_v50 = vmax.f32 %v24_v46, %v32_v47  ;;  %v56_v52 = vld [vmem:[%s233_s3 + $0x38] sm:$0xff] }
   0xd   :  { %76 = vst [vmem:[%s234_s4 + $0x18] sm:$0xff] %v68_v37  ;;  %v63_v49 = vmax.f32 %v47_v42, %v55_v45  ;;  %v64_v53 = vmax.f32 %v48_v51, %v56_v52 }
   0xe   :  { %77 = vst [vmem:[%s234_s4 + $0x20] sm:$0xff] %v69_v43 }
   0xf   :  { %78 = vst [vmem:[%s234_s4 + $0x28] sm:$0xff] %v70_v48  ;;  %v71_v54 = vmax.f32 %v39_v44, %v63_v49  ;;  %v72_v55 = vmax.f32 %v40_v50, %v64_v53 }
  0x11   :  { %79 = vst [vmem:[%s234_s4 + $0x30] sm:$0xff] %v71_v54 }
  0x12   :  { %80 = vst [vmem:[%s234_s4 + $0x38] sm:$0xff] %v72_v55 }

// kernel: _lambda_.18
= control target key start
LH: loop header
LB: loop body
LE: loop exit
PB: predicated region body
PF: predicated region fallthrough
CT: control target
= control target key end

     0   :  { %s1005_s12 = smov 0   ;;  %s1007_s13 = smov 0   ;;  %s1161_s0 = inlined_call_operand.vmem [shape: bf16[128,640], index: 0, kind: input, shape index: {}]   ;;  %s1162_s1 = inlined_call_operand.vmem [shape: bf16[640,128], index: 1, kind: input, shape index: {}]   ;;  %s1163_s2 = inlined_call_operand.vmem [shape: f32[1,128], index: 2, kind: input, shape index: {}]   ;;  %s1164_s3 = inlined_call_operand.vmem [shape: f32[128,128], index: 3, kind: output, shape index: {}]  }
   0x1   :  { %s1009_s14 = smov 0   ;;  %s1011_s15 = smov 0  }
   0x2   :  { %s1013_s16 = smov 0  }
   0x3 LB: > { %s25_s17 = sadd.s32 1, %s978_s15  ;;  %p48_p1 = scmp.ne.s32.totalorder %s970_s13, %s966_s12  ;;  %s982_s16 = sphi %s1013_s16, %s13_s16   ;;  %s978_s15 = sphi %s1011_s15, %s1168_s15   ;;  %s974_s14 = sphi %s1009_s14, %s1167_s14   ;;  %s970_s13 = sphi %s1007_s13, %s1166_s13   ;;  %s966_s12 = sphi %s1005_s12, %s1165_s12  }
   0x4   : > { %p26_p0 = scmp.ge.s32.totalorder %s25_s17, 5  ;;  %p49_p2 = scmp.eq.s32.totalorder %s982_s16, 0 }
   0x5   : > { %s41_s19 = sadd.s32 1, %s970_s13  ;;  %p785_p5 = scmp.ge.s32.totalorder %s982_s16, 5 }
   0x6   : > { %s1170_s17 = smov (%p26_p0, %s25_s17), 0  ;;  %p50_p3 = por %p49_p2, %p48_p1 }
   0x7   : > { %s37_s18 = ssub.s32 %s978_s15, %s1170_s17  ;;  %162 = sbr.rel (%p785_p5) target bundleno = 32 (0x20), region = 20 }
   0x8   : > { %p39_p4 = scmp.eq.s32.totalorder %s37_s18, 0 }
   0xa   : > { %s1040_s20 = scalar_select %p39_p4, %s970_s13, %s41_s19  }
   0xc   : > { %165 = sbr.rel (!%p50_p3) target bundleno = 32 (0x20), region = 24  ;;  %s167_s21 = sand.u32 (%p50_p3), 1, %s970_s13  }
   0xd   : > { %s787_s22 = sshll.u32 (%p50_p3), %s978_s15, 2  ;;  %s786_s23 = sshll.u32 (%p50_p3), %s167_s21, 6 }
   0xe   : > { %s1048_s26 = scalar_lea.vmem (%p50_p3), %s1161_s0, %s787_s22  ;;  %s169_s27 = scalar_lea.vmem (%p50_p3), [#allocation3], %s786_s23 }
   0xf   : > { %v191_v0 = vld [vmem:[%s1048_s26] sm:$0xf] (%p50_p3)  ;;  %v193_v1 = vld [vmem:[%s1048_s26 + $0x14] sm:$0xf] (%p50_p3)  ;;  %v195_v2 = vld [vmem:[%s1048_s26 + $0x28] sm:$0xf] (%p50_p3) }
  0x10   : > { %192 = vst [vmem:[%s169_s27] sm:$0xf] (%p50_p3), %v191_v0  ;;  %v197_v3 = vld [vmem:[%s1048_s26 + $0x3c] sm:$0xf] (%p50_p3)  ;;  %v199_v4 = vld [vmem:[%s1048_s26 + $0x50] sm:$0xf] (%p50_p3) }
  0x11   : > { %194 = vst [vmem:[%s169_s27 + $0x4] sm:$0xf] %v193_v1  ;;  %v201_v5 = vld [vmem:[%s1048_s26 + $0x64] sm:$0xf]  ;;  %v203_v6 = vld [vmem:[%s1048_s26 + $0x78] sm:$0xf] }
  0x12   : > { %196 = vst [vmem:[%s169_s27 + $0x8] sm:$0xf] %v195_v2  ;;  %v205_v7 = vld [vmem:[%s1048_s26 + $0x8c] sm:$0xf]  ;;  %v207_v8 = vld [vmem:[%s1048_s26 + $0xa0] sm:$0xf] }
  0x13   : > { %198 = vst [vmem:[%s169_s27 + $0xc] sm:$0xf] %v197_v3  ;;  %v209_v9 = vld [vmem:[%s1048_s26 + $0xb4] sm:$0xf]  ;;  %v211_v10 = vld [vmem:[%s1048_s26 + $0xc8] sm:$0xf] }
  0x14   : > { %200 = vst [vmem:[%s169_s27 + $0x10] sm:$0xf] %v199_v4  ;;  %v213_v11 = vld [vmem:[%s1048_s26 + $0xdc] sm:$0xf]  ;;  %v215_v12 = vld [vmem:[%s1048_s26 + $0xf0] sm:$0xf] }
  0x15   : > { %202 = vst [vmem:[%s169_s27 + $0x14] sm:$0xf] %v201_v5  ;;  %v217_v13 = vld [vmem:[%s1048_s26 + $0x104] sm:$0xf]  ;;  %v219_v14 = vld [vmem:[%s1048_s26 + $0x118] sm:$0xf] }
  0x16   : > { %204 = vst [vmem:[%s169_s27 + $0x18] sm:$0xf] %v203_v6  ;;  %v221_v15 = vld [vmem:[%s1048_s26 + $0x12c] sm:$0xf] }
  0x17   : > { %206 = vst [vmem:[%s169_s27 + $0x1c] sm:$0xf] %v205_v7 }
  0x18   : > { %208 = vst [vmem:[%s169_s27 + $0x20] sm:$0xf] %v207_v8 }
  0x19   : > { %210 = vst [vmem:[%s169_s27 + $0x24] sm:$0xf] %v209_v9 }
  0x1a   : > { %212 = vst [vmem:[%s169_s27 + $0x28] sm:$0xf] %v211_v10 }
  0x1b   : > { %214 = vst [vmem:[%s169_s27 + $0x2c] sm:$0xf] %v213_v11 }
  0x1c   : > { %216 = vst [vmem:[%s169_s27 + $0x30] sm:$0xf] %v215_v12 }
  0x1d   : > { %218 = vst [vmem:[%s169_s27 + $0x34] sm:$0xf] %v217_v13 }
  0x1e   : > { %220 = vst [vmem:[%s169_s27 + $0x38] sm:$0xf] %v219_v14 }
  0x1f   : > { %222 = vst [vmem:[%s169_s27 + $0x3c] sm:$0xf] %v221_v15 }
  0x20 PF: > { %p788_p6 = scmp.ge.s32.totalorder %s982_s16, 1  ;;  %p289_p7 = scmp.lt.s32.totalorder %s982_s16, 6 }
  0x22   : > { %p290_p8 = pnand %p788_p6, %p289_p7 }
  0x23   : > { %s296_s28 = sand.u32 (!%p290_p8), 1, %s966_s12   ;;  %s790_s29 = sshll.u32 (!%p290_p8), %s974_s14, 4 }
  0x24   : > { %293 = sbr.rel (%p290_p8) target bundleno = 277 (0x115), region = 69  ;;  %s789_s30 = sshll.u32 (!%p290_p8), %s296_s28, 6 }
  0x25   : > { %p335_p9 = scmp.lt.s32.totalorder (!%p290_p8), %s790_s29, 79  ;;  %s1075_s8 = scalar_lea.vmem (!%p290_p8), [#allocation3], %s789_s30 }
  0x26   : > { %p792_p10 = scmp.ne.s32.totalorder (!%p290_p8), %s974_s14, 0 }
  0x29   : > { %s1172_s29 = smov (!%p335_p9, %s790_s29), 79  ;;  %358 = sbr.rel (%p792_p10) target bundleno = 63 (0x3f), region = 77 }
  0x2a   : > { %s791_s4 = sshll.u32 %s1172_s29, 2 }
  0x2b   : > { %s1073_s7 = scalar_lea.vmem %s1162_s1, %s791_s4 }
  0x2e   : > { %v984_v16 = vmov 0.0  }
  0x2f   : > { %359 = vst [vmem:[#allocation2 + $0x30] sm:$0xff] %v984_v16 }
  0x30   : > { %360 = vst [vmem:[#allocation2] sm:$0xff] %v984_v16 }
  0x31   : > { %361 = vst [vmem:[#allocation2 + $0x58] sm:$0xff] %v984_v16 }
  0x32   : > { %362 = vst [vmem:[#allocation2 + $0x18] sm:$0xff] %v984_v16 }
  0x33   : > { %363 = vst [vmem:[#allocation2 + $0x50] sm:$0xff] %v984_v16 }
  0x34   : > { %364 = vst [vmem:[#allocation2 + $0x68] sm:$0xff] %v984_v16 }
  0x35   : > { %365 = vst [vmem:[#allocation2 + $0x8] sm:$0xff] %v984_v16 }
  0x36   : > { %366 = vst [vmem:[#allocation2 + $0x48] sm:$0xff] %v984_v16 }
  0x37   : > { %367 = vst [vmem:[#allocation2 + $0x40] sm:$0xff] %v984_v16 }
  0x38   : > { %368 = vst [vmem:[#allocation2 + $0x20] sm:$0xff] %v984_v16 }
  0x39   : > { %369 = vst [vmem:[#allocation2 + $0x10] sm:$0xff] %v984_v16 }
  0x3a   : > { %370 = vst [vmem:[#allocation2 + $0x38] sm:$0xff] %v984_v16 }
  0x3b   : > { %371 = vst [vmem:[#allocation2 + $0x60] sm:$0xff] %v984_v16 }
  0x3c   : > { %372 = vst [vmem:[#allocation2 + $0x70] sm:$0xff] %v984_v16 }
  0x3d   : > { %373 = vst [vmem:[#allocation2 + $0x78] sm:$0xff] %v984_v16 }
  0x3e   : > { %374 = vst [vmem:[#allocation2 + $0x28] sm:$0xff] %v984_v16 }
  0x3f PF: > { %v877_v17 = vld [vmem:[%s1073_s7 + $0x38] sm:$0xff]  ;;  %v876_v18 = vld [vmem:[%s1073_s7 + $0x30] sm:$0xff]  ;;  %v875_v19 = vld [vmem:[%s1073_s7 + $0x28] sm:$0xff]  ;;  %p857_p11 = scmp.ne.s32.totalorder %s974_s14, 4 }
  0x40   : > { %519 = vmatpush.bf16.msra.mxu0 %v877_v17  ;;  %878 = vmatpush.bf16.msra.mxu1 %v877_v17  ;;  %v874_v20 = vld [vmem:[%s1073_s7 + $0x20] sm:$0xff]  ;;  %v873_v21 = vld [vmem:[%s1073_s7 + $0x18] sm:$0xff]  ;;  %v872_v22 = vld [vmem:[%s1073_s7 + $0x10] sm:$0xff] }
  0x41   : > { %879 = vmatpush.bf16.msra.mxu2 %v877_v17  ;;  %880 = vmatpush.bf16.msra.mxu3 %v877_v17  ;;  %v871_v23 = vld [vmem:[%s1073_s7 + $0x8] sm:$0xff]  ;;  %v870_v24 = vld [vmem:[%s1073_s7] sm:$0xff]  ;;  %v864_v26 = vld [vmem:[%s1075_s8 + $0x10] sm:$0xff] }
  0x42   : > { %v862_v25 = vld [vmem:[%s1075_s8] sm:$0xff]  ;;  %v868_v28 = vld [vmem:[%s1075_s8 + $0x30] sm:$0xff]  ;;  %v863_v29 = vld [vmem:[%s1075_s8 + $0x8] sm:$0xff] }
  0x43   : > { %v866_v27 = vld [vmem:[%s1075_s8 + $0x20] sm:$0xff]  ;;  %v865_v30 = vld [vmem:[%s1075_s8 + $0x18] sm:$0xff]  ;;  %v867_v31 = vld [vmem:[%s1075_s8 + $0x28] sm:$0xff] }
  0x44   : > { %520 = vmatpush.bf16.msra.mxu0 %v876_v18  ;;  %881 = vmatpush.bf16.msra.mxu1 %v876_v18  ;;  %v869_v32 = vld [vmem:[%s1075_s8 + $0x38] sm:$0xff]  ;;  %v375_v33 = vld [vmem:[#allocation2 + $0x30] sm:$0xff]  ;;  %v383_v39 = vld [vmem:[#allocation2 + $0x40] sm:$0xff] }
  0x45   : > { %882 = vmatpush.bf16.msra.mxu2 %v876_v18  ;;  %883 = vmatpush.bf16.msra.mxu3 %v876_v18  ;;  %v379_v34 = vld [vmem:[#allocation2 + $0x50] sm:$0xff]  ;;  %v387_v40 = vld [vmem:[#allocation2 + $0x60] sm:$0xff]  ;;  %v380_v42 = vld [vmem:[#allocation2 + $0x68] sm:$0xff] }
  0x46   : > { %v376_v41 = vld [vmem:[#allocation2] sm:$0xff]  ;;  %v388_v52 = vld [vmem:[#allocation2 + $0x70] sm:$0xff]  ;;  %v377_v53 = vld [vmem:[#allocation2 + $0x58] sm:$0xff] }
  0x47   : > { %v384_v51 = vld [vmem:[#allocation2 + $0x20] sm:$0xff]  ;;  %v381_v54 = vld [vmem:[#allocation2 + $0x8] sm:$0xff]  ;;  %v385_v63 = vld [vmem:[#allocation2 + $0x10] sm:$0xff] }
  0x48   : > { %521 = vmatpush.bf16.msra.mxu0 %v875_v19  ;;  %884 = vmatpush.bf16.msra.mxu1 %v875_v19  ;;  %v389_v0 = vld [vmem:[#allocation2 + $0x78] sm:$0xff]  ;;  %v382_v2 = vld [vmem:[#allocation2 + $0x48] sm:$0xff] }
  0x49   : > { %885 = vmatpush.bf16.msra.mxu2 %v875_v19  ;;  %886 = vmatpush.bf16.msra.mxu3 %v875_v19  ;;  %v378_v1 = vld [vmem:[#allocation2 + $0x18] sm:$0xff]  ;;  %v390_v12 = vld [vmem:[#allocation2 + $0x28] sm:$0xff] }
  0x4a   : > { %v386_v11 = vld [vmem:[#allocation2 + $0x38] sm:$0xff] }
  0x4c   : > { %522 = vmatpush.bf16.msra.mxu0 %v874_v20  ;;  %887 = vmatpush.bf16.msra.mxu1 %v874_v20 }
  0x4d   : > { %888 = vmatpush.bf16.msra.mxu2 %v874_v20  ;;  %889 = vmatpush.bf16.msra.mxu3 %v874_v20 }
  0x50   : > { %523 = vmatpush.bf16.msra.mxu0 %v873_v21  ;;  %890 = vmatpush.bf16.msra.mxu1 %v873_v21 }
  0x51   : > { %891 = vmatpush.bf16.msra.mxu2 %v873_v21  ;;  %892 = vmatpush.bf16.msra.mxu3 %v873_v21 }
  0x54   : > { %524 = vmatpush.bf16.msra.mxu0 %v872_v22  ;;  %893 = vmatpush.bf16.msra.mxu1 %v872_v22 }
  0x55   : > { %894 = vmatpush.bf16.msra.mxu2 %v872_v22  ;;  %895 = vmatpush.bf16.msra.mxu3 %v872_v22 }
  0x58   : > { %525 = vmatpush.bf16.msra.mxu0 %v871_v23  ;;  %896 = vmatpush.bf16.msra.mxu1 %v871_v23 }
  0x59   : > { %897 = vmatpush.bf16.msra.mxu2 %v871_v23  ;;  %898 = vmatpush.bf16.msra.mxu3 %v871_v23 }
  0x5c   : > { %526 = vmatpush.bf16.msra.mxu0 %v870_v24  ;;  %899 = vmatpush.bf16.msra.mxu1 %v870_v24 }
  0x5d   : > { %900 = vmatpush.bf16.msra.mxu2 %v870_v24  ;;  %901 = vmatpush.bf16.msra.mxu3 %v870_v24 }
  0x5f   : > { %527 = vmatmul.bf16.vlgmr.msra.gmra.mxu0 %v862_v25  ;;  %537 = vmatmul.bf16.vlgmr.msra.gmra.mxu1 %v864_v26 }
  0x60   : > { %547 = vmatmul.bf16.vlgmr.msra.gmra.mxu2 %v866_v27  ;;  %557 = vmatmul.bf16.vlgmr.msra.gmra.mxu3 %v868_v28 }
  0x6f   : > { %532 = vmatmul.bf16.gmra.mxu0 %v863_v29  ;;  %542 = vmatmul.bf16.gmra.mxu1 %v865_v30 }
  0x70   : > { %552 = vmatmul.bf16.gmra.mxu2 %v867_v31  ;;  %562 = vmatmul.bf16.gmra.mxu3 %v869_v32 }
  0xdc   : > { %v528_v35 = vpop.f32.mrf.mxu0  ;;  %v538_v36 = vpop.f32.mrf.mxu1 }
  0xdd   : > { %v568_v37 = vadd.f32 %v528_v35, %v375_v33  ;;  %v572_v38 = vadd.f32 %v538_v36, %v379_v34 }
  0xdf   : > { %584 = vst [vmem:[#allocation2 + $0x30] sm:$0xff] %v568_v37 }
  0xe0   : > { %588 = vst [vmem:[#allocation2 + $0x50] sm:$0xff] %v572_v38 }
  0xe3   : > { %v548_v43 = vpop.f32.mrf.mxu2  ;;  %v558_v44 = vpop.f32.mrf.mxu3 }
  0xe4   : > { %v576_v45 = vadd.f32 %v548_v43, %v383_v39  ;;  %v580_v46 = vadd.f32 %v558_v44, %v387_v40  ;;  %v530_v47 = vpop.f32.mrf.mxu0  ;;  %v540_v48 = vpop.f32.mrf.mxu1 }
  0xe5   : > { %v569_v49 = vadd.f32 %v530_v47, %v376_v41  ;;  %v573_v50 = vadd.f32 %v540_v48, %v380_v42 }
  0xe6   : > { %592 = vst [vmem:[#allocation2 + $0x40] sm:$0xff] %v576_v45 }
  0xe7   : > { %596 = vst [vmem:[#allocation2 + $0x60] sm:$0xff] %v580_v46 }
  0xe8   : > { %585 = vst [vmem:[#allocation2] sm:$0xff] %v569_v49 }
  0xe9   : > { %589 = vst [vmem:[#allocation2 + $0x68] sm:$0xff] %v573_v50 }
  0xeb   : > { %v550_v55 = vpop.f32.mrf.mxu2  ;;  %v560_v56 = vpop.f32.mrf.mxu3 }
  0xec   : > { %v577_v57 = vadd.f32 %v550_v55, %v384_v51  ;;  %v581_v58 = vadd.f32 %v560_v56, %v388_v52  ;;  %v533_v59 = vpop.f32.mrf.mxu0  ;;  %v543_v60 = vpop.f32.mrf.mxu1 }
  0xed   : > { %v570_v61 = vadd.f32 %v533_v59, %v377_v53  ;;  %v574_v62 = vadd.f32 %v543_v60, %v381_v54 }
  0xee   : > { %593 = vst [vmem:[#allocation2 + $0x20] sm:$0xff] %v577_v57 }
  0xef   : > { %597 = vst [vmem:[#allocation2 + $0x70] sm:$0xff] %v581_v58 }
  0xf0   : > { %586 = vst [vmem:[#allocation2 + $0x58] sm:$0xff] %v570_v61 }
  0xf1   : > { %590 = vst [vmem:[#allocation2 + $0x8] sm:$0xff] %v574_v62 }
  0xf3   : > { %v553_v3 = vpop.f32.mrf.mxu2  ;;  %v563_v4 = vpop.f32.mrf.mxu3 }
  0xf4   : > { %v578_v5 = vadd.f32 %v553_v3, %v385_v63  ;;  %v582_v6 = vadd.f32 %v563_v4, %v389_v0  ;;  %v535_v7 = vpop.f32.mrf.mxu0  ;;  %v545_v8 = vpop.f32.mrf.mxu1 }
  0xf5   : > { %v571_v9 = vadd.f32 %v535_v7, %v378_v1  ;;  %v575_v10 = vadd.f32 %v545_v8, %v382_v2 }
  0xf6   : > { %594 = vst [vmem:[#allocation2 + $0x10] sm:$0xff] %v578_v5 }
  0xf7   : > { %598 = vst [vmem:[#allocation2 + $0x78] sm:$0xff] %v582_v6 }
  0xf8   : > { %587 = vst [vmem:[#allocation2 + $0x18] sm:$0xff] %v571_v9 }
  0xf9   : > { %591 = vst [vmem:[#allocation2 + $0x48] sm:$0xff] %v575_v10 }
  0xfb   : > { %v555_v13 = vpop.f32.mrf.mxu2  ;;  %v565_v14 = vpop.f32.mrf.mxu3  ;;  %603 = sbr.rel (%p857_p11) target bundleno = 277 (0x115), region = 81 }
  0xfc   : > { %v579_v15 = vadd.f32 %v555_v13, %v386_v11  ;;  %v583_v16 = vadd.f32 %v565_v14, %v390_v12 }
  0xfe   : > { %595 = vst [vmem:[#allocation2 + $0x38] sm:$0xff] %v579_v15 }
  0xff   : > { %599 = vst [vmem:[#allocation2 + $0x28] sm:$0xff] %v583_v16 }
 0x100   : > { %v604_v17 = vld [vmem:[#allocation2 + $0x30] sm:$0xff]  ;;  %v943_v18 = vld [vmem:[%s1163_s2] ss:$0 sm:$0xff]  ;;  %v606_v20 = vld [vmem:[#allocation2 + $0x58] sm:$0xff] }
 0x101   : > { %v605_v19 = vld [vmem:[#allocation2] sm:$0xff]  ;;  %v607_v21 = vld [vmem:[#allocation2 + $0x18] sm:$0xff]  ;;  %v624_v22 = vadd.f32 %v943_v18, %v604_v17  ;;  %v626_v24 = vadd.f32 %v943_v18, %v606_v20  ;;  %v608_v26 = vld [vmem:[#allocation2 + $0x50] sm:$0xff] }
 0x102   : > { %v625_v23 = vadd.f32 %v943_v18, %v605_v19  ;;  %v627_v25 = vadd.f32 %v943_v18, %v607_v21  ;;  %v609_v27 = vld [vmem:[#allocation2 + $0x68] sm:$0xff]  ;;  %v628_v29 = vadd.f32 %v943_v18, %v608_v26  ;;  %v612_v32 = vld [vmem:[#allocation2 + $0x40] sm:$0xff]  ;;  %v614_v40 = vld [vmem:[#allocation2 + $0x10] sm:$0xff] }
 0x103   : > { %v610_v28 = vld [vmem:[#allocation2 + $0x8] sm:$0xff]  ;;  %v629_v30 = vadd.f32 %v943_v18, %v609_v27  ;;  %v640_v33 = vmax.f32 %v624_v22, 0.0  ;;  %v642_v35 = vmax.f32 %v626_v24, 0.0  ;;  %v613_v37 = vld [vmem:[#allocation2 + $0x20] sm:$0xff]  ;;  %v632_v42 = vadd.f32 %v943_v18, %v612_v32  ;;  %v617_v49 = vld [vmem:[#allocation2 + $0x70] sm:$0xff] }
 0x104   : > { %v611_v31 = vld [vmem:[#allocation2 + $0x48] sm:$0xff]  ;;  %v641_v34 = vmax.f32 %v625_v23, 0.0  ;;  %v630_v36 = vadd.f32 %v943_v18, %v610_v28  ;;  %v643_v38 = vmax.f32 %v627_v25, 0.0  ;;  %v644_v41 = vmax.f32 %v628_v29, 0.0  ;;  %v616_v46 = vld [vmem:[#allocation2 + $0x60] sm:$0xff]  ;;  %v618_v52 = vld [vmem:[#allocation2 + $0x78] sm:$0xff] }
 0x105   : > { %v631_v39 = vadd.f32 %v943_v18, %v611_v31  ;;  %656 = vst [vmem:[%s1164_s3] sm:$0xff] %v640_v33  ;;  %v615_v43 = vld [vmem:[#allocation2 + $0x38] sm:$0xff]  ;;  %v645_v44 = vmax.f32 %v629_v30, 0.0  ;;  %v633_v45 = vadd.f32 %v943_v18, %v613_v37  ;;  %v634_v48 = vadd.f32 %v943_v18, %v614_v40 }
 0x106   : > { %657 = vst [vmem:[%s1164_s3 + $0x8] sm:$0xff] %v641_v34  ;;  %v646_v47 = vmax.f32 %v630_v36, 0.0  ;;  %v635_v51 = vadd.f32 %v943_v18, %v615_v43  ;;  %v648_v53 = vmax.f32 %v632_v42, 0.0  ;;  %v636_v54 = vadd.f32 %v943_v18, %v616_v46  ;;  %v619_v55 = vld [vmem:[#allocation2 + $0x28] sm:$0xff] }
 0x107   : > { %658 = vst [vmem:[%s1164_s3 + $0x10] sm:$0xff] %v642_v35  ;;  %v647_v50 = vmax.f32 %v631_v39, 0.0  ;;  %v649_v56 = vmax.f32 %v633_v45, 0.0  ;;  %v637_v57 = vadd.f32 %v943_v18, %v617_v49  ;;  %v650_v58 = vmax.f32 %v634_v48, 0.0 }
 0x108   : > { %659 = vst [vmem:[%s1164_s3 + $0x18] sm:$0xff] %v643_v38  ;;  %v638_v59 = vadd.f32 %v943_v18, %v618_v52  ;;  %v651_v60 = vmax.f32 %v635_v51, 0.0  ;;  %v639_v61 = vadd.f32 %v943_v18, %v619_v55  ;;  %v652_v62 = vmax.f32 %v636_v54, 0.0 }
 0x109   : > { %660 = vst [vmem:[%s1164_s3 + $0x20] sm:$0xff] %v644_v41  ;;  %v653_v63 = vmax.f32 %v637_v57, 0.0 }
 0x10a   : > { %661 = vst [vmem:[%s1164_s3 + $0x28] sm:$0xff] %v645_v44  ;;  %v654_v0 = vmax.f32 %v638_v59, 0.0  ;;  %v655_v1 = vmax.f32 %v639_v61, 0.0 }
 0x10b   : > { %662 = vst [vmem:[%s1164_s3 + $0x30] sm:$0xff] %v646_v47 }
 0x10c   : > { %663 = vst [vmem:[%s1164_s3 + $0x38] sm:$0xff] %v647_v50 }
 0x10d   : > { %664 = vst [vmem:[%s1164_s3 + $0x40] sm:$0xff] %v648_v53 }
 0x10e   : > { %665 = vst [vmem:[%s1164_s3 + $0x48] sm:$0xff] %v649_v56 }
 0x10f   : > { %666 = vst [vmem:[%s1164_s3 + $0x50] sm:$0xff] %v650_v58 }
 0x110   : > { %667 = vst [vmem:[%s1164_s3 + $0x58] sm:$0xff] %v651_v60 }
 0x111   : > { %668 = vst [vmem:[%s1164_s3 + $0x60] sm:$0xff] %v652_v62 }
 0x112   : > { %669 = vst [vmem:[%s1164_s3 + $0x68] sm:$0xff] %v653_v63 }
 0x113   : > { %670 = vst [vmem:[%s1164_s3 + $0x70] sm:$0xff] %v654_v0 }
 0x114   : > { %671 = vst [vmem:[%s1164_s3 + $0x78] sm:$0xff] %v655_v1 }
 0x115 PF: > { %s13_s16 = sadd.s32 1, %s982_s16   ;;  %s1165_s12 = smov %s970_s13 }
 0x116   : > { %p10_p12 = scmp.ge.s32.totalorder %s13_s16, 7   ;;  %s1166_s13 = smov %s1040_s20 }
 0x117   : > { %s1167_s14 = smov %s978_s15  ;;  %s1168_s15 = smov %s1170_s17 }
 0x118   :  { %12 = sbr.rel (!%p10_p12) target bundleno = 3 (0x3), region = 122 }

// kernel: _lambda_.19
= control target key start
LH: loop header
LB: loop body
LE: loop exit
PB: predicated region body
PF: predicated region fallthrough
CT: control target
= control target key end

     0   :  { %s1514_s12 = smov 0   ;;  %s1516_s13 = smov 0   ;;  %s1828_s0 = inlined_call_operand.vmem [shape: bf16[128,1152], index: 0, kind: input, shape index: {}]   ;;  %s1829_s1 = inlined_call_operand.vmem [shape: bf16[1152,128], index: 1, kind: input, shape index: {}]   ;;  %s1830_s2 = inlined_call_operand.vmem [shape: f32[1,128], index: 2, kind: input, shape index: {}]   ;;  %s1831_s3 = inlined_call_operand.vmem [shape: f32[128,128], index: 3, kind: output, shape index: {}]  }
   0x1   :  { %s1518_s14 = smov 0   ;;  %s1520_s15 = smov 0  }
   0x2   :  { %s1522_s16 = smov 0  }
   0x3 LB: > { %s25_s17 = sadd.s32 1, %s1487_s15  ;;  %p48_p1 = scmp.ne.s32.totalorder %s1479_s13, %s1475_s12  ;;  %s1491_s16 = sphi %s1522_s16, %s13_s16   ;;  %s1487_s15 = sphi %s1520_s15, %s1835_s15   ;;  %s1483_s14 = sphi %s1518_s14, %s1834_s14   ;;  %s1479_s13 = sphi %s1516_s13, %s1833_s13   ;;  %s1475_s12 = sphi %s1514_s12, %s1832_s12  }
   0x4   : > { %p26_p0 = scmp.ge.s32.totalorder %s25_s17, 3  ;;  %p49_p2 = scmp.eq.s32.totalorder %s1491_s16, 0 }
   0x5   : > { %s41_s19 = sadd.s32 1, %s1479_s13  ;;  %p1102_p5 = scmp.ge.s32.totalorder %s1491_s16, 3 }
   0x6   : > { %s1837_s17 = smov (%p26_p0, %s25_s17), 0  ;;  %p50_p3 = por %p49_p2, %p48_p1 }
   0x7   : > { %s37_s18 = ssub.s32 %s1487_s15, %s1837_s17  ;;  %162 = sbr.rel (%p1102_p5) target bundleno = 49 (0x31), region = 20 }
   0x8   : > { %p39_p4 = scmp.eq.s32.totalorder %s37_s18, 0 }
   0xa   : > { %s1549_s20 = scalar_select %p39_p4, %s1479_s13, %s41_s19  }
   0xc   : > { %165 = sbr.rel (!%p50_p3) target bundleno = 49 (0x31), region = 24  ;;  %s167_s21 = sand.u32 (%p50_p3), 1, %s1479_s13  }
   0xd   : > { %s1336_s22 = smul.u32 (%p50_p3), 12, %s1487_s15 }
   0xe   : > { %s1409_s23 = smul.u32 (%p50_p3), 192, %s167_s21 }
   0xf   : > { %s1557_s26 = scalar_lea.vmem (%p50_p3), %s1828_s0, %s1336_s22 }
  0x10   : > { %v190_v0 = vld [vmem:[%s1557_s26] sm:$0xff] (%p50_p3)  ;;  %v194_v2 = vld [vmem:[%s1557_s26 + $0x48] sm:$0xff] (%p50_p3)  ;;  %s1562_s27 = scalar_lea.vmem (%p50_p3), [#allocation3], %s1409_s23  ;;  %v198_v4 = vld [vmem:[%s1557_s26 + $0x90] sm:$0xff] (%p50_p3) }
  0x11   : > { %v192_v1 = vld [vmem:[%s1557_s26 + $0x24] sm:$0xff]  ;;  %191 = vst [vmem:[%s1562_s27] sm:$0xff] %v190_v0  ;;  %v196_v3 = vld [vmem:[%s1557_s26 + $0x6c] sm:$0xff]  ;;  %v200_v5 = vld [vmem:[%s1557_s26 + $0xb4] sm:$0xff] }
  0x12   : > { %193 = vst [vmem:[%s1562_s27 + $0xc] sm:$0xff] %v192_v1  ;;  %v202_v6 = vld [vmem:[%s1557_s26 + $0xd8] sm:$0xff]  ;;  %v206_v8 = vld [vmem:[%s1557_s26 + $0x120] sm:$0xff]  ;;  %v210_v10 = vld [vmem:[%s1557_s26 + $0x168] sm:$0xff] }
  0x13   : > { %195 = vst [vmem:[%s1562_s27 + $0x18] sm:$0xff] %v194_v2  ;;  %v204_v7 = vld [vmem:[%s1557_s26 + $0xfc] sm:$0xff]  ;;  %v208_v9 = vld [vmem:[%s1557_s26 + $0x144] sm:$0xff]  ;;  %v212_v11 = vld [vmem:[%s1557_s26 + $0x18c] sm:$0xff] }
  0x14   : > { %197 = vst [vmem:[%s1562_s27 + $0x24] sm:$0xff] %v196_v3  ;;  %v214_v12 = vld [vmem:[%s1557_s26 + $0x1b0] sm:$0xff]  ;;  %v218_v14 = vld [vmem:[%s1557_s26 + $0x1f8] sm:$0xff]  ;;  %v1104_v16 = vld [vmem:[%s1557_s26 + $0x8] sm:$0xf] }
  0x15   : > { %199 = vst [vmem:[%s1562_s27 + $0x30] sm:$0xff] %v198_v4  ;;  %v216_v13 = vld [vmem:[%s1557_s26 + $0x1d4] sm:$0xff]  ;;  %v220_v15 = vld [vmem:[%s1557_s26 + $0x21c] sm:$0xff]  ;;  %v1106_v17 = vld [vmem:[%s1557_s26 + $0x2c] sm:$0xf] }
  0x16   : > { %201 = vst [vmem:[%s1562_s27 + $0x3c] sm:$0xff] %v200_v5  ;;  %v1108_v18 = vld [vmem:[%s1557_s26 + $0x50] sm:$0xf]  ;;  %v1110_v19 = vld [vmem:[%s1557_s26 + $0x74] sm:$0xf] }
  0x17   : > { %203 = vst [vmem:[%s1562_s27 + $0x48] sm:$0xff] %v202_v6  ;;  %v1112_v20 = vld [vmem:[%s1557_s26 + $0x98] sm:$0xf]  ;;  %v1114_v21 = vld [vmem:[%s1557_s26 + $0xbc] sm:$0xf] }
  0x18   : > { %205 = vst [vmem:[%s1562_s27 + $0x54] sm:$0xff] %v204_v7  ;;  %v1116_v22 = vld [vmem:[%s1557_s26 + $0xe0] sm:$0xf]  ;;  %v1118_v23 = vld [vmem:[%s1557_s26 + $0x104] sm:$0xf] }
  0x19   : > { %207 = vst [vmem:[%s1562_s27 + $0x60] sm:$0xff] %v206_v8  ;;  %v1120_v24 = vld [vmem:[%s1557_s26 + $0x128] sm:$0xf]  ;;  %v1122_v25 = vld [vmem:[%s1557_s26 + $0x14c] sm:$0xf] }
  0x1a   : > { %209 = vst [vmem:[%s1562_s27 + $0x6c] sm:$0xff] %v208_v9  ;;  %v1124_v26 = vld [vmem:[%s1557_s26 + $0x170] sm:$0xf]  ;;  %v1126_v27 = vld [vmem:[%s1557_s26 + $0x194] sm:$0xf] }
  0x1b   : > { %211 = vst [vmem:[%s1562_s27 + $0x78] sm:$0xff] %v210_v10  ;;  %v1128_v28 = vld [vmem:[%s1557_s26 + $0x1b8] sm:$0xf]  ;;  %v1130_v29 = vld [vmem:[%s1557_s26 + $0x1dc] sm:$0xf] }
  0x1c   : > { %213 = vst [vmem:[%s1562_s27 + $0x84] sm:$0xff] %v212_v11  ;;  %v1132_v30 = vld [vmem:[%s1557_s26 + $0x200] sm:$0xf]  ;;  %v1134_v31 = vld [vmem:[%s1557_s26 + $0x224] sm:$0xf] }
  0x1d   : > { %215 = vst [vmem:[%s1562_s27 + $0x90] sm:$0xff] %v214_v12 }
  0x1e   : > { %217 = vst [vmem:[%s1562_s27 + $0x9c] sm:$0xff] %v216_v13 }
  0x1f   : > { %219 = vst [vmem:[%s1562_s27 + $0xa8] sm:$0xff] %v218_v14 }
  0x20   : > { %221 = vst [vmem:[%s1562_s27 + $0xb4] sm:$0xff] %v220_v15 }
  0x21   : > { %1105 = vst [vmem:[%s1562_s27 + $0x8] sm:$0xf] %v1104_v16 }
  0x22   : > { %1107 = vst [vmem:[%s1562_s27 + $0x14] sm:$0xf] %v1106_v17 }
  0x23   : > { %1109 = vst [vmem:[%s1562_s27 + $0x20] sm:$0xf] %v1108_v18 }
  0x24   : > { %1111 = vst [vmem:[%s1562_s27 + $0x2c] sm:$0xf] %v1110_v19 }
  0x25   : > { %1113 = vst [vmem:[%s1562_s27 + $0x38] sm:$0xf] %v1112_v20 }
  0x26   : > { %1115 = vst [vmem:[%s1562_s27 + $0x44] sm:$0xf] %v1114_v21 }
  0x27   : > { %1117 = vst [vmem:[%s1562_s27 + $0x50] sm:$0xf] %v1116_v22 }
  0x28   : > { %1119 = vst [vmem:[%s1562_s27 + $0x5c] sm:$0xf] %v1118_v23 }
  0x29   : > { %1121 = vst [vmem:[%s1562_s27 + $0x68] sm:$0xf] %v1120_v24 }
  0x2a   : > { %1123 = vst [vmem:[%s1562_s27 + $0x74] sm:$0xf] %v1122_v25 }
  0x2b   : > { %1125 = vst [vmem:[%s1562_s27 + $0x80] sm:$0xf] %v1124_v26 }
  0x2c   : > { %1127 = vst [vmem:[%s1562_s27 + $0x8c] sm:$0xf] %v1126_v27 }
  0x2d   : > { %1129 = vst [vmem:[%s1562_s27 + $0x98] sm:$0xf] %v1128_v28 }
  0x2e   : > { %1131 = vst [vmem:[%s1562_s27 + $0xa4] sm:$0xf] %v1130_v29 }
  0x2f   : > { %1133 = vst [vmem:[%s1562_s27 + $0xb0] sm:$0xf] %v1132_v30 }
  0x30   : > { %1135 = vst [vmem:[%s1562_s27 + $0xbc] sm:$0xf] %v1134_v31 }
  0x31 PF: > { %p1136_p6 = scmp.ge.s32.totalorder %s1491_s16, 1  ;;  %p278_p7 = scmp.lt.s32.totalorder %s1491_s16, 4 }
  0x33   : > { %p279_p8 = pnand %p1136_p6, %p278_p7 }
  0x34   : > { %s285_s28 = sand.u32 (!%p279_p8), 1, %s1475_s12   ;;  %s324_s29 = smul.u32 (!%p279_p8), 48, %s1483_s14 }
  0x35   : > { %282 = sbr.rel (%p279_p8) target bundleno = 360 (0x168), region = 54  ;;  %p1138_p10 = scmp.ne.s32.totalorder (!%p279_p8), %s1483_s14, 0 }
  0x36   : > { %s1410_s30 = smul.u32 (!%p279_p8), 192, %s285_s28  ;;  %p325_p9 = scmp.lt.s32.totalorder (!%p279_p8), %s324_s29, 143 }
  0x38   : > { %s1634_s8 = scalar_lea.vmem (!%p279_p8), [#allocation3], %s1410_s30 }
  0x3a   : > { %s1839_s29 = smov (!%p325_p9, %s324_s29), 143  ;;  %348 = sbr.rel (%p1138_p10) target bundleno = 80 (0x50), region = 62 }
  0x3b   : > { %s1137_s4 = sshll.u32 %s1839_s29, 2 }
  0x3c   : > { %s1632_s7 = scalar_lea.vmem %s1829_s1, %s1137_s4 }
  0x3f   : > { %v1493_v32 = vmov 0.0  }
  0x40   : > { %349 = vst [vmem:[#allocation2 + $0x30] sm:$0xff] %v1493_v32 }
  0x41   : > { %350 = vst [vmem:[#allocation2] sm:$0xff] %v1493_v32 }
  0x42   : > { %351 = vst [vmem:[#allocation2 + $0x58] sm:$0xff] %v1493_v32 }
  0x43   : > { %352 = vst [vmem:[#allocation2 + $0x18] sm:$0xff] %v1493_v32 }
  0x44   : > { %353 = vst [vmem:[#allocation2 + $0x50] sm:$0xff] %v1493_v32 }
  0x45   : > { %354 = vst [vmem:[#allocation2 + $0x68] sm:$0xff] %v1493_v32 }
  0x46   : > { %355 = vst [vmem:[#allocation2 + $0x8] sm:$0xff] %v1493_v32 }
  0x47   : > { %356 = vst [vmem:[#allocation2 + $0x48] sm:$0xff] %v1493_v32 }
  0x48   : > { %357 = vst [vmem:[#allocation2 + $0x40] sm:$0xff] %v1493_v32 }
  0x49   : > { %358 = vst [vmem:[#allocation2 + $0x20] sm:$0xff] %v1493_v32 }
  0x4a   : > { %359 = vst [vmem:[#allocation2 + $0x10] sm:$0xff] %v1493_v32 }
  0x4b   : > { %360 = vst [vmem:[#allocation2 + $0x38] sm:$0xff] %v1493_v32 }
  0x4c   : > { %361 = vst [vmem:[#allocation2 + $0x60] sm:$0xff] %v1493_v32 }
  0x4d   : > { %362 = vst [vmem:[#allocation2 + $0x70] sm:$0xff] %v1493_v32 }
  0x4e   : > { %363 = vst [vmem:[#allocation2 + $0x78] sm:$0xff] %v1493_v32 }
  0x4f   : > { %364 = vst [vmem:[#allocation2 + $0x28] sm:$0xff] %v1493_v32 }
  0x50 PF: > { %v1368_v33 = vld [vmem:[%s1632_s7 + $0x38] sm:$0xff]  ;;  %v1367_v36 = vld [vmem:[%s1632_s7 + $0x30] sm:$0xff]  ;;  %v1366_v39 = vld [vmem:[%s1632_s7 + $0x28] sm:$0xff]  ;;  %p1331_p11 = scmp.ne.s32.totalorder %s1483_s14, 2 }
  0x51   : > { %v1639_v34 = vld [vmem:[%s1632_s7 + $0x78] sm:$0xff]  ;;  %733 = vmatpush.bf16.msra.mxu0 %v1368_v33  ;;  %1385 = vmatpush.bf16.msra.mxu3 %v1368_v33  ;;  %v1648_v37 = vld [vmem:[%s1632_s7 + $0x70] sm:$0xff]  ;;  %v1374_v40 = vld [vmem:[%s1632_s7 + $0x68] sm:$0xff] }
  0x52   : > { %v1642_v35 = vld [vmem:[%s1632_s7 + $0xb8] sm:$0xff]  ;;  %782 = vmatpush.bf16.msra.mxu1 %v1639_v34  ;;  %v1651_v38 = vld [vmem:[%s1632_s7 + $0xb0] sm:$0xff]  ;;  %v1658_v41 = vld [vmem:[%s1632_s7 + $0xa8] sm:$0xff] }
  0x53   : > { %831 = vmatpush.bf16.msra.mxu2 %v1642_v35  ;;  %v1365_v42 = vld [vmem:[%s1632_s7 + $0x20] sm:$0xff]  ;;  %v1364_v45 = vld [vmem:[%s1632_s7 + $0x18] sm:$0xff]  ;;  %v1363_v48 = vld [vmem:[%s1632_s7 + $0x10] sm:$0xff] }
  0x54   : > { %v1373_v43 = vld [vmem:[%s1632_s7 + $0x60] sm:$0xff]  ;;  %v1372_v46 = vld [vmem:[%s1632_s7 + $0x58] sm:$0xff]  ;;  %v1371_v49 = vld [vmem:[%s1632_s7 + $0x50] sm:$0xff] }
  0x55   : > { %734 = vmatpush.bf16.msra.mxu0 %v1367_v36  ;;  %1386 = vmatpush.bf16.msra.mxu3 %v1367_v36  ;;  %v1664_v44 = vld [vmem:[%s1632_s7 + $0xa0] sm:$0xff]  ;;  %v1670_v47 = vld [vmem:[%s1632_s7 + $0x98] sm:$0xff]  ;;  %v1676_v50 = vld [vmem:[%s1632_s7 + $0x90] sm:$0xff] }
  0x56   : > { %783 = vmatpush.bf16.msra.mxu1 %v1648_v37  ;;  %v1362_v51 = vld [vmem:[%s1632_s7 + $0x8] sm:$0xff]  ;;  %v1361_v54 = vld [vmem:[%s1632_s7] sm:$0xff]  ;;  %v1213_v59 = vld [vmem:[%s1634_s8 + $0x90] sm:$0xf] }
  0x57   : > { %832 = vmatpush.bf16.msra.mxu2 %v1651_v38  ;;  %v1370_v52 = vld [vmem:[%s1632_s7 + $0x48] sm:$0xff]  ;;  %v1369_v55 = vld [vmem:[%s1632_s7 + $0x40] sm:$0xff]  ;;  %v1356_v60 = vld [vmem:[%s1634_s8 + $0x98] sm:$0xf0] }
  0x58   : > { %v1682_v53 = vld [vmem:[%s1632_s7 + $0x88] sm:$0xff]  ;;  %v1687_v56 = vld [vmem:[%s1632_s7 + $0x80] sm:$0xff]  ;;  %v1143_v62 = vld [vmem:[%s1634_s8 + $0xc] sm:$0xf0]  ;;  %v1214_v2 = vor.u32 %v1356_v60, %v1213_v59 }
  0x59   : > { %735 = vmatpush.bf16.msra.mxu0 %v1366_v39  ;;  %1387 = vmatpush.bf16.msra.mxu3 %v1366_v39  ;;  %v1141_v57 = vld [vmem:[%s1634_s8] sm:$0xf]  ;;  %v1338_v58 = vld [vmem:[%s1634_s8 + $0x8] sm:$0xf0]  ;;  %v1337_v61 = vld [vmem:[%s1634_s8 + $0x4] sm:$0xf] }
  0x5a   : > { %784 = vmatpush.bf16.msra.mxu1 %v1374_v40  ;;  %v1149_v63 = vld [vmem:[%s1634_s8 + $0x8] sm:$0xf]  ;;  %v1339_v0 = vld [vmem:[%s1634_s8 + $0x10] sm:$0xf0]  ;;  %v1142_v1 = vor.u32 %v1338_v58, %v1141_v57  ;;  %v1146_v3 = vor.u32 %v1337_v61, %v1143_v62  ;;  %v1153_v5 = vld [vmem:[%s1634_s8 + $0x18] sm:$0xf] }
  0x5b   : > { %833 = vmatpush.bf16.msra.mxu2 %v1658_v41  ;;  %v1150_v4 = vor.u32 %v1339_v0, %v1149_v63  ;;  %v1341_v6 = vld [vmem:[%s1634_s8 + $0x20] sm:$0xf0]  ;;  %v1225_v7 = vld [vmem:[%s1634_s8 + $0xa8] sm:$0xf]  ;;  %v1359_v8 = vld [vmem:[%s1634_s8 + $0xb0] sm:$0xf0] }
  0x5c   : > { %v1340_v9 = vld [vmem:[%s1634_s8 + $0x1c] sm:$0xf]  ;;  %v1155_v10 = vld [vmem:[%s1634_s8 + $0x24] sm:$0xf0]  ;;  %v1161_v11 = vld [vmem:[%s1634_s8 + $0x20] sm:$0xf]  ;;  %v1154_v13 = vor.u32 %v1341_v6, %v1153_v5  ;;  %v1226_v14 = vor.u32 %v1359_v8, %v1225_v7 }
  0x5d   : > { %736 = vmatpush.bf16.msra.mxu0 %v1365_v42  ;;  %1388 = vmatpush.bf16.msra.mxu3 %v1365_v42  ;;  %v1342_v12 = vld [vmem:[%s1634_s8 + $0x28] sm:$0xf0]  ;;  %v1158_v15 = vor.u32 %v1340_v9, %v1155_v10  ;;  %v1165_v17 = vld [vmem:[%s1634_s8 + $0x30] sm:$0xf]  ;;  %v1344_v18 = vld [vmem:[%s1634_s8 + $0x38] sm:$0xf0] }
  0x5e   : > { %785 = vmatpush.bf16.msra.mxu1 %v1373_v43  ;;  %v1162_v16 = vor.u32 %v1342_v12, %v1161_v11  ;;  %v1343_v19 = vld [vmem:[%s1634_s8 + $0x34] sm:$0xf]  ;;  %v1215_v21 = vld [vmem:[%s1634_s8 + $0x9c] sm:$0xf0]  ;;  %v1173_v23 = vld [vmem:[%s1634_s8 + $0x38] sm:$0xf]  ;;  %v1166_v25 = vor.u32 %v1344_v18, %v1165_v17 }
  0x5f   : > { %834 = vmatpush.bf16.msra.mxu2 %v1664_v44  ;;  %v1355_v20 = vld [vmem:[%s1634_s8 + $0x94] sm:$0xf]  ;;  %v1167_v22 = vld [vmem:[%s1634_s8 + $0x3c] sm:$0xf0]  ;;  %v1345_v24 = vld [vmem:[%s1634_s8 + $0x40] sm:$0xf0] }
  0x60   : > { %v1218_v26 = vor.u32 %v1355_v20, %v1215_v21  ;;  %v1170_v27 = vor.u32 %v1343_v19, %v1167_v22  ;;  %v1174_v28 = vor.u32 %v1345_v24, %v1173_v23  ;;  %v1177_v29 = vld [vmem:[%s1634_s8 + $0x48] sm:$0xf]  ;;  %v1347_v30 = vld [vmem:[%s1634_s8 + $0x50] sm:$0xf0]  ;;  %v1346_v31 = vld [vmem:[%s1634_s8 + $0x4c] sm:$0xf] }
  0x61   : > { %737 = vmatpush.bf16.msra.mxu0 %v1364_v45  ;;  %1389 = vmatpush.bf16.msra.mxu3 %v1364_v45  ;;  %v1358_v32 = vld [vmem:[%s1634_s8 + $0xac] sm:$0xf]  ;;  %v1227_v33 = vld [vmem:[%s1634_s8 + $0xb4] sm:$0xf0]  ;;  %v1348_v36 = vld [vmem:[%s1634_s8 + $0x58] sm:$0xf0] }
  0x62   : > { %786 = vmatpush.bf16.msra.mxu1 %v1372_v46  ;;  %v1230_v39 = vor.u32 %v1358_v32, %v1227_v33  ;;  %v1350_v42 = vld [vmem:[%s1634_s8 + $0x68] sm:$0xf0]  ;;  %v1357_v45 = vld [vmem:[%s1634_s8 + $0xa0] sm:$0xf0]  ;;  %v1233_v57 = vld [vmem:[%s1634_s8 + $0xb0] sm:$0xf] }
  0x63   : > { %835 = vmatpush.bf16.msra.mxu2 %v1670_v47  ;;  %v1203_v58 = vld [vmem:[%s1634_s8 + $0x84] sm:$0xf0]  ;;  %v1209_v59 = vld [vmem:[%s1634_s8 + $0x80] sm:$0xf]  ;;  %v1354_v60 = vld [vmem:[%s1634_s8 + $0x88] sm:$0xf0] }
  0x64   : > { %v1210_v0 = vor.u32 %v1354_v60, %v1209_v59  ;;  %v365_v5 = vld [vmem:[#allocation2 + $0x30] sm:$0xff]  ;;  %v367_v21 = vld [vmem:[#allocation2 + $0x58] sm:$0xff] }
  0x65   : > { %738 = vmatpush.bf16.msra.mxu0 %v1363_v48  ;;  %1390 = vmatpush.bf16.msra.mxu3 %v1363_v48  ;;  %v1351_v48 = vld [vmem:[%s1634_s8 + $0x70] sm:$0xf0] }
  0x66   : > { %787 = vmatpush.bf16.msra.mxu1 %v1371_v49 }
  0x67   : > { %836 = vmatpush.bf16.msra.mxu2 %v1676_v50 }
  0x69   : > { %739 = vmatpush.bf16.msra.mxu0 %v1362_v51  ;;  %1391 = vmatpush.bf16.msra.mxu3 %v1362_v51 }
  0x6a   : > { %788 = vmatpush.bf16.msra.mxu1 %v1370_v52 }
  0x6b   : > { %837 = vmatpush.bf16.msra.mxu2 %v1682_v53 }
  0x6d   : > { %740 = vmatpush.bf16.msra.mxu0 %v1361_v54  ;;  %1392 = vmatpush.bf16.msra.mxu3 %v1361_v54  ;;  %v1353_v54 = vld [vmem:[%s1634_s8 + $0x80] sm:$0xf0] }
  0x6e   : > { %789 = vmatpush.bf16.msra.mxu1 %v1369_v55 }
  0x6f   : > { %838 = vmatpush.bf16.msra.mxu2 %v1687_v56 }
  0x70   : > { %741 = vmatmul.bf16.vlgmr.msra.gmra.mxu0 %v1142_v1  ;;  %771 = vmatmul.bf16.vlgmr.msra.gmra.mxu3 %v1214_v2 }
  0x71   : > { %1393 = vmatpush.bf16.msrb.mxu3 %v1639_v34  ;;  %790 = vmatmul.bf16.vlgmr.msra.gmra.mxu1 %v1146_v3  ;;  %v1179_v34 = vld [vmem:[%s1634_s8 + $0x54] sm:$0xf0] }
  0x72   : > { %839 = vmatmul.bf16.vlgmr.msra.gmra.mxu2 %v1150_v4 }
  0x75   : > { %1394 = vmatpush.bf16.msrb.mxu3 %v1648_v37  ;;  %v1178_v37 = vor.u32 %v1347_v30, %v1177_v29  ;;  %v368_v29 = vld [vmem:[#allocation2 + $0x18] sm:$0xff] }
  0x79   : > { %1395 = vmatpush.bf16.msrb.mxu3 %v1374_v40 }
  0x7d   : > { %1396 = vmatpush.bf16.msrb.mxu3 %v1373_v43  ;;  %v1349_v43 = vld [vmem:[%s1634_s8 + $0x64] sm:$0xf] }
  0x80   : > { %746 = vmatmul.bf16.gmra.mxu0 %v1154_v13  ;;  %776 = vmatmul.bf16.gmra.mxu3 %v1226_v14  ;;  %v366_v13 = vld [vmem:[#allocation2] sm:$0xff] }
  0x81   : > { %1397 = vmatpush.bf16.msrb.mxu3 %v1372_v46  ;;  %795 = vmatmul.bf16.gmra.mxu1 %v1158_v15  ;;  %v1191_v46 = vld [vmem:[%s1634_s8 + $0x6c] sm:$0xf0] }
  0x82   : > { %844 = vmatmul.bf16.gmra.mxu2 %v1162_v16  ;;  %v1194_v51 = vor.u32 %v1349_v43, %v1191_v46 }
  0x85   : > { %1398 = vmatpush.bf16.msrb.mxu3 %v1371_v49 }
  0x89   : > { %1399 = vmatpush.bf16.msrb.mxu3 %v1370_v52 }
  0x8d   : > { %1400 = vmatpush.bf16.msrb.mxu3 %v1369_v55  ;;  %v1352_v55 = vld [vmem:[%s1634_s8 + $0x7c] sm:$0xf] }
  0x8e   : > { %v1206_v63 = vor.u32 %v1352_v55, %v1203_v58 }
  0x90   : > { %751 = vmatmul.bf16.gmra.mxu0 %v1166_v25  ;;  %820 = vmatmul.bf16.vlgmr.msrb.gmra.mxu3 %v1218_v26 }
  0x91   : > { %1401 = vmatpush.bf16.msra.mxu3 %v1642_v35  ;;  %800 = vmatmul.bf16.gmra.mxu1 %v1170_v27  ;;  %v1185_v35 = vld [vmem:[%s1634_s8 + $0x50] sm:$0xf] }
  0x92   : > { %849 = vmatmul.bf16.gmra.mxu2 %v1174_v28  ;;  %v1186_v40 = vor.u32 %v1348_v36, %v1185_v35 }
  0x95   : > { %1402 = vmatpush.bf16.msra.mxu3 %v1651_v38  ;;  %v1182_v38 = vor.u32 %v1346_v31, %v1179_v34 }
  0x99   : > { %1403 = vmatpush.bf16.msra.mxu3 %v1658_v41  ;;  %v1189_v41 = vld [vmem:[%s1634_s8 + $0x60] sm:$0xf] }
  0x9a   : > { %v1190_v49 = vor.u32 %v1350_v42, %v1189_v41 }
  0x9d   : > { %1404 = vmatpush.bf16.msra.mxu3 %v1664_v44  ;;  %v1221_v44 = vld [vmem:[%s1634_s8 + $0x98] sm:$0xf] }
  0xa0   : > { %756 = vmatmul.bf16.gmra.mxu0 %v1178_v37  ;;  %825 = vmatmul.bf16.gmra.mxu3 %v1230_v39  ;;  %v369_v37 = vld [vmem:[#allocation2 + $0x50] sm:$0xff] }
  0xa1   : > { %1405 = vmatpush.bf16.msra.mxu3 %v1670_v47  ;;  %805 = vmatmul.bf16.gmra.mxu1 %v1182_v38  ;;  %v1197_v47 = vld [vmem:[%s1634_s8 + $0x68] sm:$0xf] }
  0xa2   : > { %854 = vmatmul.bf16.gmra.mxu2 %v1186_v40  ;;  %v1198_v52 = vor.u32 %v1351_v48, %v1197_v47 }
  0xa5   : > { %1406 = vmatpush.bf16.msra.mxu3 %v1676_v50  ;;  %v1222_v50 = vor.u32 %v1357_v45, %v1221_v44  ;;  %v370_v45 = vld [vmem:[#allocation2 + $0x68] sm:$0xff] }
  0xa9   : > { %1407 = vmatpush.bf16.msra.mxu3 %v1682_v53  ;;  %v1201_v53 = vld [vmem:[%s1634_s8 + $0x78] sm:$0xf] }
  0xaa   : > { %v1202_v61 = vor.u32 %v1353_v54, %v1201_v53  ;;  %v371_v53 = vld [vmem:[#allocation2 + $0x8] sm:$0xff] }
  0xad   : > { %1408 = vmatpush.bf16.msra.mxu3 %v1687_v56  ;;  %v1360_v56 = vld [vmem:[%s1634_s8 + $0xb8] sm:$0xf0] }
  0xae   : > { %v1234_v62 = vor.u32 %v1360_v56, %v1233_v57 }
  0xb0   : > { %761 = vmatmul.bf16.gmra.mxu0 %v1190_v49  ;;  %869 = vmatmul.bf16.vlgmr.msra.gmra.mxu3 %v1222_v50 }
  0xb1   : > { %810 = vmatmul.bf16.gmra.mxu1 %v1194_v51 }
  0xb2   : > { %859 = vmatmul.bf16.gmra.mxu2 %v1198_v52 }
  0xc0   : > { %766 = vmatmul.bf16.gmra.mxu0 %v1202_v61  ;;  %874 = vmatmul.bf16.gmra.mxu3 %v1234_v62  ;;  %v372_v61 = vld [vmem:[#allocation2 + $0x48] sm:$0xff] }
  0xc1   : > { %815 = vmatmul.bf16.gmra.mxu1 %v1206_v63 }
  0xc2   : > { %864 = vmatmul.bf16.gmra.mxu2 %v1210_v0 }
  0xed   : > { %v742_v1 = vpop.f32.mrf.mxu0 }
  0xee   : > { %v791_v2 = vpop.f32.mrf.mxu1 }
  0xef   : > { %v792_v3 = vadd.f32 %v791_v2, %v742_v1 }
  0xf3   : > { %v1749_v4 = vpop.f32.mrf.mxu3 }
  0xf5   : > { %v840_v6 = vpop.f32.mrf.mxu2  ;;  %v744_v8 = vpop.f32.mrf.mxu0 }
  0xf6   : > { %v841_v7 = vadd.f32 %v840_v6, %v792_v3  ;;  %v793_v9 = vpop.f32.mrf.mxu1  ;;  %v377_v6 = vld [vmem:[#allocation2 + $0x60] sm:$0xff] }
  0xf7   : > { %v794_v11 = vadd.f32 %v793_v9, %v744_v8  ;;  %v373_v8 = vld [vmem:[#allocation2 + $0x40] sm:$0xff] }
  0xf8   : > { %v880_v10 = vadd.f32 %v841_v7, %v365_v5 }
  0xfa   : > { %896 = vst [vmem:[#allocation2 + $0x30] sm:$0xff] %v880_v10 }
  0xfb   : > { %v1751_v12 = vpop.f32.mrf.mxu3 }
  0xfd   : > { %v842_v14 = vpop.f32.mrf.mxu2  ;;  %v747_v16 = vpop.f32.mrf.mxu0 }
  0xfe   : > { %v843_v15 = vadd.f32 %v842_v14, %v794_v11  ;;  %v796_v17 = vpop.f32.mrf.mxu1 }
  0xff   : > { %v797_v19 = vadd.f32 %v796_v17, %v747_v16 }
 0x100   : > { %v881_v18 = vadd.f32 %v843_v15, %v366_v13 }
 0x102   : > { %897 = vst [vmem:[#allocation2] sm:$0xff] %v881_v18 }
 0x103   : > { %v1753_v20 = vpop.f32.mrf.mxu3 }
 0x105   : > { %v845_v22 = vpop.f32.mrf.mxu2  ;;  %v749_v24 = vpop.f32.mrf.mxu0 }
 0x106   : > { %v846_v23 = vadd.f32 %v845_v22, %v797_v19  ;;  %v798_v25 = vpop.f32.mrf.mxu1  ;;  %v378_v19 = vld [vmem:[#allocation2 + $0x70] sm:$0xff]  ;;  %v374_v22 = vld [vmem:[#allocation2 + $0x20] sm:$0xff] }
 0x107   : > { %v799_v27 = vadd.f32 %v798_v25, %v749_v24 }
 0x108   : > { %v882_v26 = vadd.f32 %v846_v23, %v367_v21 }
 0x10a   : > { %898 = vst [vmem:[#allocation2 + $0x58] sm:$0xff] %v882_v26 }
 0x10b   : > { %v1755_v28 = vpop.f32.mrf.mxu3 }
 0x10d   : > { %v847_v30 = vpop.f32.mrf.mxu2  ;;  %v752_v32 = vpop.f32.mrf.mxu0 }
 0x10e   : > { %v848_v31 = vadd.f32 %v847_v30, %v799_v27  ;;  %v801_v33 = vpop.f32.mrf.mxu1 }
 0x10f   : > { %v802_v35 = vadd.f32 %v801_v33, %v752_v32  ;;  %v379_v32 = vld [vmem:[#allocation2 + $0x78] sm:$0xff] }
 0x110   : > { %v883_v34 = vadd.f32 %v848_v31, %v368_v29 }
 0x112   : > { %899 = vst [vmem:[#allocation2 + $0x18] sm:$0xff] %v883_v34  ;;  %v375_v34 = vld [vmem:[#allocation2 + $0x10] sm:$0xff] }
 0x113   : > { %v821_v36 = vpop.f32.mrf.mxu3 }
 0x114   : > { %v822_v5 = vadd.f32 %v821_v36, %v1749_v4 }
 0x115   : > { %v850_v39 = vpop.f32.mrf.mxu2  ;;  %v754_v40 = vpop.f32.mrf.mxu0 }
 0x116   : > { %v851_v38 = vadd.f32 %v850_v39, %v802_v35  ;;  %v803_v41 = vpop.f32.mrf.mxu1 }
 0x117   : > { %v804_v43 = vadd.f32 %v803_v41, %v754_v40 }
 0x118   : > { %v884_v42 = vadd.f32 %v851_v38, %v369_v37 }
 0x11a   : > { %900 = vst [vmem:[#allocation2 + $0x50] sm:$0xff] %v884_v42 }
 0x11b   : > { %v823_v44 = vpop.f32.mrf.mxu3 }
 0x11c   : > { %v824_v17 = vadd.f32 %v823_v44, %v1751_v12 }
 0x11d   : > { %v852_v46 = vpop.f32.mrf.mxu2  ;;  %v757_v48 = vpop.f32.mrf.mxu0 }
 0x11e   : > { %v853_v47 = vadd.f32 %v852_v46, %v804_v43  ;;  %v806_v49 = vpop.f32.mrf.mxu1  ;;  %v380_v43 = vld [vmem:[#allocation2 + $0x28] sm:$0xff] }
 0x11f   : > { %v807_v51 = vadd.f32 %v806_v49, %v757_v48 }
 0x120   : > { %v885_v50 = vadd.f32 %v853_v47, %v370_v45  ;;  %v376_v45 = vld [vmem:[#allocation2 + $0x38] sm:$0xff] }
 0x122   : > { %901 = vst [vmem:[#allocation2 + $0x68] sm:$0xff] %v885_v50 }
 0x123   : > { %v826_v52 = vpop.f32.mrf.mxu3 }
 0x124   : > { %v827_v31 = vadd.f32 %v826_v52, %v1753_v20 }
 0x125   : > { %v855_v54 = vpop.f32.mrf.mxu2  ;;  %v759_v57 = vpop.f32.mrf.mxu0 }
 0x126   : > { %v856_v55 = vadd.f32 %v855_v54, %v807_v51  ;;  %v808_v56 = vpop.f32.mrf.mxu1 }
 0x127   : > { %v809_v59 = vadd.f32 %v808_v56, %v759_v57 }
 0x128   : > { %v886_v58 = vadd.f32 %v856_v55, %v371_v53 }
 0x12a   : > { %902 = vst [vmem:[#allocation2 + $0x8] sm:$0xff] %v886_v58 }
 0x12b   : > { %v828_v60 = vpop.f32.mrf.mxu3 }
 0x12c   : > { %v829_v41 = vadd.f32 %v828_v60, %v1755_v28 }
 0x12d   : > { %v857_v62 = vpop.f32.mrf.mxu2  ;;  %v762_v0 = vpop.f32.mrf.mxu0 }
 0x12e   : > { %v858_v63 = vadd.f32 %v857_v62, %v809_v59  ;;  %v811_v1 = vpop.f32.mrf.mxu1 }
 0x12f   : > { %v812_v3 = vadd.f32 %v811_v1, %v762_v0 }
 0x130   : > { %v887_v2 = vadd.f32 %v858_v63, %v372_v61 }
 0x132   : > { %903 = vst [vmem:[#allocation2 + $0x48] sm:$0xff] %v887_v2 }
 0x133   : > { %v870_v7 = vpop.f32.mrf.mxu3 }
 0x134   : > { %v871_v10 = vadd.f32 %v870_v7, %v822_v5 }
 0x135   : > { %v860_v9 = vpop.f32.mrf.mxu2  ;;  %v764_v13 = vpop.f32.mrf.mxu0 }
 0x136   : > { %v861_v11 = vadd.f32 %v860_v9, %v812_v3  ;;  %v892_v14 = vadd.f32 %v871_v10, %v377_v6  ;;  %v813_v15 = vpop.f32.mrf.mxu1 }
 0x137   : > { %v814_v18 = vadd.f32 %v813_v15, %v764_v13 }
 0x138   : > { %v888_v16 = vadd.f32 %v861_v11, %v373_v8  ;;  %908 = vst [vmem:[#allocation2 + $0x60] sm:$0xff] %v892_v14 }
 0x13a   : > { %904 = vst [vmem:[#allocation2 + $0x40] sm:$0xff] %v888_v16 }
 0x13b   : > { %v872_v21 = vpop.f32.mrf.mxu3 }
 0x13c   : > { %v873_v4 = vadd.f32 %v872_v21, %v824_v17 }
 0x13d   : > { %v862_v23 = vpop.f32.mrf.mxu2  ;;  %v767_v26 = vpop.f32.mrf.mxu0 }
 0x13e   : > { %v863_v24 = vadd.f32 %v862_v23, %v814_v18  ;;  %v893_v25 = vadd.f32 %v873_v4, %v378_v19  ;;  %v816_v27 = vpop.f32.mrf.mxu1 }
 0x13f   : > { %v817_v30 = vadd.f32 %v816_v27, %v767_v26 }
 0x140   : > { %v889_v29 = vadd.f32 %v863_v24, %v374_v22  ;;  %909 = vst [vmem:[#allocation2 + $0x70] sm:$0xff] %v893_v25 }
 0x142   : > { %905 = vst [vmem:[#allocation2 + $0x20] sm:$0xff] %v889_v29 }
 0x143   : > { %v875_v33 = vpop.f32.mrf.mxu3 }
 0x144   : > { %v876_v35 = vadd.f32 %v875_v33, %v827_v31 }
 0x145   : > { %v865_v12 = vpop.f32.mrf.mxu2  ;;  %v769_v38 = vpop.f32.mrf.mxu0 }
 0x146   : > { %v866_v36 = vadd.f32 %v865_v12, %v817_v30  ;;  %v894_v37 = vadd.f32 %v876_v35, %v379_v32  ;;  %v818_v40 = vpop.f32.mrf.mxu1 }
 0x147   : > { %v819_v42 = vadd.f32 %v818_v40, %v769_v38 }
 0x148   : > { %v890_v39 = vadd.f32 %v866_v36, %v375_v34  ;;  %910 = vst [vmem:[#allocation2 + $0x78] sm:$0xff] %v894_v37 }
 0x14a   : > { %906 = vst [vmem:[#allocation2 + $0x10] sm:$0xff] %v890_v39 }
 0x14b   : > { %v877_v44 = vpop.f32.mrf.mxu3 }
 0x14c   : > { %v878_v20 = vadd.f32 %v877_v44, %v829_v41 }
 0x14d   : > { %v867_v46 = vpop.f32.mrf.mxu2 }
 0x14e   : > { %v868_v47 = vadd.f32 %v867_v46, %v819_v42  ;;  %v895_v48 = vadd.f32 %v878_v20, %v380_v43  ;;  %915 = sbr.rel (%p1331_p11) target bundleno = 360 (0x168), region = 66 }
 0x150   : > { %v891_v49 = vadd.f32 %v868_v47, %v376_v45  ;;  %911 = vst [vmem:[#allocation2 + $0x28] sm:$0xff] %v895_v48 }
 0x152   : > { %907 = vst [vmem:[#allocation2 + $0x38] sm:$0xff] %v891_v49 }
 0x153   : > { %v916_v50 = vld [vmem:[#allocation2 + $0x30] sm:$0xff]  ;;  %v1452_v51 = vld [vmem:[%s1830_s2] ss:$0 sm:$0xff]  ;;  %v918_v52 = vld [vmem:[#allocation2 + $0x58] sm:$0xff] }
 0x154   : > { %v917_v28 = vld [vmem:[#allocation2] sm:$0xff]  ;;  %v919_v53 = vld [vmem:[#allocation2 + $0x18] sm:$0xff]  ;;  %v936_v54 = vadd.f32 %v1452_v51, %v916_v50  ;;  %v938_v57 = vadd.f32 %v1452_v51, %v918_v52  ;;  %v920_v58 = vld [vmem:[#allocation2 + $0x50] sm:$0xff] }
 0x155   : > { %v937_v55 = vadd.f32 %v1452_v51, %v917_v28  ;;  %v939_v56 = vadd.f32 %v1452_v51, %v919_v53  ;;  %v921_v59 = vld [vmem:[#allocation2 + $0x68] sm:$0xff]  ;;  %v940_v61 = vadd.f32 %v1452_v51, %v920_v58  ;;  %v924_v0 = vld [vmem:[#allocation2 + $0x40] sm:$0xff]  ;;  %v926_v9 = vld [vmem:[#allocation2 + $0x10] sm:$0xff] }
 0x156   : > { %v922_v60 = vld [vmem:[#allocation2 + $0x8] sm:$0xff]  ;;  %v941_v62 = vadd.f32 %v1452_v51, %v921_v59  ;;  %v952_v1 = vmax.f32 %v936_v54, 0.0  ;;  %v954_v3 = vmax.f32 %v938_v57, 0.0  ;;  %v925_v6 = vld [vmem:[#allocation2 + $0x20] sm:$0xff]  ;;  %v944_v11 = vadd.f32 %v1452_v51, %v924_v0  ;;  %v929_v19 = vld [vmem:[#allocation2 + $0x70] sm:$0xff] }
 0x157   : > { %v923_v63 = vld [vmem:[#allocation2 + $0x48] sm:$0xff]  ;;  %v953_v2 = vmax.f32 %v937_v55, 0.0  ;;  %v942_v5 = vadd.f32 %v1452_v51, %v922_v60  ;;  %v955_v7 = vmax.f32 %v939_v56, 0.0  ;;  %v956_v10 = vmax.f32 %v940_v61, 0.0  ;;  %v928_v16 = vld [vmem:[#allocation2 + $0x60] sm:$0xff]  ;;  %v930_v23 = vld [vmem:[#allocation2 + $0x78] sm:$0xff] }
 0x158   : > { %v943_v8 = vadd.f32 %v1452_v51, %v923_v63  ;;  %968 = vst [vmem:[%s1831_s3] sm:$0xff] %v952_v1  ;;  %v957_v14 = vmax.f32 %v941_v62, 0.0  ;;  %v945_v15 = vadd.f32 %v1452_v51, %v925_v6  ;;  %v946_v18 = vadd.f32 %v1452_v51, %v926_v9  ;;  %v931_v25 = vld [vmem:[#allocation2 + $0x28] sm:$0xff] }
 0x159   : > { %v927_v13 = vld [vmem:[#allocation2 + $0x38] sm:$0xff]  ;;  %969 = vst [vmem:[%s1831_s3 + $0x8] sm:$0xff] %v953_v2  ;;  %v958_v17 = vmax.f32 %v942_v5, 0.0  ;;  %v960_v4 = vmax.f32 %v944_v11, 0.0  ;;  %v948_v24 = vadd.f32 %v1452_v51, %v928_v16  ;;  %v949_v27 = vadd.f32 %v1452_v51, %v929_v19 }
 0x15a   : > { %970 = vst [vmem:[%s1831_s3 + $0x10] sm:$0xff] %v954_v3  ;;  %v959_v21 = vmax.f32 %v943_v8, 0.0  ;;  %v947_v22 = vadd.f32 %v1452_v51, %v927_v13  ;;  %v961_v26 = vmax.f32 %v945_v15, 0.0  ;;  %v962_v29 = vmax.f32 %v946_v18, 0.0 }
 0x15b   : > { %971 = vst [vmem:[%s1831_s3 + $0x18] sm:$0xff] %v955_v7  ;;  %v950_v30 = vadd.f32 %v1452_v51, %v930_v23  ;;  %v951_v32 = vadd.f32 %v1452_v51, %v931_v25  ;;  %v964_v33 = vmax.f32 %v948_v24, 0.0  ;;  %v965_v34 = vmax.f32 %v949_v27, 0.0 }
 0x15c   : > { %972 = vst [vmem:[%s1831_s3 + $0x20] sm:$0xff] %v956_v10  ;;  %v963_v31 = vmax.f32 %v947_v22, 0.0 }
 0x15d   : > { %973 = vst [vmem:[%s1831_s3 + $0x28] sm:$0xff] %v957_v14  ;;  %v966_v12 = vmax.f32 %v950_v30, 0.0  ;;  %v967_v35 = vmax.f32 %v951_v32, 0.0 }
 0x15e   : > { %974 = vst [vmem:[%s1831_s3 + $0x30] sm:$0xff] %v958_v17 }
 0x15f   : > { %975 = vst [vmem:[%s1831_s3 + $0x38] sm:$0xff] %v959_v21 }
 0x160   : > { %976 = vst [vmem:[%s1831_s3 + $0x40] sm:$0xff] %v960_v4 }
 0x161   : > { %977 = vst [vmem:[%s1831_s3 + $0x48] sm:$0xff] %v961_v26 }
 0x162   : > { %978 = vst [vmem:[%s1831_s3 + $0x50] sm:$0xff] %v962_v29 }
 0x163   : > { %979 = vst [vmem:[%s1831_s3 + $0x58] sm:$0xff] %v963_v31 }
 0x164   : > { %980 = vst [vmem:[%s1831_s3 + $0x60] sm:$0xff] %v964_v33 }
 0x165   : > { %981 = vst [vmem:[%s1831_s3 + $0x68] sm:$0xff] %v965_v34 }
 0x166   : > { %982 = vst [vmem:[%s1831_s3 + $0x70] sm:$0xff] %v966_v12 }
 0x167   : > { %983 = vst [vmem:[%s1831_s3 + $0x78] sm:$0xff] %v967_v35 }
 0x168 PF: > { %s13_s16 = sadd.s32 1, %s1491_s16   ;;  %s1832_s12 = smov %s1479_s13 }
 0x169   : > { %p10_p12 = scmp.ge.s32.totalorder %s13_s16, 5   ;;  %s1833_s13 = smov %s1549_s20 }
 0x16a   : > { %s1834_s14 = smov %s1487_s15  ;;  %s1835_s15 = smov %s1837_s17 }
 0x16b   :  { %12 = sbr.rel (!%p10_p12) target bundleno = 3 (0x3), region = 113 }

// kernel: _lambda_.20
= control target key start
LH: loop header
LB: loop body
LE: loop exit
PB: predicated region body
PF: predicated region fallthrough
CT: control target
= control target key end

     0   :  { %s138_s0 = inlined_call_operand.vmem [shape: f32[8,512], index: 0, kind: input, shape index: {}]   ;;  %s139_s1 = inlined_call_operand.vmem [shape: f32[8,512], index: 1, kind: input, shape index: {}]   ;;  %s140_s2 = inlined_call_operand.vmem [shape: f32[8,512], index: 2, kind: input, shape index: {}]   ;;  %s141_s3 = inlined_call_operand.vmem [shape: f32[8,512], index: 3, kind: input, shape index: {}]   ;;  %s142_s4 = inlined_call_operand.vmem [shape: f32[8,512], index: 4, kind: output, shape index: {}]  }
   0x1   :  { %v17_v0 = vld [vmem:[%s138_s0] sm:$0xff]  ;;  %v18_v5 = vld [vmem:[%s138_s0 + $0x8] sm:$0xff]  ;;  %v19_v11 = vld [vmem:[%s138_s0 + $0x10] sm:$0xff] }
   0x2   :  { %v21_v1 = vld [vmem:[%s139_s1] sm:$0xff]  ;;  %v22_v6 = vld [vmem:[%s139_s1 + $0x8] sm:$0xff]  ;;  %v23_v13 = vld [vmem:[%s139_s1 + $0x10] sm:$0xff] }
   0x3   :  { %v29_v2 = vld [vmem:[%s140_s2] sm:$0xff]  ;;  %v25_v3 = vmax.f32 %v17_v0, %v21_v1  ;;  %v26_v8 = vmax.f32 %v18_v5, %v22_v6  ;;  %v30_v9 = vld [vmem:[%s140_s2 + $0x8] sm:$0xff]  ;;  %v31_v14 = vld [vmem:[%s140_s2 + $0x10] sm:$0xff]  ;;  %v27_v17 = vmax.f32 %v19_v11, %v23_v13 }
   0x4   :  { %v33_v4 = vld [vmem:[%s141_s3] sm:$0xff]  ;;  %v34_v10 = vld [vmem:[%s141_s3 + $0x8] sm:$0xff]  ;;  %v35_v15 = vld [vmem:[%s141_s3 + $0x10] sm:$0xff] }
   0x5   :  { %v37_v7 = vmax.f32 %v29_v2, %v33_v4  ;;  %v38_v12 = vmax.f32 %v30_v9, %v34_v10  ;;  %v39_v18 = vmax.f32 %v31_v14, %v35_v15  ;;  %v20_v19 = vld [vmem:[%s138_s0 + $0x18] sm:$0xff] }
   0x6   :  { %v24_v20 = vld [vmem:[%s139_s1 + $0x18] sm:$0xff] }
   0x7   :  { %v41_v16 = vmax.f32 %v25_v3, %v37_v7  ;;  %v32_v21 = vld [vmem:[%s140_s2 + $0x18] sm:$0xff]  ;;  %v42_v22 = vmax.f32 %v26_v8, %v38_v12  ;;  %v28_v23 = vmax.f32 %v20_v19, %v24_v20  ;;  %v43_v25 = vmax.f32 %v27_v17, %v39_v18 }
   0x8   :  { %v36_v24 = vld [vmem:[%s141_s3 + $0x18] sm:$0xff] }
   0x9   :  { %45 = vst [vmem:[%s142_s4] sm:$0xff] %v41_v16  ;;  %v40_v26 = vmax.f32 %v32_v21, %v36_v24 }
   0xa   :  { %46 = vst [vmem:[%s142_s4 + $0x8] sm:$0xff] %v42_v22 }
   0xb   :  { %47 = vst [vmem:[%s142_s4 + $0x10] sm:$0xff] %v43_v25  ;;  %v44_v27 = vmax.f32 %v28_v23, %v40_v26 }
   0xd   :  { %48 = vst [vmem:[%s142_s4 + $0x18] sm:$0xff] %v44_v27 }

// kernel: _lambda_.22
= control target key start
LH: loop header
LB: loop body
LE: loop exit
PB: predicated region body
PF: predicated region fallthrough
CT: control target
= control target key end

     0   :  { %s1683_s12 = smov 0   ;;  %s1685_s13 = smov 0   ;;  %s2075_s0 = inlined_call_operand.vmem [shape: bf16[8,1024], index: 0, kind: input, shape index: {}]   ;;  %s2076_s1 = inlined_call_operand.vmem [shape: bf16[1024,1024], index: 1, kind: input, shape index: {}]   ;;  %s2077_s2 = inlined_call_operand.vmem [shape: f32[1,1024], index: 2, kind: input, shape index: {}]   ;;  %s2078_s3 = inlined_call_operand.vmem [shape: f32[8,1024], index: 3, kind: output, shape index: {}]  }
   0x1   :  { %s1687_s14 = smov 0   ;;  %s1689_s15 = smov 0  }
   0x2   :  { %s1691_s16 = smov 0   ;;  %s1693_s17 = smov 0  }
   0x3   :  { %s1695_s18 = smov 0  }
   0x4 LB: > { %s25_s19 = sadd.s32 1, %s1652_s16  ;;  %s28_s20 = sadd.s32 1, %s1656_s17  ;;  %s1660_s18 = sphi %s1695_s18, %s13_s18   ;;  %s1656_s17 = sphi %s1693_s17, %s2084_s17   ;;  %s1652_s16 = sphi %s1691_s16, %s2083_s16   ;;  %s1648_s15 = sphi %s1689_s15, %s2082_s15   ;;  %s1644_s14 = sphi %s1687_s14, %s2081_s14   ;;  %s1640_s13 = sphi %s1685_s13, %s2080_s13   ;;  %s1636_s12 = sphi %s1683_s12, %s2079_s12  }
   0x5   : > { %p26_p0 = scmp.ge.s32.totalorder %s25_s19, 2  ;;  %p76_p1 = scmp.ne.s32.totalorder %s1640_s13, %s1636_s12 }
   0x6   : > { %p77_p2 = scmp.eq.s32.totalorder %s1660_s18, 0  ;;  %s69_s24 = sadd.s32 1, %s1640_s13 }
   0x7   : > { %s2086_s19 = smov (%p26_p0, %s25_s19), 0  ;;  %s2088_s20 = smov (!%p26_p0, %s28_s20), %s1656_s17 }
   0x8   : > { %p78_p3 = por %p77_p2, %p76_p1  ;;  %p30_p4 = scmp.ge.s32.totalorder %s2088_s20, 4 }
   0x9   : > { %s64_s21 = ssub.s32 %s1652_s16, %s2086_s19  ;;  %p1211_p6 = scmp.ge.s32.totalorder %s1660_s18, 8 }
   0xa   : > { %s2090_s20 = smov (%p30_p4, %s2088_s20), 0 }
   0xb   : > { %s65_s22 = ssub.s32 %s1656_s17, %s2090_s20  ;;  %156 = sbr.rel (%p1211_p6) target bundleno = 87 (0x57), region = 16 }
   0xc   : > { %s66_s23 = sor.u32 %s65_s22, %s64_s21 }
   0xd   : > { %p67_p5 = scmp.eq.s32.totalorder %s66_s23, 0 }
   0xf   : > { %s1734_s25 = scalar_select %p67_p5, %s1640_s13, %s69_s24  }
  0x10   : > { %172 = sbr.rel (!%p78_p3) target bundleno = 87 (0x57), region = 24  ;;  %s174_s26 = sand.u32 (%p78_p3), 1, %s1640_s13  }
  0x11   : > { %s1214_s27 = sshll.u32 (%p78_p3), %s1656_s17, 1  ;;  %s1212_s28 = sshll.u32 (%p78_p3), %s174_s26, 9 }
  0x12   : > { %s1484_s29 = sshll.u32 (%p78_p3), %s1652_s16, 9  ;;  %s1748_s8 = scalar_lea.vmem (%p78_p3), [#allocation3], %s1212_s28 }
  0x13   : > { %s180_s30 = sadd.s32 (%p78_p3), %s1484_s29, %s1214_s27 }
  0x14   : > { %s1216_s4 = sshll.u32 (%p78_p3), %s180_s30, 2 }
  0x15   : > { %s1743_s7 = scalar_lea.vmem %s2076_s1, %s1216_s4 }
  0x16   : > { %v337_v0 = vld [vmem:[%s1743_s7] sm:$0xff] }
  0x17   : > { %v339_v1 = vld [vmem:[%s1743_s7 + $0x20] sm:$0xff]  ;;  %338 = vst [vmem:[%s1748_s8] sm:$0xff] %v337_v0 }
  0x18   : > { %v341_v2 = vld [vmem:[%s1743_s7 + $0x40] sm:$0xff]  ;;  %340 = vst [vmem:[%s1748_s8 + $0x8] sm:$0xff] %v339_v1 }
  0x19   : > { %v343_v3 = vld [vmem:[%s1743_s7 + $0x60] sm:$0xff]  ;;  %342 = vst [vmem:[%s1748_s8 + $0x10] sm:$0xff] %v341_v2 }
  0x1a   : > { %v345_v4 = vld [vmem:[%s1743_s7 + $0x80] sm:$0xff]  ;;  %344 = vst [vmem:[%s1748_s8 + $0x18] sm:$0xff] %v343_v3 }
  0x1b   : > { %v347_v5 = vld [vmem:[%s1743_s7 + $0xa0] sm:$0xff]  ;;  %346 = vst [vmem:[%s1748_s8 + $0x20] sm:$0xff] %v345_v4 }
  0x1c   : > { %v349_v6 = vld [vmem:[%s1743_s7 + $0xc0] sm:$0xff]  ;;  %348 = vst [vmem:[%s1748_s8 + $0x28] sm:$0xff] %v347_v5 }
  0x1d   : > { %v351_v7 = vld [vmem:[%s1743_s7 + $0xe0] sm:$0xff]  ;;  %350 = vst [vmem:[%s1748_s8 + $0x30] sm:$0xff] %v349_v6 }
  0x1e   : > { %v353_v8 = vld [vmem:[%s1743_s7 + $0x100] sm:$0xff]  ;;  %352 = vst [vmem:[%s1748_s8 + $0x38] sm:$0xff] %v351_v7 }
  0x1f   : > { %v355_v9 = vld [vmem:[%s1743_s7 + $0x120] sm:$0xff]  ;;  %354 = vst [vmem:[%s1748_s8 + $0x40] sm:$0xff] %v353_v8 }
  0x20   : > { %v357_v10 = vld [vmem:[%s1743_s7 + $0x140] sm:$0xff]  ;;  %356 = vst [vmem:[%s1748_s8 + $0x48] sm:$0xff] %v355_v9 }
  0x21   : > { %v359_v11 = vld [vmem:[%s1743_s7 + $0x160] sm:$0xff]  ;;  %358 = vst [vmem:[%s1748_s8 + $0x50] sm:$0xff] %v357_v10 }
  0x22   : > { %v361_v12 = vld [vmem:[%s1743_s7 + $0x180] sm:$0xff]  ;;  %360 = vst [vmem:[%s1748_s8 + $0x58] sm:$0xff] %v359_v11 }
  0x23   : > { %v363_v13 = vld [vmem:[%s1743_s7 + $0x1a0] sm:$0xff]  ;;  %362 = vst [vmem:[%s1748_s8 + $0x60] sm:$0xff] %v361_v12 }
  0x24   : > { %v365_v14 = vld [vmem:[%s1743_s7 + $0x1c0] sm:$0xff]  ;;  %364 = vst [vmem:[%s1748_s8 + $0x68] sm:$0xff] %v363_v13 }
  0x25   : > { %v367_v15 = vld [vmem:[%s1743_s7 + $0x1e0] sm:$0xff]  ;;  %366 = vst [vmem:[%s1748_s8 + $0x70] sm:$0xff] %v365_v14 }
  0x26   : > { %v369_v16 = vld [vmem:[%s1743_s7 + $0x200] sm:$0xff]  ;;  %368 = vst [vmem:[%s1748_s8 + $0x78] sm:$0xff] %v367_v15 }
  0x27   : > { %v371_v17 = vld [vmem:[%s1743_s7 + $0x220] sm:$0xff]  ;;  %370 = vst [vmem:[%s1748_s8 + $0x80] sm:$0xff] %v369_v16 }
  0x28   : > { %v373_v18 = vld [vmem:[%s1743_s7 + $0x240] sm:$0xff]  ;;  %372 = vst [vmem:[%s1748_s8 + $0x88] sm:$0xff] %v371_v17 }
  0x29   : > { %v375_v19 = vld [vmem:[%s1743_s7 + $0x260] sm:$0xff]  ;;  %374 = vst [vmem:[%s1748_s8 + $0x90] sm:$0xff] %v373_v18 }
  0x2a   : > { %v377_v20 = vld [vmem:[%s1743_s7 + $0x280] sm:$0xff]  ;;  %376 = vst [vmem:[%s1748_s8 + $0x98] sm:$0xff] %v375_v19 }
  0x2b   : > { %v379_v21 = vld [vmem:[%s1743_s7 + $0x2a0] sm:$0xff]  ;;  %378 = vst [vmem:[%s1748_s8 + $0xa0] sm:$0xff] %v377_v20 }
  0x2c   : > { %v381_v22 = vld [vmem:[%s1743_s7 + $0x2c0] sm:$0xff]  ;;  %380 = vst [vmem:[%s1748_s8 + $0xa8] sm:$0xff] %v379_v21 }
  0x2d   : > { %v383_v23 = vld [vmem:[%s1743_s7 + $0x2e0] sm:$0xff]  ;;  %382 = vst [vmem:[%s1748_s8 + $0xb0] sm:$0xff] %v381_v22 }
  0x2e   : > { %v385_v24 = vld [vmem:[%s1743_s7 + $0x300] sm:$0xff]  ;;  %384 = vst [vmem:[%s1748_s8 + $0xb8] sm:$0xff] %v383_v23 }
  0x2f   : > { %v387_v25 = vld [vmem:[%s1743_s7 + $0x320] sm:$0xff]  ;;  %386 = vst [vmem:[%s1748_s8 + $0xc0] sm:$0xff] %v385_v24 }
  0x30   : > { %v389_v26 = vld [vmem:[%s1743_s7 + $0x340] sm:$0xff]  ;;  %388 = vst [vmem:[%s1748_s8 + $0xc8] sm:$0xff] %v387_v25 }
  0x31   : > { %v391_v27 = vld [vmem:[%s1743_s7 + $0x360] sm:$0xff]  ;;  %390 = vst [vmem:[%s1748_s8 + $0xd0] sm:$0xff] %v389_v26 }
  0x32   : > { %v393_v28 = vld [vmem:[%s1743_s7 + $0x380] sm:$0xff]  ;;  %392 = vst [vmem:[%s1748_s8 + $0xd8] sm:$0xff] %v391_v27 }
  0x33   : > { %v395_v29 = vld [vmem:[%s1743_s7 + $0x3a0] sm:$0xff]  ;;  %394 = vst [vmem:[%s1748_s8 + $0xe0] sm:$0xff] %v393_v28 }
  0x34   : > { %v397_v30 = vld [vmem:[%s1743_s7 + $0x3c0] sm:$0xff]  ;;  %396 = vst [vmem:[%s1748_s8 + $0xe8] sm:$0xff] %v395_v29 }
  0x35   : > { %v399_v31 = vld [vmem:[%s1743_s7 + $0x3e0] sm:$0xff]  ;;  %398 = vst [vmem:[%s1748_s8 + $0xf0] sm:$0xff] %v397_v30 }
  0x36   : > { %v401_v32 = vld [vmem:[%s1743_s7 + $0x400] sm:$0xff]  ;;  %400 = vst [vmem:[%s1748_s8 + $0xf8] sm:$0xff] %v399_v31 }
  0x37   : > { %v403_v33 = vld [vmem:[%s1743_s7 + $0x420] sm:$0xff]  ;;  %402 = vst [vmem:[%s1748_s8 + $0x100] sm:$0xff] %v401_v32 }
  0x38   : > { %v405_v34 = vld [vmem:[%s1743_s7 + $0x440] sm:$0xff]  ;;  %404 = vst [vmem:[%s1748_s8 + $0x108] sm:$0xff] %v403_v33 }
  0x39   : > { %v407_v35 = vld [vmem:[%s1743_s7 + $0x460] sm:$0xff]  ;;  %406 = vst [vmem:[%s1748_s8 + $0x110] sm:$0xff] %v405_v34 }
  0x3a   : > { %v409_v36 = vld [vmem:[%s1743_s7 + $0x480] sm:$0xff]  ;;  %408 = vst [vmem:[%s1748_s8 + $0x118] sm:$0xff] %v407_v35 }
  0x3b   : > { %v411_v37 = vld [vmem:[%s1743_s7 + $0x4a0] sm:$0xff]  ;;  %410 = vst [vmem:[%s1748_s8 + $0x120] sm:$0xff] %v409_v36 }
  0x3c   : > { %v413_v38 = vld [vmem:[%s1743_s7 + $0x4c0] sm:$0xff]  ;;  %412 = vst [vmem:[%s1748_s8 + $0x128] sm:$0xff] %v411_v37 }
  0x3d   : > { %v415_v39 = vld [vmem:[%s1743_s7 + $0x4e0] sm:$0xff]  ;;  %414 = vst [vmem:[%s1748_s8 + $0x130] sm:$0xff] %v413_v38 }
  0x3e   : > { %v417_v40 = vld [vmem:[%s1743_s7 + $0x500] sm:$0xff]  ;;  %416 = vst [vmem:[%s1748_s8 + $0x138] sm:$0xff] %v415_v39 }
  0x3f   : > { %v419_v41 = vld [vmem:[%s1743_s7 + $0x520] sm:$0xff]  ;;  %418 = vst [vmem:[%s1748_s8 + $0x140] sm:$0xff] %v417_v40 }
  0x40   : > { %v421_v42 = vld [vmem:[%s1743_s7 + $0x540] sm:$0xff]  ;;  %420 = vst [vmem:[%s1748_s8 + $0x148] sm:$0xff] %v419_v41 }
  0x41   : > { %v423_v43 = vld [vmem:[%s1743_s7 + $0x560] sm:$0xff]  ;;  %422 = vst [vmem:[%s1748_s8 + $0x150] sm:$0xff] %v421_v42 }
  0x42   : > { %v425_v44 = vld [vmem:[%s1743_s7 + $0x580] sm:$0xff]  ;;  %424 = vst [vmem:[%s1748_s8 + $0x158] sm:$0xff] %v423_v43 }
  0x43   : > { %v427_v45 = vld [vmem:[%s1743_s7 + $0x5a0] sm:$0xff]  ;;  %426 = vst [vmem:[%s1748_s8 + $0x160] sm:$0xff] %v425_v44 }
  0x44   : > { %v429_v46 = vld [vmem:[%s1743_s7 + $0x5c0] sm:$0xff]  ;;  %428 = vst [vmem:[%s1748_s8 + $0x168] sm:$0xff] %v427_v45 }
  0x45   : > { %v431_v47 = vld [vmem:[%s1743_s7 + $0x5e0] sm:$0xff]  ;;  %430 = vst [vmem:[%s1748_s8 + $0x170] sm:$0xff] %v429_v46 }
  0x46   : > { %v433_v48 = vld [vmem:[%s1743_s7 + $0x600] sm:$0xff]  ;;  %432 = vst [vmem:[%s1748_s8 + $0x178] sm:$0xff] %v431_v47 }
  0x47   : > { %v435_v49 = vld [vmem:[%s1743_s7 + $0x620] sm:$0xff]  ;;  %434 = vst [vmem:[%s1748_s8 + $0x180] sm:$0xff] %v433_v48 }
  0x48   : > { %v437_v50 = vld [vmem:[%s1743_s7 + $0x640] sm:$0xff]  ;;  %436 = vst [vmem:[%s1748_s8 + $0x188] sm:$0xff] %v435_v49 }
  0x49   : > { %v439_v51 = vld [vmem:[%s1743_s7 + $0x660] sm:$0xff]  ;;  %438 = vst [vmem:[%s1748_s8 + $0x190] sm:$0xff] %v437_v50 }
  0x4a   : > { %v441_v52 = vld [vmem:[%s1743_s7 + $0x680] sm:$0xff]  ;;  %440 = vst [vmem:[%s1748_s8 + $0x198] sm:$0xff] %v439_v51 }
  0x4b   : > { %v443_v53 = vld [vmem:[%s1743_s7 + $0x6a0] sm:$0xff]  ;;  %442 = vst [vmem:[%s1748_s8 + $0x1a0] sm:$0xff] %v441_v52 }
  0x4c   : > { %v445_v54 = vld [vmem:[%s1743_s7 + $0x6c0] sm:$0xff]  ;;  %444 = vst [vmem:[%s1748_s8 + $0x1a8] sm:$0xff] %v443_v53 }
  0x4d   : > { %v447_v55 = vld [vmem:[%s1743_s7 + $0x6e0] sm:$0xff]  ;;  %446 = vst [vmem:[%s1748_s8 + $0x1b0] sm:$0xff] %v445_v54 }
  0x4e   : > { %v449_v56 = vld [vmem:[%s1743_s7 + $0x700] sm:$0xff]  ;;  %448 = vst [vmem:[%s1748_s8 + $0x1b8] sm:$0xff] %v447_v55 }
  0x4f   : > { %v451_v57 = vld [vmem:[%s1743_s7 + $0x720] sm:$0xff]  ;;  %450 = vst [vmem:[%s1748_s8 + $0x1c0] sm:$0xff] %v449_v56 }
  0x50   : > { %v453_v58 = vld [vmem:[%s1743_s7 + $0x740] sm:$0xff]  ;;  %452 = vst [vmem:[%s1748_s8 + $0x1c8] sm:$0xff] %v451_v57 }
  0x51   : > { %v455_v59 = vld [vmem:[%s1743_s7 + $0x760] sm:$0xff]  ;;  %454 = vst [vmem:[%s1748_s8 + $0x1d0] sm:$0xff] %v453_v58 }
  0x52   : > { %v457_v60 = vld [vmem:[%s1743_s7 + $0x780] sm:$0xff]  ;;  %456 = vst [vmem:[%s1748_s8 + $0x1d8] sm:$0xff] %v455_v59 }
  0x53   : > { %v459_v61 = vld [vmem:[%s1743_s7 + $0x7a0] sm:$0xff]  ;;  %458 = vst [vmem:[%s1748_s8 + $0x1e0] sm:$0xff] %v457_v60 }
  0x54   : > { %v461_v62 = vld [vmem:[%s1743_s7 + $0x7c0] sm:$0xff]  ;;  %460 = vst [vmem:[%s1748_s8 + $0x1e8] sm:$0xff] %v459_v61 }
  0x55   : > { %v463_v63 = vld [vmem:[%s1743_s7 + $0x7e0] sm:$0xff]  ;;  %462 = vst [vmem:[%s1748_s8 + $0x1f0] sm:$0xff] %v461_v62 }
  0x56   : > { %464 = vst [vmem:[%s1748_s8 + $0x1f8] sm:$0xff] %v463_v63 }
  0x57 PF: > { %p1217_p7 = scmp.ge.s32.totalorder %s1660_s18, 1  ;;  %p477_p8 = scmp.lt.s32.totalorder %s1660_s18, 9 }
  0x59   : > { %p478_p9 = pnand %p1217_p7, %p477_p8 }
  0x5a   : > { %s484_s9 = sand.u32 (!%p478_p9), 1, %s1636_s12   ;;  %s1219_s10 = sshll.u32 (!%p478_p9), %s1644_s14, 2 }
  0x5b   : > { %481 = sbr.rel (%p478_p9) target bundleno = 326 (0x146), region = 66  ;;  %s1218_s11 = sshll.u32 (!%p478_p9), %s484_s9, 9 }
  0x5c   : > { %p527_p10 = scmp.lt.s32.totalorder (!%p478_p9), %s1219_s10, 7  ;;  %s1221_s21 = sshll.u32 (!%p478_p9), %s1648_s15, 1 }
  0x5d   : > { %p537_p11 = scmp.lt.s32.totalorder (!%p478_p9), %s1221_s21, 7  ;;  %s1897_s5 = scalar_lea.vmem (!%p478_p9), [#allocation3], %s1218_s11 }
  0x5e   : > { %p1224_p12 = scmp.ne.s32.totalorder (!%p478_p9), %s1644_s14, 0 }
  0x60   : > { %s2092_s10 = smov (!%p527_p10, %s1219_s10), 7  ;;  %s2094_s21 = smov (!%p537_p11, %s1221_s21), 7 }
  0x61   : > { %s1220_s22 = sshll.u32 %s2092_s10, 2  ;;  %s539_s12 = scalar_lea.vmem %s2077_s2, %s2094_s21 }
  0x62   : > { %s1883_s26 = scalar_lea.vmem %s2075_s0, %s1220_s22  ;;  %s1223_s29 = sshll.u32 %s2094_s21, 3 }
  0x63   : > { %s1895_s15 = scalar_lea.vmem %s2078_s3, %s1223_s29  ;;  %554 = sbr.rel (%p1224_p12) target bundleno = 107 (0x6b), region = 74 }
  0x68   : > { %v1662_v0 = vmov 0.0  }
  0x69   : > { %555 = vst [vmem:[#allocation2] sm:$0xff] %v1662_v0 }
  0x6a   : > { %556 = vst [vmem:[#allocation2 + $0x8] sm:$0xff] %v1662_v0 }
  0x6b PF: > { %v1283_v1 = vld [vmem:[%s1897_s5 + $0x70] sm:$0xf]  ;;  %v1500_v2 = vld [vmem:[%s1897_s5 + $0x74] sm:$0xf0]  ;;  %v1275_v12 = vld [vmem:[%s1897_s5 + $0x60] sm:$0xf] }
  0x6c   : > { %v1347_v3 = vld [vmem:[%s1897_s5 + $0xf0] sm:$0xf]  ;;  %v1284_v4 = vor.u32 %v1500_v2, %v1283_v1  ;;  %v1516_v5 = vld [vmem:[%s1897_s5 + $0xf4] sm:$0xf0]  ;;  %v1498_v14 = vld [vmem:[%s1897_s5 + $0x64] sm:$0xf0] }
  0x6d   : > { %v1411_v6 = vld [vmem:[%s1897_s5 + $0x170] sm:$0xf]  ;;  %v1532_v7 = vld [vmem:[%s1897_s5 + $0x174] sm:$0xf0]  ;;  %v1348_v8 = vor.u32 %v1516_v5, %v1347_v3  ;;  %v1339_v15 = vld [vmem:[%s1897_s5 + $0xe0] sm:$0xf]  ;;  %v1276_v17 = vor.u32 %v1498_v14, %v1275_v12 }
  0x6e   : > { %v1412_v9 = vor.u32 %v1532_v7, %v1411_v6  ;;  %v1475_v10 = vld [vmem:[%s1897_s5 + $0x1f0] sm:$0xf]  ;;  %v1548_v11 = vld [vmem:[%s1897_s5 + $0x1f4] sm:$0xf0]  ;;  %959 = vmatpush.bf16.msra.mxu0 %v1284_v4  ;;  %v1514_v16 = vld [vmem:[%s1897_s5 + $0xe4] sm:$0xf0] }
  0x6f   : > { %v1476_v13 = vor.u32 %v1548_v11, %v1475_v10  ;;  %972 = vmatpush.bf16.msra.mxu1 %v1348_v8  ;;  %v1340_v18 = vor.u32 %v1514_v16, %v1339_v15  ;;  %v1403_v19 = vld [vmem:[%s1897_s5 + $0x160] sm:$0xf]  ;;  %v1530_v20 = vld [vmem:[%s1897_s5 + $0x164] sm:$0xf0]  ;;  %v1267_v24 = vld [vmem:[%s1897_s5 + $0x50] sm:$0xf] }
  0x70   : > { %985 = vmatpush.bf16.msra.mxu2 %v1412_v9  ;;  %v1467_v21 = vld [vmem:[%s1897_s5 + $0x1e0] sm:$0xf]  ;;  %v1404_v22 = vor.u32 %v1530_v20, %v1403_v19  ;;  %v1546_v23 = vld [vmem:[%s1897_s5 + $0x1e4] sm:$0xf0]  ;;  %v1496_v25 = vld [vmem:[%s1897_s5 + $0x54] sm:$0xf0] }
  0x71   : > { %998 = vmatpush.bf16.msra.mxu3 %v1476_v13  ;;  %v1468_v26 = vor.u32 %v1546_v23, %v1467_v21  ;;  %v1331_v27 = vld [vmem:[%s1897_s5 + $0xd0] sm:$0xf]  ;;  %v1512_v28 = vld [vmem:[%s1897_s5 + $0xd4] sm:$0xf0]  ;;  %v1268_v30 = vor.u32 %v1496_v25, %v1267_v24  ;;  %v1259_v36 = vld [vmem:[%s1897_s5 + $0x40] sm:$0xf] }
  0x72   : > { %v1395_v29 = vld [vmem:[%s1897_s5 + $0x150] sm:$0xf]  ;;  %960 = vmatpush.bf16.msra.mxu0 %v1276_v17  ;;  %v1528_v31 = vld [vmem:[%s1897_s5 + $0x154] sm:$0xf0]  ;;  %v1332_v34 = vor.u32 %v1512_v28, %v1331_v27  ;;  %v1494_v37 = vld [vmem:[%s1897_s5 + $0x44] sm:$0xf0] }
  0x73   : > { %v1459_v32 = vld [vmem:[%s1897_s5 + $0x1d0] sm:$0xf]  ;;  %v1544_v33 = vld [vmem:[%s1897_s5 + $0x1d4] sm:$0xf0]  ;;  %973 = vmatpush.bf16.msra.mxu1 %v1340_v18  ;;  %v1396_v35 = vor.u32 %v1528_v31, %v1395_v29  ;;  %v1323_v38 = vld [vmem:[%s1897_s5 + $0xc0] sm:$0xf]  ;;  %v1260_v45 = vor.u32 %v1494_v37, %v1259_v36 }
  0x74   : > { %986 = vmatpush.bf16.msra.mxu2 %v1404_v22  ;;  %v1460_v39 = vor.u32 %v1544_v33, %v1459_v32  ;;  %v1510_v40 = vld [vmem:[%s1897_s5 + $0xc4] sm:$0xf0]  ;;  %v1387_v41 = vld [vmem:[%s1897_s5 + $0x140] sm:$0xf]  ;;  %v1251_v48 = vld [vmem:[%s1897_s5 + $0x30] sm:$0xf] }
  0x75   : > { %999 = vmatpush.bf16.msra.mxu3 %v1468_v26  ;;  %v1526_v42 = vld [vmem:[%s1897_s5 + $0x144] sm:$0xf0]  ;;  %v1451_v43 = vld [vmem:[%s1897_s5 + $0x1c0] sm:$0xf]  ;;  %v1324_v46 = vor.u32 %v1510_v40, %v1323_v38  ;;  %v1492_v49 = vld [vmem:[%s1897_s5 + $0x34] sm:$0xf0] }
  0x76   : > { %v1542_v44 = vld [vmem:[%s1897_s5 + $0x1c4] sm:$0xf0]  ;;  %961 = vmatpush.bf16.msra.mxu0 %v1268_v30  ;;  %v1388_v47 = vor.u32 %v1526_v42, %v1387_v41  ;;  %v1315_v50 = vld [vmem:[%s1897_s5 + $0xb0] sm:$0xf]  ;;  %v1508_v52 = vld [vmem:[%s1897_s5 + $0xb4] sm:$0xf0]  ;;  %v1252_v57 = vor.u32 %v1492_v49, %v1251_v48 }
  0x77   : > { %974 = vmatpush.bf16.msra.mxu1 %v1332_v34  ;;  %v1452_v51 = vor.u32 %v1542_v44, %v1451_v43  ;;  %v1379_v53 = vld [vmem:[%s1897_s5 + $0x130] sm:$0xf]  ;;  %v1524_v54 = vld [vmem:[%s1897_s5 + $0x134] sm:$0xf0]  ;;  %v1316_v58 = vor.u32 %v1508_v52, %v1315_v50  ;;  %v1243_v60 = vld [vmem:[%s1897_s5 + $0x20] sm:$0xf] }
  0x78   : > { %987 = vmatpush.bf16.msra.mxu2 %v1396_v35  ;;  %v1443_v55 = vld [vmem:[%s1897_s5 + $0x1b0] sm:$0xf]  ;;  %v1540_v56 = vld [vmem:[%s1897_s5 + $0x1b4] sm:$0xf0]  ;;  %v1380_v59 = vor.u32 %v1524_v54, %v1379_v53  ;;  %v1490_v61 = vld [vmem:[%s1897_s5 + $0x24] sm:$0xf0] }
  0x79   : > { %1000 = vmatpush.bf16.msra.mxu3 %v1460_v39  ;;  %v1307_v62 = vld [vmem:[%s1897_s5 + $0xa0] sm:$0xf]  ;;  %v1444_v63 = vor.u32 %v1540_v56, %v1443_v55  ;;  %v1506_v0 = vld [vmem:[%s1897_s5 + $0xa4] sm:$0xf0]  ;;  %v1244_v5 = vor.u32 %v1490_v61, %v1243_v60  ;;  %v1235_v8 = vld [vmem:[%s1897_s5 + $0x10] sm:$0xf] }
  0x7a   : > { %962 = vmatpush.bf16.msra.mxu0 %v1260_v45  ;;  %v1371_v1 = vld [vmem:[%s1897_s5 + $0x120] sm:$0xf]  ;;  %v1522_v2 = vld [vmem:[%s1897_s5 + $0x124] sm:$0xf0]  ;;  %v1308_v6 = vor.u32 %v1506_v0, %v1307_v62  ;;  %v1488_v9 = vld [vmem:[%s1897_s5 + $0x14] sm:$0xf0] }
  0x7b   : > { %975 = vmatpush.bf16.msra.mxu1 %v1324_v46  ;;  %v1435_v3 = vld [vmem:[%s1897_s5 + $0x1a0] sm:$0xf]  ;;  %v1538_v4 = vld [vmem:[%s1897_s5 + $0x1a4] sm:$0xf0]  ;;  %v1372_v7 = vor.u32 %v1522_v2, %v1371_v1  ;;  %v1299_v10 = vld [vmem:[%s1897_s5 + $0x90] sm:$0xf]  ;;  %v1236_v17 = vor.u32 %v1488_v9, %v1235_v8 }
  0x7c   : > { %988 = vmatpush.bf16.msra.mxu2 %v1388_v47  ;;  %v1436_v11 = vor.u32 %v1538_v4, %v1435_v3  ;;  %v1504_v12 = vld [vmem:[%s1897_s5 + $0x94] sm:$0xf0]  ;;  %v1363_v13 = vld [vmem:[%s1897_s5 + $0x110] sm:$0xf]  ;;  %v1227_v18 = vld [vmem:[%s1897_s5] sm:$0xf] }
  0x7d   : > { %1001 = vmatpush.bf16.msra.mxu3 %v1452_v51  ;;  %v1520_v14 = vld [vmem:[%s1897_s5 + $0x114] sm:$0xf0]  ;;  %v1427_v15 = vld [vmem:[%s1897_s5 + $0x190] sm:$0xf]  ;;  %v1486_v19 = vld [vmem:[%s1897_s5 + $0x4] sm:$0xf0]  ;;  %v1300_v21 = vor.u32 %v1504_v12, %v1299_v10 }
  0x7e   : > { %963 = vmatpush.bf16.msra.mxu0 %v1252_v57  ;;  %v1536_v16 = vld [vmem:[%s1897_s5 + $0x194] sm:$0xf0]  ;;  %v1291_v20 = vld [vmem:[%s1897_s5 + $0x80] sm:$0xf]  ;;  %v1364_v22 = vor.u32 %v1520_v14, %v1363_v13  ;;  %v1502_v23 = vld [vmem:[%s1897_s5 + $0x84] sm:$0xf0]  ;;  %v1228_v33 = vor.u32 %v1486_v19, %v1227_v18 }
  0x7f   : > { %976 = vmatpush.bf16.msra.mxu1 %v1316_v58  ;;  %v1355_v24 = vld [vmem:[%s1897_s5 + $0x100] sm:$0xf]  ;;  %v1518_v25 = vld [vmem:[%s1897_s5 + $0x104] sm:$0xf0]  ;;  %v1428_v26 = vor.u32 %v1536_v16, %v1427_v15  ;;  %v1499_v29 = vld [vmem:[%s1897_s5 + $0x74] sm:$0xf]  ;;  %v1292_v38 = vor.u32 %v1502_v23, %v1291_v20 }
  0x80   : > { %989 = vmatpush.bf16.msra.mxu2 %v1380_v59  ;;  %v1419_v27 = vld [vmem:[%s1897_s5 + $0x180] sm:$0xf]  ;;  %v1534_v28 = vld [vmem:[%s1897_s5 + $0x184] sm:$0xf0]  ;;  %v1285_v30 = vld [vmem:[%s1897_s5 + $0x78] sm:$0xf0]  ;;  %v1356_v39 = vor.u32 %v1518_v25, %v1355_v24 }
  0x81   : > { %1002 = vmatpush.bf16.msra.mxu3 %v1444_v63  ;;  %v1515_v31 = vld [vmem:[%s1897_s5 + $0xf4] sm:$0xf]  ;;  %v560_v32 = vld [vmem:[%s1883_s26 + $0x8] sm:$0xff]  ;;  %v1420_v43 = vor.u32 %v1534_v28, %v1419_v27  ;;  %v1288_v44 = vor.u32 %v1499_v29, %v1285_v30  ;;  %v1497_v48 = vld [vmem:[%s1897_s5 + $0x64] sm:$0xf]  ;;  %p1481_p13 = scmp.ne.s32.totalorder %s1644_s14, 1 }
  0x82   : > { %964 = vmatpush.bf16.msra.mxu0 %v1244_v5  ;;  %v1349_v34 = vld [vmem:[%s1897_s5 + $0xf8] sm:$0xf0]  ;;  %v1531_v35 = vld [vmem:[%s1897_s5 + $0x174] sm:$0xf]  ;;  %v629_v37 = vunpack.c.l.b16 %v560_v32  ;;  %v630_v42 = vunpack.c.h.b16 %v560_v32  ;;  %v1277_v49 = vld [vmem:[%s1897_s5 + $0x68] sm:$0xf0] }
  0x83   : > { %977 = vmatpush.bf16.msra.mxu1 %v1308_v6  ;;  %v1413_v36 = vld [vmem:[%s1897_s5 + $0x178] sm:$0xf0]  ;;  %v1547_v40 = vld [vmem:[%s1897_s5 + $0x1f4] sm:$0xf]  ;;  %v1352_v46 = vor.u32 %v1515_v31, %v1349_v34  ;;  %v1513_v50 = vld [vmem:[%s1897_s5 + $0xe4] sm:$0xf]  ;;  %v1280_v62 = vor.u32 %v1497_v48, %v1277_v49 }
  0x84   : > { %990 = vmatpush.bf16.msra.mxu2 %v1372_v7  ;;  %v1477_v41 = vld [vmem:[%s1897_s5 + $0x1f8] sm:$0xf0]  ;;  %v559_v45 = vld [vmem:[%s1883_s26] sm:$0xff]  ;;  %v1416_v47 = vor.u32 %v1531_v35, %v1413_v36  ;;  %v1341_v54 = vld [vmem:[%s1897_s5 + $0xe8] sm:$0xf0]  ;;  %v1980_v57 = vpack.c.b16 %v629_v37, %v629_v37  ;;  %v1984_v60 = vpack.c.b16 %v630_v42, %v630_v42 }
  0x85   : > { %1003 = vmatpush.bf16.msra.mxu3 %v1436_v11  ;;  %v627_v51 = vunpack.c.l.b16 %v559_v45  ;;  %v628_v52 = vunpack.c.h.b16 %v559_v45  ;;  %v1480_v53 = vor.u32 %v1547_v40, %v1477_v41  ;;  %v1529_v55 = vld [vmem:[%s1897_s5 + $0x164] sm:$0xf]  ;;  %v1405_v56 = vld [vmem:[%s1897_s5 + $0x168] sm:$0xf0]  ;;  %v1344_v0 = vor.u32 %v1513_v50, %v1341_v54  ;;  %v1495_v2 = vld [vmem:[%s1897_s5 + $0x54] sm:$0xf] }
  0x86   : > { %965 = vmatpush.bf16.msra.mxu0 %v1236_v17  ;;  %v1545_v58 = vld [vmem:[%s1897_s5 + $0x1e4] sm:$0xf]  ;;  %v1469_v59 = vld [vmem:[%s1897_s5 + $0x1e8] sm:$0xf0]  ;;  %v1408_v1 = vor.u32 %v1529_v55, %v1405_v56  ;;  %v1269_v3 = vld [vmem:[%s1897_s5 + $0x58] sm:$0xf0] }
  0x87   : > { %978 = vmatpush.bf16.msra.mxu1 %v1300_v21  ;;  %v1986_v61 = vpack.c.b16 %v627_v51, %v627_v51  ;;  %v1988_v63 = vpack.c.b16 %v628_v52, %v628_v52  ;;  %v1511_v4 = vld [vmem:[%s1897_s5 + $0xd4] sm:$0xf]  ;;  %v1472_v5 = vor.u32 %v1545_v58, %v1469_v59  ;;  %v1333_v6 = vld [vmem:[%s1897_s5 + $0xd8] sm:$0xf0]  ;;  %v1272_v11 = vor.u32 %v1495_v2, %v1269_v3  ;;  %v1493_v14 = vld [vmem:[%s1897_s5 + $0x44] sm:$0xf] }
  0x88   : > { %991 = vmatpush.bf16.msra.mxu2 %v1364_v22  ;;  %v1527_v7 = vld [vmem:[%s1897_s5 + $0x154] sm:$0xf]  ;;  %v1397_v8 = vld [vmem:[%s1897_s5 + $0x158] sm:$0xf0]  ;;  %v1336_v12 = vor.u32 %v1511_v4, %v1333_v6  ;;  %v1261_v15 = vld [vmem:[%s1897_s5 + $0x48] sm:$0xf0] }
  0x89   : > { %1004 = vmatpush.bf16.msra.mxu3 %v1428_v26  ;;  %v1543_v9 = vld [vmem:[%s1897_s5 + $0x1d4] sm:$0xf]  ;;  %v1461_v10 = vld [vmem:[%s1897_s5 + $0x1d8] sm:$0xf0]  ;;  %v1400_v13 = vor.u32 %v1527_v7, %v1397_v8  ;;  %v1509_v16 = vld [vmem:[%s1897_s5 + $0xc4] sm:$0xf]  ;;  %v1264_v23 = vor.u32 %v1493_v14, %v1261_v15 }
  0x8a   : > { %966 = vmatpush.bf16.msra.mxu0 %v1228_v33  ;;  %v1464_v17 = vor.u32 %v1543_v9, %v1461_v10  ;;  %v1325_v18 = vld [vmem:[%s1897_s5 + $0xc8] sm:$0xf0]  ;;  %v1525_v19 = vld [vmem:[%s1897_s5 + $0x144] sm:$0xf]  ;;  %v1491_v26 = vld [vmem:[%s1897_s5 + $0x34] sm:$0xf] }
  0x8b   : > { %979 = vmatpush.bf16.msra.mxu1 %v1292_v38  ;;  %v1389_v20 = vld [vmem:[%s1897_s5 + $0x148] sm:$0xf0]  ;;  %v1541_v21 = vld [vmem:[%s1897_s5 + $0x1c4] sm:$0xf]  ;;  %v1328_v24 = vor.u32 %v1509_v16, %v1325_v18  ;;  %v1253_v27 = vld [vmem:[%s1897_s5 + $0x38] sm:$0xf0] }
  0x8c   : > { %992 = vmatpush.bf16.msra.mxu2 %v1356_v39  ;;  %v1453_v22 = vld [vmem:[%s1897_s5 + $0x1c8] sm:$0xf0]  ;;  %v1392_v25 = vor.u32 %v1525_v19, %v1389_v20  ;;  %v1507_v28 = vld [vmem:[%s1897_s5 + $0xb4] sm:$0xf]  ;;  %v1317_v30 = vld [vmem:[%s1897_s5 + $0xb8] sm:$0xf0]  ;;  %v1256_v35 = vor.u32 %v1491_v26, %v1253_v27 }
  0x8d   : > { %1005 = vmatpush.bf16.msra.mxu3 %v1420_v43  ;;  %967 = vmatmul.bf16.vlgmr.msra.gmra.mxu0 %v1986_v61  ;;  %v1456_v29 = vor.u32 %v1541_v21, %v1453_v22  ;;  %v1523_v31 = vld [vmem:[%s1897_s5 + $0x134] sm:$0xf]  ;;  %v1381_v32 = vld [vmem:[%s1897_s5 + $0x138] sm:$0xf0]  ;;  %v1320_v36 = vor.u32 %v1507_v28, %v1317_v30  ;;  %v1489_v38 = vld [vmem:[%s1897_s5 + $0x24] sm:$0xf] }
  0x8e   : > { %1011 = vmatpush.bf16.msrb.mxu0 %v1288_v44  ;;  %980 = vmatmul.bf16.vlgmr.msra.gmra.mxu1 %v1988_v63  ;;  %v1539_v33 = vld [vmem:[%s1897_s5 + $0x1b4] sm:$0xf]  ;;  %v1445_v34 = vld [vmem:[%s1897_s5 + $0x1b8] sm:$0xf0]  ;;  %v1384_v37 = vor.u32 %v1523_v31, %v1381_v32  ;;  %v1245_v39 = vld [vmem:[%s1897_s5 + $0x28] sm:$0xf0] }
  0x8f   : > { %1024 = vmatpush.bf16.msrb.mxu1 %v1352_v46  ;;  %993 = vmatmul.bf16.vlgmr.msra.gmra.mxu2 %v1980_v57  ;;  %v1505_v40 = vld [vmem:[%s1897_s5 + $0xa4] sm:$0xf]  ;;  %v1448_v41 = vor.u32 %v1539_v33, %v1445_v34  ;;  %v1309_v42 = vld [vmem:[%s1897_s5 + $0xa8] sm:$0xf0]  ;;  %v1487_v50 = vld [vmem:[%s1897_s5 + $0x14] sm:$0xf] }
  0x90   : > { %1037 = vmatpush.bf16.msrb.mxu2 %v1416_v47  ;;  %1006 = vmatmul.bf16.vlgmr.msra.gmra.mxu3 %v1984_v60  ;;  %v1521_v43 = vld [vmem:[%s1897_s5 + $0x124] sm:$0xf]  ;;  %v1373_v44 = vld [vmem:[%s1897_s5 + $0x128] sm:$0xf0]  ;;  %v1248_v47 = vor.u32 %v1489_v38, %v1245_v39  ;;  %v1312_v48 = vor.u32 %v1505_v40, %v1309_v42  ;;  %v1237_v51 = vld [vmem:[%s1897_s5 + $0x18] sm:$0xf0] }
  0x91   : > { %1050 = vmatpush.bf16.msrb.mxu3 %v1480_v53  ;;  %v1537_v45 = vld [vmem:[%s1897_s5 + $0x1a4] sm:$0xf]  ;;  %v1437_v46 = vld [vmem:[%s1897_s5 + $0x1a8] sm:$0xf0]  ;;  %v1376_v49 = vor.u32 %v1521_v43, %v1373_v44  ;;  %v1503_v52 = vld [vmem:[%s1897_s5 + $0x94] sm:$0xf] }
  0x92   : > { %1012 = vmatpush.bf16.msrb.mxu0 %v1280_v62  ;;  %v1440_v53 = vor.u32 %v1537_v45, %v1437_v46  ;;  %v1301_v54 = vld [vmem:[%s1897_s5 + $0x98] sm:$0xf0]  ;;  %v1519_v55 = vld [vmem:[%s1897_s5 + $0x114] sm:$0xf]  ;;  %v1240_v62 = vor.u32 %v1487_v50, %v1237_v51  ;;  %v1485_v2 = vld [vmem:[%s1897_s5 + $0x4] sm:$0xf] }
  0x93   : > { %1025 = vmatpush.bf16.msrb.mxu1 %v1344_v0  ;;  %v1365_v56 = vld [vmem:[%s1897_s5 + $0x118] sm:$0xf0]  ;;  %v1535_v58 = vld [vmem:[%s1897_s5 + $0x194] sm:$0xf]  ;;  %v1304_v0 = vor.u32 %v1503_v52, %v1301_v54  ;;  %v1229_v3 = vld [vmem:[%s1897_s5 + $0x8] sm:$0xf0] }
  0x94   : > { %1038 = vmatpush.bf16.msrb.mxu2 %v1408_v1  ;;  %v1429_v59 = vld [vmem:[%s1897_s5 + $0x198] sm:$0xf0]  ;;  %v1368_v1 = vor.u32 %v1519_v55, %v1365_v56  ;;  %v1501_v4 = vld [vmem:[%s1897_s5 + $0x84] sm:$0xf]  ;;  %v1293_v6 = vld [vmem:[%s1897_s5 + $0x88] sm:$0xf0] }
  0x95   : > { %1051 = vmatpush.bf16.msrb.mxu3 %v1472_v5  ;;  %v1432_v5 = vor.u32 %v1535_v58, %v1429_v59  ;;  %v1517_v7 = vld [vmem:[%s1897_s5 + $0x104] sm:$0xf]  ;;  %v1357_v8 = vld [vmem:[%s1897_s5 + $0x108] sm:$0xf0]  ;;  %v557_v21 = vld [vmem:[#allocation2] sm:$0xff] }
  0x96   : > { %1013 = vmatpush.bf16.msrb.mxu0 %v1272_v11  ;;  %v1533_v9 = vld [vmem:[%s1897_s5 + $0x184] sm:$0xf]  ;;  %v1421_v10 = vld [vmem:[%s1897_s5 + $0x188] sm:$0xf0]  ;;  %v1232_v11 = vor.u32 %v1485_v2, %v1229_v3  ;;  %v558_v31 = vld [vmem:[#allocation2 + $0x8] sm:$0xff] }
  0x97   : > { %1026 = vmatpush.bf16.msrb.mxu1 %v1336_v12  ;;  %v1296_v12 = vor.u32 %v1501_v4, %v1293_v6  ;;  %v1424_v14 = vor.u32 %v1533_v9, %v1421_v10 }
  0x98   : > { %1039 = vmatpush.bf16.msrb.mxu2 %v1400_v13  ;;  %v1360_v13 = vor.u32 %v1517_v7, %v1357_v8 }
  0x99   : > { %1052 = vmatpush.bf16.msrb.mxu3 %v1464_v17 }
  0x9a   : > { %1014 = vmatpush.bf16.msrb.mxu0 %v1264_v23 }
  0x9b   : > { %1027 = vmatpush.bf16.msrb.mxu1 %v1328_v24 }
  0x9c   : > { %1040 = vmatpush.bf16.msrb.mxu2 %v1392_v25 }
  0x9d   : > { %1053 = vmatpush.bf16.msrb.mxu3 %v1456_v29 }
  0x9e   : > { %1015 = vmatpush.bf16.msrb.mxu0 %v1256_v35 }
  0x9f   : > { %1028 = vmatpush.bf16.msrb.mxu1 %v1320_v36 }
  0xa0   : > { %1041 = vmatpush.bf16.msrb.mxu2 %v1384_v37 }
  0xa1   : > { %1054 = vmatpush.bf16.msrb.mxu3 %v1448_v41 }
  0xa2   : > { %1016 = vmatpush.bf16.msrb.mxu0 %v1248_v47 }
  0xa3   : > { %1029 = vmatpush.bf16.msrb.mxu1 %v1312_v48 }
  0xa4   : > { %1042 = vmatpush.bf16.msrb.mxu2 %v1376_v49 }
  0xa5   : > { %1055 = vmatpush.bf16.msrb.mxu3 %v1440_v53 }
  0xa6   : > { %1017 = vmatpush.bf16.msrb.mxu0 %v1240_v62 }
  0xa7   : > { %1030 = vmatpush.bf16.msrb.mxu1 %v1304_v0 }
  0xa8   : > { %1043 = vmatpush.bf16.msrb.mxu2 %v1368_v1 }
  0xa9   : > { %1056 = vmatpush.bf16.msrb.mxu3 %v1432_v5 }
  0xaa   : > { %1018 = vmatpush.bf16.msrb.mxu0 %v1232_v11 }
  0xab   : > { %1031 = vmatpush.bf16.msrb.mxu1 %v1296_v12 }
  0xac   : > { %1044 = vmatpush.bf16.msrb.mxu2 %v1360_v13 }
  0xad   : > { %1057 = vmatpush.bf16.msrb.mxu3 %v1424_v14  ;;  %1019 = vmatmul.bf16.vlgmr.msrb.gmra.mxu0 %v1986_v61 }
  0xae   : > { %1032 = vmatmul.bf16.vlgmr.msrb.gmra.mxu1 %v1988_v63 }
  0xaf   : > { %1045 = vmatmul.bf16.vlgmr.msrb.gmra.mxu2 %v1980_v57 }
  0xb0   : > { %1058 = vmatmul.bf16.vlgmr.msrb.gmra.mxu3 %v1984_v60 }
 0x10a   : > { %v968_v15 = vpop.f32.mrf.mxu0 }
 0x10b   : > { %v981_v16 = vpop.f32.mrf.mxu1 }
 0x10c   : > { %v982_v17 = vadd.f32 %v981_v16, %v968_v15 }
 0x112   : > { %v994_v18 = vpop.f32.mrf.mxu2  ;;  %v970_v23 = vpop.f32.mrf.mxu0 }
 0x113   : > { %v995_v19 = vadd.f32 %v994_v18, %v982_v17  ;;  %v1007_v20 = vpop.f32.mrf.mxu3  ;;  %v983_v24 = vpop.f32.mrf.mxu1 }
 0x115   : > { %v1008_v22 = vadd.f32 %v1007_v20, %v995_v19 }
 0x117   : > { %v1063_v25 = vadd.f32 %v1008_v22, %v557_v21 }
 0x119   : > { %1065 = vst [vmem:[#allocation2] sm:$0xff] %v1063_v25 }
 0x11a   : > { %v996_v26 = vpop.f32.mrf.mxu2 }
 0x11b   : > { %v1009_v61 = vpop.f32.mrf.mxu3 }
 0x12a   : > { %v1020_v27 = vpop.f32.mrf.mxu0 }
 0x12b   : > { %v1033_v63 = vpop.f32.mrf.mxu1 }
 0x12c   : > { %v1034_v28 = vadd.f32 %v1033_v63, %v1020_v27 }
 0x132   : > { %v1046_v57 = vpop.f32.mrf.mxu2  ;;  %v1022_v30 = vpop.f32.mrf.mxu0 }
 0x133   : > { %v1047_v29 = vadd.f32 %v1046_v57, %v1034_v28  ;;  %v1059_v60 = vpop.f32.mrf.mxu3  ;;  %v1035_v32 = vpop.f32.mrf.mxu1 }
 0x135   : > { %v1060_v33 = vadd.f32 %v1059_v60, %v1047_v29 }
 0x137   : > { %v1064_v34 = vadd.f32 %v1060_v33, %v558_v31  ;;  %1070 = sbr.rel (%p1481_p13) target bundleno = 326 (0x146), region = 78 }
 0x139   : > { %1066 = vst [vmem:[#allocation2 + $0x8] sm:$0xff] %v1064_v34 }
 0x13a   : > { %v1048_v35 = vpop.f32.mrf.mxu2 }
 0x13b   : > { %v1061_v36 = vpop.f32.mrf.mxu3 }
 0x13c   : > { %v1071_v37 = vld [vmem:[#allocation2] sm:$0xff] }
 0x13d   : > { %v1073_v38 = vld [vmem:[%s539_s12] sm:$0x3] }
 0x13e   : > { %v1075_v40 = vperm.slane %v1073_v38, 0  ;;  %v1076_v41 = vperm.slane %v1073_v38, 1 }
 0x140   : > { %v1072_v39 = vld [vmem:[#allocation2 + $0x8] sm:$0xff]  ;;  %v1079_v42 = vadd.f32 %v1075_v40, %v1071_v37 }
 0x141   : > { %v1080_v43 = vadd.f32 %v1076_v41, %v1072_v39 }
 0x142   : > { %v1081_v44 = vmax.f32 %v1079_v42, 0.0 }
 0x143   : > { %v1082_v45 = vmax.f32 %v1080_v43, 0.0 }
 0x144   : > { %1083 = vst [vmem:[%s1895_s15] sm:$0xff] %v1081_v44 }
 0x145   : > { %1084 = vst [vmem:[%s1895_s15 + $0x8] sm:$0xff] %v1082_v45 }
 0x146 PF: > { %s13_s18 = sadd.s32 1, %s1660_s18   ;;  %s2079_s12 = smov %s1640_s13 }
 0x147   : > { %p10_p0 = scmp.ge.s32.totalorder %s13_s18, 10   ;;  %s2080_s13 = smov %s1734_s25 }
 0x148   : > { %s2081_s14 = smov %s1652_s16  ;;  %s2082_s15 = smov %s1656_s17 }
 0x149   : > { %s2083_s16 = smov %s2086_s19  ;;  %s2084_s17 = smov %s2090_s20 }
 0x14a   :  { %12 = sbr.rel (!%p10_p0) target bundleno = 4 (0x4), region = 119 }

// kernel: _lambda_.21
= control target key start
LH: loop header
LB: loop body
LE: loop exit
PB: predicated region body
PF: predicated region fallthrough
CT: control target
= control target key end

     0   :  { %s1683_s12 = smov 0   ;;  %s1685_s13 = smov 0   ;;  %s2075_s0 = inlined_call_operand.vmem [shape: bf16[8,2048], index: 0, kind: input, shape index: {}]   ;;  %s2076_s1 = inlined_call_operand.vmem [shape: bf16[2048,1024], index: 1, kind: input, shape index: {}]   ;;  %s2077_s2 = inlined_call_operand.vmem [shape: f32[1,1024], index: 2, kind: input, shape index: {}]   ;;  %s2078_s3 = inlined_call_operand.vmem [shape: f32[8,1024], index: 3, kind: output, shape index: {}]  }
   0x1   :  { %s1687_s14 = smov 0   ;;  %s1689_s15 = smov 0  }
   0x2   :  { %s1691_s16 = smov 0   ;;  %s1693_s17 = smov 0  }
   0x3   :  { %s1695_s18 = smov 0  }
   0x4 LB: > { %s25_s19 = sadd.s32 1, %s1652_s16  ;;  %s28_s20 = sadd.s32 1, %s1656_s17  ;;  %s1660_s18 = sphi %s1695_s18, %s13_s18   ;;  %s1656_s17 = sphi %s1693_s17, %s2084_s17   ;;  %s1652_s16 = sphi %s1691_s16, %s2083_s16   ;;  %s1648_s15 = sphi %s1689_s15, %s2082_s15   ;;  %s1644_s14 = sphi %s1687_s14, %s2081_s14   ;;  %s1640_s13 = sphi %s1685_s13, %s2080_s13   ;;  %s1636_s12 = sphi %s1683_s12, %s2079_s12  }
   0x5   : > { %p26_p0 = scmp.ge.s32.totalorder %s25_s19, 4  ;;  %p76_p1 = scmp.ne.s32.totalorder %s1640_s13, %s1636_s12 }
   0x6   : > { %p77_p2 = scmp.eq.s32.totalorder %s1660_s18, 0  ;;  %s69_s24 = sadd.s32 1, %s1640_s13 }
   0x7   : > { %s2086_s19 = smov (%p26_p0, %s25_s19), 0  ;;  %s2088_s20 = smov (!%p26_p0, %s28_s20), %s1656_s17 }
   0x8   : > { %p78_p3 = por %p77_p2, %p76_p1  ;;  %p30_p4 = scmp.ge.s32.totalorder %s2088_s20, 4 }
   0x9   : > { %s64_s21 = ssub.s32 %s1652_s16, %s2086_s19  ;;  %p1211_p6 = scmp.ge.s32.totalorder %s1660_s18, 16 }
   0xa   : > { %s2090_s20 = smov (%p30_p4, %s2088_s20), 0 }
   0xb   : > { %s65_s22 = ssub.s32 %s1656_s17, %s2090_s20  ;;  %156 = sbr.rel (%p1211_p6) target bundleno = 87 (0x57), region = 16 }
   0xc   : > { %s66_s23 = sor.u32 %s65_s22, %s64_s21 }
   0xd   : > { %p67_p5 = scmp.eq.s32.totalorder %s66_s23, 0 }
   0xf   : > { %s1734_s25 = scalar_select %p67_p5, %s1640_s13, %s69_s24  }
  0x10   : > { %172 = sbr.rel (!%p78_p3) target bundleno = 87 (0x57), region = 24  ;;  %s174_s26 = sand.u32 (%p78_p3), 1, %s1640_s13  }
  0x11   : > { %s1214_s27 = sshll.u32 (%p78_p3), %s1656_s17, 1  ;;  %s1212_s28 = sshll.u32 (%p78_p3), %s174_s26, 9 }
  0x12   : > { %s1484_s29 = sshll.u32 (%p78_p3), %s1652_s16, 9  ;;  %s1748_s8 = scalar_lea.vmem (%p78_p3), [#allocation3], %s1212_s28 }
  0x13   : > { %s180_s30 = sadd.s32 (%p78_p3), %s1484_s29, %s1214_s27 }
  0x14   : > { %s1216_s4 = sshll.u32 (%p78_p3), %s180_s30, 2 }
  0x15   : > { %s1743_s7 = scalar_lea.vmem %s2076_s1, %s1216_s4 }
  0x16   : > { %v337_v0 = vld [vmem:[%s1743_s7] sm:$0xff] }
  0x17   : > { %v339_v1 = vld [vmem:[%s1743_s7 + $0x20] sm:$0xff]  ;;  %338 = vst [vmem:[%s1748_s8] sm:$0xff] %v337_v0 }
  0x18   : > { %v341_v2 = vld [vmem:[%s1743_s7 + $0x40] sm:$0xff]  ;;  %340 = vst [vmem:[%s1748_s8 + $0x8] sm:$0xff] %v339_v1 }
  0x19   : > { %v343_v3 = vld [vmem:[%s1743_s7 + $0x60] sm:$0xff]  ;;  %342 = vst [vmem:[%s1748_s8 + $0x10] sm:$0xff] %v341_v2 }
  0x1a   : > { %v345_v4 = vld [vmem:[%s1743_s7 + $0x80] sm:$0xff]  ;;  %344 = vst [vmem:[%s1748_s8 + $0x18] sm:$0xff] %v343_v3 }
  0x1b   : > { %v347_v5 = vld [vmem:[%s1743_s7 + $0xa0] sm:$0xff]  ;;  %346 = vst [vmem:[%s1748_s8 + $0x20] sm:$0xff] %v345_v4 }
  0x1c   : > { %v349_v6 = vld [vmem:[%s1743_s7 + $0xc0] sm:$0xff]  ;;  %348 = vst [vmem:[%s1748_s8 + $0x28] sm:$0xff] %v347_v5 }
  0x1d   : > { %v351_v7 = vld [vmem:[%s1743_s7 + $0xe0] sm:$0xff]  ;;  %350 = vst [vmem:[%s1748_s8 + $0x30] sm:$0xff] %v349_v6 }
  0x1e   : > { %v353_v8 = vld [vmem:[%s1743_s7 + $0x100] sm:$0xff]  ;;  %352 = vst [vmem:[%s1748_s8 + $0x38] sm:$0xff] %v351_v7 }
  0x1f   : > { %v355_v9 = vld [vmem:[%s1743_s7 + $0x120] sm:$0xff]  ;;  %354 = vst [vmem:[%s1748_s8 + $0x40] sm:$0xff] %v353_v8 }
  0x20   : > { %v357_v10 = vld [vmem:[%s1743_s7 + $0x140] sm:$0xff]  ;;  %356 = vst [vmem:[%s1748_s8 + $0x48] sm:$0xff] %v355_v9 }
  0x21   : > { %v359_v11 = vld [vmem:[%s1743_s7 + $0x160] sm:$0xff]  ;;  %358 = vst [vmem:[%s1748_s8 + $0x50] sm:$0xff] %v357_v10 }
  0x22   : > { %v361_v12 = vld [vmem:[%s1743_s7 + $0x180] sm:$0xff]  ;;  %360 = vst [vmem:[%s1748_s8 + $0x58] sm:$0xff] %v359_v11 }
  0x23   : > { %v363_v13 = vld [vmem:[%s1743_s7 + $0x1a0] sm:$0xff]  ;;  %362 = vst [vmem:[%s1748_s8 + $0x60] sm:$0xff] %v361_v12 }
  0x24   : > { %v365_v14 = vld [vmem:[%s1743_s7 + $0x1c0] sm:$0xff]  ;;  %364 = vst [vmem:[%s1748_s8 + $0x68] sm:$0xff] %v363_v13 }
  0x25   : > { %v367_v15 = vld [vmem:[%s1743_s7 + $0x1e0] sm:$0xff]  ;;  %366 = vst [vmem:[%s1748_s8 + $0x70] sm:$0xff] %v365_v14 }
  0x26   : > { %v369_v16 = vld [vmem:[%s1743_s7 + $0x200] sm:$0xff]  ;;  %368 = vst [vmem:[%s1748_s8 + $0x78] sm:$0xff] %v367_v15 }
  0x27   : > { %v371_v17 = vld [vmem:[%s1743_s7 + $0x220] sm:$0xff]  ;;  %370 = vst [vmem:[%s1748_s8 + $0x80] sm:$0xff] %v369_v16 }
  0x28   : > { %v373_v18 = vld [vmem:[%s1743_s7 + $0x240] sm:$0xff]  ;;  %372 = vst [vmem:[%s1748_s8 + $0x88] sm:$0xff] %v371_v17 }
  0x29   : > { %v375_v19 = vld [vmem:[%s1743_s7 + $0x260] sm:$0xff]  ;;  %374 = vst [vmem:[%s1748_s8 + $0x90] sm:$0xff] %v373_v18 }
  0x2a   : > { %v377_v20 = vld [vmem:[%s1743_s7 + $0x280] sm:$0xff]  ;;  %376 = vst [vmem:[%s1748_s8 + $0x98] sm:$0xff] %v375_v19 }
  0x2b   : > { %v379_v21 = vld [vmem:[%s1743_s7 + $0x2a0] sm:$0xff]  ;;  %378 = vst [vmem:[%s1748_s8 + $0xa0] sm:$0xff] %v377_v20 }
  0x2c   : > { %v381_v22 = vld [vmem:[%s1743_s7 + $0x2c0] sm:$0xff]  ;;  %380 = vst [vmem:[%s1748_s8 + $0xa8] sm:$0xff] %v379_v21 }
  0x2d   : > { %v383_v23 = vld [vmem:[%s1743_s7 + $0x2e0] sm:$0xff]  ;;  %382 = vst [vmem:[%s1748_s8 + $0xb0] sm:$0xff] %v381_v22 }
  0x2e   : > { %v385_v24 = vld [vmem:[%s1743_s7 + $0x300] sm:$0xff]  ;;  %384 = vst [vmem:[%s1748_s8 + $0xb8] sm:$0xff] %v383_v23 }
  0x2f   : > { %v387_v25 = vld [vmem:[%s1743_s7 + $0x320] sm:$0xff]  ;;  %386 = vst [vmem:[%s1748_s8 + $0xc0] sm:$0xff] %v385_v24 }
  0x30   : > { %v389_v26 = vld [vmem:[%s1743_s7 + $0x340] sm:$0xff]  ;;  %388 = vst [vmem:[%s1748_s8 + $0xc8] sm:$0xff] %v387_v25 }
  0x31   : > { %v391_v27 = vld [vmem:[%s1743_s7 + $0x360] sm:$0xff]  ;;  %390 = vst [vmem:[%s1748_s8 + $0xd0] sm:$0xff] %v389_v26 }
  0x32   : > { %v393_v28 = vld [vmem:[%s1743_s7 + $0x380] sm:$0xff]  ;;  %392 = vst [vmem:[%s1748_s8 + $0xd8] sm:$0xff] %v391_v27 }
  0x33   : > { %v395_v29 = vld [vmem:[%s1743_s7 + $0x3a0] sm:$0xff]  ;;  %394 = vst [vmem:[%s1748_s8 + $0xe0] sm:$0xff] %v393_v28 }
  0x34   : > { %v397_v30 = vld [vmem:[%s1743_s7 + $0x3c0] sm:$0xff]  ;;  %396 = vst [vmem:[%s1748_s8 + $0xe8] sm:$0xff] %v395_v29 }
  0x35   : > { %v399_v31 = vld [vmem:[%s1743_s7 + $0x3e0] sm:$0xff]  ;;  %398 = vst [vmem:[%s1748_s8 + $0xf0] sm:$0xff] %v397_v30 }
  0x36   : > { %v401_v32 = vld [vmem:[%s1743_s7 + $0x400] sm:$0xff]  ;;  %400 = vst [vmem:[%s1748_s8 + $0xf8] sm:$0xff] %v399_v31 }
  0x37   : > { %v403_v33 = vld [vmem:[%s1743_s7 + $0x420] sm:$0xff]  ;;  %402 = vst [vmem:[%s1748_s8 + $0x100] sm:$0xff] %v401_v32 }
  0x38   : > { %v405_v34 = vld [vmem:[%s1743_s7 + $0x440] sm:$0xff]  ;;  %404 = vst [vmem:[%s1748_s8 + $0x108] sm:$0xff] %v403_v33 }
  0x39   : > { %v407_v35 = vld [vmem:[%s1743_s7 + $0x460] sm:$0xff]  ;;  %406 = vst [vmem:[%s1748_s8 + $0x110] sm:$0xff] %v405_v34 }
  0x3a   : > { %v409_v36 = vld [vmem:[%s1743_s7 + $0x480] sm:$0xff]  ;;  %408 = vst [vmem:[%s1748_s8 + $0x118] sm:$0xff] %v407_v35 }
  0x3b   : > { %v411_v37 = vld [vmem:[%s1743_s7 + $0x4a0] sm:$0xff]  ;;  %410 = vst [vmem:[%s1748_s8 + $0x120] sm:$0xff] %v409_v36 }
  0x3c   : > { %v413_v38 = vld [vmem:[%s1743_s7 + $0x4c0] sm:$0xff]  ;;  %412 = vst [vmem:[%s1748_s8 + $0x128] sm:$0xff] %v411_v37 }
  0x3d   : > { %v415_v39 = vld [vmem:[%s1743_s7 + $0x4e0] sm:$0xff]  ;;  %414 = vst [vmem:[%s1748_s8 + $0x130] sm:$0xff] %v413_v38 }
  0x3e   : > { %v417_v40 = vld [vmem:[%s1743_s7 + $0x500] sm:$0xff]  ;;  %416 = vst [vmem:[%s1748_s8 + $0x138] sm:$0xff] %v415_v39 }
  0x3f   : > { %v419_v41 = vld [vmem:[%s1743_s7 + $0x520] sm:$0xff]  ;;  %418 = vst [vmem:[%s1748_s8 + $0x140] sm:$0xff] %v417_v40 }
  0x40   : > { %v421_v42 = vld [vmem:[%s1743_s7 + $0x540] sm:$0xff]  ;;  %420 = vst [vmem:[%s1748_s8 + $0x148] sm:$0xff] %v419_v41 }
  0x41   : > { %v423_v43 = vld [vmem:[%s1743_s7 + $0x560] sm:$0xff]  ;;  %422 = vst [vmem:[%s1748_s8 + $0x150] sm:$0xff] %v421_v42 }
  0x42   : > { %v425_v44 = vld [vmem:[%s1743_s7 + $0x580] sm:$0xff]  ;;  %424 = vst [vmem:[%s1748_s8 + $0x158] sm:$0xff] %v423_v43 }
  0x43   : > { %v427_v45 = vld [vmem:[%s1743_s7 + $0x5a0] sm:$0xff]  ;;  %426 = vst [vmem:[%s1748_s8 + $0x160] sm:$0xff] %v425_v44 }
  0x44   : > { %v429_v46 = vld [vmem:[%s1743_s7 + $0x5c0] sm:$0xff]  ;;  %428 = vst [vmem:[%s1748_s8 + $0x168] sm:$0xff] %v427_v45 }
  0x45   : > { %v431_v47 = vld [vmem:[%s1743_s7 + $0x5e0] sm:$0xff]  ;;  %430 = vst [vmem:[%s1748_s8 + $0x170] sm:$0xff] %v429_v46 }
  0x46   : > { %v433_v48 = vld [vmem:[%s1743_s7 + $0x600] sm:$0xff]  ;;  %432 = vst [vmem:[%s1748_s8 + $0x178] sm:$0xff] %v431_v47 }
  0x47   : > { %v435_v49 = vld [vmem:[%s1743_s7 + $0x620] sm:$0xff]  ;;  %434 = vst [vmem:[%s1748_s8 + $0x180] sm:$0xff] %v433_v48 }
  0x48   : > { %v437_v50 = vld [vmem:[%s1743_s7 + $0x640] sm:$0xff]  ;;  %436 = vst [vmem:[%s1748_s8 + $0x188] sm:$0xff] %v435_v49 }
  0x49   : > { %v439_v51 = vld [vmem:[%s1743_s7 + $0x660] sm:$0xff]  ;;  %438 = vst [vmem:[%s1748_s8 + $0x190] sm:$0xff] %v437_v50 }
  0x4a   : > { %v441_v52 = vld [vmem:[%s1743_s7 + $0x680] sm:$0xff]  ;;  %440 = vst [vmem:[%s1748_s8 + $0x198] sm:$0xff] %v439_v51 }
  0x4b   : > { %v443_v53 = vld [vmem:[%s1743_s7 + $0x6a0] sm:$0xff]  ;;  %442 = vst [vmem:[%s1748_s8 + $0x1a0] sm:$0xff] %v441_v52 }
  0x4c   : > { %v445_v54 = vld [vmem:[%s1743_s7 + $0x6c0] sm:$0xff]  ;;  %444 = vst [vmem:[%s1748_s8 + $0x1a8] sm:$0xff] %v443_v53 }
  0x4d   : > { %v447_v55 = vld [vmem:[%s1743_s7 + $0x6e0] sm:$0xff]  ;;  %446 = vst [vmem:[%s1748_s8 + $0x1b0] sm:$0xff] %v445_v54 }
  0x4e   : > { %v449_v56 = vld [vmem:[%s1743_s7 + $0x700] sm:$0xff]  ;;  %448 = vst [vmem:[%s1748_s8 + $0x1b8] sm:$0xff] %v447_v55 }
  0x4f   : > { %v451_v57 = vld [vmem:[%s1743_s7 + $0x720] sm:$0xff]  ;;  %450 = vst [vmem:[%s1748_s8 + $0x1c0] sm:$0xff] %v449_v56 }
  0x50   : > { %v453_v58 = vld [vmem:[%s1743_s7 + $0x740] sm:$0xff]  ;;  %452 = vst [vmem:[%s1748_s8 + $0x1c8] sm:$0xff] %v451_v57 }
  0x51   : > { %v455_v59 = vld [vmem:[%s1743_s7 + $0x760] sm:$0xff]  ;;  %454 = vst [vmem:[%s1748_s8 + $0x1d0] sm:$0xff] %v453_v58 }
  0x52   : > { %v457_v60 = vld [vmem:[%s1743_s7 + $0x780] sm:$0xff]  ;;  %456 = vst [vmem:[%s1748_s8 + $0x1d8] sm:$0xff] %v455_v59 }
  0x53   : > { %v459_v61 = vld [vmem:[%s1743_s7 + $0x7a0] sm:$0xff]  ;;  %458 = vst [vmem:[%s1748_s8 + $0x1e0] sm:$0xff] %v457_v60 }
  0x54   : > { %v461_v62 = vld [vmem:[%s1743_s7 + $0x7c0] sm:$0xff]  ;;  %460 = vst [vmem:[%s1748_s8 + $0x1e8] sm:$0xff] %v459_v61 }
  0x55   : > { %v463_v63 = vld [vmem:[%s1743_s7 + $0x7e0] sm:$0xff]  ;;  %462 = vst [vmem:[%s1748_s8 + $0x1f0] sm:$0xff] %v461_v62 }
  0x56   : > { %464 = vst [vmem:[%s1748_s8 + $0x1f8] sm:$0xff] %v463_v63 }
  0x57 PF: > { %p1217_p7 = scmp.ge.s32.totalorder %s1660_s18, 1  ;;  %p477_p8 = scmp.lt.s32.totalorder %s1660_s18, 17 }
  0x59   : > { %p478_p9 = pnand %p1217_p7, %p477_p8 }
  0x5a   : > { %s484_s9 = sand.u32 (!%p478_p9), 1, %s1636_s12   ;;  %s1219_s10 = sshll.u32 (!%p478_p9), %s1644_s14, 2 }
  0x5b   : > { %481 = sbr.rel (%p478_p9) target bundleno = 326 (0x146), region = 66  ;;  %s1218_s11 = sshll.u32 (!%p478_p9), %s484_s9, 9 }
  0x5c   : > { %p527_p10 = scmp.lt.s32.totalorder (!%p478_p9), %s1219_s10, 15  ;;  %s1221_s21 = sshll.u32 (!%p478_p9), %s1648_s15, 1 }
  0x5d   : > { %p537_p11 = scmp.lt.s32.totalorder (!%p478_p9), %s1221_s21, 7  ;;  %s1897_s5 = scalar_lea.vmem (!%p478_p9), [#allocation3], %s1218_s11 }
  0x5e   : > { %p1224_p12 = scmp.ne.s32.totalorder (!%p478_p9), %s1644_s14, 0 }
  0x60   : > { %s2092_s10 = smov (!%p527_p10, %s1219_s10), 15  ;;  %s2094_s21 = smov (!%p537_p11, %s1221_s21), 7 }
  0x61   : > { %s1220_s22 = sshll.u32 %s2092_s10, 2  ;;  %s539_s12 = scalar_lea.vmem %s2077_s2, %s2094_s21 }
  0x62   : > { %s1883_s26 = scalar_lea.vmem %s2075_s0, %s1220_s22  ;;  %s1223_s29 = sshll.u32 %s2094_s21, 3 }
  0x63   : > { %s1895_s15 = scalar_lea.vmem %s2078_s3, %s1223_s29  ;;  %554 = sbr.rel (%p1224_p12) target bundleno = 107 (0x6b), region = 74 }
  0x68   : > { %v1662_v0 = vmov 0.0  }
  0x69   : > { %555 = vst [vmem:[#allocation2] sm:$0xff] %v1662_v0 }
  0x6a   : > { %556 = vst [vmem:[#allocation2 + $0x8] sm:$0xff] %v1662_v0 }
  0x6b PF: > { %v1283_v1 = vld [vmem:[%s1897_s5 + $0x70] sm:$0xf]  ;;  %v1500_v2 = vld [vmem:[%s1897_s5 + $0x74] sm:$0xf0]  ;;  %v1275_v12 = vld [vmem:[%s1897_s5 + $0x60] sm:$0xf] }
  0x6c   : > { %v1347_v3 = vld [vmem:[%s1897_s5 + $0xf0] sm:$0xf]  ;;  %v1284_v4 = vor.u32 %v1500_v2, %v1283_v1  ;;  %v1516_v5 = vld [vmem:[%s1897_s5 + $0xf4] sm:$0xf0]  ;;  %v1498_v14 = vld [vmem:[%s1897_s5 + $0x64] sm:$0xf0] }
  0x6d   : > { %v1411_v6 = vld [vmem:[%s1897_s5 + $0x170] sm:$0xf]  ;;  %v1532_v7 = vld [vmem:[%s1897_s5 + $0x174] sm:$0xf0]  ;;  %v1348_v8 = vor.u32 %v1516_v5, %v1347_v3  ;;  %v1339_v15 = vld [vmem:[%s1897_s5 + $0xe0] sm:$0xf]  ;;  %v1276_v17 = vor.u32 %v1498_v14, %v1275_v12 }
  0x6e   : > { %v1412_v9 = vor.u32 %v1532_v7, %v1411_v6  ;;  %v1475_v10 = vld [vmem:[%s1897_s5 + $0x1f0] sm:$0xf]  ;;  %v1548_v11 = vld [vmem:[%s1897_s5 + $0x1f4] sm:$0xf0]  ;;  %959 = vmatpush.bf16.msra.mxu0 %v1284_v4  ;;  %v1514_v16 = vld [vmem:[%s1897_s5 + $0xe4] sm:$0xf0] }
  0x6f   : > { %v1476_v13 = vor.u32 %v1548_v11, %v1475_v10  ;;  %972 = vmatpush.bf16.msra.mxu1 %v1348_v8  ;;  %v1340_v18 = vor.u32 %v1514_v16, %v1339_v15  ;;  %v1403_v19 = vld [vmem:[%s1897_s5 + $0x160] sm:$0xf]  ;;  %v1530_v20 = vld [vmem:[%s1897_s5 + $0x164] sm:$0xf0]  ;;  %v1267_v24 = vld [vmem:[%s1897_s5 + $0x50] sm:$0xf] }
  0x70   : > { %985 = vmatpush.bf16.msra.mxu2 %v1412_v9  ;;  %v1467_v21 = vld [vmem:[%s1897_s5 + $0x1e0] sm:$0xf]  ;;  %v1404_v22 = vor.u32 %v1530_v20, %v1403_v19  ;;  %v1546_v23 = vld [vmem:[%s1897_s5 + $0x1e4] sm:$0xf0]  ;;  %v1496_v25 = vld [vmem:[%s1897_s5 + $0x54] sm:$0xf0] }
  0x71   : > { %998 = vmatpush.bf16.msra.mxu3 %v1476_v13  ;;  %v1468_v26 = vor.u32 %v1546_v23, %v1467_v21  ;;  %v1331_v27 = vld [vmem:[%s1897_s5 + $0xd0] sm:$0xf]  ;;  %v1512_v28 = vld [vmem:[%s1897_s5 + $0xd4] sm:$0xf0]  ;;  %v1268_v30 = vor.u32 %v1496_v25, %v1267_v24  ;;  %v1259_v36 = vld [vmem:[%s1897_s5 + $0x40] sm:$0xf] }
  0x72   : > { %v1395_v29 = vld [vmem:[%s1897_s5 + $0x150] sm:$0xf]  ;;  %960 = vmatpush.bf16.msra.mxu0 %v1276_v17  ;;  %v1528_v31 = vld [vmem:[%s1897_s5 + $0x154] sm:$0xf0]  ;;  %v1332_v34 = vor.u32 %v1512_v28, %v1331_v27  ;;  %v1494_v37 = vld [vmem:[%s1897_s5 + $0x44] sm:$0xf0] }
  0x73   : > { %v1459_v32 = vld [vmem:[%s1897_s5 + $0x1d0] sm:$0xf]  ;;  %v1544_v33 = vld [vmem:[%s1897_s5 + $0x1d4] sm:$0xf0]  ;;  %973 = vmatpush.bf16.msra.mxu1 %v1340_v18  ;;  %v1396_v35 = vor.u32 %v1528_v31, %v1395_v29  ;;  %v1323_v38 = vld [vmem:[%s1897_s5 + $0xc0] sm:$0xf]  ;;  %v1260_v45 = vor.u32 %v1494_v37, %v1259_v36 }
  0x74   : > { %986 = vmatpush.bf16.msra.mxu2 %v1404_v22  ;;  %v1460_v39 = vor.u32 %v1544_v33, %v1459_v32  ;;  %v1510_v40 = vld [vmem:[%s1897_s5 + $0xc4] sm:$0xf0]  ;;  %v1387_v41 = vld [vmem:[%s1897_s5 + $0x140] sm:$0xf]  ;;  %v1251_v48 = vld [vmem:[%s1897_s5 + $0x30] sm:$0xf] }
  0x75   : > { %999 = vmatpush.bf16.msra.mxu3 %v1468_v26  ;;  %v1526_v42 = vld [vmem:[%s1897_s5 + $0x144] sm:$0xf0]  ;;  %v1451_v43 = vld [vmem:[%s1897_s5 + $0x1c0] sm:$0xf]  ;;  %v1324_v46 = vor.u32 %v1510_v40, %v1323_v38  ;;  %v1492_v49 = vld [vmem:[%s1897_s5 + $0x34] sm:$0xf0] }
  0x76   : > { %v1542_v44 = vld [vmem:[%s1897_s5 + $0x1c4] sm:$0xf0]  ;;  %961 = vmatpush.bf16.msra.mxu0 %v1268_v30  ;;  %v1388_v47 = vor.u32 %v1526_v42, %v1387_v41  ;;  %v1315_v50 = vld [vmem:[%s1897_s5 + $0xb0] sm:$0xf]  ;;  %v1508_v52 = vld [vmem:[%s1897_s5 + $0xb4] sm:$0xf0]  ;;  %v1252_v57 = vor.u32 %v1492_v49, %v1251_v48 }
  0x77   : > { %974 = vmatpush.bf16.msra.mxu1 %v1332_v34  ;;  %v1452_v51 = vor.u32 %v1542_v44, %v1451_v43  ;;  %v1379_v53 = vld [vmem:[%s1897_s5 + $0x130] sm:$0xf]  ;;  %v1524_v54 = vld [vmem:[%s1897_s5 + $0x134] sm:$0xf0]  ;;  %v1316_v58 = vor.u32 %v1508_v52, %v1315_v50  ;;  %v1243_v60 = vld [vmem:[%s1897_s5 + $0x20] sm:$0xf] }
  0x78   : > { %987 = vmatpush.bf16.msra.mxu2 %v1396_v35  ;;  %v1443_v55 = vld [vmem:[%s1897_s5 + $0x1b0] sm:$0xf]  ;;  %v1540_v56 = vld [vmem:[%s1897_s5 + $0x1b4] sm:$0xf0]  ;;  %v1380_v59 = vor.u32 %v1524_v54, %v1379_v53  ;;  %v1490_v61 = vld [vmem:[%s1897_s5 + $0x24] sm:$0xf0] }
  0x79   : > { %1000 = vmatpush.bf16.msra.mxu3 %v1460_v39  ;;  %v1307_v62 = vld [vmem:[%s1897_s5 + $0xa0] sm:$0xf]  ;;  %v1444_v63 = vor.u32 %v1540_v56, %v1443_v55  ;;  %v1506_v0 = vld [vmem:[%s1897_s5 + $0xa4] sm:$0xf0]  ;;  %v1244_v5 = vor.u32 %v1490_v61, %v1243_v60  ;;  %v1235_v8 = vld [vmem:[%s1897_s5 + $0x10] sm:$0xf] }
  0x7a   : > { %962 = vmatpush.bf16.msra.mxu0 %v1260_v45  ;;  %v1371_v1 = vld [vmem:[%s1897_s5 + $0x120] sm:$0xf]  ;;  %v1522_v2 = vld [vmem:[%s1897_s5 + $0x124] sm:$0xf0]  ;;  %v1308_v6 = vor.u32 %v1506_v0, %v1307_v62  ;;  %v1488_v9 = vld [vmem:[%s1897_s5 + $0x14] sm:$0xf0] }
  0x7b   : > { %975 = vmatpush.bf16.msra.mxu1 %v1324_v46  ;;  %v1435_v3 = vld [vmem:[%s1897_s5 + $0x1a0] sm:$0xf]  ;;  %v1538_v4 = vld [vmem:[%s1897_s5 + $0x1a4] sm:$0xf0]  ;;  %v1372_v7 = vor.u32 %v1522_v2, %v1371_v1  ;;  %v1299_v10 = vld [vmem:[%s1897_s5 + $0x90] sm:$0xf]  ;;  %v1236_v17 = vor.u32 %v1488_v9, %v1235_v8 }
  0x7c   : > { %988 = vmatpush.bf16.msra.mxu2 %v1388_v47  ;;  %v1436_v11 = vor.u32 %v1538_v4, %v1435_v3  ;;  %v1504_v12 = vld [vmem:[%s1897_s5 + $0x94] sm:$0xf0]  ;;  %v1363_v13 = vld [vmem:[%s1897_s5 + $0x110] sm:$0xf]  ;;  %v1227_v18 = vld [vmem:[%s1897_s5] sm:$0xf] }
  0x7d   : > { %1001 = vmatpush.bf16.msra.mxu3 %v1452_v51  ;;  %v1520_v14 = vld [vmem:[%s1897_s5 + $0x114] sm:$0xf0]  ;;  %v1427_v15 = vld [vmem:[%s1897_s5 + $0x190] sm:$0xf]  ;;  %v1486_v19 = vld [vmem:[%s1897_s5 + $0x4] sm:$0xf0]  ;;  %v1300_v21 = vor.u32 %v1504_v12, %v1299_v10 }
  0x7e   : > { %963 = vmatpush.bf16.msra.mxu0 %v1252_v57  ;;  %v1536_v16 = vld [vmem:[%s1897_s5 + $0x194] sm:$0xf0]  ;;  %v1291_v20 = vld [vmem:[%s1897_s5 + $0x80] sm:$0xf]  ;;  %v1364_v22 = vor.u32 %v1520_v14, %v1363_v13  ;;  %v1502_v23 = vld [vmem:[%s1897_s5 + $0x84] sm:$0xf0]  ;;  %v1228_v33 = vor.u32 %v1486_v19, %v1227_v18 }
  0x7f   : > { %976 = vmatpush.bf16.msra.mxu1 %v1316_v58  ;;  %v1355_v24 = vld [vmem:[%s1897_s5 + $0x100] sm:$0xf]  ;;  %v1518_v25 = vld [vmem:[%s1897_s5 + $0x104] sm:$0xf0]  ;;  %v1428_v26 = vor.u32 %v1536_v16, %v1427_v15  ;;  %v1499_v29 = vld [vmem:[%s1897_s5 + $0x74] sm:$0xf]  ;;  %v1292_v38 = vor.u32 %v1502_v23, %v1291_v20 }
  0x80   : > { %989 = vmatpush.bf16.msra.mxu2 %v1380_v59  ;;  %v1419_v27 = vld [vmem:[%s1897_s5 + $0x180] sm:$0xf]  ;;  %v1534_v28 = vld [vmem:[%s1897_s5 + $0x184] sm:$0xf0]  ;;  %v1285_v30 = vld [vmem:[%s1897_s5 + $0x78] sm:$0xf0]  ;;  %v1356_v39 = vor.u32 %v1518_v25, %v1355_v24 }
  0x81   : > { %1002 = vmatpush.bf16.msra.mxu3 %v1444_v63  ;;  %v1515_v31 = vld [vmem:[%s1897_s5 + $0xf4] sm:$0xf]  ;;  %v560_v32 = vld [vmem:[%s1883_s26 + $0x8] sm:$0xff]  ;;  %v1420_v43 = vor.u32 %v1534_v28, %v1419_v27  ;;  %v1288_v44 = vor.u32 %v1499_v29, %v1285_v30  ;;  %v1497_v48 = vld [vmem:[%s1897_s5 + $0x64] sm:$0xf]  ;;  %p1481_p13 = scmp.ne.s32.totalorder %s1644_s14, 3 }
  0x82   : > { %964 = vmatpush.bf16.msra.mxu0 %v1244_v5  ;;  %v1349_v34 = vld [vmem:[%s1897_s5 + $0xf8] sm:$0xf0]  ;;  %v1531_v35 = vld [vmem:[%s1897_s5 + $0x174] sm:$0xf]  ;;  %v629_v37 = vunpack.c.l.b16 %v560_v32  ;;  %v630_v42 = vunpack.c.h.b16 %v560_v32  ;;  %v1277_v49 = vld [vmem:[%s1897_s5 + $0x68] sm:$0xf0] }
  0x83   : > { %977 = vmatpush.bf16.msra.mxu1 %v1308_v6  ;;  %v1413_v36 = vld [vmem:[%s1897_s5 + $0x178] sm:$0xf0]  ;;  %v1547_v40 = vld [vmem:[%s1897_s5 + $0x1f4] sm:$0xf]  ;;  %v1352_v46 = vor.u32 %v1515_v31, %v1349_v34  ;;  %v1513_v50 = vld [vmem:[%s1897_s5 + $0xe4] sm:$0xf]  ;;  %v1280_v62 = vor.u32 %v1497_v48, %v1277_v49 }
  0x84   : > { %990 = vmatpush.bf16.msra.mxu2 %v1372_v7  ;;  %v1477_v41 = vld [vmem:[%s1897_s5 + $0x1f8] sm:$0xf0]  ;;  %v559_v45 = vld [vmem:[%s1883_s26] sm:$0xff]  ;;  %v1416_v47 = vor.u32 %v1531_v35, %v1413_v36  ;;  %v1341_v54 = vld [vmem:[%s1897_s5 + $0xe8] sm:$0xf0]  ;;  %v1980_v57 = vpack.c.b16 %v629_v37, %v629_v37  ;;  %v1984_v60 = vpack.c.b16 %v630_v42, %v630_v42 }
  0x85   : > { %1003 = vmatpush.bf16.msra.mxu3 %v1436_v11  ;;  %v627_v51 = vunpack.c.l.b16 %v559_v45  ;;  %v628_v52 = vunpack.c.h.b16 %v559_v45  ;;  %v1480_v53 = vor.u32 %v1547_v40, %v1477_v41  ;;  %v1529_v55 = vld [vmem:[%s1897_s5 + $0x164] sm:$0xf]  ;;  %v1405_v56 = vld [vmem:[%s1897_s5 + $0x168] sm:$0xf0]  ;;  %v1344_v0 = vor.u32 %v1513_v50, %v1341_v54  ;;  %v1495_v2 = vld [vmem:[%s1897_s5 + $0x54] sm:$0xf] }
  0x86   : > { %965 = vmatpush.bf16.msra.mxu0 %v1236_v17  ;;  %v1545_v58 = vld [vmem:[%s1897_s5 + $0x1e4] sm:$0xf]  ;;  %v1469_v59 = vld [vmem:[%s1897_s5 + $0x1e8] sm:$0xf0]  ;;  %v1408_v1 = vor.u32 %v1529_v55, %v1405_v56  ;;  %v1269_v3 = vld [vmem:[%s1897_s5 + $0x58] sm:$0xf0] }
  0x87   : > { %978 = vmatpush.bf16.msra.mxu1 %v1300_v21  ;;  %v1986_v61 = vpack.c.b16 %v627_v51, %v627_v51  ;;  %v1988_v63 = vpack.c.b16 %v628_v52, %v628_v52  ;;  %v1511_v4 = vld [vmem:[%s1897_s5 + $0xd4] sm:$0xf]  ;;  %v1472_v5 = vor.u32 %v1545_v58, %v1469_v59  ;;  %v1333_v6 = vld [vmem:[%s1897_s5 + $0xd8] sm:$0xf0]  ;;  %v1272_v11 = vor.u32 %v1495_v2, %v1269_v3  ;;  %v1493_v14 = vld [vmem:[%s1897_s5 + $0x44] sm:$0xf] }
  0x88   : > { %991 = vmatpush.bf16.msra.mxu2 %v1364_v22  ;;  %v1527_v7 = vld [vmem:[%s1897_s5 + $0x154] sm:$0xf]  ;;  %v1397_v8 = vld [vmem:[%s1897_s5 + $0x158] sm:$0xf0]  ;;  %v1336_v12 = vor.u32 %v1511_v4, %v1333_v6  ;;  %v1261_v15 = vld [vmem:[%s1897_s5 + $0x48] sm:$0xf0] }
  0x89   : > { %1004 = vmatpush.bf16.msra.mxu3 %v1428_v26  ;;  %v1543_v9 = vld [vmem:[%s1897_s5 + $0x1d4] sm:$0xf]  ;;  %v1461_v10 = vld [vmem:[%s1897_s5 + $0x1d8] sm:$0xf0]  ;;  %v1400_v13 = vor.u32 %v1527_v7, %v1397_v8  ;;  %v1509_v16 = vld [vmem:[%s1897_s5 + $0xc4] sm:$0xf]  ;;  %v1264_v23 = vor.u32 %v1493_v14, %v1261_v15 }
  0x8a   : > { %966 = vmatpush.bf16.msra.mxu0 %v1228_v33  ;;  %v1464_v17 = vor.u32 %v1543_v9, %v1461_v10  ;;  %v1325_v18 = vld [vmem:[%s1897_s5 + $0xc8] sm:$0xf0]  ;;  %v1525_v19 = vld [vmem:[%s1897_s5 + $0x144] sm:$0xf]  ;;  %v1491_v26 = vld [vmem:[%s1897_s5 + $0x34] sm:$0xf] }
  0x8b   : > { %979 = vmatpush.bf16.msra.mxu1 %v1292_v38  ;;  %v1389_v20 = vld [vmem:[%s1897_s5 + $0x148] sm:$0xf0]  ;;  %v1541_v21 = vld [vmem:[%s1897_s5 + $0x1c4] sm:$0xf]  ;;  %v1328_v24 = vor.u32 %v1509_v16, %v1325_v18  ;;  %v1253_v27 = vld [vmem:[%s1897_s5 + $0x38] sm:$0xf0] }
  0x8c   : > { %992 = vmatpush.bf16.msra.mxu2 %v1356_v39  ;;  %v1453_v22 = vld [vmem:[%s1897_s5 + $0x1c8] sm:$0xf0]  ;;  %v1392_v25 = vor.u32 %v1525_v19, %v1389_v20  ;;  %v1507_v28 = vld [vmem:[%s1897_s5 + $0xb4] sm:$0xf]  ;;  %v1317_v30 = vld [vmem:[%s1897_s5 + $0xb8] sm:$0xf0]  ;;  %v1256_v35 = vor.u32 %v1491_v26, %v1253_v27 }
  0x8d   : > { %1005 = vmatpush.bf16.msra.mxu3 %v1420_v43  ;;  %967 = vmatmul.bf16.vlgmr.msra.gmra.mxu0 %v1986_v61  ;;  %v1456_v29 = vor.u32 %v1541_v21, %v1453_v22  ;;  %v1523_v31 = vld [vmem:[%s1897_s5 + $0x134] sm:$0xf]  ;;  %v1381_v32 = vld [vmem:[%s1897_s5 + $0x138] sm:$0xf0]  ;;  %v1320_v36 = vor.u32 %v1507_v28, %v1317_v30  ;;  %v1489_v38 = vld [vmem:[%s1897_s5 + $0x24] sm:$0xf] }
  0x8e   : > { %1011 = vmatpush.bf16.msrb.mxu0 %v1288_v44  ;;  %980 = vmatmul.bf16.vlgmr.msra.gmra.mxu1 %v1988_v63  ;;  %v1539_v33 = vld [vmem:[%s1897_s5 + $0x1b4] sm:$0xf]  ;;  %v1445_v34 = vld [vmem:[%s1897_s5 + $0x1b8] sm:$0xf0]  ;;  %v1384_v37 = vor.u32 %v1523_v31, %v1381_v32  ;;  %v1245_v39 = vld [vmem:[%s1897_s5 + $0x28] sm:$0xf0] }
  0x8f   : > { %1024 = vmatpush.bf16.msrb.mxu1 %v1352_v46  ;;  %993 = vmatmul.bf16.vlgmr.msra.gmra.mxu2 %v1980_v57  ;;  %v1505_v40 = vld [vmem:[%s1897_s5 + $0xa4] sm:$0xf]  ;;  %v1448_v41 = vor.u32 %v1539_v33, %v1445_v34  ;;  %v1309_v42 = vld [vmem:[%s1897_s5 + $0xa8] sm:$0xf0]  ;;  %v1487_v50 = vld [vmem:[%s1897_s5 + $0x14] sm:$0xf] }
  0x90   : > { %1037 = vmatpush.bf16.msrb.mxu2 %v1416_v47  ;;  %1006 = vmatmul.bf16.vlgmr.msra.gmra.mxu3 %v1984_v60  ;;  %v1521_v43 = vld [vmem:[%s1897_s5 + $0x124] sm:$0xf]  ;;  %v1373_v44 = vld [vmem:[%s1897_s5 + $0x128] sm:$0xf0]  ;;  %v1248_v47 = vor.u32 %v1489_v38, %v1245_v39  ;;  %v1312_v48 = vor.u32 %v1505_v40, %v1309_v42  ;;  %v1237_v51 = vld [vmem:[%s1897_s5 + $0x18] sm:$0xf0] }
  0x91   : > { %1050 = vmatpush.bf16.msrb.mxu3 %v1480_v53  ;;  %v1537_v45 = vld [vmem:[%s1897_s5 + $0x1a4] sm:$0xf]  ;;  %v1437_v46 = vld [vmem:[%s1897_s5 + $0x1a8] sm:$0xf0]  ;;  %v1376_v49 = vor.u32 %v1521_v43, %v1373_v44  ;;  %v1503_v52 = vld [vmem:[%s1897_s5 + $0x94] sm:$0xf] }
  0x92   : > { %1012 = vmatpush.bf16.msrb.mxu0 %v1280_v62  ;;  %v1440_v53 = vor.u32 %v1537_v45, %v1437_v46  ;;  %v1301_v54 = vld [vmem:[%s1897_s5 + $0x98] sm:$0xf0]  ;;  %v1519_v55 = vld [vmem:[%s1897_s5 + $0x114] sm:$0xf]  ;;  %v1240_v62 = vor.u32 %v1487_v50, %v1237_v51  ;;  %v1485_v2 = vld [vmem:[%s1897_s5 + $0x4] sm:$0xf] }
  0x93   : > { %1025 = vmatpush.bf16.msrb.mxu1 %v1344_v0  ;;  %v1365_v56 = vld [vmem:[%s1897_s5 + $0x118] sm:$0xf0]  ;;  %v1535_v58 = vld [vmem:[%s1897_s5 + $0x194] sm:$0xf]  ;;  %v1304_v0 = vor.u32 %v1503_v52, %v1301_v54  ;;  %v1229_v3 = vld [vmem:[%s1897_s5 + $0x8] sm:$0xf0] }
  0x94   : > { %1038 = vmatpush.bf16.msrb.mxu2 %v1408_v1  ;;  %v1429_v59 = vld [vmem:[%s1897_s5 + $0x198] sm:$0xf0]  ;;  %v1368_v1 = vor.u32 %v1519_v55, %v1365_v56  ;;  %v1501_v4 = vld [vmem:[%s1897_s5 + $0x84] sm:$0xf]  ;;  %v1293_v6 = vld [vmem:[%s1897_s5 + $0x88] sm:$0xf0] }
  0x95   : > { %1051 = vmatpush.bf16.msrb.mxu3 %v1472_v5  ;;  %v1432_v5 = vor.u32 %v1535_v58, %v1429_v59  ;;  %v1517_v7 = vld [vmem:[%s1897_s5 + $0x104] sm:$0xf]  ;;  %v1357_v8 = vld [vmem:[%s1897_s5 + $0x108] sm:$0xf0]  ;;  %v557_v21 = vld [vmem:[#allocation2] sm:$0xff] }
  0x96   : > { %1013 = vmatpush.bf16.msrb.mxu0 %v1272_v11  ;;  %v1533_v9 = vld [vmem:[%s1897_s5 + $0x184] sm:$0xf]  ;;  %v1421_v10 = vld [vmem:[%s1897_s5 + $0x188] sm:$0xf0]  ;;  %v1232_v11 = vor.u32 %v1485_v2, %v1229_v3  ;;  %v558_v31 = vld [vmem:[#allocation2 + $0x8] sm:$0xff] }
  0x97   : > { %1026 = vmatpush.bf16.msrb.mxu1 %v1336_v12  ;;  %v1296_v12 = vor.u32 %v1501_v4, %v1293_v6  ;;  %v1424_v14 = vor.u32 %v1533_v9, %v1421_v10 }
  0x98   : > { %1039 = vmatpush.bf16.msrb.mxu2 %v1400_v13  ;;  %v1360_v13 = vor.u32 %v1517_v7, %v1357_v8 }
  0x99   : > { %1052 = vmatpush.bf16.msrb.mxu3 %v1464_v17 }
  0x9a   : > { %1014 = vmatpush.bf16.msrb.mxu0 %v1264_v23 }
  0x9b   : > { %1027 = vmatpush.bf16.msrb.mxu1 %v1328_v24 }
  0x9c   : > { %1040 = vmatpush.bf16.msrb.mxu2 %v1392_v25 }
  0x9d   : > { %1053 = vmatpush.bf16.msrb.mxu3 %v1456_v29 }
  0x9e   : > { %1015 = vmatpush.bf16.msrb.mxu0 %v1256_v35 }
  0x9f   : > { %1028 = vmatpush.bf16.msrb.mxu1 %v1320_v36 }
  0xa0   : > { %1041 = vmatpush.bf16.msrb.mxu2 %v1384_v37 }
  0xa1   : > { %1054 = vmatpush.bf16.msrb.mxu3 %v1448_v41 }
  0xa2   : > { %1016 = vmatpush.bf16.msrb.mxu0 %v1248_v47 }
  0xa3   : > { %1029 = vmatpush.bf16.msrb.mxu1 %v1312_v48 }
  0xa4   : > { %1042 = vmatpush.bf16.msrb.mxu2 %v1376_v49 }
  0xa5   : > { %1055 = vmatpush.bf16.msrb.mxu3 %v1440_v53 }
  0xa6   : > { %1017 = vmatpush.bf16.msrb.mxu0 %v1240_v62 }
  0xa7   : > { %1030 = vmatpush.bf16.msrb.mxu1 %v1304_v0 }
  0xa8   : > { %1043 = vmatpush.bf16.msrb.mxu2 %v1368_v1 }
  0xa9   : > { %1056 = vmatpush.bf16.msrb.mxu3 %v1432_v5 }
  0xaa   : > { %1018 = vmatpush.bf16.msrb.mxu0 %v1232_v11 }
  0xab   : > { %1031 = vmatpush.bf16.msrb.mxu1 %v1296_v12 }
  0xac   : > { %1044 = vmatpush.bf16.msrb.mxu2 %v1360_v13 }
  0xad   : > { %1057 = vmatpush.bf16.msrb.mxu3 %v1424_v14  ;;  %1019 = vmatmul.bf16.vlgmr.msrb.gmra.mxu0 %v1986_v61 }
  0xae   : > { %1032 = vmatmul.bf16.vlgmr.msrb.gmra.mxu1 %v1988_v63 }
  0xaf   : > { %1045 = vmatmul.bf16.vlgmr.msrb.gmra.mxu2 %v1980_v57 }
  0xb0   : > { %1058 = vmatmul.bf16.vlgmr.msrb.gmra.mxu3 %v1984_v60 }
 0x10a   : > { %v968_v15 = vpop.f32.mrf.mxu0 }
 0x10b   : > { %v981_v16 = vpop.f32.mrf.mxu1 }
 0x10c   : > { %v982_v17 = vadd.f32 %v981_v16, %v968_v15 }
 0x112   : > { %v994_v18 = vpop.f32.mrf.mxu2  ;;  %v970_v23 = vpop.f32.mrf.mxu0 }
 0x113   : > { %v995_v19 = vadd.f32 %v994_v18, %v982_v17  ;;  %v1007_v20 = vpop.f32.mrf.mxu3  ;;  %v983_v24 = vpop.f32.mrf.mxu1 }
 0x115   : > { %v1008_v22 = vadd.f32 %v1007_v20, %v995_v19 }
 0x117   : > { %v1063_v25 = vadd.f32 %v1008_v22, %v557_v21 }
 0x119   : > { %1065 = vst [vmem:[#allocation2] sm:$0xff] %v1063_v25 }
 0x11a   : > { %v996_v26 = vpop.f32.mrf.mxu2 }
 0x11b   : > { %v1009_v61 = vpop.f32.mrf.mxu3 }
 0x12a   : > { %v1020_v27 = vpop.f32.mrf.mxu0 }
 0x12b   : > { %v1033_v63 = vpop.f32.mrf.mxu1 }
 0x12c   : > { %v1034_v28 = vadd.f32 %v1033_v63, %v1020_v27 }
 0x132   : > { %v1046_v57 = vpop.f32.mrf.mxu2  ;;  %v1022_v30 = vpop.f32.mrf.mxu0 }
 0x133   : > { %v1047_v29 = vadd.f32 %v1046_v57, %v1034_v28  ;;  %v1059_v60 = vpop.f32.mrf.mxu3  ;;  %v1035_v32 = vpop.f32.mrf.mxu1 }
 0x135   : > { %v1060_v33 = vadd.f32 %v1059_v60, %v1047_v29 }
 0x137   : > { %v1064_v34 = vadd.f32 %v1060_v33, %v558_v31  ;;  %1070 = sbr.rel (%p1481_p13) target bundleno = 326 (0x146), region = 78 }
 0x139   : > { %1066 = vst [vmem:[#allocation2 + $0x8] sm:$0xff] %v1064_v34 }
 0x13a   : > { %v1048_v35 = vpop.f32.mrf.mxu2 }
 0x13b   : > { %v1061_v36 = vpop.f32.mrf.mxu3 }
 0x13c   : > { %v1071_v37 = vld [vmem:[#allocation2] sm:$0xff] }
 0x13d   : > { %v1073_v38 = vld [vmem:[%s539_s12] sm:$0x3] }
 0x13e   : > { %v1075_v40 = vperm.slane %v1073_v38, 0  ;;  %v1076_v41 = vperm.slane %v1073_v38, 1 }
 0x140   : > { %v1072_v39 = vld [vmem:[#allocation2 + $0x8] sm:$0xff]  ;;  %v1079_v42 = vadd.f32 %v1075_v40, %v1071_v37 }
 0x141   : > { %v1080_v43 = vadd.f32 %v1076_v41, %v1072_v39 }
 0x142   : > { %v1081_v44 = vmax.f32 %v1079_v42, 0.0 }
 0x143   : > { %v1082_v45 = vmax.f32 %v1080_v43, 0.0 }
 0x144   : > { %1083 = vst [vmem:[%s1895_s15] sm:$0xff] %v1081_v44 }
 0x145   : > { %1084 = vst [vmem:[%s1895_s15 + $0x8] sm:$0xff] %v1082_v45 }
 0x146 PF: > { %s13_s18 = sadd.s32 1, %s1660_s18   ;;  %s2079_s12 = smov %s1640_s13 }
 0x147   : > { %p10_p0 = scmp.ge.s32.totalorder %s13_s18, 18   ;;  %s2080_s13 = smov %s1734_s25 }
 0x148   : > { %s2081_s14 = smov %s1652_s16  ;;  %s2082_s15 = smov %s1656_s17 }
 0x149   : > { %s2083_s16 = smov %s2086_s19  ;;  %s2084_s17 = smov %s2090_s20 }
 0x14a   :  { %12 = sbr.rel (!%p10_p0) target bundleno = 4 (0x4), region = 119 }

// kernel: _lambda_.23
= control target key start
LH: loop header
LB: loop body
LE: loop exit
PB: predicated region body
PF: predicated region fallthrough
CT: control target
= control target key end

     0   :  { %s1681_s12 = smov 0   ;;  %s1683_s13 = smov 0   ;;  %s2073_s0 = inlined_call_operand.vmem [shape: bf16[8,1024], index: 0, kind: input, shape index: {}]   ;;  %s2074_s1 = inlined_call_operand.vmem [shape: bf16[1024,1024], index: 1, kind: input, shape index: {}]   ;;  %s2075_s2 = inlined_call_operand.vmem [shape: f32[1,1024], index: 2, kind: input, shape index: {}]   ;;  %s2076_s3 = inlined_call_operand.vmem [shape: f32[8,1024], index: 3, kind: output, shape index: {}]  }
   0x1   :  { %s1685_s14 = smov 0   ;;  %s1687_s15 = smov 0  }
   0x2   :  { %s1689_s16 = smov 0   ;;  %s1691_s17 = smov 0  }
   0x3   :  { %s1693_s18 = smov 0  }
   0x4 LB: > { %s25_s19 = sadd.s32 1, %s1650_s16  ;;  %s28_s20 = sadd.s32 1, %s1654_s17  ;;  %s1658_s18 = sphi %s1693_s18, %s13_s18   ;;  %s1654_s17 = sphi %s1691_s17, %s2082_s17   ;;  %s1650_s16 = sphi %s1689_s16, %s2081_s16   ;;  %s1646_s15 = sphi %s1687_s15, %s2080_s15   ;;  %s1642_s14 = sphi %s1685_s14, %s2079_s14   ;;  %s1638_s13 = sphi %s1683_s13, %s2078_s13   ;;  %s1634_s12 = sphi %s1681_s12, %s2077_s12  }
   0x5   : > { %p26_p0 = scmp.ge.s32.totalorder %s25_s19, 2  ;;  %p76_p1 = scmp.ne.s32.totalorder %s1638_s13, %s1634_s12 }
   0x6   : > { %p77_p2 = scmp.eq.s32.totalorder %s1658_s18, 0  ;;  %s69_s24 = sadd.s32 1, %s1638_s13 }
   0x7   : > { %s2084_s19 = smov (%p26_p0, %s25_s19), 0  ;;  %s2086_s20 = smov (!%p26_p0, %s28_s20), %s1654_s17 }
   0x8   : > { %p78_p3 = por %p77_p2, %p76_p1  ;;  %p30_p4 = scmp.ge.s32.totalorder %s2086_s20, 4 }
   0x9   : > { %s64_s21 = ssub.s32 %s1650_s16, %s2084_s19  ;;  %p1209_p6 = scmp.ge.s32.totalorder %s1658_s18, 8 }
   0xa   : > { %s2088_s20 = smov (%p30_p4, %s2086_s20), 0 }
   0xb   : > { %s65_s22 = ssub.s32 %s1654_s17, %s2088_s20  ;;  %156 = sbr.rel (%p1209_p6) target bundleno = 87 (0x57), region = 16 }
   0xc   : > { %s66_s23 = sor.u32 %s65_s22, %s64_s21 }
   0xd   : > { %p67_p5 = scmp.eq.s32.totalorder %s66_s23, 0 }
   0xf   : > { %s1732_s25 = scalar_select %p67_p5, %s1638_s13, %s69_s24  }
  0x10   : > { %172 = sbr.rel (!%p78_p3) target bundleno = 87 (0x57), region = 24  ;;  %s174_s26 = sand.u32 (%p78_p3), 1, %s1638_s13  }
  0x11   : > { %s1212_s27 = sshll.u32 (%p78_p3), %s1654_s17, 1  ;;  %s1210_s28 = sshll.u32 (%p78_p3), %s174_s26, 9 }
  0x12   : > { %s1482_s29 = sshll.u32 (%p78_p3), %s1650_s16, 9  ;;  %s1746_s8 = scalar_lea.vmem (%p78_p3), [#allocation3], %s1210_s28 }
  0x13   : > { %s180_s30 = sadd.s32 (%p78_p3), %s1482_s29, %s1212_s27 }
  0x14   : > { %s1214_s4 = sshll.u32 (%p78_p3), %s180_s30, 2 }
  0x15   : > { %s1741_s7 = scalar_lea.vmem %s2074_s1, %s1214_s4 }
  0x16   : > { %v337_v0 = vld [vmem:[%s1741_s7] sm:$0xff] }
  0x17   : > { %v339_v1 = vld [vmem:[%s1741_s7 + $0x20] sm:$0xff]  ;;  %338 = vst [vmem:[%s1746_s8] sm:$0xff] %v337_v0 }
  0x18   : > { %v341_v2 = vld [vmem:[%s1741_s7 + $0x40] sm:$0xff]  ;;  %340 = vst [vmem:[%s1746_s8 + $0x8] sm:$0xff] %v339_v1 }
  0x19   : > { %v343_v3 = vld [vmem:[%s1741_s7 + $0x60] sm:$0xff]  ;;  %342 = vst [vmem:[%s1746_s8 + $0x10] sm:$0xff] %v341_v2 }
  0x1a   : > { %v345_v4 = vld [vmem:[%s1741_s7 + $0x80] sm:$0xff]  ;;  %344 = vst [vmem:[%s1746_s8 + $0x18] sm:$0xff] %v343_v3 }
  0x1b   : > { %v347_v5 = vld [vmem:[%s1741_s7 + $0xa0] sm:$0xff]  ;;  %346 = vst [vmem:[%s1746_s8 + $0x20] sm:$0xff] %v345_v4 }
  0x1c   : > { %v349_v6 = vld [vmem:[%s1741_s7 + $0xc0] sm:$0xff]  ;;  %348 = vst [vmem:[%s1746_s8 + $0x28] sm:$0xff] %v347_v5 }
  0x1d   : > { %v351_v7 = vld [vmem:[%s1741_s7 + $0xe0] sm:$0xff]  ;;  %350 = vst [vmem:[%s1746_s8 + $0x30] sm:$0xff] %v349_v6 }
  0x1e   : > { %v353_v8 = vld [vmem:[%s1741_s7 + $0x100] sm:$0xff]  ;;  %352 = vst [vmem:[%s1746_s8 + $0x38] sm:$0xff] %v351_v7 }
  0x1f   : > { %v355_v9 = vld [vmem:[%s1741_s7 + $0x120] sm:$0xff]  ;;  %354 = vst [vmem:[%s1746_s8 + $0x40] sm:$0xff] %v353_v8 }
  0x20   : > { %v357_v10 = vld [vmem:[%s1741_s7 + $0x140] sm:$0xff]  ;;  %356 = vst [vmem:[%s1746_s8 + $0x48] sm:$0xff] %v355_v9 }
  0x21   : > { %v359_v11 = vld [vmem:[%s1741_s7 + $0x160] sm:$0xff]  ;;  %358 = vst [vmem:[%s1746_s8 + $0x50] sm:$0xff] %v357_v10 }
  0x22   : > { %v361_v12 = vld [vmem:[%s1741_s7 + $0x180] sm:$0xff]  ;;  %360 = vst [vmem:[%s1746_s8 + $0x58] sm:$0xff] %v359_v11 }
  0x23   : > { %v363_v13 = vld [vmem:[%s1741_s7 + $0x1a0] sm:$0xff]  ;;  %362 = vst [vmem:[%s1746_s8 + $0x60] sm:$0xff] %v361_v12 }
  0x24   : > { %v365_v14 = vld [vmem:[%s1741_s7 + $0x1c0] sm:$0xff]  ;;  %364 = vst [vmem:[%s1746_s8 + $0x68] sm:$0xff] %v363_v13 }
  0x25   : > { %v367_v15 = vld [vmem:[%s1741_s7 + $0x1e0] sm:$0xff]  ;;  %366 = vst [vmem:[%s1746_s8 + $0x70] sm:$0xff] %v365_v14 }
  0x26   : > { %v369_v16 = vld [vmem:[%s1741_s7 + $0x200] sm:$0xff]  ;;  %368 = vst [vmem:[%s1746_s8 + $0x78] sm:$0xff] %v367_v15 }
  0x27   : > { %v371_v17 = vld [vmem:[%s1741_s7 + $0x220] sm:$0xff]  ;;  %370 = vst [vmem:[%s1746_s8 + $0x80] sm:$0xff] %v369_v16 }
  0x28   : > { %v373_v18 = vld [vmem:[%s1741_s7 + $0x240] sm:$0xff]  ;;  %372 = vst [vmem:[%s1746_s8 + $0x88] sm:$0xff] %v371_v17 }
  0x29   : > { %v375_v19 = vld [vmem:[%s1741_s7 + $0x260] sm:$0xff]  ;;  %374 = vst [vmem:[%s1746_s8 + $0x90] sm:$0xff] %v373_v18 }
  0x2a   : > { %v377_v20 = vld [vmem:[%s1741_s7 + $0x280] sm:$0xff]  ;;  %376 = vst [vmem:[%s1746_s8 + $0x98] sm:$0xff] %v375_v19 }
  0x2b   : > { %v379_v21 = vld [vmem:[%s1741_s7 + $0x2a0] sm:$0xff]  ;;  %378 = vst [vmem:[%s1746_s8 + $0xa0] sm:$0xff] %v377_v20 }
  0x2c   : > { %v381_v22 = vld [vmem:[%s1741_s7 + $0x2c0] sm:$0xff]  ;;  %380 = vst [vmem:[%s1746_s8 + $0xa8] sm:$0xff] %v379_v21 }
  0x2d   : > { %v383_v23 = vld [vmem:[%s1741_s7 + $0x2e0] sm:$0xff]  ;;  %382 = vst [vmem:[%s1746_s8 + $0xb0] sm:$0xff] %v381_v22 }
  0x2e   : > { %v385_v24 = vld [vmem:[%s1741_s7 + $0x300] sm:$0xff]  ;;  %384 = vst [vmem:[%s1746_s8 + $0xb8] sm:$0xff] %v383_v23 }
  0x2f   : > { %v387_v25 = vld [vmem:[%s1741_s7 + $0x320] sm:$0xff]  ;;  %386 = vst [vmem:[%s1746_s8 + $0xc0] sm:$0xff] %v385_v24 }
  0x30   : > { %v389_v26 = vld [vmem:[%s1741_s7 + $0x340] sm:$0xff]  ;;  %388 = vst [vmem:[%s1746_s8 + $0xc8] sm:$0xff] %v387_v25 }
  0x31   : > { %v391_v27 = vld [vmem:[%s1741_s7 + $0x360] sm:$0xff]  ;;  %390 = vst [vmem:[%s1746_s8 + $0xd0] sm:$0xff] %v389_v26 }
  0x32   : > { %v393_v28 = vld [vmem:[%s1741_s7 + $0x380] sm:$0xff]  ;;  %392 = vst [vmem:[%s1746_s8 + $0xd8] sm:$0xff] %v391_v27 }
  0x33   : > { %v395_v29 = vld [vmem:[%s1741_s7 + $0x3a0] sm:$0xff]  ;;  %394 = vst [vmem:[%s1746_s8 + $0xe0] sm:$0xff] %v393_v28 }
  0x34   : > { %v397_v30 = vld [vmem:[%s1741_s7 + $0x3c0] sm:$0xff]  ;;  %396 = vst [vmem:[%s1746_s8 + $0xe8] sm:$0xff] %v395_v29 }
  0x35   : > { %v399_v31 = vld [vmem:[%s1741_s7 + $0x3e0] sm:$0xff]  ;;  %398 = vst [vmem:[%s1746_s8 + $0xf0] sm:$0xff] %v397_v30 }
  0x36   : > { %v401_v32 = vld [vmem:[%s1741_s7 + $0x400] sm:$0xff]  ;;  %400 = vst [vmem:[%s1746_s8 + $0xf8] sm:$0xff] %v399_v31 }
  0x37   : > { %v403_v33 = vld [vmem:[%s1741_s7 + $0x420] sm:$0xff]  ;;  %402 = vst [vmem:[%s1746_s8 + $0x100] sm:$0xff] %v401_v32 }
  0x38   : > { %v405_v34 = vld [vmem:[%s1741_s7 + $0x440] sm:$0xff]  ;;  %404 = vst [vmem:[%s1746_s8 + $0x108] sm:$0xff] %v403_v33 }
  0x39   : > { %v407_v35 = vld [vmem:[%s1741_s7 + $0x460] sm:$0xff]  ;;  %406 = vst [vmem:[%s1746_s8 + $0x110] sm:$0xff] %v405_v34 }
  0x3a   : > { %v409_v36 = vld [vmem:[%s1741_s7 + $0x480] sm:$0xff]  ;;  %408 = vst [vmem:[%s1746_s8 + $0x118] sm:$0xff] %v407_v35 }
  0x3b   : > { %v411_v37 = vld [vmem:[%s1741_s7 + $0x4a0] sm:$0xff]  ;;  %410 = vst [vmem:[%s1746_s8 + $0x120] sm:$0xff] %v409_v36 }
  0x3c   : > { %v413_v38 = vld [vmem:[%s1741_s7 + $0x4c0] sm:$0xff]  ;;  %412 = vst [vmem:[%s1746_s8 + $0x128] sm:$0xff] %v411_v37 }
  0x3d   : > { %v415_v39 = vld [vmem:[%s1741_s7 + $0x4e0] sm:$0xff]  ;;  %414 = vst [vmem:[%s1746_s8 + $0x130] sm:$0xff] %v413_v38 }
  0x3e   : > { %v417_v40 = vld [vmem:[%s1741_s7 + $0x500] sm:$0xff]  ;;  %416 = vst [vmem:[%s1746_s8 + $0x138] sm:$0xff] %v415_v39 }
  0x3f   : > { %v419_v41 = vld [vmem:[%s1741_s7 + $0x520] sm:$0xff]  ;;  %418 = vst [vmem:[%s1746_s8 + $0x140] sm:$0xff] %v417_v40 }
  0x40   : > { %v421_v42 = vld [vmem:[%s1741_s7 + $0x540] sm:$0xff]  ;;  %420 = vst [vmem:[%s1746_s8 + $0x148] sm:$0xff] %v419_v41 }
  0x41   : > { %v423_v43 = vld [vmem:[%s1741_s7 + $0x560] sm:$0xff]  ;;  %422 = vst [vmem:[%s1746_s8 + $0x150] sm:$0xff] %v421_v42 }
  0x42   : > { %v425_v44 = vld [vmem:[%s1741_s7 + $0x580] sm:$0xff]  ;;  %424 = vst [vmem:[%s1746_s8 + $0x158] sm:$0xff] %v423_v43 }
  0x43   : > { %v427_v45 = vld [vmem:[%s1741_s7 + $0x5a0] sm:$0xff]  ;;  %426 = vst [vmem:[%s1746_s8 + $0x160] sm:$0xff] %v425_v44 }
  0x44   : > { %v429_v46 = vld [vmem:[%s1741_s7 + $0x5c0] sm:$0xff]  ;;  %428 = vst [vmem:[%s1746_s8 + $0x168] sm:$0xff] %v427_v45 }
  0x45   : > { %v431_v47 = vld [vmem:[%s1741_s7 + $0x5e0] sm:$0xff]  ;;  %430 = vst [vmem:[%s1746_s8 + $0x170] sm:$0xff] %v429_v46 }
  0x46   : > { %v433_v48 = vld [vmem:[%s1741_s7 + $0x600] sm:$0xff]  ;;  %432 = vst [vmem:[%s1746_s8 + $0x178] sm:$0xff] %v431_v47 }
  0x47   : > { %v435_v49 = vld [vmem:[%s1741_s7 + $0x620] sm:$0xff]  ;;  %434 = vst [vmem:[%s1746_s8 + $0x180] sm:$0xff] %v433_v48 }
  0x48   : > { %v437_v50 = vld [vmem:[%s1741_s7 + $0x640] sm:$0xff]  ;;  %436 = vst [vmem:[%s1746_s8 + $0x188] sm:$0xff] %v435_v49 }
  0x49   : > { %v439_v51 = vld [vmem:[%s1741_s7 + $0x660] sm:$0xff]  ;;  %438 = vst [vmem:[%s1746_s8 + $0x190] sm:$0xff] %v437_v50 }
  0x4a   : > { %v441_v52 = vld [vmem:[%s1741_s7 + $0x680] sm:$0xff]  ;;  %440 = vst [vmem:[%s1746_s8 + $0x198] sm:$0xff] %v439_v51 }
  0x4b   : > { %v443_v53 = vld [vmem:[%s1741_s7 + $0x6a0] sm:$0xff]  ;;  %442 = vst [vmem:[%s1746_s8 + $0x1a0] sm:$0xff] %v441_v52 }
  0x4c   : > { %v445_v54 = vld [vmem:[%s1741_s7 + $0x6c0] sm:$0xff]  ;;  %444 = vst [vmem:[%s1746_s8 + $0x1a8] sm:$0xff] %v443_v53 }
  0x4d   : > { %v447_v55 = vld [vmem:[%s1741_s7 + $0x6e0] sm:$0xff]  ;;  %446 = vst [vmem:[%s1746_s8 + $0x1b0] sm:$0xff] %v445_v54 }
  0x4e   : > { %v449_v56 = vld [vmem:[%s1741_s7 + $0x700] sm:$0xff]  ;;  %448 = vst [vmem:[%s1746_s8 + $0x1b8] sm:$0xff] %v447_v55 }
  0x4f   : > { %v451_v57 = vld [vmem:[%s1741_s7 + $0x720] sm:$0xff]  ;;  %450 = vst [vmem:[%s1746_s8 + $0x1c0] sm:$0xff] %v449_v56 }
  0x50   : > { %v453_v58 = vld [vmem:[%s1741_s7 + $0x740] sm:$0xff]  ;;  %452 = vst [vmem:[%s1746_s8 + $0x1c8] sm:$0xff] %v451_v57 }
  0x51   : > { %v455_v59 = vld [vmem:[%s1741_s7 + $0x760] sm:$0xff]  ;;  %454 = vst [vmem:[%s1746_s8 + $0x1d0] sm:$0xff] %v453_v58 }
  0x52   : > { %v457_v60 = vld [vmem:[%s1741_s7 + $0x780] sm:$0xff]  ;;  %456 = vst [vmem:[%s1746_s8 + $0x1d8] sm:$0xff] %v455_v59 }
  0x53   : > { %v459_v61 = vld [vmem:[%s1741_s7 + $0x7a0] sm:$0xff]  ;;  %458 = vst [vmem:[%s1746_s8 + $0x1e0] sm:$0xff] %v457_v60 }
  0x54   : > { %v461_v62 = vld [vmem:[%s1741_s7 + $0x7c0] sm:$0xff]  ;;  %460 = vst [vmem:[%s1746_s8 + $0x1e8] sm:$0xff] %v459_v61 }
  0x55   : > { %v463_v63 = vld [vmem:[%s1741_s7 + $0x7e0] sm:$0xff]  ;;  %462 = vst [vmem:[%s1746_s8 + $0x1f0] sm:$0xff] %v461_v62 }
  0x56   : > { %464 = vst [vmem:[%s1746_s8 + $0x1f8] sm:$0xff] %v463_v63 }
  0x57 PF: > { %p1215_p7 = scmp.ge.s32.totalorder %s1658_s18, 1  ;;  %p477_p8 = scmp.lt.s32.totalorder %s1658_s18, 9 }
  0x59   : > { %p478_p9 = pnand %p1215_p7, %p477_p8 }
  0x5a   : > { %s484_s9 = sand.u32 (!%p478_p9), 1, %s1634_s12   ;;  %s1217_s10 = sshll.u32 (!%p478_p9), %s1642_s14, 2 }
  0x5b   : > { %481 = sbr.rel (%p478_p9) target bundleno = 324 (0x144), region = 66  ;;  %s1216_s11 = sshll.u32 (!%p478_p9), %s484_s9, 9 }
  0x5c   : > { %p527_p10 = scmp.lt.s32.totalorder (!%p478_p9), %s1217_s10, 7  ;;  %s1219_s21 = sshll.u32 (!%p478_p9), %s1646_s15, 1 }
  0x5d   : > { %p537_p11 = scmp.lt.s32.totalorder (!%p478_p9), %s1219_s21, 7  ;;  %s1895_s5 = scalar_lea.vmem (!%p478_p9), [#allocation3], %s1216_s11 }
  0x5e   : > { %p1222_p12 = scmp.ne.s32.totalorder (!%p478_p9), %s1642_s14, 0 }
  0x60   : > { %s2090_s10 = smov (!%p527_p10, %s1217_s10), 7  ;;  %s2092_s21 = smov (!%p537_p11, %s1219_s21), 7 }
  0x61   : > { %s1218_s22 = sshll.u32 %s2090_s10, 2  ;;  %s539_s12 = scalar_lea.vmem %s2075_s2, %s2092_s21 }
  0x62   : > { %s1881_s26 = scalar_lea.vmem %s2073_s0, %s1218_s22  ;;  %s1221_s29 = sshll.u32 %s2092_s21, 3 }
  0x63   : > { %s1893_s15 = scalar_lea.vmem %s2076_s3, %s1221_s29  ;;  %554 = sbr.rel (%p1222_p12) target bundleno = 107 (0x6b), region = 74 }
  0x68   : > { %v1660_v0 = vmov 0.0  }
  0x69   : > { %555 = vst [vmem:[#allocation2] sm:$0xff] %v1660_v0 }
  0x6a   : > { %556 = vst [vmem:[#allocation2 + $0x8] sm:$0xff] %v1660_v0 }
  0x6b PF: > { %v1281_v1 = vld [vmem:[%s1895_s5 + $0x70] sm:$0xf]  ;;  %v1498_v2 = vld [vmem:[%s1895_s5 + $0x74] sm:$0xf0]  ;;  %v1273_v12 = vld [vmem:[%s1895_s5 + $0x60] sm:$0xf] }
  0x6c   : > { %v1345_v3 = vld [vmem:[%s1895_s5 + $0xf0] sm:$0xf]  ;;  %v1282_v4 = vor.u32 %v1498_v2, %v1281_v1  ;;  %v1514_v5 = vld [vmem:[%s1895_s5 + $0xf4] sm:$0xf0]  ;;  %v1496_v14 = vld [vmem:[%s1895_s5 + $0x64] sm:$0xf0] }
  0x6d   : > { %v1409_v6 = vld [vmem:[%s1895_s5 + $0x170] sm:$0xf]  ;;  %v1530_v7 = vld [vmem:[%s1895_s5 + $0x174] sm:$0xf0]  ;;  %v1346_v8 = vor.u32 %v1514_v5, %v1345_v3  ;;  %v1337_v15 = vld [vmem:[%s1895_s5 + $0xe0] sm:$0xf]  ;;  %v1274_v17 = vor.u32 %v1496_v14, %v1273_v12 }
  0x6e   : > { %v1410_v9 = vor.u32 %v1530_v7, %v1409_v6  ;;  %v1473_v10 = vld [vmem:[%s1895_s5 + $0x1f0] sm:$0xf]  ;;  %v1546_v11 = vld [vmem:[%s1895_s5 + $0x1f4] sm:$0xf0]  ;;  %959 = vmatpush.bf16.msra.mxu0 %v1282_v4  ;;  %v1512_v16 = vld [vmem:[%s1895_s5 + $0xe4] sm:$0xf0] }
  0x6f   : > { %v1474_v13 = vor.u32 %v1546_v11, %v1473_v10  ;;  %972 = vmatpush.bf16.msra.mxu1 %v1346_v8  ;;  %v1338_v18 = vor.u32 %v1512_v16, %v1337_v15  ;;  %v1401_v19 = vld [vmem:[%s1895_s5 + $0x160] sm:$0xf]  ;;  %v1528_v20 = vld [vmem:[%s1895_s5 + $0x164] sm:$0xf0]  ;;  %v1265_v24 = vld [vmem:[%s1895_s5 + $0x50] sm:$0xf] }
  0x70   : > { %985 = vmatpush.bf16.msra.mxu2 %v1410_v9  ;;  %v1465_v21 = vld [vmem:[%s1895_s5 + $0x1e0] sm:$0xf]  ;;  %v1402_v22 = vor.u32 %v1528_v20, %v1401_v19  ;;  %v1544_v23 = vld [vmem:[%s1895_s5 + $0x1e4] sm:$0xf0]  ;;  %v1494_v25 = vld [vmem:[%s1895_s5 + $0x54] sm:$0xf0] }
  0x71   : > { %998 = vmatpush.bf16.msra.mxu3 %v1474_v13  ;;  %v1466_v26 = vor.u32 %v1544_v23, %v1465_v21  ;;  %v1329_v27 = vld [vmem:[%s1895_s5 + $0xd0] sm:$0xf]  ;;  %v1510_v28 = vld [vmem:[%s1895_s5 + $0xd4] sm:$0xf0]  ;;  %v1266_v30 = vor.u32 %v1494_v25, %v1265_v24  ;;  %v1257_v36 = vld [vmem:[%s1895_s5 + $0x40] sm:$0xf] }
  0x72   : > { %v1393_v29 = vld [vmem:[%s1895_s5 + $0x150] sm:$0xf]  ;;  %960 = vmatpush.bf16.msra.mxu0 %v1274_v17  ;;  %v1526_v31 = vld [vmem:[%s1895_s5 + $0x154] sm:$0xf0]  ;;  %v1330_v34 = vor.u32 %v1510_v28, %v1329_v27  ;;  %v1492_v37 = vld [vmem:[%s1895_s5 + $0x44] sm:$0xf0] }
  0x73   : > { %v1457_v32 = vld [vmem:[%s1895_s5 + $0x1d0] sm:$0xf]  ;;  %v1542_v33 = vld [vmem:[%s1895_s5 + $0x1d4] sm:$0xf0]  ;;  %973 = vmatpush.bf16.msra.mxu1 %v1338_v18  ;;  %v1394_v35 = vor.u32 %v1526_v31, %v1393_v29  ;;  %v1321_v38 = vld [vmem:[%s1895_s5 + $0xc0] sm:$0xf]  ;;  %v1258_v45 = vor.u32 %v1492_v37, %v1257_v36 }
  0x74   : > { %986 = vmatpush.bf16.msra.mxu2 %v1402_v22  ;;  %v1458_v39 = vor.u32 %v1542_v33, %v1457_v32  ;;  %v1508_v40 = vld [vmem:[%s1895_s5 + $0xc4] sm:$0xf0]  ;;  %v1385_v41 = vld [vmem:[%s1895_s5 + $0x140] sm:$0xf]  ;;  %v1249_v48 = vld [vmem:[%s1895_s5 + $0x30] sm:$0xf] }
  0x75   : > { %999 = vmatpush.bf16.msra.mxu3 %v1466_v26  ;;  %v1524_v42 = vld [vmem:[%s1895_s5 + $0x144] sm:$0xf0]  ;;  %v1449_v43 = vld [vmem:[%s1895_s5 + $0x1c0] sm:$0xf]  ;;  %v1322_v46 = vor.u32 %v1508_v40, %v1321_v38  ;;  %v1490_v49 = vld [vmem:[%s1895_s5 + $0x34] sm:$0xf0] }
  0x76   : > { %v1540_v44 = vld [vmem:[%s1895_s5 + $0x1c4] sm:$0xf0]  ;;  %961 = vmatpush.bf16.msra.mxu0 %v1266_v30  ;;  %v1386_v47 = vor.u32 %v1524_v42, %v1385_v41  ;;  %v1313_v50 = vld [vmem:[%s1895_s5 + $0xb0] sm:$0xf]  ;;  %v1506_v52 = vld [vmem:[%s1895_s5 + $0xb4] sm:$0xf0]  ;;  %v1250_v57 = vor.u32 %v1490_v49, %v1249_v48 }
  0x77   : > { %974 = vmatpush.bf16.msra.mxu1 %v1330_v34  ;;  %v1450_v51 = vor.u32 %v1540_v44, %v1449_v43  ;;  %v1377_v53 = vld [vmem:[%s1895_s5 + $0x130] sm:$0xf]  ;;  %v1522_v54 = vld [vmem:[%s1895_s5 + $0x134] sm:$0xf0]  ;;  %v1314_v58 = vor.u32 %v1506_v52, %v1313_v50  ;;  %v1241_v60 = vld [vmem:[%s1895_s5 + $0x20] sm:$0xf] }
  0x78   : > { %987 = vmatpush.bf16.msra.mxu2 %v1394_v35  ;;  %v1441_v55 = vld [vmem:[%s1895_s5 + $0x1b0] sm:$0xf]  ;;  %v1538_v56 = vld [vmem:[%s1895_s5 + $0x1b4] sm:$0xf0]  ;;  %v1378_v59 = vor.u32 %v1522_v54, %v1377_v53  ;;  %v1488_v61 = vld [vmem:[%s1895_s5 + $0x24] sm:$0xf0] }
  0x79   : > { %1000 = vmatpush.bf16.msra.mxu3 %v1458_v39  ;;  %v1305_v62 = vld [vmem:[%s1895_s5 + $0xa0] sm:$0xf]  ;;  %v1442_v63 = vor.u32 %v1538_v56, %v1441_v55  ;;  %v1504_v0 = vld [vmem:[%s1895_s5 + $0xa4] sm:$0xf0]  ;;  %v1242_v5 = vor.u32 %v1488_v61, %v1241_v60  ;;  %v1233_v8 = vld [vmem:[%s1895_s5 + $0x10] sm:$0xf] }
  0x7a   : > { %962 = vmatpush.bf16.msra.mxu0 %v1258_v45  ;;  %v1369_v1 = vld [vmem:[%s1895_s5 + $0x120] sm:$0xf]  ;;  %v1520_v2 = vld [vmem:[%s1895_s5 + $0x124] sm:$0xf0]  ;;  %v1306_v6 = vor.u32 %v1504_v0, %v1305_v62  ;;  %v1486_v9 = vld [vmem:[%s1895_s5 + $0x14] sm:$0xf0] }
  0x7b   : > { %975 = vmatpush.bf16.msra.mxu1 %v1322_v46  ;;  %v1433_v3 = vld [vmem:[%s1895_s5 + $0x1a0] sm:$0xf]  ;;  %v1536_v4 = vld [vmem:[%s1895_s5 + $0x1a4] sm:$0xf0]  ;;  %v1370_v7 = vor.u32 %v1520_v2, %v1369_v1  ;;  %v1297_v10 = vld [vmem:[%s1895_s5 + $0x90] sm:$0xf]  ;;  %v1234_v17 = vor.u32 %v1486_v9, %v1233_v8 }
  0x7c   : > { %988 = vmatpush.bf16.msra.mxu2 %v1386_v47  ;;  %v1434_v11 = vor.u32 %v1536_v4, %v1433_v3  ;;  %v1502_v12 = vld [vmem:[%s1895_s5 + $0x94] sm:$0xf0]  ;;  %v1361_v13 = vld [vmem:[%s1895_s5 + $0x110] sm:$0xf]  ;;  %v1225_v18 = vld [vmem:[%s1895_s5] sm:$0xf] }
  0x7d   : > { %1001 = vmatpush.bf16.msra.mxu3 %v1450_v51  ;;  %v1518_v14 = vld [vmem:[%s1895_s5 + $0x114] sm:$0xf0]  ;;  %v1425_v15 = vld [vmem:[%s1895_s5 + $0x190] sm:$0xf]  ;;  %v1484_v19 = vld [vmem:[%s1895_s5 + $0x4] sm:$0xf0]  ;;  %v1298_v21 = vor.u32 %v1502_v12, %v1297_v10 }
  0x7e   : > { %963 = vmatpush.bf16.msra.mxu0 %v1250_v57  ;;  %v1534_v16 = vld [vmem:[%s1895_s5 + $0x194] sm:$0xf0]  ;;  %v1289_v20 = vld [vmem:[%s1895_s5 + $0x80] sm:$0xf]  ;;  %v1362_v22 = vor.u32 %v1518_v14, %v1361_v13  ;;  %v1500_v23 = vld [vmem:[%s1895_s5 + $0x84] sm:$0xf0]  ;;  %v1226_v33 = vor.u32 %v1484_v19, %v1225_v18 }
  0x7f   : > { %976 = vmatpush.bf16.msra.mxu1 %v1314_v58  ;;  %v1353_v24 = vld [vmem:[%s1895_s5 + $0x100] sm:$0xf]  ;;  %v1516_v25 = vld [vmem:[%s1895_s5 + $0x104] sm:$0xf0]  ;;  %v1426_v26 = vor.u32 %v1534_v16, %v1425_v15  ;;  %v1497_v29 = vld [vmem:[%s1895_s5 + $0x74] sm:$0xf]  ;;  %v1290_v38 = vor.u32 %v1500_v23, %v1289_v20 }
  0x80   : > { %989 = vmatpush.bf16.msra.mxu2 %v1378_v59  ;;  %v1417_v27 = vld [vmem:[%s1895_s5 + $0x180] sm:$0xf]  ;;  %v1532_v28 = vld [vmem:[%s1895_s5 + $0x184] sm:$0xf0]  ;;  %v1283_v30 = vld [vmem:[%s1895_s5 + $0x78] sm:$0xf0]  ;;  %v1354_v39 = vor.u32 %v1516_v25, %v1353_v24 }
  0x81   : > { %1002 = vmatpush.bf16.msra.mxu3 %v1442_v63  ;;  %v1513_v31 = vld [vmem:[%s1895_s5 + $0xf4] sm:$0xf]  ;;  %v560_v32 = vld [vmem:[%s1881_s26 + $0x8] sm:$0xff]  ;;  %v1418_v43 = vor.u32 %v1532_v28, %v1417_v27  ;;  %v1286_v44 = vor.u32 %v1497_v29, %v1283_v30  ;;  %v1495_v48 = vld [vmem:[%s1895_s5 + $0x64] sm:$0xf]  ;;  %p1479_p13 = scmp.ne.s32.totalorder %s1642_s14, 1 }
  0x82   : > { %964 = vmatpush.bf16.msra.mxu0 %v1242_v5  ;;  %v1347_v34 = vld [vmem:[%s1895_s5 + $0xf8] sm:$0xf0]  ;;  %v1529_v35 = vld [vmem:[%s1895_s5 + $0x174] sm:$0xf]  ;;  %v629_v37 = vunpack.c.l.b16 %v560_v32  ;;  %v630_v42 = vunpack.c.h.b16 %v560_v32  ;;  %v1275_v49 = vld [vmem:[%s1895_s5 + $0x68] sm:$0xf0] }
  0x83   : > { %977 = vmatpush.bf16.msra.mxu1 %v1306_v6  ;;  %v1411_v36 = vld [vmem:[%s1895_s5 + $0x178] sm:$0xf0]  ;;  %v1545_v40 = vld [vmem:[%s1895_s5 + $0x1f4] sm:$0xf]  ;;  %v1350_v46 = vor.u32 %v1513_v31, %v1347_v34  ;;  %v1511_v50 = vld [vmem:[%s1895_s5 + $0xe4] sm:$0xf]  ;;  %v1278_v62 = vor.u32 %v1495_v48, %v1275_v49 }
  0x84   : > { %990 = vmatpush.bf16.msra.mxu2 %v1370_v7  ;;  %v1475_v41 = vld [vmem:[%s1895_s5 + $0x1f8] sm:$0xf0]  ;;  %v559_v45 = vld [vmem:[%s1881_s26] sm:$0xff]  ;;  %v1414_v47 = vor.u32 %v1529_v35, %v1411_v36  ;;  %v1339_v54 = vld [vmem:[%s1895_s5 + $0xe8] sm:$0xf0]  ;;  %v1978_v57 = vpack.c.b16 %v629_v37, %v629_v37  ;;  %v1982_v60 = vpack.c.b16 %v630_v42, %v630_v42 }
  0x85   : > { %1003 = vmatpush.bf16.msra.mxu3 %v1434_v11  ;;  %v627_v51 = vunpack.c.l.b16 %v559_v45  ;;  %v628_v52 = vunpack.c.h.b16 %v559_v45  ;;  %v1478_v53 = vor.u32 %v1545_v40, %v1475_v41  ;;  %v1527_v55 = vld [vmem:[%s1895_s5 + $0x164] sm:$0xf]  ;;  %v1403_v56 = vld [vmem:[%s1895_s5 + $0x168] sm:$0xf0]  ;;  %v1342_v0 = vor.u32 %v1511_v50, %v1339_v54  ;;  %v1493_v2 = vld [vmem:[%s1895_s5 + $0x54] sm:$0xf] }
  0x86   : > { %965 = vmatpush.bf16.msra.mxu0 %v1234_v17  ;;  %v1543_v58 = vld [vmem:[%s1895_s5 + $0x1e4] sm:$0xf]  ;;  %v1467_v59 = vld [vmem:[%s1895_s5 + $0x1e8] sm:$0xf0]  ;;  %v1406_v1 = vor.u32 %v1527_v55, %v1403_v56  ;;  %v1267_v3 = vld [vmem:[%s1895_s5 + $0x58] sm:$0xf0] }
  0x87   : > { %978 = vmatpush.bf16.msra.mxu1 %v1298_v21  ;;  %v1984_v61 = vpack.c.b16 %v627_v51, %v627_v51  ;;  %v1986_v63 = vpack.c.b16 %v628_v52, %v628_v52  ;;  %v1509_v4 = vld [vmem:[%s1895_s5 + $0xd4] sm:$0xf]  ;;  %v1470_v5 = vor.u32 %v1543_v58, %v1467_v59  ;;  %v1331_v6 = vld [vmem:[%s1895_s5 + $0xd8] sm:$0xf0]  ;;  %v1270_v11 = vor.u32 %v1493_v2, %v1267_v3  ;;  %v1491_v14 = vld [vmem:[%s1895_s5 + $0x44] sm:$0xf] }
  0x88   : > { %991 = vmatpush.bf16.msra.mxu2 %v1362_v22  ;;  %v1525_v7 = vld [vmem:[%s1895_s5 + $0x154] sm:$0xf]  ;;  %v1395_v8 = vld [vmem:[%s1895_s5 + $0x158] sm:$0xf0]  ;;  %v1334_v12 = vor.u32 %v1509_v4, %v1331_v6  ;;  %v1259_v15 = vld [vmem:[%s1895_s5 + $0x48] sm:$0xf0] }
  0x89   : > { %1004 = vmatpush.bf16.msra.mxu3 %v1426_v26  ;;  %v1541_v9 = vld [vmem:[%s1895_s5 + $0x1d4] sm:$0xf]  ;;  %v1459_v10 = vld [vmem:[%s1895_s5 + $0x1d8] sm:$0xf0]  ;;  %v1398_v13 = vor.u32 %v1525_v7, %v1395_v8  ;;  %v1507_v16 = vld [vmem:[%s1895_s5 + $0xc4] sm:$0xf]  ;;  %v1262_v23 = vor.u32 %v1491_v14, %v1259_v15 }
  0x8a   : > { %966 = vmatpush.bf16.msra.mxu0 %v1226_v33  ;;  %v1462_v17 = vor.u32 %v1541_v9, %v1459_v10  ;;  %v1323_v18 = vld [vmem:[%s1895_s5 + $0xc8] sm:$0xf0]  ;;  %v1523_v19 = vld [vmem:[%s1895_s5 + $0x144] sm:$0xf]  ;;  %v1489_v26 = vld [vmem:[%s1895_s5 + $0x34] sm:$0xf] }
  0x8b   : > { %979 = vmatpush.bf16.msra.mxu1 %v1290_v38  ;;  %v1387_v20 = vld [vmem:[%s1895_s5 + $0x148] sm:$0xf0]  ;;  %v1539_v21 = vld [vmem:[%s1895_s5 + $0x1c4] sm:$0xf]  ;;  %v1326_v24 = vor.u32 %v1507_v16, %v1323_v18  ;;  %v1251_v27 = vld [vmem:[%s1895_s5 + $0x38] sm:$0xf0] }
  0x8c   : > { %992 = vmatpush.bf16.msra.mxu2 %v1354_v39  ;;  %v1451_v22 = vld [vmem:[%s1895_s5 + $0x1c8] sm:$0xf0]  ;;  %v1390_v25 = vor.u32 %v1523_v19, %v1387_v20  ;;  %v1505_v28 = vld [vmem:[%s1895_s5 + $0xb4] sm:$0xf]  ;;  %v1315_v30 = vld [vmem:[%s1895_s5 + $0xb8] sm:$0xf0]  ;;  %v1254_v35 = vor.u32 %v1489_v26, %v1251_v27 }
  0x8d   : > { %1005 = vmatpush.bf16.msra.mxu3 %v1418_v43  ;;  %967 = vmatmul.bf16.vlgmr.msra.gmra.mxu0 %v1984_v61  ;;  %v1454_v29 = vor.u32 %v1539_v21, %v1451_v22  ;;  %v1521_v31 = vld [vmem:[%s1895_s5 + $0x134] sm:$0xf]  ;;  %v1379_v32 = vld [vmem:[%s1895_s5 + $0x138] sm:$0xf0]  ;;  %v1318_v36 = vor.u32 %v1505_v28, %v1315_v30  ;;  %v1487_v38 = vld [vmem:[%s1895_s5 + $0x24] sm:$0xf] }
  0x8e   : > { %1011 = vmatpush.bf16.msrb.mxu0 %v1286_v44  ;;  %980 = vmatmul.bf16.vlgmr.msra.gmra.mxu1 %v1986_v63  ;;  %v1537_v33 = vld [vmem:[%s1895_s5 + $0x1b4] sm:$0xf]  ;;  %v1443_v34 = vld [vmem:[%s1895_s5 + $0x1b8] sm:$0xf0]  ;;  %v1382_v37 = vor.u32 %v1521_v31, %v1379_v32  ;;  %v1243_v39 = vld [vmem:[%s1895_s5 + $0x28] sm:$0xf0] }
  0x8f   : > { %1024 = vmatpush.bf16.msrb.mxu1 %v1350_v46  ;;  %993 = vmatmul.bf16.vlgmr.msra.gmra.mxu2 %v1978_v57  ;;  %v1503_v40 = vld [vmem:[%s1895_s5 + $0xa4] sm:$0xf]  ;;  %v1446_v41 = vor.u32 %v1537_v33, %v1443_v34  ;;  %v1307_v42 = vld [vmem:[%s1895_s5 + $0xa8] sm:$0xf0]  ;;  %v1485_v50 = vld [vmem:[%s1895_s5 + $0x14] sm:$0xf] }
  0x90   : > { %1037 = vmatpush.bf16.msrb.mxu2 %v1414_v47  ;;  %1006 = vmatmul.bf16.vlgmr.msra.gmra.mxu3 %v1982_v60  ;;  %v1519_v43 = vld [vmem:[%s1895_s5 + $0x124] sm:$0xf]  ;;  %v1371_v44 = vld [vmem:[%s1895_s5 + $0x128] sm:$0xf0]  ;;  %v1246_v47 = vor.u32 %v1487_v38, %v1243_v39  ;;  %v1310_v48 = vor.u32 %v1503_v40, %v1307_v42  ;;  %v1235_v51 = vld [vmem:[%s1895_s5 + $0x18] sm:$0xf0] }
  0x91   : > { %1050 = vmatpush.bf16.msrb.mxu3 %v1478_v53  ;;  %v1535_v45 = vld [vmem:[%s1895_s5 + $0x1a4] sm:$0xf]  ;;  %v1435_v46 = vld [vmem:[%s1895_s5 + $0x1a8] sm:$0xf0]  ;;  %v1374_v49 = vor.u32 %v1519_v43, %v1371_v44  ;;  %v1501_v52 = vld [vmem:[%s1895_s5 + $0x94] sm:$0xf] }
  0x92   : > { %1012 = vmatpush.bf16.msrb.mxu0 %v1278_v62  ;;  %v1438_v53 = vor.u32 %v1535_v45, %v1435_v46  ;;  %v1299_v54 = vld [vmem:[%s1895_s5 + $0x98] sm:$0xf0]  ;;  %v1517_v55 = vld [vmem:[%s1895_s5 + $0x114] sm:$0xf]  ;;  %v1238_v62 = vor.u32 %v1485_v50, %v1235_v51  ;;  %v1483_v2 = vld [vmem:[%s1895_s5 + $0x4] sm:$0xf] }
  0x93   : > { %1025 = vmatpush.bf16.msrb.mxu1 %v1342_v0  ;;  %v1363_v56 = vld [vmem:[%s1895_s5 + $0x118] sm:$0xf0]  ;;  %v1533_v58 = vld [vmem:[%s1895_s5 + $0x194] sm:$0xf]  ;;  %v1302_v0 = vor.u32 %v1501_v52, %v1299_v54  ;;  %v1227_v3 = vld [vmem:[%s1895_s5 + $0x8] sm:$0xf0] }
  0x94   : > { %1038 = vmatpush.bf16.msrb.mxu2 %v1406_v1  ;;  %v1427_v59 = vld [vmem:[%s1895_s5 + $0x198] sm:$0xf0]  ;;  %v1366_v1 = vor.u32 %v1517_v55, %v1363_v56  ;;  %v1499_v4 = vld [vmem:[%s1895_s5 + $0x84] sm:$0xf]  ;;  %v1291_v6 = vld [vmem:[%s1895_s5 + $0x88] sm:$0xf0] }
  0x95   : > { %1051 = vmatpush.bf16.msrb.mxu3 %v1470_v5  ;;  %v1430_v5 = vor.u32 %v1533_v58, %v1427_v59  ;;  %v1515_v7 = vld [vmem:[%s1895_s5 + $0x104] sm:$0xf]  ;;  %v1355_v8 = vld [vmem:[%s1895_s5 + $0x108] sm:$0xf0]  ;;  %v557_v21 = vld [vmem:[#allocation2] sm:$0xff] }
  0x96   : > { %1013 = vmatpush.bf16.msrb.mxu0 %v1270_v11  ;;  %v1531_v9 = vld [vmem:[%s1895_s5 + $0x184] sm:$0xf]  ;;  %v1419_v10 = vld [vmem:[%s1895_s5 + $0x188] sm:$0xf0]  ;;  %v1230_v11 = vor.u32 %v1483_v2, %v1227_v3  ;;  %v558_v31 = vld [vmem:[#allocation2 + $0x8] sm:$0xff] }
  0x97   : > { %1026 = vmatpush.bf16.msrb.mxu1 %v1334_v12  ;;  %v1294_v12 = vor.u32 %v1499_v4, %v1291_v6  ;;  %v1422_v14 = vor.u32 %v1531_v9, %v1419_v10 }
  0x98   : > { %1039 = vmatpush.bf16.msrb.mxu2 %v1398_v13  ;;  %v1358_v13 = vor.u32 %v1515_v7, %v1355_v8 }
  0x99   : > { %1052 = vmatpush.bf16.msrb.mxu3 %v1462_v17 }
  0x9a   : > { %1014 = vmatpush.bf16.msrb.mxu0 %v1262_v23 }
  0x9b   : > { %1027 = vmatpush.bf16.msrb.mxu1 %v1326_v24 }
  0x9c   : > { %1040 = vmatpush.bf16.msrb.mxu2 %v1390_v25 }
  0x9d   : > { %1053 = vmatpush.bf16.msrb.mxu3 %v1454_v29 }
  0x9e   : > { %1015 = vmatpush.bf16.msrb.mxu0 %v1254_v35 }
  0x9f   : > { %1028 = vmatpush.bf16.msrb.mxu1 %v1318_v36 }
  0xa0   : > { %1041 = vmatpush.bf16.msrb.mxu2 %v1382_v37 }
  0xa1   : > { %1054 = vmatpush.bf16.msrb.mxu3 %v1446_v41 }
  0xa2   : > { %1016 = vmatpush.bf16.msrb.mxu0 %v1246_v47 }
  0xa3   : > { %1029 = vmatpush.bf16.msrb.mxu1 %v1310_v48 }
  0xa4   : > { %1042 = vmatpush.bf16.msrb.mxu2 %v1374_v49 }
  0xa5   : > { %1055 = vmatpush.bf16.msrb.mxu3 %v1438_v53 }
  0xa6   : > { %1017 = vmatpush.bf16.msrb.mxu0 %v1238_v62 }
  0xa7   : > { %1030 = vmatpush.bf16.msrb.mxu1 %v1302_v0 }
  0xa8   : > { %1043 = vmatpush.bf16.msrb.mxu2 %v1366_v1 }
  0xa9   : > { %1056 = vmatpush.bf16.msrb.mxu3 %v1430_v5 }
  0xaa   : > { %1018 = vmatpush.bf16.msrb.mxu0 %v1230_v11 }
  0xab   : > { %1031 = vmatpush.bf16.msrb.mxu1 %v1294_v12 }
  0xac   : > { %1044 = vmatpush.bf16.msrb.mxu2 %v1358_v13 }
  0xad   : > { %1057 = vmatpush.bf16.msrb.mxu3 %v1422_v14  ;;  %1019 = vmatmul.bf16.vlgmr.msrb.gmra.mxu0 %v1984_v61 }
  0xae   : > { %1032 = vmatmul.bf16.vlgmr.msrb.gmra.mxu1 %v1986_v63 }
  0xaf   : > { %1045 = vmatmul.bf16.vlgmr.msrb.gmra.mxu2 %v1978_v57 }
  0xb0   : > { %1058 = vmatmul.bf16.vlgmr.msrb.gmra.mxu3 %v1982_v60 }
 0x10a   : > { %v968_v15 = vpop.f32.mrf.mxu0 }
 0x10b   : > { %v981_v16 = vpop.f32.mrf.mxu1 }
 0x10c   : > { %v982_v17 = vadd.f32 %v981_v16, %v968_v15 }
 0x112   : > { %v994_v18 = vpop.f32.mrf.mxu2  ;;  %v970_v23 = vpop.f32.mrf.mxu0 }
 0x113   : > { %v995_v19 = vadd.f32 %v994_v18, %v982_v17  ;;  %v1007_v20 = vpop.f32.mrf.mxu3  ;;  %v983_v24 = vpop.f32.mrf.mxu1 }
 0x115   : > { %v1008_v22 = vadd.f32 %v1007_v20, %v995_v19 }
 0x117   : > { %v1063_v25 = vadd.f32 %v1008_v22, %v557_v21 }
 0x119   : > { %1065 = vst [vmem:[#allocation2] sm:$0xff] %v1063_v25 }
 0x11a   : > { %v996_v26 = vpop.f32.mrf.mxu2 }
 0x11b   : > { %v1009_v61 = vpop.f32.mrf.mxu3 }
 0x12a   : > { %v1020_v27 = vpop.f32.mrf.mxu0 }
 0x12b   : > { %v1033_v63 = vpop.f32.mrf.mxu1 }
 0x12c   : > { %v1034_v28 = vadd.f32 %v1033_v63, %v1020_v27 }
 0x132   : > { %v1046_v57 = vpop.f32.mrf.mxu2  ;;  %v1022_v30 = vpop.f32.mrf.mxu0 }
 0x133   : > { %v1047_v29 = vadd.f32 %v1046_v57, %v1034_v28  ;;  %v1059_v60 = vpop.f32.mrf.mxu3  ;;  %v1035_v32 = vpop.f32.mrf.mxu1 }
 0x135   : > { %v1060_v33 = vadd.f32 %v1059_v60, %v1047_v29 }
 0x137   : > { %v1064_v34 = vadd.f32 %v1060_v33, %v558_v31  ;;  %1070 = sbr.rel (%p1479_p13) target bundleno = 324 (0x144), region = 78 }
 0x139   : > { %1066 = vst [vmem:[#allocation2 + $0x8] sm:$0xff] %v1064_v34 }
 0x13a   : > { %v1048_v35 = vpop.f32.mrf.mxu2 }
 0x13b   : > { %v1061_v36 = vpop.f32.mrf.mxu3 }
 0x13c   : > { %v1071_v37 = vld [vmem:[#allocation2] sm:$0xff] }
 0x13d   : > { %v1073_v38 = vld [vmem:[%s539_s12] sm:$0x3] }
 0x13e   : > { %v1075_v40 = vperm.slane %v1073_v38, 0  ;;  %v1076_v41 = vperm.slane %v1073_v38, 1 }
 0x140   : > { %v1072_v39 = vld [vmem:[#allocation2 + $0x8] sm:$0xff]  ;;  %v1079_v42 = vadd.f32 %v1075_v40, %v1071_v37 }
 0x141   : > { %v1080_v43 = vadd.f32 %v1076_v41, %v1072_v39 }
 0x142   : > { %1081 = vst [vmem:[%s1893_s15] sm:$0xff] %v1079_v42 }
 0x143   : > { %1082 = vst [vmem:[%s1893_s15 + $0x8] sm:$0xff] %v1080_v43 }
 0x144 PF: > { %s13_s18 = sadd.s32 1, %s1658_s18   ;;  %s2077_s12 = smov %s1638_s13 }
 0x145   : > { %p10_p0 = scmp.ge.s32.totalorder %s13_s18, 10   ;;  %s2078_s13 = smov %s1732_s25 }
 0x146   : > { %s2079_s14 = smov %s1650_s16  ;;  %s2080_s15 = smov %s1654_s17 }
 0x147   : > { %s2081_s16 = smov %s2084_s19  ;;  %s2082_s17 = smov %s2088_s20 }
 0x148   :  { %12 = sbr.rel (!%p10_p0) target bundleno = 4 (0x4), region = 119 }

</bundles_post_ra>
